<compile_context>
chip_gen: v7x
topology: tpu7x:2x2x1
jax: 0.10.0
libtpu: 0.0.40
codegen_flags: <defaults>
</compile_context>

<pallas_src>
import jax
import jax.numpy as jnp
from jax.experimental import pallas as pl
from jax.experimental.pallas import tpu as pltpu

EXPANSION = 4
BN_EPS = 1e-5
LANE = 128


def _round_up(n, m=LANE):
    return ((n + m - 1) // m) * m


def _bottleneck_kernel(x_ref, w1_ref, b1_ref, w2_ref, b2_ref, w3_ref, b3_ref,
                       out_ref, pad_ref):
    """One (batch, row-tile) per grid step: 1x1 -> 3x3 -> 1x1 conv, BN folded
    into the weights (per-channel f32 shift kept), ReLU, identity residual."""
    H, W, Cin = x_ref.shape                      # full image (batch squeezed)
    TH = out_ref.shape[0]                        # rows per tile
    width = w1_ref.shape[1]
    Cout = w3_ref.shape[1]
    h = pl.program_id(1)
    row0 = pl.multiple_of(h * TH, TH)

    w1 = w1_ref[...]
    b1 = b1_ref[...]

    def conv1(rows_bf16, m):
        y = jnp.dot(rows_bf16.reshape(m, Cin), w1,
                    preferred_element_type=jnp.float32)
        return jnp.maximum(y + b1, 0.0)

    # --- conv1 (1x1, BN scale pre-folded) + shift + ReLU on the tile rows ---
    h1 = conv1(x_ref[pl.ds(row0, TH)], TH * W)               # (TH*W, width) f32

    # 3x3 halo rows: recompute conv1 on the row just above / below the tile
    # (clamped read; the value is zeroed at the image border).
    h1_top = conv1(x_ref[pl.ds(jnp.maximum(row0 - 1, 0), 1)], W)
    h1_top = jnp.where(h > 0, h1_top, 0.0)
    h1_bot = conv1(x_ref[pl.ds(jnp.minimum(row0 + TH, H - 1), 1)], W)
    h1_bot = jnp.where(h < pl.num_programs(1) - 1, h1_bot, 0.0)

    # --- fill the zero-haloed conv2 input scratch ----------------------------
    # Every element is rewritten every step, so this stays correct when the
    # grid is sharded across TensorCores in any order.
    zcol = jnp.zeros((TH + 2, 1, width), pad_ref.dtype)
    pad_ref[:, 0:1, :] = zcol
    pad_ref[:, W + 1:W + 2, :] = zcol
    pad_ref[0:1, 1:W + 1, :] = h1_top.reshape(1, W, width).astype(pad_ref.dtype)
    pad_ref[TH + 1:TH + 2, 1:W + 1, :] = h1_bot.reshape(1, W, width).astype(pad_ref.dtype)
    pad_ref[1:TH + 1, 1:W + 1, :] = h1.reshape(TH, W, width).astype(pad_ref.dtype)

    # --- conv2 (3x3, stride 1, pad 1): nine accumulated dots, no im2col slab -
    # TODO(synk): the kx=1/2 tap slice+flatten still costs a sublane repack;
    #             a pltpu.roll-based shift (XLU slot) or a lane-packed tap
    #             layout for width<128 stages would remove that copy.
    acc = None
    for ky in range(3):
        for kx in range(3):
            tap = pad_ref[ky:ky + TH, kx:kx + W, :].reshape(TH * W, width)
            d = jnp.dot(tap, w2_ref[ky * 3 + kx],
                        preferred_element_type=jnp.float32)
            acc = d if acc is None else acc + d
    h2 = jnp.maximum(acc + b2_ref[...], 0.0)

    # --- conv3 (1x1) + shift --------------------------------------------------
    h3 = jnp.dot(h2.astype(w3_ref.dtype), w3_ref[...],
                 preferred_element_type=jnp.float32) + b3_ref[...]

    # --- residual add (downsample=None => identity) + ReLU --------------------
    # Re-read x here instead of keeping it live across the three convs.
    identity = x_ref[pl.ds(row0, TH)].reshape(TH * W, Cout).astype(jnp.float32)
    out = jnp.maximum(h3 + identity, 0.0)
    out_ref[...] = out.reshape(TH, W, Cout).astype(out_ref.dtype)


def _const_spec(shape, single_buffer):
    n = len(shape)
    idx = lambda b, hh, n=n: (0,) * n
    if single_buffer:
        # Constant block index -> never re-DMA'd; one VMEM copy is enough.
        return pl.BlockSpec(shape, idx, pipeline_mode=pl.Buffered(1))
    return pl.BlockSpec(shape, idx)


def _vmem_limit_bytes():
    try:
        cap = int(pltpu.get_tpu_info().vmem_capacity_bytes)
    except Exception:
        cap = 64 * 1024 * 1024
    # <= half of physical VMEM: ~32 MiB on v7x (64 MiB/TC), 64 MiB on v5e/v6e.
    return int(min(cap // 2, 64 * 1024 * 1024))


def _pick_tile_rows(H, W, max_m=2048):
    """Largest row-tile TH dividing H with TH*W <= max_m and >= 2 grid steps
    along H; prefer TH*W a multiple of 256 for the 256-wide v6e/v7x MXU."""
    cands = [t for t in range(1, H) if H % t == 0 and t * W <= max_m and H // t >= 2]
    if not cands:
        return H
    mult = [t for t in cands if (t * W) % 256 == 0]
    return max(mult) if mult else max(cands)


def _bottleneck_pallas_nhwc(x_nhwc, kparams, th):
    w1, b1, w2, b2, w3, b3 = kparams
    B, H, W, Cin = x_nhwc.shape
    width = w1.shape[1]
    Cout = w3.shape[1]
    assert Cin == Cout, "identity residual requires padded Cin == padded Cout"
    assert H % th == 0
    nH = H // th

    def build(single_buffer):
        cs = lambda a: _const_spec(a.shape, single_buffer)
        return pl.pallas_call(
            _bottleneck_kernel,
            out_shape=jax.ShapeDtypeStruct((B, H, W, Cout), jnp.bfloat16),
            grid_spec=pltpu.PrefetchScalarGridSpec(
                num_scalar_prefetch=0,
                grid=(B, nH),
                in_specs=[
                    # Full image per batch element (block index constant along
                    # the row-tile axis => DMA'd once per image); tile rows and
                    # the 1-row 3x3 halo are sliced in-kernel, so halos never
                    # cross a pipeline-tile seam.
                    pl.BlockSpec((None, H, W, Cin), lambda b, hh: (b, 0, 0, 0)),
                    cs(w1), cs(b1), cs(w2), cs(b2), cs(w3), cs(b3),
                ],
                out_specs=pl.BlockSpec((None, th, W, Cout),
                                       lambda b, hh: (b, hh, 0, 0)),
                scratch_shapes=[pltpu.VMEM((th + 2, W + 2, width), jnp.bfloat16)],
            ),
            compiler_params=pltpu.CompilerParams(
                dimension_semantics=("parallel", "parallel"),
                vmem_limit_bytes=_vmem_limit_bytes()),
        )(x_nhwc, w1, b1, w2, b2, w3, b3)

    try:
        return build(single_buffer=True)      # Buffered(1) weights (VMEM win)
    except Exception:
        return build(single_buffer=False)     # fallback: default buffering


def bottleneck_forward(x_nchw, kparams):
    """PyTorch-facing wrapper: NCHW f32 in, NCHW f32 out."""
    cin = x_nchw.shape[1]
    cin_p = kparams[0].shape[0]                      # padded input channels
    H, W = x_nchw.shape[2], x_nchw.shape[3]
    x_nhwc = jnp.transpose(x_nchw, (0, 2, 3, 1))
    if cin_p != cin:
        x_nhwc = jnp.pad(x_nhwc, ((0, 0), (0, 0), (0, 0), (0, cin_p - cin)))
    x_nhwc = x_nhwc.astype(jnp.bfloat16)
    th = _pick_tile_rows(H, W)
    out_nhwc = _bottleneck_pallas_nhwc(x_nhwc, kparams, th)
    out_nhwc = out_nhwc[..., :cin].astype(x_nchw.dtype)     # cout == cin here
    return jnp.transpose(out_nhwc, (0, 3, 1, 2))


# ---------------------------------------------------------------------------
# Deterministic parameter construction (synthetic; matches nn.Module shapes).
# ---------------------------------------------------------------------------
def init_params(key, inplanes, planes, base_width=64, groups=1):
    width = int(planes * (base_width / 64.0)) * groups
    cout = planes * EXPANSION
    ks = jax.random.split(key, 15)

    def conv_w(k, o, i, kh, kw):
        bound = (i * kh * kw) ** -0.5
        return jax.random.uniform(k, (o, i, kh, kw), jnp.float32, -bound, bound)

    def bn_p(kg, kb, km, kv, c):
        gamma = jax.random.uniform(kg, (c,), jnp.float32, 0.5, 1.5)
        beta = jax.random.uniform(kb, (c,), jnp.float32, -0.5, 0.5)
        mean = jax.random.uniform(km, (c,), jnp.float32, -0.5, 0.5)
        var = jax.random.uniform(kv, (c,), jnp.float32, 0.5, 1.5)
        return gamma, beta, mean, var

    # PyTorch layouts: conv weight OIHW, BN per-channel vectors.
    w1_oihw = conv_w(ks[0], width, inplanes, 1, 1)
    w2_oihw = conv_w(ks[1], width, width, 3, 3)
    w3_oihw = conv_w(ks[2], cout, width, 1, 1)
    bn1 = bn_p(ks[3], ks[4], ks[5], ks[6], width)
    bn2 = bn_p(ks[7], ks[8], ks[9], ks[10], width)
    bn3 = bn_p(ks[11], ks[12], ks[13], ks[14], cout)
    torch_params = (w1_oihw, w2_oihw, w3_oihw, bn1, bn2, bn3)

    # Fold BN scale into the conv weights in f32, pad channel dims to 128
    # multiples, then cast the weights to bf16 (shifts stay f32).
    def fold_bn(p):
        g, b, m, v = p
        scale = g / jnp.sqrt(v + BN_EPS)
        return scale, b - m * scale

    s1, sh1 = fold_bn(bn1)
    s2, sh2 = fold_bn(bn2)
    s3, sh3 = fold_bn(bn3)

    cin_p, width_p, cout_p = _round_up(inplanes), _round_up(width), _round_up(cout)

    def pad2(a, r, c):
        return jnp.pad(a, ((0, r - a.shape[0]), (0, c - a.shape[1])))

    # conv1: OIHW (width, inplanes, 1, 1) -> (Cin, width), BN scale per column.
    w1_k = pad2(jnp.transpose(w1_oihw[:, :, 0, 0]) * s1[None, :],
                cin_p, width_p).astype(jnp.bfloat16)

    # conv2: OIHW -> (ky, kx, Cin, Cout), scale out channels, pad, reshape to
    # (9, width_p, width_p); tap index t = ky*3 + kx matches the kernel loop.
    # TODO(synk): for width<128 stages, pack taps before lane-padding
    #             (K = round_up(9*width, 128)) to drop zero-K MXU passes.
    w2_k = jnp.transpose(w2_oihw, (2, 3, 1, 0)) * s2[None, None, None, :]
    w2_k = jnp.pad(w2_k, ((0, 0), (0, 0),
                          (0, width_p - width), (0, width_p - width)))
    w2_k = w2_k.reshape(9, width_p, width_p).astype(jnp.bfloat16)

    # conv3: OIHW (cout, width, 1, 1) -> (width, cout), BN scale per column.
    w3_k = pad2(jnp.transpose(w3_oihw[:, :, 0, 0]) * s3[None, :],
                width_p, cout_p).astype(jnp.bfloat16)

    def pad_shift(sh, c_p):
        return jnp.pad(sh, (0, c_p - sh.shape[0])).reshape(1, c_p)  # f32

    kparams = (w1_k, pad_shift(sh1, width_p),
               w2_k, pad_shift(sh2, width_p),
               w3_k, pad_shift(sh3, cout_p))
    return torch_params, kparams


# ---------------------------------------------------------------------------
# Pure-JAX f32 reference in PyTorch layout (correctness check only).
# ---------------------------------------------------------------------------
def bottleneck_ref_nchw(x, torch_params):
    w1, w2, w3, bn1, bn2, bn3 = torch_params

    def conv(h, w, pad):
        return jax.lax.conv_general_dilated(
            h, w, window_strides=(1, 1), padding=[(pad, pad), (pad, pad)],
            dimension_numbers=("NCHW", "OIHW", "NCHW"))

    def bn(h, p):
        g, b, m, v = (t.reshape(1, -1, 1, 1) for t in p)
        return (h - m) / jnp.sqrt(v + BN_EPS) * g + b

    out = jax.nn.relu(bn(conv(x, w1, 0), bn1))
    out = jax.nn.relu(bn(conv(out, w2, 1), bn2))
    out = bn(conv(out, w3, 0), bn3)
    return jax.nn.relu(out + x)


if __name__ == "__main__":
    key = jax.random.PRNGKey(0)
    kx, kp = jax.random.split(key)

    # Small shapes: downsample=None requires inplanes == planes * 4, stride=1.
    # (Real-stage perf tuning — e.g. 56x56x256 — is a benchmark concern, not
    #  part of this correctness run.)
    B, H, W = 2, 16, 16
    planes = 8
    inplanes = planes * EXPANSION          # 32
    x = jax.random.normal(kx, (B, inplanes, H, W), jnp.float32)  # NCHW

    torch_params, kparams = init_params(kp, inplanes, planes)

    out = jax.block_until_ready(bottleneck_forward(x, kparams))
    ref = bottleneck_ref_nchw(x, torch_params)

    assert out.shape == ref.shape == (B, planes * EXPANSION, H, W)
    # bf16 activations/weights (f32 accumulation) vs. f32 reference tolerance.
    assert jnp.allclose(out, ref, atol=5e-2, rtol=2.5e-2), \
        float(jnp.max(jnp.abs(out - ref)))
    print("KERNEL_OK")
</pallas_src>

<mosaic_0001>
module attributes {stable_mosaic.version = 11 : i64} {
  func.func @_bottleneck_kernel(%arg0: i32, %arg1: i32, %arg2: memref<1x16x16x128xbf16, #tpu.memory_space<vmem>>, %arg3: memref<128x128xbf16, #tpu.memory_space<vmem>>, %arg4: memref<1x128xf32, #tpu.memory_space<vmem>>, %arg5: memref<9x128x128xbf16, #tpu.memory_space<vmem>>, %arg6: memref<1x128xf32, #tpu.memory_space<vmem>>, %arg7: memref<128x128xbf16, #tpu.memory_space<vmem>>, %arg8: memref<1x128xf32, #tpu.memory_space<vmem>>, %arg9: memref<1x8x16x128xbf16, #tpu.memory_space<vmem>>, %arg10: memref<10x18x128xbf16, #tpu.memory_space<vmem>>) attributes {dimension_semantics = [#tpu.dimension_semantics<parallel>, #tpu.dimension_semantics<parallel>], iteration_bounds = array<i64: 2, 2>, scalar_prefetch = 0 : i64, scratch_operands = 1 : i64, tpu.core_type = #tpu.core_type<tc>, window_params = [{transform_indices = @transform_0, window_bounds = array<i64: 1, 16, 16, 128>}, {pipeline_mode = #tpu.pipeline_mode<synchronous>, transform_indices = @transform_1, window_bounds = array<i64: 128, 128>}, {pipeline_mode = #tpu.pipeline_mode<synchronous>, transform_indices = @transform_2, window_bounds = array<i64: 1, 128>}, {pipeline_mode = #tpu.pipeline_mode<synchronous>, transform_indices = @transform_3, window_bounds = array<i64: 9, 128, 128>}, {pipeline_mode = #tpu.pipeline_mode<synchronous>, transform_indices = @transform_4, window_bounds = array<i64: 1, 128>}, {pipeline_mode = #tpu.pipeline_mode<synchronous>, transform_indices = @transform_5, window_bounds = array<i64: 128, 128>}, {pipeline_mode = #tpu.pipeline_mode<synchronous>, transform_indices = @transform_6, window_bounds = array<i64: 1, 128>}, {transform_indices = @transform_7, window_bounds = array<i64: 1, 8, 16, 128>}]} {
    %c8_i32 = arith.constant 8 : i32
    %0 = arith.muli %arg1, %c8_i32 : i32
    %1 = tpu.assume_multiple %0, 8 : i32
    %c0 = arith.constant 0 : index
    %c0_0 = arith.constant 0 : index
    %2 = vector.load %arg3[%c0, %c0_0] : memref<128x128xbf16, #tpu.memory_space<vmem>>, vector<128x128xbf16>
    %c0_1 = arith.constant 0 : index
    %c0_2 = arith.constant 0 : index
    %3 = vector.load %arg4[%c0_1, %c0_2] : memref<1x128xf32, #tpu.memory_space<vmem>>, vector<1x128xf32>
    %c0_3 = arith.constant 0 : index
    %4 = arith.index_cast %1 : i32 to index
    %c0_4 = arith.constant 0 : index
    %c0_5 = arith.constant 0 : index
    %5 = vector.load %arg2[%c0_3, %4, %c0_4, %c0_5] : memref<1x16x16x128xbf16, #tpu.memory_space<vmem>>, vector<1x8x16x128xbf16>
    %6 = vector.shape_cast %5 : vector<1x8x16x128xbf16> to vector<8x16x128xbf16>
    %7 = vector.shape_cast %6 : vector<8x16x128xbf16> to vector<128x128xbf16>
    %cst = arith.constant dense<0.000000e+00> : vector<128x128xf32>
    %8 = tpu.matmul %7, %2, %cst {dimension_numbers = #tpu.dot_dimension_numbers<[1], [0], [0], [1], [0, 0, 1, 1], [], []>} : vector<128x128xbf16>, vector<128x128xbf16>, vector<128x128xf32> -> vector<128x128xf32>
    %9 = vector.broadcast %3 : vector<1x128xf32> to vector<128x128xf32>
    %10 = arith.addf %8, %9 : vector<128x128xf32>
    %cst_6 = arith.constant 0.000000e+00 : f32
    %11 = vector.broadcast %cst_6 : f32 to vector<128x128xf32>
    %12 = arith.maximumf %10, %11 : vector<128x128xf32>
    %c1_i32 = arith.constant 1 : i32
    %13 = arith.subi %1, %c1_i32 : i32
    %c0_i32 = arith.constant 0 : i32
    %14 = arith.maxsi %13, %c0_i32 : i32
    %c0_7 = arith.constant 0 : index
    %15 = arith.index_cast %14 : i32 to index
    %c0_8 = arith.constant 0 : index
    %c0_9 = arith.constant 0 : index
    %16 = vector.load %arg2[%c0_7, %15, %c0_8, %c0_9] : memref<1x16x16x128xbf16, #tpu.memory_space<vmem>>, vector<1x1x16x128xbf16>
    %17 = vector.shape_cast %16 : vector<1x1x16x128xbf16> to vector<1x16x128xbf16>
    %18 = vector.shape_cast %17 : vector<1x16x128xbf16> to vector<16x128xbf16>
    %cst_10 = arith.constant dense<0.000000e+00> : vector<16x128xf32>
    %19 = tpu.matmul %18, %2, %cst_10 {dimension_numbers = #tpu.dot_dimension_numbers<[1], [0], [0], [1], [0, 0, 1, 1], [], []>} : vector<16x128xbf16>, vector<128x128xbf16>, vector<16x128xf32> -> vector<16x128xf32>
    %20 = vector.broadcast %3 : vector<1x128xf32> to vector<16x128xf32>
    %21 = arith.addf %19, %20 : vector<16x128xf32>
    %cst_11 = arith.constant 0.000000e+00 : f32
    %22 = vector.broadcast %cst_11 : f32 to vector<16x128xf32>
    %23 = arith.maximumf %21, %22 : vector<16x128xf32>
    %c0_i32_12 = arith.constant 0 : i32
    %24 = arith.cmpi sgt, %arg1, %c0_i32_12 : i32
    %cst_13 = arith.constant 0.000000e+00 : f32
    %25 = vector.broadcast %cst_13 : f32 to vector<16x128xf32>
    %26 = arith.select %24, %23, %25 : vector<16x128xf32>
    %c8_i32_14 = arith.constant 8 : i32
    %27 = arith.addi %1, %c8_i32_14 : i32
    %c15_i32 = arith.constant 15 : i32
    %28 = arith.minsi %27, %c15_i32 : i32
    %c0_15 = arith.constant 0 : index
    %29 = arith.index_cast %28 : i32 to index
    %c0_16 = arith.constant 0 : index
    %c0_17 = arith.constant 0 : index
    %30 = vector.load %arg2[%c0_15, %29, %c0_16, %c0_17] : memref<1x16x16x128xbf16, #tpu.memory_space<vmem>>, vector<1x1x16x128xbf16>
    %31 = vector.shape_cast %30 : vector<1x1x16x128xbf16> to vector<1x16x128xbf16>
    %32 = vector.shape_cast %31 : vector<1x16x128xbf16> to vector<16x128xbf16>
    %cst_18 = arith.constant dense<0.000000e+00> : vector<16x128xf32>
    %33 = tpu.matmul %32, %2, %cst_18 {dimension_numbers = #tpu.dot_dimension_numbers<[1], [0], [0], [1], [0, 0, 1, 1], [], []>} : vector<16x128xbf16>, vector<128x128xbf16>, vector<16x128xf32> -> vector<16x128xf32>
    %34 = vector.broadcast %3 : vector<1x128xf32> to vector<16x128xf32>
    %35 = arith.addf %33, %34 : vector<16x128xf32>
    %cst_19 = arith.constant 0.000000e+00 : f32
    %36 = vector.broadcast %cst_19 : f32 to vector<16x128xf32>
    %37 = arith.maximumf %35, %36 : vector<16x128xf32>
    %c1_i32_20 = arith.constant 1 : i32
    %38 = arith.cmpi slt, %arg1, %c1_i32_20 : i32
    %cst_21 = arith.constant 0.000000e+00 : f32
    %39 = vector.broadcast %cst_21 : f32 to vector<16x128xf32>
    %40 = arith.select %38, %37, %39 : vector<16x128xf32>
    %cst_22 = arith.constant 0.000000e+00 : bf16
    %41 = vector.broadcast %cst_22 : bf16 to vector<10x1x128xbf16>
    %c0_23 = arith.constant 0 : index
    %c0_24 = arith.constant 0 : index
    %c0_25 = arith.constant 0 : index
    %42 = vector.load %arg10[%c0_23, %c0_24, %c0_25] : memref<10x18x128xbf16, #tpu.memory_space<vmem>>, vector<10x1x128xbf16>
    tpu.vector_store %arg10[%c0_23, %c0_24, %c0_25], %41 {strides = array<i32>} : memref<10x18x128xbf16, #tpu.memory_space<vmem>>, vector<10x1x128xbf16>,
    %c0_26 = arith.constant 0 : index
    %c17 = arith.constant 17 : index
    %c0_27 = arith.constant 0 : index
    %43 = vector.load %arg10[%c0_26, %c17, %c0_27] : memref<10x18x128xbf16, #tpu.memory_space<vmem>>, vector<10x1x128xbf16>
    tpu.vector_store %arg10[%c0_26, %c17, %c0_27], %41 {strides = array<i32>} : memref<10x18x128xbf16, #tpu.memory_space<vmem>>, vector<10x1x128xbf16>,
    %44 = vector.shape_cast %26 : vector<16x128xf32> to vector<1x16x128xf32>
    %45 = arith.truncf %44 : vector<1x16x128xf32> to vector<1x16x128xbf16>
    %c0_28 = arith.constant 0 : index
    %c1 = arith.constant 1 : index
    %c0_29 = arith.constant 0 : index
    %46 = vector.load %arg10[%c0_28, %c1, %c0_29] : memref<10x18x128xbf16, #tpu.memory_space<vmem>>, vector<1x16x128xbf16>
    tpu.vector_store %arg10[%c0_28, %c1, %c0_29], %45 {strides = array<i32>} : memref<10x18x128xbf16, #tpu.memory_space<vmem>>, vector<1x16x128xbf16>,
    %47 = vector.shape_cast %40 : vector<16x128xf32> to vector<1x16x128xf32>
    %48 = arith.truncf %47 : vector<1x16x128xf32> to vector<1x16x128xbf16>
    %c9 = arith.constant 9 : index
    %c1_30 = arith.constant 1 : index
    %c0_31 = arith.constant 0 : index
    %49 = vector.load %arg10[%c9, %c1_30, %c0_31] : memref<10x18x128xbf16, #tpu.memory_space<vmem>>, vector<1x16x128xbf16>
    tpu.vector_store %arg10[%c9, %c1_30, %c0_31], %48 {strides = array<i32>} : memref<10x18x128xbf16, #tpu.memory_space<vmem>>, vector<1x16x128xbf16>,
    %50 = vector.shape_cast %12 : vector<128x128xf32> to vector<8x16x128xf32>
    %51 = arith.truncf %50 : vector<8x16x128xf32> to vector<8x16x128xbf16>
    %c1_32 = arith.constant 1 : index
    %c1_33 = arith.constant 1 : index
    %c0_34 = arith.constant 0 : index
    %52 = vector.load %arg10[%c1_32, %c1_33, %c0_34] : memref<10x18x128xbf16, #tpu.memory_space<vmem>>, vector<8x16x128xbf16>
    tpu.vector_store %arg10[%c1_32, %c1_33, %c0_34], %51 {strides = array<i32>} : memref<10x18x128xbf16, #tpu.memory_space<vmem>>, vector<8x16x128xbf16>,
    %c0_35 = arith.constant 0 : index
    %c0_36 = arith.constant 0 : index
    %c0_37 = arith.constant 0 : index
    %53 = vector.load %arg10[%c0_35, %c0_36, %c0_37] : memref<10x18x128xbf16, #tpu.memory_space<vmem>>, vector<8x16x128xbf16>
    %54 = vector.shape_cast %53 : vector<8x16x128xbf16> to vector<128x128xbf16>
    %c0_38 = arith.constant 0 : index
    %c0_39 = arith.constant 0 : index
    %c0_40 = arith.constant 0 : index
    %55 = vector.load %arg5[%c0_38, %c0_39, %c0_40] : memref<9x128x128xbf16, #tpu.memory_space<vmem>>, vector<1x128x128xbf16>
    %56 = vector.shape_cast %55 : vector<1x128x128xbf16> to vector<128x128xbf16>
    %cst_41 = arith.constant dense<0.000000e+00> : vector<128x128xf32>
    %57 = tpu.matmul %54, %56, %cst_41 {dimension_numbers = #tpu.dot_dimension_numbers<[1], [0], [0], [1], [0, 0, 1, 1], [], []>} : vector<128x128xbf16>, vector<128x128xbf16>, vector<128x128xf32> -> vector<128x128xf32>
    %c0_42 = arith.constant 0 : index
    %c1_43 = arith.constant 1 : index
    %c0_44 = arith.constant 0 : index
    %58 = vector.load %arg10[%c0_42, %c1_43, %c0_44] : memref<10x18x128xbf16, #tpu.memory_space<vmem>>, vector<8x16x128xbf16>
    %59 = vector.shape_cast %58 : vector<8x16x128xbf16> to vector<128x128xbf16>
    %c1_45 = arith.constant 1 : index
    %c0_46 = arith.constant 0 : index
    %c0_47 = arith.constant 0 : index
    %60 = vector.load %arg5[%c1_45, %c0_46, %c0_47] : memref<9x128x128xbf16, #tpu.memory_space<vmem>>, vector<1x128x128xbf16>
    %61 = vector.shape_cast %60 : vector<1x128x128xbf16> to vector<128x128xbf16>
    %cst_48 = arith.constant dense<0.000000e+00> : vector<128x128xf32>
    %62 = tpu.matmul %59, %61, %cst_48 {dimension_numbers = #tpu.dot_dimension_numbers<[1], [0], [0], [1], [0, 0, 1, 1], [], []>} : vector<128x128xbf16>, vector<128x128xbf16>, vector<128x128xf32> -> vector<128x128xf32>
    %63 = arith.addf %57, %62 : vector<128x128xf32>
    %c0_49 = arith.constant 0 : index
    %c2 = arith.constant 2 : index
    %c0_50 = arith.constant 0 : index
    %64 = vector.load %arg10[%c0_49, %c2, %c0_50] : memref<10x18x128xbf16, #tpu.memory_space<vmem>>, vector<8x16x128xbf16>
    %65 = vector.shape_cast %64 : vector<8x16x128xbf16> to vector<128x128xbf16>
    %c2_51 = arith.constant 2 : index
    %c0_52 = arith.constant 0 : index
    %c0_53 = arith.constant 0 : index
    %66 = vector.load %arg5[%c2_51, %c0_52, %c0_53] : memref<9x128x128xbf16, #tpu.memory_space<vmem>>, vector<1x128x128xbf16>
    %67 = vector.shape_cast %66 : vector<1x128x128xbf16> to vector<128x128xbf16>
    %cst_54 = arith.constant dense<0.000000e+00> : vector<128x128xf32>
    %68 = tpu.matmul %65, %67, %cst_54 {dimension_numbers = #tpu.dot_dimension_numbers<[1], [0], [0], [1], [0, 0, 1, 1], [], []>} : vector<128x128xbf16>, vector<128x128xbf16>, vector<128x128xf32> -> vector<128x128xf32>
    %69 = arith.addf %63, %68 : vector<128x128xf32>
    %c1_55 = arith.constant 1 : index
    %c0_56 = arith.constant 0 : index
    %c0_57 = arith.constant 0 : index
    %70 = vector.load %arg10[%c1_55, %c0_56, %c0_57] : memref<10x18x128xbf16, #tpu.memory_space<vmem>>, vector<8x16x128xbf16>
    %71 = vector.shape_cast %70 : vector<8x16x128xbf16> to vector<128x128xbf16>
    %c3 = arith.constant 3 : index
    %c0_58 = arith.constant 0 : index
    %c0_59 = arith.constant 0 : index
    %72 = vector.load %arg5[%c3, %c0_58, %c0_59] : memref<9x128x128xbf16, #tpu.memory_space<vmem>>, vector<1x128x128xbf16>
    %73 = vector.shape_cast %72 : vector<1x128x128xbf16> to vector<128x128xbf16>
    %cst_60 = arith.constant dense<0.000000e+00> : vector<128x128xf32>
    %74 = tpu.matmul %71, %73, %cst_60 {dimension_numbers = #tpu.dot_dimension_numbers<[1], [0], [0], [1], [0, 0, 1, 1], [], []>} : vector<128x128xbf16>, vector<128x128xbf16>, vector<128x128xf32> -> vector<128x128xf32>
    %75 = arith.addf %69, %74 : vector<128x128xf32>
    %c1_61 = arith.constant 1 : index
    %c1_62 = arith.constant 1 : index
    %c0_63 = arith.constant 0 : index
    %76 = vector.load %arg10[%c1_61, %c1_62, %c0_63] : memref<10x18x128xbf16, #tpu.memory_space<vmem>>, vector<8x16x128xbf16>
    %77 = vector.shape_cast %76 : vector<8x16x128xbf16> to vector<128x128xbf16>
    %c4 = arith.constant 4 : index
    %c0_64 = arith.constant 0 : index
    %c0_65 = arith.constant 0 : index
    %78 = vector.load %arg5[%c4, %c0_64, %c0_65] : memref<9x128x128xbf16, #tpu.memory_space<vmem>>, vector<1x128x128xbf16>
    %79 = vector.shape_cast %78 : vector<1x128x128xbf16> to vector<128x128xbf16>
    %cst_66 = arith.constant dense<0.000000e+00> : vector<128x128xf32>
    %80 = tpu.matmul %77, %79, %cst_66 {dimension_numbers = #tpu.dot_dimension_numbers<[1], [0], [0], [1], [0, 0, 1, 1], [], []>} : vector<128x128xbf16>, vector<128x128xbf16>, vector<128x128xf32> -> vector<128x128xf32>
    %81 = arith.addf %75, %80 : vector<128x128xf32>
    %c1_67 = arith.constant 1 : index
    %c2_68 = arith.constant 2 : index
    %c0_69 = arith.constant 0 : index
    %82 = vector.load %arg10[%c1_67, %c2_68, %c0_69] : memref<10x18x128xbf16, #tpu.memory_space<vmem>>, vector<8x16x128xbf16>
    %83 = vector.shape_cast %82 : vector<8x16x128xbf16> to vector<128x128xbf16>
    %c5 = arith.constant 5 : index
    %c0_70 = arith.constant 0 : index
    %c0_71 = arith.constant 0 : index
    %84 = vector.load %arg5[%c5, %c0_70, %c0_71] : memref<9x128x128xbf16, #tpu.memory_space<vmem>>, vector<1x128x128xbf16>
    %85 = vector.shape_cast %84 : vector<1x128x128xbf16> to vector<128x128xbf16>
    %cst_72 = arith.constant dense<0.000000e+00> : vector<128x128xf32>
    %86 = tpu.matmul %83, %85, %cst_72 {dimension_numbers = #tpu.dot_dimension_numbers<[1], [0], [0], [1], [0, 0, 1, 1], [], []>} : vector<128x128xbf16>, vector<128x128xbf16>, vector<128x128xf32> -> vector<128x128xf32>
    %87 = arith.addf %81, %86 : vector<128x128xf32>
    %c2_73 = arith.constant 2 : index
    %c0_74 = arith.constant 0 : index
    %c0_75 = arith.constant 0 : index
    %88 = vector.load %arg10[%c2_73, %c0_74, %c0_75] : memref<10x18x128xbf16, #tpu.memory_space<vmem>>, vector<8x16x128xbf16>
    %89 = vector.shape_cast %88 : vector<8x16x128xbf16> to vector<128x128xbf16>
    %c6 = arith.constant 6 : index
    %c0_76 = arith.constant 0 : index
    %c0_77 = arith.constant 0 : index
    %90 = vector.load %arg5[%c6, %c0_76, %c0_77] : memref<9x128x128xbf16, #tpu.memory_space<vmem>>, vector<1x128x128xbf16>
    %91 = vector.shape_cast %90 : vector<1x128x128xbf16> to vector<128x128xbf16>
    %cst_78 = arith.constant dense<0.000000e+00> : vector<128x128xf32>
    %92 = tpu.matmul %89, %91, %cst_78 {dimension_numbers = #tpu.dot_dimension_numbers<[1], [0], [0], [1], [0, 0, 1, 1], [], []>} : vector<128x128xbf16>, vector<128x128xbf16>, vector<128x128xf32> -> vector<128x128xf32>
    %93 = arith.addf %87, %92 : vector<128x128xf32>
    %c2_79 = arith.constant 2 : index
    %c1_80 = arith.constant 1 : index
    %c0_81 = arith.constant 0 : index
    %94 = vector.load %arg10[%c2_79, %c1_80, %c0_81] : memref<10x18x128xbf16, #tpu.memory_space<vmem>>, vector<8x16x128xbf16>
    %95 = vector.shape_cast %94 : vector<8x16x128xbf16> to vector<128x128xbf16>
    %c7 = arith.constant 7 : index
    %c0_82 = arith.constant 0 : index
    %c0_83 = arith.constant 0 : index
    %96 = vector.load %arg5[%c7, %c0_82, %c0_83] : memref<9x128x128xbf16, #tpu.memory_space<vmem>>, vector<1x128x128xbf16>
    %97 = vector.shape_cast %96 : vector<1x128x128xbf16> to vector<128x128xbf16>
    %cst_84 = arith.constant dense<0.000000e+00> : vector<128x128xf32>
    %98 = tpu.matmul %95, %97, %cst_84 {dimension_numbers = #tpu.dot_dimension_numbers<[1], [0], [0], [1], [0, 0, 1, 1], [], []>} : vector<128x128xbf16>, vector<128x128xbf16>, vector<128x128xf32> -> vector<128x128xf32>
    %99 = arith.addf %93, %98 : vector<128x128xf32>
    %c2_85 = arith.constant 2 : index
    %c2_86 = arith.constant 2 : index
    %c0_87 = arith.constant 0 : index
    %100 = vector.load %arg10[%c2_85, %c2_86, %c0_87] : memref<10x18x128xbf16, #tpu.memory_space<vmem>>, vector<8x16x128xbf16>
    %101 = vector.shape_cast %100 : vector<8x16x128xbf16> to vector<128x128xbf16>
    %c8 = arith.constant 8 : index
    %c0_88 = arith.constant 0 : index
    %c0_89 = arith.constant 0 : index
    %102 = vector.load %arg5[%c8, %c0_88, %c0_89] : memref<9x128x128xbf16, #tpu.memory_space<vmem>>, vector<1x128x128xbf16>
    %103 = vector.shape_cast %102 : vector<1x128x128xbf16> to vector<128x128xbf16>
    %cst_90 = arith.constant dense<0.000000e+00> : vector<128x128xf32>
    %104 = tpu.matmul %101, %103, %cst_90 {dimension_numbers = #tpu.dot_dimension_numbers<[1], [0], [0], [1], [0, 0, 1, 1], [], []>} : vector<128x128xbf16>, vector<128x128xbf16>, vector<128x128xf32> -> vector<128x128xf32>
    %105 = arith.addf %99, %104 : vector<128x128xf32>
    %c0_91 = arith.constant 0 : index
    %c0_92 = arith.constant 0 : index
    %106 = vector.load %arg6[%c0_91, %c0_92] : memref<1x128xf32, #tpu.memory_space<vmem>>, vector<1x128xf32>
    %107 = vector.broadcast %106 : vector<1x128xf32> to vector<128x128xf32>
    %108 = arith.addf %105, %107 : vector<128x128xf32>
    %cst_93 = arith.constant 0.000000e+00 : f32
    %109 = vector.broadcast %cst_93 : f32 to vector<128x128xf32>
    %110 = arith.maximumf %108, %109 : vector<128x128xf32>
    %111 = arith.truncf %110 : vector<128x128xf32> to vector<128x128xbf16>
    %c0_94 = arith.constant 0 : index
    %c0_95 = arith.constant 0 : index
    %112 = vector.load %arg7[%c0_94, %c0_95] : memref<128x128xbf16, #tpu.memory_space<vmem>>, vector<128x128xbf16>
    %cst_96 = arith.constant dense<0.000000e+00> : vector<128x128xf32>
    %113 = tpu.matmul %111, %112, %cst_96 {dimension_numbers = #tpu.dot_dimension_numbers<[1], [0], [0], [1], [0, 0, 1, 1], [], []>} : vector<128x128xbf16>, vector<128x128xbf16>, vector<128x128xf32> -> vector<128x128xf32>
    %c0_97 = arith.constant 0 : index
    %c0_98 = arith.constant 0 : index
    %114 = vector.load %arg8[%c0_97, %c0_98] : memref<1x128xf32, #tpu.memory_space<vmem>>, vector<1x128xf32>
    %115 = vector.broadcast %114 : vector<1x128xf32> to vector<128x128xf32>
    %116 = arith.addf %113, %115 : vector<128x128xf32>
    %c0_99 = arith.constant 0 : index
    %117 = arith.index_cast %1 : i32 to index
    %c0_100 = arith.constant 0 : index
    %c0_101 = arith.constant 0 : index
    %118 = vector.load %arg2[%c0_99, %117, %c0_100, %c0_101] : memref<1x16x16x128xbf16, #tpu.memory_space<vmem>>, vector<1x8x16x128xbf16>
    %119 = vector.shape_cast %118 : vector<1x8x16x128xbf16> to vector<8x16x128xbf16>
    %120 = vector.shape_cast %119 : vector<8x16x128xbf16> to vector<128x128xbf16>
    %121 = arith.extf %120 : vector<128x128xbf16> to vector<128x128xf32>
    %122 = arith.addf %116, %121 : vector<128x128xf32>
    %cst_102 = arith.constant 0.000000e+00 : f32
    %123 = vector.broadcast %cst_102 : f32 to vector<128x128xf32>
    %124 = arith.maximumf %122, %123 : vector<128x128xf32>
    %125 = vector.shape_cast %124 : vector<128x128xf32> to vector<8x16x128xf32>
    %126 = arith.truncf %125 : vector<8x16x128xf32> to vector<8x16x128xbf16>
    %c0_103 = arith.constant 0 : index
    %c0_104 = arith.constant 0 : index
    %c0_105 = arith.constant 0 : index
    %c0_106 = arith.constant 0 : index
    %127 = vector.load %arg9[%c0_103, %c0_104, %c0_105, %c0_106] : memref<1x8x16x128xbf16, #tpu.memory_space<vmem>>, vector<1x8x16x128xbf16>
    %128 = vector.shape_cast %127 : vector<1x8x16x128xbf16> to vector<8x16x128xbf16>
    %129 = vector.shape_cast %126 : vector<8x16x128xbf16> to vector<1x8x16x128xbf16>
    tpu.vector_store %arg9[%c0_103, %c0_104, %c0_105, %c0_106], %129 {strides = array<i32>} : memref<1x8x16x128xbf16, #tpu.memory_space<vmem>>, vector<1x8x16x128xbf16>,
    return
  }
  func.func @transform_0(%arg0: i32, %arg1: i32) -> (i32, i32, i32, i32) {
    %c0_i32 = arith.constant 0 : i32
    %c0_i32_0 = arith.constant 0 : i32
    %c0_i32_1 = arith.constant 0 : i32
    %c0_i32_2 = arith.constant 0 : i32
    return %arg0, %c0_i32, %c0_i32_0, %c0_i32_1 : i32, i32, i32, i32
  }
  func.func @transform_1(%arg0: i32, %arg1: i32) -> (i32, i32) {
    %c0_i32 = arith.constant 0 : i32
    %c0_i32_0 = arith.constant 0 : i32
    %c0_i32_1 = arith.constant 0 : i32
    return %c0_i32, %c0_i32_0 : i32, i32
  }
  func.func @transform_2(%arg0: i32, %arg1: i32) -> (i32, i32) {
    %c0_i32 = arith.constant 0 : i32
    %c0_i32_0 = arith.constant 0 : i32
    %c0_i32_1 = arith.constant 0 : i32
    return %c0_i32, %c0_i32_0 : i32, i32
  }
  func.func @transform_3(%arg0: i32, %arg1: i32) -> (i32, i32, i32) {
    %c0_i32 = arith.constant 0 : i32
    %c0_i32_0 = arith.constant 0 : i32
    %c0_i32_1 = arith.constant 0 : i32
    %c0_i32_2 = arith.constant 0 : i32
    return %c0_i32, %c0_i32_0, %c0_i32_1 : i32, i32, i32
  }
  func.func @transform_4(%arg0: i32, %arg1: i32) -> (i32, i32) {
    %c0_i32 = arith.constant 0 : i32
    %c0_i32_0 = arith.constant 0 : i32
    %c0_i32_1 = arith.constant 0 : i32
    return %c0_i32, %c0_i32_0 : i32, i32
  }
  func.func @transform_5(%arg0: i32, %arg1: i32) -> (i32, i32) {
    %c0_i32 = arith.constant 0 : i32
    %c0_i32_0 = arith.constant 0 : i32
    %c0_i32_1 = arith.constant 0 : i32
    return %c0_i32, %c0_i32_0 : i32, i32
  }
  func.func @transform_6(%arg0: i32, %arg1: i32) -> (i32, i32) {
    %c0_i32 = arith.constant 0 : i32
    %c0_i32_0 = arith.constant 0 : i32
    %c0_i32_1 = arith.constant 0 : i32
    return %c0_i32, %c0_i32_0 : i32, i32
  }
  func.func @transform_7(%arg0: i32, %arg1: i32) -> (i32, i32, i32, i32) {
    %c0_i32 = arith.constant 0 : i32
    %c0_i32_0 = arith.constant 0 : i32
    %c0_i32_1 = arith.constant 0 : i32
    return %arg0, %arg1, %c0_i32, %c0_i32_0 : i32, i32, i32, i32
  }
}

module attributes {stable_mosaic.version = 11 : i64} {
  func.func @_bottleneck_kernel(%arg0: i32, %arg1: i32, %arg2: memref<1x16x16x128xbf16, #tpu.memory_space<vmem>>, %arg3: memref<128x128xbf16, #tpu.memory_space<vmem>>, %arg4: memref<1x128xf32, #tpu.memory_space<vmem>>, %arg5: memref<9x128x128xbf16, #tpu.memory_space<vmem>>, %arg6: memref<1x128xf32, #tpu.memory_space<vmem>>, %arg7: memref<128x128xbf16, #tpu.memory_space<vmem>>, %arg8: memref<1x128xf32, #tpu.memory_space<vmem>>, %arg9: memref<1x8x16x128xbf16, #tpu.memory_space<vmem>>, %arg10: memref<10x18x128xbf16, #tpu.memory_space<vmem>>) attributes {dimension_semantics = [#tpu.dimension_semantics<parallel>, #tpu.dimension_semantics<parallel>], iteration_bounds = array<i64: 2, 2>, scalar_prefetch = 0 : i64, scratch_operands = 1 : i64, tpu.core_type = #tpu.core_type<tc>, window_params = [{transform_indices = @transform_0, window_bounds = array<i64: 1, 16, 16, 128>}, {pipeline_mode = #tpu.pipeline_mode<synchronous>, transform_indices = @transform_1, window_bounds = array<i64: 128, 128>}, {pipeline_mode = #tpu.pipeline_mode<synchronous>, transform_indices = @transform_2, window_bounds = array<i64: 1, 128>}, {pipeline_mode = #tpu.pipeline_mode<synchronous>, transform_indices = @transform_3, window_bounds = array<i64: 9, 128, 128>}, {pipeline_mode = #tpu.pipeline_mode<synchronous>, transform_indices = @transform_4, window_bounds = array<i64: 1, 128>}, {pipeline_mode = #tpu.pipeline_mode<synchronous>, transform_indices = @transform_5, window_bounds = array<i64: 128, 128>}, {pipeline_mode = #tpu.pipeline_mode<synchronous>, transform_indices = @transform_6, window_bounds = array<i64: 1, 128>}, {transform_indices = @transform_7, window_bounds = array<i64: 1, 8, 16, 128>}]} {
    %c8_i32 = arith.constant 8 : i32
    %0 = arith.muli %arg1, %c8_i32 : i32
    %1 = tpu.assume_multiple %0, 8 : i32
    %c0 = arith.constant 0 : index
    %c0_0 = arith.constant 0 : index
    %2 = vector.load %arg3[%c0, %c0_0] : memref<128x128xbf16, #tpu.memory_space<vmem>>, vector<128x128xbf16>
    %c0_1 = arith.constant 0 : index
    %c0_2 = arith.constant 0 : index
    %3 = vector.load %arg4[%c0_1, %c0_2] : memref<1x128xf32, #tpu.memory_space<vmem>>, vector<1x128xf32>
    %c0_3 = arith.constant 0 : index
    %4 = arith.index_cast %1 : i32 to index
    %c0_4 = arith.constant 0 : index
    %c0_5 = arith.constant 0 : index
    %5 = vector.load %arg2[%c0_3, %4, %c0_4, %c0_5] : memref<1x16x16x128xbf16, #tpu.memory_space<vmem>>, vector<1x8x16x128xbf16>
    %6 = vector.shape_cast %5 : vector<1x8x16x128xbf16> to vector<8x16x128xbf16>
    %7 = vector.shape_cast %6 : vector<8x16x128xbf16> to vector<128x128xbf16>
    %cst = arith.constant dense<0.000000e+00> : vector<128x128xf32>
    %8 = tpu.matmul %7, %2, %cst {dimension_numbers = #tpu.dot_dimension_numbers<[1], [0], [0], [1], [0, 0, 1, 1], [], []>} : vector<128x128xbf16>, vector<128x128xbf16>, vector<128x128xf32> -> vector<128x128xf32>
    %9 = vector.broadcast %3 : vector<1x128xf32> to vector<128x128xf32>
    %10 = arith.addf %8, %9 : vector<128x128xf32>
    %cst_6 = arith.constant 0.000000e+00 : f32
    %11 = vector.broadcast %cst_6 : f32 to vector<128x128xf32>
    %12 = arith.maximumf %10, %11 : vector<128x128xf32>
    %c1_i32 = arith.constant 1 : i32
    %13 = arith.subi %1, %c1_i32 : i32
    %c0_i32 = arith.constant 0 : i32
    %14 = arith.maxsi %13, %c0_i32 : i32
    %c0_7 = arith.constant 0 : index
    %15 = arith.index_cast %14 : i32 to index
    %c0_8 = arith.constant 0 : index
    %c0_9 = arith.constant 0 : index
    %16 = vector.load %arg2[%c0_7, %15, %c0_8, %c0_9] : memref<1x16x16x128xbf16, #tpu.memory_space<vmem>>, vector<1x1x16x128xbf16>
    %17 = vector.shape_cast %16 : vector<1x1x16x128xbf16> to vector<1x16x128xbf16>
    %18 = vector.shape_cast %17 : vector<1x16x128xbf16> to vector<16x128xbf16>
    %cst_10 = arith.constant dense<0.000000e+00> : vector<16x128xf32>
    %19 = tpu.matmul %18, %2, %cst_10 {dimension_numbers = #tpu.dot_dimension_numbers<[1], [0], [0], [1], [0, 0, 1, 1], [], []>} : vector<16x128xbf16>, vector<128x128xbf16>, vector<16x128xf32> -> vector<16x128xf32>
    %20 = vector.broadcast %3 : vector<1x128xf32> to vector<16x128xf32>
    %21 = arith.addf %19, %20 : vector<16x128xf32>
    %cst_11 = arith.constant 0.000000e+00 : f32
    %22 = vector.broadcast %cst_11 : f32 to vector<16x128xf32>
    %23 = arith.maximumf %21, %22 : vector<16x128xf32>
    %c0_i32_12 = arith.constant 0 : i32
    %24 = arith.cmpi sgt, %arg1, %c0_i32_12 : i32
    %cst_13 = arith.constant 0.000000e+00 : f32
    %25 = vector.broadcast %cst_13 : f32 to vector<16x128xf32>
    %26 = arith.select %24, %23, %25 : vector<16x128xf32>
    %c8_i32_14 = arith.constant 8 : i32
    %27 = arith.addi %1, %c8_i32_14 : i32
    %c15_i32 = arith.constant 15 : i32
    %28 = arith.minsi %27, %c15_i32 : i32
    %c0_15 = arith.constant 0 : index
    %29 = arith.index_cast %28 : i32 to index
    %c0_16 = arith.constant 0 : index
    %c0_17 = arith.constant 0 : index
    %30 = vector.load %arg2[%c0_15, %29, %c0_16, %c0_17] : memref<1x16x16x128xbf16, #tpu.memory_space<vmem>>, vector<1x1x16x128xbf16>
    %31 = vector.shape_cast %30 : vector<1x1x16x128xbf16> to vector<1x16x128xbf16>
    %32 = vector.shape_cast %31 : vector<1x16x128xbf16> to vector<16x128xbf16>
    %cst_18 = arith.constant dense<0.000000e+00> : vector<16x128xf32>
    %33 = tpu.matmul %32, %2, %cst_18 {dimension_numbers = #tpu.dot_dimension_numbers<[1], [0], [0], [1], [0, 0, 1, 1], [], []>} : vector<16x128xbf16>, vector<128x128xbf16>, vector<16x128xf32> -> vector<16x128xf32>
    %34 = vector.broadcast %3 : vector<1x128xf32> to vector<16x128xf32>
    %35 = arith.addf %33, %34 : vector<16x128xf32>
    %cst_19 = arith.constant 0.000000e+00 : f32
    %36 = vector.broadcast %cst_19 : f32 to vector<16x128xf32>
    %37 = arith.maximumf %35, %36 : vector<16x128xf32>
    %c1_i32_20 = arith.constant 1 : i32
    %38 = arith.cmpi slt, %arg1, %c1_i32_20 : i32
    %cst_21 = arith.constant 0.000000e+00 : f32
    %39 = vector.broadcast %cst_21 : f32 to vector<16x128xf32>
    %40 = arith.select %38, %37, %39 : vector<16x128xf32>
    %cst_22 = arith.constant 0.000000e+00 : bf16
    %41 = vector.broadcast %cst_22 : bf16 to vector<10x1x128xbf16>
    %c0_23 = arith.constant 0 : index
    %c0_24 = arith.constant 0 : index
    %c0_25 = arith.constant 0 : index
    %42 = vector.load %arg10[%c0_23, %c0_24, %c0_25] : memref<10x18x128xbf16, #tpu.memory_space<vmem>>, vector<10x1x128xbf16>
    tpu.vector_store %arg10[%c0_23, %c0_24, %c0_25], %41 {strides = array<i32>} : memref<10x18x128xbf16, #tpu.memory_space<vmem>>, vector<10x1x128xbf16>,
    %c0_26 = arith.constant 0 : index
    %c17 = arith.constant 17 : index
    %c0_27 = arith.constant 0 : index
    %43 = vector.load %arg10[%c0_26, %c17, %c0_27] : memref<10x18x128xbf16, #tpu.memory_space<vmem>>, vector<10x1x128xbf16>
    tpu.vector_store %arg10[%c0_26, %c17, %c0_27], %41 {strides = array<i32>} : memref<10x18x128xbf16, #tpu.memory_space<vmem>>, vector<10x1x128xbf16>,
    %44 = vector.shape_cast %26 : vector<16x128xf32> to vector<1x16x128xf32>
    %45 = arith.truncf %44 : vector<1x16x128xf32> to vector<1x16x128xbf16>
    %c0_28 = arith.constant 0 : index
    %c1 = arith.constant 1 : index
    %c0_29 = arith.constant 0 : index
    %46 = vector.load %arg10[%c0_28, %c1, %c0_29] : memref<10x18x128xbf16, #tpu.memory_space<vmem>>, vector<1x16x128xbf16>
    tpu.vector_store %arg10[%c0_28, %c1, %c0_29], %45 {strides = array<i32>} : memref<10x18x128xbf16, #tpu.memory_space<vmem>>, vector<1x16x128xbf16>,
    %47 = vector.shape_cast %40 : vector<16x128xf32> to vector<1x16x128xf32>
    %48 = arith.truncf %47 : vector<1x16x128xf32> to vector<1x16x128xbf16>
    %c9 = arith.constant 9 : index
    %c1_30 = arith.constant 1 : index
    %c0_31 = arith.constant 0 : index
    %49 = vector.load %arg10[%c9, %c1_30, %c0_31] : memref<10x18x128xbf16, #tpu.memory_space<vmem>>, vector<1x16x128xbf16>
    tpu.vector_store %arg10[%c9, %c1_30, %c0_31], %48 {strides = array<i32>} : memref<10x18x128xbf16, #tpu.memory_space<vmem>>, vector<1x16x128xbf16>,
    %50 = vector.shape_cast %12 : vector<128x128xf32> to vector<8x16x128xf32>
    %51 = arith.truncf %50 : vector<8x16x128xf32> to vector<8x16x128xbf16>
    %c1_32 = arith.constant 1 : index
    %c1_33 = arith.constant 1 : index
    %c0_34 = arith.constant 0 : index
    %52 = vector.load %arg10[%c1_32, %c1_33, %c0_34] : memref<10x18x128xbf16, #tpu.memory_space<vmem>>, vector<8x16x128xbf16>
    tpu.vector_store %arg10[%c1_32, %c1_33, %c0_34], %51 {strides = array<i32>} : memref<10x18x128xbf16, #tpu.memory_space<vmem>>, vector<8x16x128xbf16>,
    %c0_35 = arith.constant 0 : index
    %c0_36 = arith.constant 0 : index
    %c0_37 = arith.constant 0 : index
    %53 = vector.load %arg10[%c0_35, %c0_36, %c0_37] : memref<10x18x128xbf16, #tpu.memory_space<vmem>>, vector<8x16x128xbf16>
    %54 = vector.shape_cast %53 : vector<8x16x128xbf16> to vector<128x128xbf16>
    %c0_38 = arith.constant 0 : index
    %c0_39 = arith.constant 0 : index
    %c0_40 = arith.constant 0 : index
    %55 = vector.load %arg5[%c0_38, %c0_39, %c0_40] : memref<9x128x128xbf16, #tpu.memory_space<vmem>>, vector<1x128x128xbf16>
    %56 = vector.shape_cast %55 : vector<1x128x128xbf16> to vector<128x128xbf16>
    %cst_41 = arith.constant dense<0.000000e+00> : vector<128x128xf32>
    %57 = tpu.matmul %54, %56, %cst_41 {dimension_numbers = #tpu.dot_dimension_numbers<[1], [0], [0], [1], [0, 0, 1, 1], [], []>} : vector<128x128xbf16>, vector<128x128xbf16>, vector<128x128xf32> -> vector<128x128xf32>
    %c0_42 = arith.constant 0 : index
    %c1_43 = arith.constant 1 : index
    %c0_44 = arith.constant 0 : index
    %58 = vector.load %arg10[%c0_42, %c1_43, %c0_44] : memref<10x18x128xbf16, #tpu.memory_space<vmem>>, vector<8x16x128xbf16>
    %59 = vector.shape_cast %58 : vector<8x16x128xbf16> to vector<128x128xbf16>
    %c1_45 = arith.constant 1 : index
    %c0_46 = arith.constant 0 : index
    %c0_47 = arith.constant 0 : index
    %60 = vector.load %arg5[%c1_45, %c0_46, %c0_47] : memref<9x128x128xbf16, #tpu.memory_space<vmem>>, vector<1x128x128xbf16>
    %61 = vector.shape_cast %60 : vector<1x128x128xbf16> to vector<128x128xbf16>
    %cst_48 = arith.constant dense<0.000000e+00> : vector<128x128xf32>
    %62 = tpu.matmul %59, %61, %cst_48 {dimension_numbers = #tpu.dot_dimension_numbers<[1], [0], [0], [1], [0, 0, 1, 1], [], []>} : vector<128x128xbf16>, vector<128x128xbf16>, vector<128x128xf32> -> vector<128x128xf32>
    %63 = arith.addf %57, %62 : vector<128x128xf32>
    %c0_49 = arith.constant 0 : index
    %c2 = arith.constant 2 : index
    %c0_50 = arith.constant 0 : index
    %64 = vector.load %arg10[%c0_49, %c2, %c0_50] : memref<10x18x128xbf16, #tpu.memory_space<vmem>>, vector<8x16x128xbf16>
    %65 = vector.shape_cast %64 : vector<8x16x128xbf16> to vector<128x128xbf16>
    %c2_51 = arith.constant 2 : index
    %c0_52 = arith.constant 0 : index
    %c0_53 = arith.constant 0 : index
    %66 = vector.load %arg5[%c2_51, %c0_52, %c0_53] : memref<9x128x128xbf16, #tpu.memory_space<vmem>>, vector<1x128x128xbf16>
    %67 = vector.shape_cast %66 : vector<1x128x128xbf16> to vector<128x128xbf16>
    %cst_54 = arith.constant dense<0.000000e+00> : vector<128x128xf32>
    %68 = tpu.matmul %65, %67, %cst_54 {dimension_numbers = #tpu.dot_dimension_numbers<[1], [0], [0], [1], [0, 0, 1, 1], [], []>} : vector<128x128xbf16>, vector<128x128xbf16>, vector<128x128xf32> -> vector<128x128xf32>
    %69 = arith.addf %63, %68 : vector<128x128xf32>
    %c1_55 = arith.constant 1 : index
    %c0_56 = arith.constant 0 : index
    %c0_57 = arith.constant 0 : index
    %70 = vector.load %arg10[%c1_55, %c0_56, %c0_57] : memref<10x18x128xbf16, #tpu.memory_space<vmem>>, vector<8x16x128xbf16>
    %71 = vector.shape_cast %70 : vector<8x16x128xbf16> to vector<128x128xbf16>
    %c3 = arith.constant 3 : index
    %c0_58 = arith.constant 0 : index
    %c0_59 = arith.constant 0 : index
    %72 = vector.load %arg5[%c3, %c0_58, %c0_59] : memref<9x128x128xbf16, #tpu.memory_space<vmem>>, vector<1x128x128xbf16>
    %73 = vector.shape_cast %72 : vector<1x128x128xbf16> to vector<128x128xbf16>
    %cst_60 = arith.constant dense<0.000000e+00> : vector<128x128xf32>
    %74 = tpu.matmul %71, %73, %cst_60 {dimension_numbers = #tpu.dot_dimension_numbers<[1], [0], [0], [1], [0, 0, 1, 1], [], []>} : vector<128x128xbf16>, vector<128x128xbf16>, vector<128x128xf32> -> vector<128x128xf32>
    %75 = arith.addf %69, %74 : vector<128x128xf32>
    %c1_61 = arith.constant 1 : index
    %c1_62 = arith.constant 1 : index
    %c0_63 = arith.constant 0 : index
    %76 = vector.load %arg10[%c1_61, %c1_62, %c0_63] : memref<10x18x128xbf16, #tpu.memory_space<vmem>>, vector<8x16x128xbf16>
    %77 = vector.shape_cast %76 : vector<8x16x128xbf16> to vector<128x128xbf16>
    %c4 = arith.constant 4 : index
    %c0_64 = arith.constant 0 : index
    %c0_65 = arith.constant 0 : index
    %78 = vector.load %arg5[%c4, %c0_64, %c0_65] : memref<9x128x128xbf16, #tpu.memory_space<vmem>>, vector<1x128x128xbf16>
    %79 = vector.shape_cast %78 : vector<1x128x128xbf16> to vector<128x128xbf16>
    %cst_66 = arith.constant dense<0.000000e+00> : vector<128x128xf32>
    %80 = tpu.matmul %77, %79, %cst_66 {dimension_numbers = #tpu.dot_dimension_numbers<[1], [0], [0], [1], [0, 0, 1, 1], [], []>} : vector<128x128xbf16>, vector<128x128xbf16>, vector<128x128xf32> -> vector<128x128xf32>
    %81 = arith.addf %75, %80 : vector<128x128xf32>
    %c1_67 = arith.constant 1 : index
    %c2_68 = arith.constant 2 : index
    %c0_69 = arith.constant 0 : index
    %82 = vector.load %arg10[%c1_67, %c2_68, %c0_69] : memref<10x18x128xbf16, #tpu.memory_space<vmem>>, vector<8x16x128xbf16>
    %83 = vector.shape_cast %82 : vector<8x16x128xbf16> to vector<128x128xbf16>
    %c5 = arith.constant 5 : index
    %c0_70 = arith.constant 0 : index
    %c0_71 = arith.constant 0 : index
    %84 = vector.load %arg5[%c5, %c0_70, %c0_71] : memref<9x128x128xbf16, #tpu.memory_space<vmem>>, vector<1x128x128xbf16>
    %85 = vector.shape_cast %84 : vector<1x128x128xbf16> to vector<128x128xbf16>
    %cst_72 = arith.constant dense<0.000000e+00> : vector<128x128xf32>
    %86 = tpu.matmul %83, %85, %cst_72 {dimension_numbers = #tpu.dot_dimension_numbers<[1], [0], [0], [1], [0, 0, 1, 1], [], []>} : vector<128x128xbf16>, vector<128x128xbf16>, vector<128x128xf32> -> vector<128x128xf32>
    %87 = arith.addf %81, %86 : vector<128x128xf32>
    %c2_73 = arith.constant 2 : index
    %c0_74 = arith.constant 0 : index
    %c0_75 = arith.constant 0 : index
    %88 = vector.load %arg10[%c2_73, %c0_74, %c0_75] : memref<10x18x128xbf16, #tpu.memory_space<vmem>>, vector<8x16x128xbf16>
    %89 = vector.shape_cast %88 : vector<8x16x128xbf16> to vector<128x128xbf16>
    %c6 = arith.constant 6 : index
    %c0_76 = arith.constant 0 : index
    %c0_77 = arith.constant 0 : index
    %90 = vector.load %arg5[%c6, %c0_76, %c0_77] : memref<9x128x128xbf16, #tpu.memory_space<vmem>>, vector<1x128x128xbf16>
    %91 = vector.shape_cast %90 : vector<1x128x128xbf16> to vector<128x128xbf16>
    %cst_78 = arith.constant dense<0.000000e+00> : vector<128x128xf32>
    %92 = tpu.matmul %89, %91, %cst_78 {dimension_numbers = #tpu.dot_dimension_numbers<[1], [0], [0], [1], [0, 0, 1, 1], [], []>} : vector<128x128xbf16>, vector<128x128xbf16>, vector<128x128xf32> -> vector<128x128xf32>
    %93 = arith.addf %87, %92 : vector<128x128xf32>
    %c2_79 = arith.constant 2 : index
    %c1_80 = arith.constant 1 : index
    %c0_81 = arith.constant 0 : index
    %94 = vector.load %arg10[%c2_79, %c1_80, %c0_81] : memref<10x18x128xbf16, #tpu.memory_space<vmem>>, vector<8x16x128xbf16>
    %95 = vector.shape_cast %94 : vector<8x16x128xbf16> to vector<128x128xbf16>
    %c7 = arith.constant 7 : index
    %c0_82 = arith.constant 0 : index
    %c0_83 = arith.constant 0 : index
    %96 = vector.load %arg5[%c7, %c0_82, %c0_83] : memref<9x128x128xbf16, #tpu.memory_space<vmem>>, vector<1x128x128xbf16>
    %97 = vector.shape_cast %96 : vector<1x128x128xbf16> to vector<128x128xbf16>
    %cst_84 = arith.constant dense<0.000000e+00> : vector<128x128xf32>
    %98 = tpu.matmul %95, %97, %cst_84 {dimension_numbers = #tpu.dot_dimension_numbers<[1], [0], [0], [1], [0, 0, 1, 1], [], []>} : vector<128x128xbf16>, vector<128x128xbf16>, vector<128x128xf32> -> vector<128x128xf32>
    %99 = arith.addf %93, %98 : vector<128x128xf32>
    %c2_85 = arith.constant 2 : index
    %c2_86 = arith.constant 2 : index
    %c0_87 = arith.constant 0 : index
    %100 = vector.load %arg10[%c2_85, %c2_86, %c0_87] : memref<10x18x128xbf16, #tpu.memory_space<vmem>>, vector<8x16x128xbf16>
    %101 = vector.shape_cast %100 : vector<8x16x128xbf16> to vector<128x128xbf16>
    %c8 = arith.constant 8 : index
    %c0_88 = arith.constant 0 : index
    %c0_89 = arith.constant 0 : index
    %102 = vector.load %arg5[%c8, %c0_88, %c0_89] : memref<9x128x128xbf16, #tpu.memory_space<vmem>>, vector<1x128x128xbf16>
    %103 = vector.shape_cast %102 : vector<1x128x128xbf16> to vector<128x128xbf16>
    %cst_90 = arith.constant dense<0.000000e+00> : vector<128x128xf32>
    %104 = tpu.matmul %101, %103, %cst_90 {dimension_numbers = #tpu.dot_dimension_numbers<[1], [0], [0], [1], [0, 0, 1, 1], [], []>} : vector<128x128xbf16>, vector<128x128xbf16>, vector<128x128xf32> -> vector<128x128xf32>
    %105 = arith.addf %99, %104 : vector<128x128xf32>
    %c0_91 = arith.constant 0 : index
    %c0_92 = arith.constant 0 : index
    %106 = vector.load %arg6[%c0_91, %c0_92] : memref<1x128xf32, #tpu.memory_space<vmem>>, vector<1x128xf32>
    %107 = vector.broadcast %106 : vector<1x128xf32> to vector<128x128xf32>
    %108 = arith.addf %105, %107 : vector<128x128xf32>
    %cst_93 = arith.constant 0.000000e+00 : f32
    %109 = vector.broadcast %cst_93 : f32 to vector<128x128xf32>
    %110 = arith.maximumf %108, %109 : vector<128x128xf32>
    %111 = arith.truncf %110 : vector<128x128xf32> to vector<128x128xbf16>
    %c0_94 = arith.constant 0 : index
    %c0_95 = arith.constant 0 : index
    %112 = vector.load %arg7[%c0_94, %c0_95] : memref<128x128xbf16, #tpu.memory_space<vmem>>, vector<128x128xbf16>
    %cst_96 = arith.constant dense<0.000000e+00> : vector<128x128xf32>
    %113 = tpu.matmul %111, %112, %cst_96 {dimension_numbers = #tpu.dot_dimension_numbers<[1], [0], [0], [1], [0, 0, 1, 1], [], []>} : vector<128x128xbf16>, vector<128x128xbf16>, vector<128x128xf32> -> vector<128x128xf32>
    %c0_97 = arith.constant 0 : index
    %c0_98 = arith.constant 0 : index
    %114 = vector.load %arg8[%c0_97, %c0_98] : memref<1x128xf32, #tpu.memory_space<vmem>>, vector<1x128xf32>
    %115 = vector.broadcast %114 : vector<1x128xf32> to vector<128x128xf32>
    %116 = arith.addf %113, %115 : vector<128x128xf32>
    %c0_99 = arith.constant 0 : index
    %117 = arith.index_cast %1 : i32 to index
    %c0_100 = arith.constant 0 : index
    %c0_101 = arith.constant 0 : index
    %118 = vector.load %arg2[%c0_99, %117, %c0_100, %c0_101] : memref<1x16x16x128xbf16, #tpu.memory_space<vmem>>, vector<1x8x16x128xbf16>
    %119 = vector.shape_cast %118 : vector<1x8x16x128xbf16> to vector<8x16x128xbf16>
    %120 = vector.shape_cast %119 : vector<8x16x128xbf16> to vector<128x128xbf16>
    %121 = arith.extf %120 : vector<128x128xbf16> to vector<128x128xf32>
    %122 = arith.addf %116, %121 : vector<128x128xf32>
    %cst_102 = arith.constant 0.000000e+00 : f32
    %123 = vector.broadcast %cst_102 : f32 to vector<128x128xf32>
    %124 = arith.maximumf %122, %123 : vector<128x128xf32>
    %125 = vector.shape_cast %124 : vector<128x128xf32> to vector<8x16x128xf32>
    %126 = arith.truncf %125 : vector<8x16x128xf32> to vector<8x16x128xbf16>
    %c0_103 = arith.constant 0 : index
    %c0_104 = arith.constant 0 : index
    %c0_105 = arith.constant 0 : index
    %c0_106 = arith.constant 0 : index
    %127 = vector.load %arg9[%c0_103, %c0_104, %c0_105, %c0_106] : memref<1x8x16x128xbf16, #tpu.memory_space<vmem>>, vector<1x8x16x128xbf16>
    %128 = vector.shape_cast %127 : vector<1x8x16x128xbf16> to vector<8x16x128xbf16>
    %129 = vector.shape_cast %126 : vector<8x16x128xbf16> to vector<1x8x16x128xbf16>
    tpu.vector_store %arg9[%c0_103, %c0_104, %c0_105, %c0_106], %129 {strides = array<i32>} : memref<1x8x16x128xbf16, #tpu.memory_space<vmem>>, vector<1x8x16x128xbf16>,
    return
  }
  func.func @transform_0(%arg0: i32, %arg1: i32) -> (i32, i32, i32, i32) {
    %c0_i32 = arith.constant 0 : i32
    %c0_i32_0 = arith.constant 0 : i32
    %c0_i32_1 = arith.constant 0 : i32
    %c0_i32_2 = arith.constant 0 : i32
    return %arg0, %c0_i32, %c0_i32_0, %c0_i32_1 : i32, i32, i32, i32
  }
  func.func @transform_1(%arg0: i32, %arg1: i32) -> (i32, i32) {
    %c0_i32 = arith.constant 0 : i32
    %c0_i32_0 = arith.constant 0 : i32
    %c0_i32_1 = arith.constant 0 : i32
    return %c0_i32, %c0_i32_0 : i32, i32
  }
  func.func @transform_2(%arg0: i32, %arg1: i32) -> (i32, i32) {
    %c0_i32 = arith.constant 0 : i32
    %c0_i32_0 = arith.constant 0 : i32
    %c0_i32_1 = arith.constant 0 : i32
    return %c0_i32, %c0_i32_0 : i32, i32
  }
  func.func @transform_3(%arg0: i32, %arg1: i32) -> (i32, i32, i32) {
    %c0_i32 = arith.constant 0 : i32
    %c0_i32_0 = arith.constant 0 : i32
    %c0_i32_1 = arith.constant 0 : i32
    %c0_i32_2 = arith.constant 0 : i32
    return %c0_i32, %c0_i32_0, %c0_i32_1 : i32, i32, i32
  }
  func.func @transform_4(%arg0: i32, %arg1: i32) -> (i32, i32) {
    %c0_i32 = arith.constant 0 : i32
    %c0_i32_0 = arith.constant 0 : i32
    %c0_i32_1 = arith.constant 0 : i32
    return %c0_i32, %c0_i32_0 : i32, i32
  }
  func.func @transform_5(%arg0: i32, %arg1: i32) -> (i32, i32) {
    %c0_i32 = arith.constant 0 : i32
    %c0_i32_0 = arith.constant 0 : i32
    %c0_i32_1 = arith.constant 0 : i32
    return %c0_i32, %c0_i32_0 : i32, i32
  }
  func.func @transform_6(%arg0: i32, %arg1: i32) -> (i32, i32) {
    %c0_i32 = arith.constant 0 : i32
    %c0_i32_0 = arith.constant 0 : i32
    %c0_i32_1 = arith.constant 0 : i32
    return %c0_i32, %c0_i32_0 : i32, i32
  }
  func.func @transform_7(%arg0: i32, %arg1: i32) -> (i32, i32, i32, i32) {
    %c0_i32 = arith.constant 0 : i32
    %c0_i32_0 = arith.constant 0 : i32
    %c0_i32_1 = arith.constant 0 : i32
    return %arg0, %arg1, %c0_i32, %c0_i32_0 : i32, i32, i32, i32
  }
}

</mosaic_0001>

<bundles_post_ra>
// kernel: tpu_custom_call.1
= control target key start
LH: loop header
LB: loop body
LE: loop exit
PB: predicated region body
PF: predicated region fallthrough
CT: control target
= control target key end

     0   :  { %s7375_s0 = inlined_call_operand.hbm [shape: bf16[2,16,16,128], index: 0, kind: input, shape index: {}]   ;;  %s7376_s1 = inlined_call_operand.hbm [shape: bf16[128,128], index: 1, kind: input, shape index: {}]   ;;  %s7377_s2 = inlined_call_operand.vmem [shape: f32[1,128], index: 2, kind: input, shape index: {}]   ;;  %s7378_s3 = inlined_call_operand.hbm [shape: bf16[9,128,128], index: 3, kind: input, shape index: {}]   ;;  %s7379_s4 = inlined_call_operand.vmem [shape: f32[1,128], index: 4, kind: input, shape index: {}]   ;;  %s7380_s5 = inlined_call_operand.hbm [shape: bf16[128,128], index: 5, kind: input, shape index: {}]   ;;  %s7381_s6 = inlined_call_operand.vmem [shape: f32[1,128], index: 6, kind: input, shape index: {}]   ;;  %s7382_s7 = inlined_call_operand.hbm [shape: bf16[2,16,16,128], index: 7, kind: output, shape index: {}]  }
   0x1   :  { %7397 = sst [smem:[#allocation21_spill]] %s7376_s1 }
   0x2   :  { %7398 = sst [smem:[#allocation22_spill]] %s7378_s3 }
   0x3   :  { %7399 = sst [smem:[#allocation23_spill]] %s7379_s4 }
   0x4   :  { %7400 = sst [smem:[#allocation24_spill]] %s7381_s6 }
   0x5   :  { %7401 = sst [smem:[#allocation25_spill]] %s7382_s7 }
   0x6   :  { %12 = vsyncpa [#allocation4], 0 }
   0x7   :  { %14 = vsyncpa [#allocation4 + $0x1], 0 }
   0x8   :  { %15 = vsyncpa [#allocation7], 0 }
   0x9   :  { %16 = vsyncpa [#allocation10], 0 }
   0xa   :  { %17 = vsyncpa [#allocation5], 0 }
   0xb   :  { %19 = vsyncpa [#allocation5 + $0x1], 0  ;;  %s6147_s24 = smov 0   ;;  %s6149_s25 = smov 0  }
   0xc   :  { %s6151_s26 = smov 0   ;;  %s6153_s27 = smov 0  }
   0xd   :  { %s6155_s28 = smov 0   ;;  %s6157_s29 = smov 0  }
   0xe   :  { %s6159_s30 = smov 0   ;;  %s6161_s8 = smov 0  }
   0xf   :  { %s6163_s9 = smov 0   ;;  %s6165_s10 = smov 0  }
  0x10   :  { %s6167_s11 = smov 0  }
  0x11 LB: > { %7402 = sst [smem:[#allocation16_spill]] %s6054_s24  ;;  %s4482_s12 = sadd.s32 4294967295, %s6094_s11   ;;  %s6094_s11 = sphi %s6167_s11, %s25_s11   ;;  %s6090_s10 = sphi %s6165_s10, %s7459_s10   ;;  %s6086_s9 = sphi %s6163_s9, %s7458_s9   ;;  %s6082_s8 = sphi %s6161_s8, %s7457_s8   ;;  %s6078_s30 = sphi %s6159_s30, %s7456_s30   ;;  %s6074_s29 = sphi %s6157_s29, %s7455_s29   ;;  %s6070_s28 = sphi %s6155_s28, %s7454_s28   ;;  %s6066_s27 = sphi %s6153_s27, %s7453_s27   ;;  %s6062_s26 = sphi %s6151_s26, %s7452_s26   ;;  %s6058_s25 = sphi %s6149_s25, %s7451_s25   ;;  %s6054_s24 = sphi %s6147_s24, %s7450_s24  }
  0x12   : > { %7403 = sst [smem:[#allocation17_spill]] %s6058_s25  ;;  %s4483_s13 = sadd.s32 4294967294, %s6094_s11  }
  0x13   : > { %7404 = sst [smem:[#allocation18_spill]] %s6082_s8  ;;  %p57_p0 = scmp.ne.s32.totalorder %s6070_s28, %s6066_s27 }
  0x14   : > { %p6203_p1 = scmp.eq.s32.totalorder %s4482_s12, 0  ;;  %p208_p2 = scmp.ne.s32.totalorder %s6062_s26, %s6058_s25 }
  0x15   : > { %p209_p4 = scmp.eq.s32.totalorder %s4482_s12, 3  ;;  %p214_p5 = scmp.ne.s32.totalorder %s6058_s25, %s6054_s24 }
  0x16   : > { %s7405_s14 = scalar_select %p6203_p1, 1, 0 }
  0x17   : > { %p6212_p3 = por %p6203_p1, %p57_p0  ;;  %p215_p6 = scmp.eq.s32.totalorder %s4483_s13, 3 }
  0x18   : > { %p6218_p7 = por %p209_p4, %p208_p2  ;;  %p4484_p8 = scmp.ge.s32.totalorder %s6094_s11, 1 }
  0x19   : > { %s7406_s16 = scalar_select %p6212_p3, 1, 0 }
  0x1a   : > { %s7407_s17 = scalar_select %p6218_p7, 1, 0 }
  0x1b   : > { %p6223_p9 = por %p215_p6, %p214_p5  ;;  %p222_p10 = scmp.lt.s32.totalorder %s6094_s11, 5 }
  0x1c   : > { %7408 = sst [smem:[#allocation19_spill]] %s7407_s17  ;;  %s6096_s20 = smov [#allocation6]  }
  0x1d   : > { %s7409_s18 = scalar_select %p6223_p9, 1, 0 }
  0x1e   : > { %p6228_p11 = pnand %p4484_p8, %p222_p10  ;;  %s234_s21 = sshll.u32 %s6096_s20, 4  ;;  %s6232_s21 = int_to_ptr.vmem [resolvable:$true] %s234_s21 }
  0x1f   : > { %7410 = sst [smem:[#allocation20_spill]] %s7409_s18  ;;  %s6097_s23 = smov [#allocation8]  }
  0x20   : > { %s7411_s19 = scalar_select %p6228_p11, 1, 0 }
  0x21   : > { %p5604_p12 = pneg %p6228_p11  ;;  %s250_s27 = sshll.u32 %s6097_s23, 4  ;;  %s6242_s27 = int_to_ptr.vmem [resolvable:$true] %s250_s27 }
  0x22   : > { %s6098_s12 = smov [#allocation9]   ;;  %s7413_s1 = sld [smem:[#allocation21_spill]] }
  0x23   : > { %p6238_p13 = pnand %p5604_p12, %p6203_p1  ;;  %s6244_s13 = sshll.u32 %s6098_s12, 4  ;;  %s267_s13 = int_to_ptr.vmem [resolvable:$true] %s6244_s13 }
  0x25   : > { %p6254_p2 = pneg %p6238_p13 }
  0x28   : > { %s5850_s20 = scalar_lea.hbm %s7413_s1, 1024 }
  0x29   : > { %p5851_p0 = scmp.ne.s32.totalorder %s7413_s1, %s5850_s20  ;;  %p5857_p6 = scmp.lt.u32.totalorder %s5850_s20, %s7413_s1 }
  0x2b   : > { %p5853_p4 = pnand %p6254_p2, %p5851_p0 }
  0x2d   : > { %p5854_p5 = pneg %p5853_p4 }
  0x2f   : > { %p5859_p8 = pnand %p5857_p6, %p5854_p5 }
  0x31   : > { %5862 = shalt.err (!%p5859_p8)
}
  0x32   : > { %s5863_s7 = scalar_lea.vmem %s6232_s21, 1024  ;;  %p5871_p7 = scmp.lt.s32.totalorder %s6232_s21, %s6232_s21 }
  0x33   : > { %p5864_p10 = scmp.ne.s32.totalorder %s6232_s21, %s5863_s7  ;;  %p5872_p1 = scmp.lt.s32.totalorder %s5863_s7, %s5863_s7 }
  0x35   : > { %p5866_p12 = pnand %p5864_p10, %p6254_p2  ;;  %p5873_p0 = por %p5872_p1, %p5871_p7 }
  0x37   : > { %p5867_p9 = pneg %p5866_p12 }
  0x39   : > { %p5874_p4 = pnand %p5873_p0, %p5867_p9 }
  0x3b   : > { %5877 = shalt.err (!%p5874_p4)
}
  0x3c   : > { %s7395_s24 = smov 64   ;;  %s7396_s15 = smov 4  }
  0x3d   : > { %5607 = dma.hbm_to_vmem [thread:$0]  (!%p6238_p13), %s7413_s1, 1024, %s6232_s21, [#allocation7], %s7395_s24, %s7395_s24, %s7396_s15  }
  0x3e   : > { %s7415_s3 = sld [smem:[#allocation22_spill]] }
  0x44   : > { %s5878_s7 = scalar_lea.hbm %s7415_s3, 9216 }
  0x45   : > { %p5879_p1 = scmp.ne.s32.totalorder %s7415_s3, %s5878_s7  ;;  %p5885_p5 = scmp.lt.u32.totalorder %s5878_s7, %s7415_s3 }
  0x47   : > { %p5881_p7 = pnand %p5879_p1, %p6254_p2 }
  0x49   : > { %p5882_p9 = pneg %p5881_p7 }
  0x4b   : > { %p5887_p6 = pnand %p5885_p5, %p5882_p9 }
  0x4d   : > { %5890 = shalt.err (!%p5887_p6)
}
  0x4e   : > { %s5891_s21 = scalar_lea.vmem %s6242_s27, 9216  ;;  %p5899_p0 = scmp.lt.s32.totalorder %s6242_s27, %s6242_s27 }
  0x4f   : > { %p5892_p8 = scmp.ne.s32.totalorder %s6242_s27, %s5891_s21  ;;  %p5900_p4 = scmp.lt.s32.totalorder %s5891_s21, %s5891_s21 }
  0x51   : > { %p5894_p10 = pnand %p5892_p8, %p6254_p2  ;;  %p5901_p1 = por %p5900_p4, %p5899_p0 }
  0x53   : > { %p5895_p12 = pneg %p5894_p10 }
  0x55   : > { %p5902_p7 = pnand %p5901_p1, %p5895_p12 }
  0x57   : > { %5905 = shalt.err (!%p5902_p7)
}
  0x58   : > { %5610 = dma.hbm_to_vmem [thread:$0]  (!%p6238_p13), %s7415_s3, 9216, %s6242_s27, [#allocation7], %s7395_s24, %s7395_s24, %s7396_s15  }
  0x59   : > { %s5906_s18 = scalar_lea.hbm %s7380_s5, 1024 }
  0x5a   : > { %p5907_p9 = scmp.ne.s32.totalorder %s7380_s5, %s5906_s18  ;;  %p5913_p8 = scmp.lt.u32.totalorder %s5906_s18, %s7380_s5 }
  0x5c   : > { %p5909_p5 = pnand %p5907_p9, %p6254_p2 }
  0x5e   : > { %p5910_p6 = pneg %p5909_p5 }
  0x60   : > { %p5915_p10 = pnand %p5913_p8, %p5910_p6 }
  0x62   : > { %5918 = shalt.err (!%p5915_p10)
}
  0x63   : > { %s5919_s21 = scalar_lea.vmem %s267_s13, 1024  ;;  %p5927_p1 = scmp.lt.s32.totalorder %s267_s13, %s267_s13 }
  0x64   : > { %p5920_p12 = scmp.ne.s32.totalorder %s267_s13, %s5919_s21  ;;  %p5928_p7 = scmp.lt.s32.totalorder %s5919_s21, %s5919_s21 }
  0x66   : > { %p5922_p0 = pnand %p5920_p12, %p6254_p2  ;;  %p5929_p3 = por %p5928_p7, %p5927_p1 }
  0x68   : > { %p5923_p4 = pneg %p5922_p0 }
  0x6a   : > { %p5930_p11 = pnand %p5929_p3, %p5923_p4 }
  0x6c   : > { %5933 = shalt.err (!%p5930_p11)
}
  0x6d   : > { %5613 = dma.hbm_to_vmem [thread:$0]  (!%p6238_p13), %s7380_s5, 1024, %s267_s13, [#allocation10], %s7395_s24, %s7395_s24, %s7396_s15  }
  0x6e   : > { %s34_s17 = sadd.s32 1, %s6086_s9  ;;  %s37_s22 = sadd.s32 1, %s6090_s10 }
  0x6f   : > { %p35_p3 = scmp.ge.s32.totalorder %s34_s17, 2  ;;  %s44_s6 = sadd.s32 1, %s6074_s29 }
  0x70   : > { %p51_p11 = scmp.ne.s32.totalorder %s6074_s29, %s6070_s28  ;;  %p52_p2 = scmp.eq.s32.totalorder %s6094_s11, 0 }
  0x71   : > { %s7461_s17 = smov (%p35_p3, %s34_s17), 0  ;;  %s7463_s22 = smov (!%p35_p3, %s37_s22), %s6090_s10 }
  0x72   : > { %s194_s25 = ssub.s32 %s6086_s9, %s7461_s17  ;;  %p39_p9 = scmp.ge.s32.totalorder %s7463_s22, 2 }
  0x73   : > { %p5625_p5 = scmp.lt.s32.totalorder %s6094_s11, 4  ;;  %p6338_p13 = por %p52_p2, %p51_p11 }
  0x74   : > { %s283_s8 = sand.u32 1, %s6074_s29   ;;  %s7465_s22 = smov (%p39_p9, %s7463_s22), 0 }
  0x75   : > { %s4489_s18 = sshll.u32 %s283_s8, 7  ;;  %s41_s20 = ssub.s32 %s6090_s10, %s7465_s22 }
  0x76   : > { %p42_p6 = scmp.eq.s32.totalorder %s41_s20, 0  ;;  %s195_s23 = sor.u32 %s194_s25, %s41_s20 }
  0x77   : > { %p196_p8 = scmp.eq.s32.totalorder %s195_s23, 0  ;;  %s4746_s12 = sshll.u32 %s6090_s10, 11 }
  0x78   : > { %s6349_s7 = scalar_select %p42_p6, %s6074_s29, %s44_s6  }
  0x79   : > { %s7417_s21 = sadd.s32 1, %s6062_s26  ;;  %s6359_s15 = scalar_lea.hbm %s7375_s0, %s4746_s12 }
  0x7a   : > { %s6354_s27 = scalar_select %p196_p8, %s6062_s26, %s7417_s21  }
  0x7b   : > { %s287_s1 = scalar_lea.vmem [#allocation3], %s4489_s18  ;;  %p6367_p10 = pnand %p5625_p5, %p6338_p13 }
  0x7c   : > { %s294_s3 = sshll.u32 %s287_s1, 4  ;;  %s6371_s25 = scalar_lea.sflag [#allocation4], %s283_s8  ;;  %s6361_s3 = int_to_ptr.vmem [resolvable:$true] %s294_s3 }
  0x7d   : > { %s5934_s24 = scalar_lea.hbm %s6359_s15, 2048  ;;  %p5936_p0 = pneg %p6367_p10 }
  0x7e   : > { %p5935_p12 = scmp.ne.s32.totalorder %s6359_s15, %s5934_s24  ;;  %s5939_s13 = scalar_lea.hbm %s7375_s0, 4096 }
  0x7f   : > { %p5940_p7 = scmp.lt.u32.totalorder %s6359_s15, %s7375_s0  ;;  %p5941_p3 = scmp.lt.u32.totalorder %s5939_s13, %s5934_s24 }
  0x80   : > { %p5937_p4 = pnand %p5936_p0, %p5935_p12  ;;  %p5943_p2 = scmp.lt.u32.totalorder %s5934_s24, %s6359_s15 }
  0x81   : > { %p5942_p11 = por %p5941_p3, %p5940_p7 }
  0x82   : > { %p5938_p1 = pneg %p5937_p4 }
  0x83   : > { %p5944_p9 = por %p5943_p2, %p5942_p11 }
  0x85   : > { %p5945_p5 = pnand %p5944_p9, %p5938_p1 }
  0x87   : > { %5948 = shalt.err (!%p5945_p5)
}
  0x88   : > { %s5949_s8 = scalar_lea.vmem %s6361_s3, 2048  ;;  %s6101_s12 = smov [#allocation3]  }
  0x89   : > { %p5950_p13 = scmp.ne.s32.totalorder %s6361_s3, %s5949_s8  ;;  %s5954_s21 = sshll.u32 %s6101_s12, 4  ;;  %s5955_s21 = int_to_ptr.vmem [resolvable:$false] %s5954_s21 }
  0x8a   : > { %s5956_s4 = scalar_lea.vmem %s5955_s21, 4096  ;;  %p5957_p12 = scmp.lt.s32.totalorder %s6361_s3, %s5955_s21 }
  0x8b   : > { %p5952_p6 = pnand %p5950_p13, %p5936_p0  ;;  %p5958_p4 = scmp.lt.s32.totalorder %s5956_s4, %s5949_s8 }
  0x8d   : > { %p5953_p8 = pneg %p5952_p6  ;;  %p5959_p7 = por %p5958_p4, %p5957_p12 }
  0x8f   : > { %p5960_p3 = pnand %p5959_p7, %p5953_p8 }
  0x91   : > { %5963 = shalt.err (!%p5960_p3)
}
  0x92   : > { %s7419_s24 = smov 4   ;;  %s7420_s1 = smov 64  }
  0x93   : > { %5617 = dma.hbm_to_vmem [thread:$0]  (!%p6367_p10), %s6359_s15, 2048, %s6361_s3, %s6371_s25, %s7420_s1, %s7420_s1, %s7419_s24  }
  0x94   : > { %p7421_p0 = scmp.ne.s32.totalorder %s7411_s19, 0 }
  0x95   : > { %s308_s18 = sand.u32 (!%p7421_p0), 1, %s6070_s28   ;;  %p7422_p1 = scmp.ne.s32.totalorder (!%p7421_p0), %s7406_s16, 0 }
  0x96   : > { %306 = sbr.rel (%p7421_p0) target bundleno = 1158 (0x486), region = 48  ;;  %s4493_s13 = sshll.u32 (!%p7421_p0), %s308_s18, 7 }
  0x97   : > { %s309_s20 = scalar_lea.sflag (!%p7421_p0), [#allocation4], %s308_s18  ;;  %s6405_s23 = scalar_lea.vmem (!%p7421_p0), [#allocation3], %s4493_s13 }
  0x9d   : > { %6037 = dma.done.wait (%p7422_p1), %s309_s20, 2048  }
  0x9e   : > { %6039 = vsyncadd (%p7422_p1), %s309_s20, 4294965248  ;;  %p7423_p11 = scmp.ne.s32.totalorder %s7405_s14, 0 }
  0xa0   : > { %6041 = dma.done.wait (%p7423_p11), [#allocation7], 10240  }
  0xa1   : > { %6043 = vsyncadd (%p7423_p11), [#allocation7], 4294957056 }
  0xa2   : > { %6045 = dma.done.wait (%p7423_p11), [#allocation10], 1024  }
  0xa3   : > { %6047 = vsyncadd (%p7423_p11), [#allocation10], 4294966272  ;;  %s4498_s3 = sshll.u32 %s6078_s30, 3  ;;  %v6420_v0 = vld [vmem:[#allocation6] sm:$0xff]   ;;  %v6422_v1 = vld [vmem:[#allocation6 + $0x8] sm:$0xff]   ;;  %s4748_s19 = sshll.u32 %s6078_s30, 6 }
  0xa4   : > { %s4518_s16 = sadd.s32 4294967295, %s4498_s3  ;;  %5068 = vmatprep.subr.bf16.mxu0 %v6420_v0  ;;  %s672_s15 = sadd.s32 8, %s4498_s3  ;;  %v6428_v2 = vld [vmem:[#allocation6 + $0x10] sm:$0xff]   ;;  %v6434_v3 = vld [vmem:[#allocation6 + $0x18] sm:$0xff]   ;;  %v5731_v5 = vld [vmem:[#allocation6 + $0x20] sm:$0xff]   ;;  %v6102_v11 = vmov 0.0  }
  0xa5   : > { %5069 = vmatpush3.bf16.msra.mxu0 %v6420_v0  ;;  %p610_p10 = scmp.gt.s32.totalorder %s4518_s16, 0  ;;  %s6431_s14 = scalar_lea.vmem %s6405_s23, %s4748_s19 [#allocation3]  ;;  %v5732_v6 = vld [vmem:[#allocation6 + $0x28] sm:$0xff]   ;;  %v5733_v7 = vld [vmem:[#allocation6 + $0x30] sm:$0xff]   ;;  %v5734_v8 = vld [vmem:[#allocation6 + $0x38] sm:$0xff]   ;;  %vm6103_vm0 = vmmov 0   ;;  %vm735_vm1 = vcmask 1040384  }
  0xa6   : > { %5070 = vmatprep.subr.bf16.mxu0 %v6422_v1  ;;  %p673_p2 = scmp.lt.s32.totalorder %s672_s15, 15  ;;  %v5735_v4 = vld [vmem:[%s6431_s14] sm:$0xff]   ;;  %v5736_v9 = vld [vmem:[%s6431_s14 + $0x8] sm:$0xff]   ;;  %v5737_v10 = vld [vmem:[%s6431_s14 + $0x10] sm:$0xff]   ;;  %vm736_vm2 = vsmask.f32 256 }
  0xa7   : > { %s7467_s16 = smov (!%p610_p10, %s4518_s16), 0  ;;  %5084 = vmatprep.mubr.bf16.mxu0 %v5735_v4  ;;  %v5738_v12 = vld [vmem:[%s6431_s14 + $0x18] sm:$0xff]   ;;  %v5739_v13 = vld [vmem:[%s6431_s14 + $0x20] sm:$0xff]   ;;  %v5740_v14 = vld [vmem:[%s6431_s14 + $0x28] sm:$0xff]   ;;  %vm768_vm4 = vsmask.f32 7938 }
  0xa8   : > { %s7469_s15 = smov (!%p673_p2, %s672_s15), 15  ;;  %s4749_s6 = sshll.u32 %s7467_s16, 3  ;;  %v5741_v15 = vld [vmem:[%s6431_s14 + $0x30] sm:$0xff]   ;;  %v5742_v16 = vld [vmem:[%s6431_s14 + $0x38] sm:$0xff]   ;;  %vm6465_vm3 = vmand %vm735_vm1, %vm736_vm2  ;;  %vm828_vm6 = vcmask 1043456   ;;  %vm1782_vm10 = vcmask 1042432  }
  0xa9   : > { %5071 = vmatpush3.bf16.msra.mxu0 %v6422_v1  ;;  %s4750_s25 = sshll.u32 %s7469_s15, 3  ;;  %s6442_s8 = scalar_lea.vmem %s6405_s23, %s4749_s6 [#allocation3]  ;;  %v744_v20 = vld [vmem:[#allocation2 + $0x18] sm:$0x1]  ;;  %vm6472_vm5 = vmand %vm735_vm1, %vm768_vm4  ;;  %v741_v23 = vld [vmem:[#allocation2 + $0xc] sm:$0x1]  ;;  %vm1783_vm11 = vcmask 1046532  }
  0xaa   : > { %5072 = vmatprep.subr.bf16.mxu0 %v6428_v2  ;;  %s6445_s12 = scalar_lea.vmem %s6405_s23, %s4750_s25 [#allocation3]  ;;  %v5743_v17 = vld [vmem:[%s6442_s8] sm:$0xff]   ;;  %v745_v21 = vsel %vm6465_vm3, 0, %v744_v20  ;;  %v742_v24 = vsel %vm6465_vm3, 0, %v741_v23  ;;  %v773_v27 = vld [vmem:[#allocation2 + $0x14] sm:$0x1]  ;;  %v5745_v53 = vld [vmem:[#allocation8 + $0x80] sm:$0xff]  }
  0xab   : > { %v5744_v18 = vld [vmem:[%s6445_s12] sm:$0xff]   ;;  %746 = vst [vmem:[#allocation2 + $0x18] sm:$0x1] %v745_v21  ;;  %743 = vst [vmem:[#allocation2 + $0xc] sm:$0x1] %v742_v24  ;;  %v774_v28 = vsel %vm6472_vm5, 0, %v773_v27  ;;  %5204 = vmatprep.subr.bf16.mxu1 %v5745_v53 }
  0xac   : > { %v776_v25 = vld [vmem:[#allocation2 + $0x20] sm:$0x1]  ;;  %775 = vst [vmem:[#allocation2 + $0x14] sm:$0x1] %v774_v28  ;;  %v750_v29 = vld [vmem:[#allocation2 + $0x30] sm:$0x1]  ;;  %5205 = vmatpush3.bf16.msra.mxu1 %v5745_v53  ;;  %vm6527_vm8 = vmand %vm828_vm6, %vm768_vm4 }
  0xad   : > { %5073 = vmatpush3.bf16.msra.mxu0 %v6428_v2  ;;  %v777_v26 = vsel %vm6472_vm5, 0, %v776_v25  ;;  %v751_v30 = vsel %vm6465_vm3, 0, %v750_v29  ;;  %v747_v31 = vld [vmem:[#allocation2 + $0x24] sm:$0x1]  ;;  %v782_v33 = vld [vmem:[#allocation2 + $0x38] sm:$0x1]  ;;  %vm6626_vm13 = vmor %vm1782_vm10, %vm1783_vm11 }
  0xae   : > { %5074 = vmatprep.subr.bf16.mxu0 %v6434_v3  ;;  %778 = vst [vmem:[#allocation2 + $0x20] sm:$0x1] %v777_v26  ;;  %752 = vst [vmem:[#allocation2 + $0x30] sm:$0x1] %v751_v30  ;;  %v748_v32 = vsel %vm6465_vm3, 0, %v747_v31  ;;  %v783_v34 = vsel %vm6472_vm5, 0, %v782_v33 }
  0xaf   : > { %749 = vst [vmem:[#allocation2 + $0x24] sm:$0x1] %v748_v32  ;;  %v779_v35 = vld [vmem:[#allocation2 + $0x2c] sm:$0x1]  ;;  %784 = vst [vmem:[#allocation2 + $0x38] sm:$0x1] %v783_v34 }
  0xb0   : > { %v780_v36 = vsel %vm6472_vm5, 0, %v779_v35  ;;  %v756_v37 = vld [vmem:[#allocation2 + $0x48] sm:$0x1]  ;;  %v753_v39 = vld [vmem:[#allocation2 + $0x3c] sm:$0x1]  ;;  %v5747_v55 = vld [vmem:[#allocation8 + $0x88] sm:$0xff]  }
  0xb1   : > { %5075 = vmatpush3.bf16.msra.mxu0 %v6434_v3  ;;  %781 = vst [vmem:[#allocation2 + $0x2c] sm:$0x1] %v780_v36  ;;  %v757_v38 = vsel %vm6465_vm3, 0, %v756_v37  ;;  %v754_v40 = vsel %vm6465_vm3, 0, %v753_v39  ;;  %v788_v41 = vld [vmem:[#allocation2 + $0x50] sm:$0x1]  ;;  %5206 = vmatprep.subr.bf16.mxu1 %v5747_v55 }
  0xb2   : > { %5076 = vmatprep.subr.bf16.mxu0 %v5731_v5  ;;  %758 = vst [vmem:[#allocation2 + $0x48] sm:$0x1] %v757_v38  ;;  %755 = vst [vmem:[#allocation2 + $0x3c] sm:$0x1] %v754_v40  ;;  %v789_v42 = vsel %vm6472_vm5, 0, %v788_v41  ;;  %v5746_v54 = vld [vmem:[#allocation8 + $0x40] sm:$0xff]   ;;  %5207 = vmatpush3.bf16.msra.mxu1 %v5747_v55 }
  0xb3   : > { %790 = vst [vmem:[#allocation2 + $0x50] sm:$0x1] %v789_v42  ;;  %v785_v43 = vld [vmem:[#allocation2 + $0x44] sm:$0x1]  ;;  %v762_v45 = vld [vmem:[#allocation2 + $0x60] sm:$0x1] }
  0xb4   : > { %v786_v44 = vsel %vm6472_vm5, 0, %v785_v43  ;;  %v763_v46 = vsel %vm6465_vm3, 0, %v762_v45  ;;  %v759_v47 = vld [vmem:[#allocation2 + $0x54] sm:$0x1]  ;;  %v794_v49 = vld [vmem:[#allocation2 + $0x68] sm:$0x1] }
  0xb5   : > { %5077 = vmatpush3.bf16.msra.mxu0 %v5731_v5  ;;  %787 = vst [vmem:[#allocation2 + $0x44] sm:$0x1] %v786_v44  ;;  %764 = vst [vmem:[#allocation2 + $0x60] sm:$0x1] %v763_v46  ;;  %v760_v48 = vsel %vm6465_vm3, 0, %v759_v47  ;;  %v795_v50 = vsel %vm6472_vm5, 0, %v794_v49 }
  0xb6   : > { %5078 = vmatprep.subr.bf16.mxu0 %v5732_v6  ;;  %761 = vst [vmem:[#allocation2 + $0x54] sm:$0x1] %v760_v48  ;;  %v791_v51 = vld [vmem:[#allocation2 + $0x5c] sm:$0x1]  ;;  %796 = vst [vmem:[#allocation2 + $0x68] sm:$0x1] %v795_v50 }
  0xb7   : > { %v792_v52 = vsel %vm6472_vm5, 0, %v791_v51  ;;  %v738_v56 = vld [vmem:[#allocation2] sm:$0x1]  ;;  %v770_v58 = vld [vmem:[#allocation2 + $0x8] sm:$0x1]  ;;  %v5751_v63 = vld [vmem:[#allocation8 + $0x98] sm:$0xff]  }
  0xb8   : > { %793 = vst [vmem:[#allocation2 + $0x5c] sm:$0x1] %v792_v52  ;;  %v739_v57 = vsel %vm6465_vm3, 0, %v738_v56  ;;  %v771_v59 = vsel %vm6472_vm5, 0, %v770_v58  ;;  %v5748_v60 = vld [vmem:[#allocation8 + $0x48] sm:$0xff]   ;;  %v5749_v61 = vld [vmem:[#allocation8 + $0x90] sm:$0xff]  }
  0xb9   : > { %5079 = vmatpush3.bf16.msra.mxu0 %v5732_v6  ;;  %740 = vst [vmem:[#allocation2] sm:$0x1] %v739_v57  ;;  %772 = vst [vmem:[#allocation2 + $0x8] sm:$0x1] %v771_v59  ;;  %5208 = vmatprep.subr.bf16.mxu1 %v5749_v61  ;;  %v5750_v62 = vld [vmem:[#allocation8 + $0x50] sm:$0xff]   ;;  %v5756_v4 = vld [vmem:[#allocation8 + $0x68] sm:$0xff]  }
  0xba   : > { %5080 = vmatprep.subr.bf16.mxu0 %v5733_v7  ;;  %5209 = vmatpush3.bf16.msra.mxu1 %v5749_v61  ;;  %vm806_vm7 = vsmask.f32 4368  ;;  %v1087_v41 = vld [vmem:[#allocation2 + $0x18] sm:$0xf]  ;;  %v1080_v49 = vld [vmem:[#allocation2 + $0xc] sm:$0xf] }
  0xbb   : > { %5210 = vmatprep.subr.bf16.mxu1 %v5751_v63  ;;  %vm6534_vm9 = vmor %vm736_vm2, %vm806_vm7  ;;  %v1091_v56 = vld [vmem:[#allocation2 + $0x20] sm:$0x1]  ;;  %p666_p9 = scmp.gt.s32.totalorder %s6078_s30, 0  ;;  %vm1176_vm14 = vsmask.f32 3328  ;;  %p729_p5 = scmp.lt.s32.totalorder %s6078_s30, 1 }
  0xbc   : > { %vm1177_vm15 = vsmask.f32 7440  ;;  %v5809_v19 = vld [vmem:[#allocation8 + $0x180] sm:$0xff]   ;;  %s7440_s3 = sld [smem:[#allocation23_spill]]  ;;  %s7441_s16 = sld [smem:[#allocation17_spill]] }
  0xbd   : > { %5081 = vmatpush3.bf16.msra.mxu0 %v5733_v7  ;;  %s6567_s24 = scalar_select %p666_p9, 1, 0 }
  0xbe   : > { %5082 = vmatprep.subr.bf16.mxu0 %v5734_v8  ;;  %5211 = vmatpush3.bf16.msra.mxu1 %v5751_v63  ;;  %s730_s1 = scalar_select %p729_p5, 1, 0 }
  0xbf   : > { %s7442_s6 = sld [smem:[#allocation24_spill]]  ;;  %s7443_s21 = sld [smem:[#allocation18_spill]] }
  0xc0   : > { %s4787_s4 = sshll.u32 %s6078_s30, 4  ;;  %s7444_s30 = sld [smem:[#allocation19_spill]] }
  0xc1   : > { %5083 = vmatpush3.bf16.msra.mxu0 %v5734_v8  ;;  %s7445_s23 = sld [smem:[#allocation25_spill]] }
  0xc2   : > { %5100 = vmatprep.subr.bf16.mxu0 %v6102_v11  ;;  %s352_s25 = sand.u32 1, %s7441_s16  }
  0xc3   : > { %s4497_s8 = sshll.u32 %s352_s25, 6  ;;  %s7314_s19 = scalar_lea.sflag [#allocation5], %s352_s25 }
  0xc4   : > { %5085 = vmatmul.mubr.bf16.vlgmr.msra.gmra.mrb[0].mxu0 %v5736_v9  ;;  %v6510_v9 = vld [vmem:[#allocation8 + $0xc0] sm:$0xff]   ;;  %s7278_s12 = scalar_lea.vmem [#allocation11], %s4497_s8 }
  0xc5   : > { %5101 = vmatpush3.bf16.msra.mxu0 %v6420_v0  ;;  %5088 = vmatprep.mubr.bf16.mxu0 %v5737_v10  ;;  %v6513_v10 = vld [vmem:[#allocation8] sm:$0xff]   ;;  %s4360_s18 = sshll.u32 %s7278_s12, 4  ;;  %s7308_s18 = int_to_ptr.vmem [resolvable:$true] %s4360_s18 }
  0xc6   : > { %5102 = vmatprep.subr.bf16.mxu0 %v6102_v11  ;;  %s5964_s15 = scalar_lea.vmem %s7308_s18, 1024  ;;  %p7446_p6 = scmp.ne.s32.totalorder %s7444_s30, 0 }
  0xc7   : > { %p5965_p13 = scmp.ne.s32.totalorder %s7308_s18, %s5964_s15 }
  0xc9   : > { %5103 = vmatpush3.bf16.msra.mxu0 %v6422_v1  ;;  %p5966_p8 = pnand %p5965_p13, %p7446_p6 }
  0xca   : > { %5104 = vmatprep.subr.bf16.mxu0 %v6102_v11 }
  0xcb   : > { %p5967_p12 = pneg %p5966_p8 }
  0xcc   : > { %5089 = vmatmul.mubr.bf16.gmra.mrb[4].mxu0 %v5738_v12 }
  0xcd   : > { %5105 = vmatpush3.bf16.msra.mxu0 %v6428_v2  ;;  %5092 = vmatprep.mubr.bf16.mxu0 %v5739_v13 }
  0xce   : > { %5106 = vmatprep.subr.bf16.mxu0 %v6102_v11 }
  0xd1   : > { %5107 = vmatpush3.bf16.msra.mxu0 %v6434_v3 }
  0xd2   : > { %5108 = vmatprep.subr.bf16.mxu0 %v6102_v11 }
  0xd4   : > { %5093 = vmatmul.mubr.bf16.gmra.mrb[8].mxu0 %v5740_v14 }
  0xd5   : > { %5109 = vmatpush3.bf16.msra.mxu0 %v5731_v5  ;;  %5096 = vmatprep.mubr.bf16.mxu0 %v5741_v15 }
  0xd6   : > { %5110 = vmatprep.subr.bf16.mxu0 %v6102_v11 }
  0xd9   : > { %5111 = vmatpush3.bf16.msra.mxu0 %v5732_v6 }
  0xda   : > { %5112 = vmatprep.subr.bf16.mxu0 %v6102_v11 }
  0xdc   : > { %5097 = vmatmul.mubr.bf16.gmra.mrb[12].mxu0 %v5742_v16 }
  0xdd   : > { %5113 = vmatpush3.bf16.msra.mxu0 %v5733_v7  ;;  %5116 = vmatprep.mubr.msk.bf16.mxu0 %vm6103_vm0, %v6102_v11 }
  0xde   : > { %5114 = vmatprep.subr.bf16.mxu0 %v6102_v11 }
  0xe1   : > { %5115 = vmatpush3.bf16.msra.mxu0 %v5734_v8 }
  0xe2   : > { %5120 = vmatprep.subr.bf16.mxu0 %v6102_v11 }
  0xe4   : > { %5117 = vmatmul.mubr.bf16.vlgmr.msra.gmra.mrb[16].mxu0 %v5743_v17 }
  0xe5   : > { %5121 = vmatpush3.bf16.msra.mxu0 %v6420_v0  ;;  %5136 = vmatprep.mubr.msk.bf16.mxu0 %vm6103_vm0, %v6102_v11  ;;  %v5752_v0 = vld [vmem:[#allocation8 + $0x58] sm:$0xff]   ;;  %vm6686_vm0 = vmor %vm1176_vm14, %vm1177_vm15 }
  0xe6   : > { %5122 = vmatprep.subr.bf16.mxu0 %v6102_v11 }
  0xe9   : > { %5123 = vmatpush3.bf16.msra.mxu0 %v6422_v1  ;;  %v5753_v1 = vld [vmem:[#allocation8 + $0xa0] sm:$0xff]  }
  0xea   : > { %5124 = vmatprep.subr.bf16.mxu0 %v6102_v11  ;;  %5212 = vmatprep.subr.bf16.mxu1 %v5753_v1 }
  0xeb   : > { %5213 = vmatpush3.bf16.msra.mxu1 %v5753_v1 }
  0xed   : > { %5125 = vmatpush3.bf16.msra.mxu0 %v6428_v2  ;;  %v5754_v2 = vld [vmem:[#allocation8 + $0x60] sm:$0xff]  }
  0xee   : > { %5126 = vmatprep.subr.bf16.mxu0 %v6102_v11 }
  0xf1   : > { %5127 = vmatpush3.bf16.msra.mxu0 %v6434_v3  ;;  %v5755_v3 = vld [vmem:[#allocation8 + $0xa8] sm:$0xff]  }
  0xf2   : > { %5128 = vmatprep.subr.bf16.mxu0 %v6102_v11  ;;  %5214 = vmatprep.subr.bf16.mxu1 %v5755_v3 }
  0xf3   : > { %5215 = vmatpush3.bf16.msra.mxu1 %v5755_v3 }
  0xf5   : > { %5129 = vmatpush3.bf16.msra.mxu0 %v5731_v5  ;;  %v5757_v5 = vld [vmem:[#allocation8 + $0xb0] sm:$0xff]  }
  0xf6   : > { %5130 = vmatprep.subr.bf16.mxu0 %v6102_v11  ;;  %5216 = vmatprep.subr.bf16.mxu1 %v5757_v5 }
  0xf7   : > { %5217 = vmatpush3.bf16.msra.mxu1 %v5757_v5 }
  0xf9   : > { %5131 = vmatpush3.bf16.msra.mxu0 %v5732_v6  ;;  %v5758_v6 = vld [vmem:[#allocation8 + $0x70] sm:$0xff]  }
  0xfa   : > { %5132 = vmatprep.subr.bf16.mxu0 %v6102_v11 }
  0xfd   : > { %5133 = vmatpush3.bf16.msra.mxu0 %v5733_v7  ;;  %v5759_v7 = vld [vmem:[#allocation8 + $0xb8] sm:$0xff]  }
  0xfe   : > { %5134 = vmatprep.subr.bf16.mxu0 %v6102_v11  ;;  %5218 = vmatprep.subr.bf16.mxu1 %v5759_v7  ;;  %v6519_v11 = vld [vmem:[%s7377_s2] ss:$0 sm:$0xff] }
  0xff   : > { %5219 = vmatpush3.bf16.msra.mxu1 %v5759_v7 }
 0x100   : > { %5236 = vmatprep.subr.bf16.mxu1 %v6510_v9 }
 0x101   : > { %5135 = vmatpush3.bf16.msra.mxu0 %v5734_v8  ;;  %v5760_v8 = vld [vmem:[#allocation8 + $0x78] sm:$0xff]  }
 0x102   : > { %5140 = vmatprep.subr.bf16.mxu0 %v5746_v54 }
 0x104   : > { %5137 = vmatmul.mubr.bf16.vlgmr.msra.gmra.mrb[20].mxu0 %v5744_v18 }
 0x105   : > { %5141 = vmatpush3.bf16.msra.mxu0 %v5746_v54 }
 0x106   : > { %5142 = vmatprep.subr.bf16.mxu0 %v5748_v60 }
 0x109   : > { %5143 = vmatpush3.bf16.msra.mxu0 %v5748_v60 }
 0x10a   : > { %5144 = vmatprep.subr.bf16.mxu0 %v5750_v62 }
 0x10d   : > { %5145 = vmatpush3.bf16.msra.mxu0 %v5750_v62  ;;  %v1084_v62 = vld [vmem:[#allocation2 + $0x14] sm:$0x1] }
 0x10e   : > { %5146 = vmatprep.subr.bf16.mxu0 %v5752_v0 }
 0x111   : > { %5147 = vmatpush3.bf16.msra.mxu0 %v5752_v0 }
 0x112   : > { %5148 = vmatprep.subr.bf16.mxu0 %v5754_v2 }
 0x115   : > { %5149 = vmatpush3.bf16.msra.mxu0 %v5754_v2 }
 0x116   : > { %5150 = vmatprep.subr.bf16.mxu0 %v5756_v4 }
 0x119   : > { %5151 = vmatpush3.bf16.msra.mxu0 %v5756_v4 }
 0x11a   : > { %5152 = vmatprep.subr.bf16.mxu0 %v5758_v6 }
 0x11d   : > { %5153 = vmatpush3.bf16.msra.mxu0 %v5758_v6 }
 0x11e   : > { %5154 = vmatprep.subr.bf16.mxu0 %v5760_v8 }
 0x121   : > { %5155 = vmatpush3.bf16.msra.mxu0 %v5760_v8 }
 0x122   : > { %5172 = vmatprep.subr.bf16.mxu0 %v6513_v10 }
 0x197   : > { %v5086_v12 = vpop.f32.mrb[0].mxu0 }
 0x198   : > { %v539_v13 = vadd.f32 %v5086_v12, %v6519_v11  ;;  %v530_v14 = vpop.f32.mrb[1].mxu0 }
 0x199   : > { %v531_v15 = vadd.f32 %v6519_v11, %v530_v14  ;;  %v5087_v16 = vpop.f32.mrb[2].mxu0 }
 0x19a   : > { %v595_v17 = vmax.f32 %v539_v13, 0.0  ;;  %v542_v18 = vadd.f32 %v5087_v16, %v6519_v11  ;;  %v533_v20 = vpop.f32.mrb[3].mxu0  ;;  %v1101_v16 = vld [vmem:[#allocation2 + $0x30] sm:$0xf] }
 0x19b   : > { %v593_v21 = vmax.f32 %v531_v15, 0.0  ;;  %v534_v23 = vadd.f32 %v6519_v11, %v533_v20 }
 0x19c   : > { %v4757_v24 = vpack.c.bf16 %v595_v17, %v595_v17  ;;  %v596_v25 = vmax.f32 %v542_v18, 0.0 }
 0x19d   : > { %v4755_v26 = vpack.c.bf16 %v593_v21, %v593_v21  ;;  %v594_v27 = vmax.f32 %v534_v23, 0.0 }
 0x19e   : > { %v937_v28 = vshrl.u32 %v4757_v24, 16  ;;  %v4758_v29 = vpack.c.bf16 %v596_v25, %v596_v25  ;;  %v940_v30 = vshll.u32 %v4757_v24, 16  ;;  %v1094_v25 = vld [vmem:[#allocation2 + $0x24] sm:$0xf] }
 0x19f   : > { %v920_v31 = vshrl.u32 %v4755_v26, 16  ;;  %v923_v32 = vshll.u32 %v4755_v26, 16  ;;  %v4756_v33 = vpack.c.bf16 %v594_v27, %v594_v27  ;;  %v5090_v34 = vpop.f32.mrb[4].mxu0 }
 0x1a0   : > { %v939_v35 = vrot.slane %v937_v28, 7  ;;  %v945_v36 = vshrl.u32 %v4758_v29, 16  ;;  %v948_v37 = vshll.u32 %v4758_v29, 16  ;;  %v555_v38 = vadd.f32 %v5090_v34, %v6519_v11  ;;  %v546_v39 = vpop.f32.mrb[5].mxu0 }
 0x1a1   : > { %v922_v42 = vrot.slane %v920_v31, 7  ;;  %v928_v43 = vshrl.u32 %v4756_v33, 16  ;;  %v931_v44 = vshll.u32 %v4756_v33, 16  ;;  %v547_v45 = vadd.f32 %v6519_v11, %v546_v39  ;;  %v5091_v46 = vpop.f32.mrb[6].mxu0 }
 0x1a2   : > { %v942_v47 = vor.u32 %v940_v30, %v939_v35  ;;  %v943_v48 = vrot.slane %v939_v35, 4  ;;  %v947_v50 = vrot.slane %v945_v36, 7  ;;  %v599_v51 = vmax.f32 %v555_v38, 0.0  ;;  %v549_v52 = vpop.f32.mrb[7].mxu0 }
 0x1a3   : > { %v925_v53 = vor.u32 %v923_v32, %v922_v42  ;;  %v926_v54 = vrot.slane %v922_v42, 4  ;;  %v930_v57 = vrot.slane %v928_v43, 7  ;;  %v597_v58 = vmax.f32 %v547_v45, 0.0 }
 0x1a4   : > { %v1088_v59 = vsel %vm6527_vm8, %v942_v47, %v1087_v41  ;;  %v950_v60 = vor.u32 %v948_v37, %v947_v50  ;;  %v952_v61 = vrot.slane %v947_v50, 4  ;;  %v4761_v63 = vpack.c.bf16 %v599_v51, %v599_v51  ;;  %v1105_v50 = vld [vmem:[#allocation2 + $0x38] sm:$0x1]  ;;  %v1098_v51 = vld [vmem:[#allocation2 + $0x2c] sm:$0x1] }
 0x1a5   : > { %1089 = vst [vmem:[#allocation2 + $0x18] sm:$0xf] %v1088_v59  ;;  %v1081_v0 = vsel %vm6527_vm8, %v925_v53, %v1080_v49  ;;  %v933_v1 = vor.u32 %v931_v44, %v930_v57  ;;  %v935_v2 = vrot.slane %v930_v57, 4  ;;  %v4759_v3 = vpack.c.bf16 %v597_v58, %v597_v58 }
 0x1a6   : > { %1082 = vst [vmem:[#allocation2 + $0xc] sm:$0xf] %v1081_v0  ;;  %v951_v4 = vsel %vm6534_vm9, %v943_v48, %v950_v60  ;;  %v1092_v5 = vsel %vm6465_vm3, %v952_v61, %v1091_v56  ;;  %v971_v6 = vshrl.u32 %v4761_v63, 16  ;;  %v974_v12 = vshll.u32 %v4761_v63, 16  ;;  %v1115_v0 = vld [vmem:[#allocation2 + $0x48] sm:$0xf] }
 0x1a7   : > { %1090 = vst [vmem:[#allocation2 + $0x1c] sm:$0xf] %v951_v4  ;;  %1093 = vst [vmem:[#allocation2 + $0x20] sm:$0x1] %v1092_v5  ;;  %v934_v7 = vsel %vm6534_vm9, %v926_v54, %v933_v1  ;;  %v1085_v8 = vsel %vm6465_vm3, %v935_v2, %v1084_v62  ;;  %v954_v13 = vshrl.u32 %v4759_v3, 16  ;;  %v5094_v14 = vpop.f32.mrb[8].mxu0  ;;  %v558_v17 = vadd.f32 %v5091_v46, %v6519_v11 }
 0x1a8   : > { %1083 = vst [vmem:[#allocation2 + $0x10] sm:$0xf] %v934_v7  ;;  %1086 = vst [vmem:[#allocation2 + $0x14] sm:$0x1] %v1085_v8  ;;  %v6550_v15 = vrot.slane %v971_v6, 7  ;;  %v550_v18 = vadd.f32 %v6519_v11, %v549_v52  ;;  %v571_v20 = vadd.f32 %v5094_v14, %v6519_v11  ;;  %v562_v21 = vpop.f32.mrb[9].mxu0 }
 0x1a9   : > { %v956_v23 = vrot.slane %v954_v13, 7  ;;  %v957_v24 = vshll.u32 %v4759_v3, 16  ;;  %v563_v26 = vadd.f32 %v6519_v11, %v562_v21  ;;  %v5095_v27 = vpop.f32.mrb[10].mxu0  ;;  %v600_v30 = vmax.f32 %v558_v17, 0.0 }
 0x1aa   : > { %v976_v28 = vor.u32 %v974_v12, %v6550_v15  ;;  %v977_v29 = vrot.slane %v6550_v15, 4  ;;  %v598_v31 = vmax.f32 %v550_v18, 0.0  ;;  %v565_v32 = vpop.f32.mrb[11].mxu0  ;;  %v603_v35 = vmax.f32 %v571_v20, 0.0  ;;  %v1108_v12 = vld [vmem:[#allocation2 + $0x3c] sm:$0xf] }
 0x1ab   : > { %v959_v33 = vor.u32 %v957_v24, %v956_v23  ;;  %v960_v34 = vrot.slane %v956_v23, 4  ;;  %v601_v36 = vmax.f32 %v563_v26, 0.0  ;;  %v4762_v38 = vpack.c.bf16 %v600_v30, %v600_v30 }
 0x1ac   : > { %v1102_v37 = vsel %vm6527_vm8, %v976_v28, %v1101_v16  ;;  %v4760_v39 = vpack.c.bf16 %v598_v31, %v598_v31  ;;  %v574_v41 = vadd.f32 %v5095_v27, %v6519_v11  ;;  %v4765_v43 = vpack.c.bf16 %v603_v35, %v603_v35 }
 0x1ad   : > { %1103 = vst [vmem:[#allocation2 + $0x30] sm:$0xf] %v1102_v37  ;;  %v1095_v42 = vsel %vm6527_vm8, %v959_v33, %v1094_v25  ;;  %v4763_v44 = vpack.c.bf16 %v601_v36, %v601_v36  ;;  %v566_v45 = vadd.f32 %v6519_v11, %v565_v32  ;;  %v979_v46 = vshrl.u32 %v4762_v38, 16  ;;  %v1119_v37 = vld [vmem:[#allocation2 + $0x50] sm:$0x1] }
 0x1ae   : > { %1096 = vst [vmem:[#allocation2 + $0x24] sm:$0xf] %v1095_v42  ;;  %v982_v47 = vshll.u32 %v4762_v38, 16  ;;  %v962_v48 = vshrl.u32 %v4760_v39, 16  ;;  %v965_v49 = vshll.u32 %v4760_v39, 16  ;;  %v1005_v52 = vshrl.u32 %v4765_v43, 16 }
 0x1af   : > { %v1008_v53 = vshll.u32 %v4765_v43, 16  ;;  %v988_v54 = vshrl.u32 %v4763_v44, 16  ;;  %v991_v56 = vshll.u32 %v4763_v44, 16  ;;  %v5098_v57 = vpop.f32.mrb[12].mxu0  ;;  %v981_v58 = vrot.slane %v979_v46, 7 }
 0x1b0   : > { %v964_v59 = vrot.slane %v962_v48, 7  ;;  %v604_v60 = vmax.f32 %v574_v41, 0.0  ;;  %v602_v61 = vmax.f32 %v566_v45, 0.0  ;;  %v578_v62 = vpop.f32.mrb[13].mxu0  ;;  %v6569_v63 = vrot.slane %v1005_v52, 7 }
 0x1b1   : > { %v6571_v1 = vrot.slane %v988_v54, 7  ;;  %v587_v2 = vadd.f32 %v5098_v57, %v6519_v11  ;;  %v579_v3 = vadd.f32 %v6519_v11, %v578_v62  ;;  %v5099_v4 = vpop.f32.mrb[14].mxu0  ;;  %v984_v5 = vor.u32 %v982_v47, %v981_v58  ;;  %v1112_v47 = vld [vmem:[#allocation2 + $0x44] sm:$0x1] }
 0x1b2   : > { %v986_v6 = vrot.slane %v981_v58, 4  ;;  %v967_v7 = vor.u32 %v965_v49, %v964_v59  ;;  %v969_v8 = vrot.slane %v964_v59, 4  ;;  %v581_v13 = vpop.f32.mrb[15].mxu0  ;;  %v1010_v14 = vor.u32 %v1008_v53, %v6569_v63 }
 0x1b3   : > { %v1011_v15 = vrot.slane %v6569_v63, 4  ;;  %v993_v16 = vor.u32 %v991_v56, %v6571_v1  ;;  %v668_v17 = vstv %s6567_s24  ;;  %v985_v18 = vsel %vm6534_vm9, %v977_v29, %v984_v5  ;;  %v1129_v5 = vld [vmem:[#allocation2 + $0x60] sm:$0xf]  ;;  %s4742_s24 = sshll.u32 %s7443_s21, 5 }
 0x1b4   : > { %v1106_v20 = vsel %vm6465_vm3, %v986_v6, %v1105_v50  ;;  %v968_v21 = vsel %vm6534_vm9, %v960_v34, %v967_v7  ;;  %v1099_v23 = vsel %vm6465_vm3, %v969_v8, %v1098_v51  ;;  %1104 = vst [vmem:[#allocation2 + $0x34] sm:$0xf] %v985_v18  ;;  %v1116_v24 = vsel %vm6527_vm8, %v1010_v14, %v1115_v0  ;;  %v1122_v6 = vld [vmem:[#allocation2 + $0x54] sm:$0xf]  ;;  %v1759_v14 = vld [vmem:[#allocation2 + $0xc] sm:$0xe] }
 0x1b5   : > { %1107 = vst [vmem:[#allocation2 + $0x38] sm:$0x1] %v1106_v20  ;;  %1097 = vst [vmem:[#allocation2 + $0x28] sm:$0xf] %v968_v21  ;;  %v1109_v25 = vsel %vm6527_vm8, %v993_v16, %v1108_v12  ;;  %v4766_v26 = vpack.c.bf16 %v604_v60, %v604_v60  ;;  %v4764_v27 = vpack.c.bf16 %v602_v61, %v602_v61  ;;  %v607_v28 = vmax.f32 %v587_v2, 0.0 }
 0x1b6   : > { %1100 = vst [vmem:[#allocation2 + $0x2c] sm:$0x1] %v1099_v23  ;;  %1117 = vst [vmem:[#allocation2 + $0x48] sm:$0xf] %v1116_v24  ;;  %v605_v29 = vmax.f32 %v579_v3, 0.0  ;;  %v590_v30 = vadd.f32 %v5099_v4, %v6519_v11  ;;  %v582_v31 = vadd.f32 %v6519_v11, %v581_v13  ;;  %v994_v32 = vrot.slane %v6571_v1, 4 }
 0x1b7   : > { %1110 = vst [vmem:[#allocation2 + $0x3c] sm:$0xf] %v1109_v25  ;;  %v1013_v33 = vshrl.u32 %v4766_v26, 16  ;;  %v1016_v34 = vshll.u32 %v4766_v26, 16  ;;  %v996_v35 = vshrl.u32 %v4764_v27, 16  ;;  %v657_v36 = vpop.f32.mrb[16].mxu0  ;;  %v4769_v38 = vpack.c.bf16 %v607_v28, %v607_v28 }
 0x1b8   : > { %v4767_v39 = vpack.c.bf16 %v605_v29, %v605_v29  ;;  %v608_v41 = vmax.f32 %v590_v30, 0.0  ;;  %v606_v42 = vmax.f32 %v582_v31, 0.0  ;;  %v5118_v43 = vpop.f32.mrb[17].mxu0  ;;  %v999_v46 = vshll.u32 %v4764_v27, 16  ;;  %v6595_v60 = vld [vmem:[#allocation2 + $0x14] sm:$0x1] }
 0x1b9   : > { %v1015_v44 = vrot.slane %v1013_v33, 7  ;;  %v998_v45 = vrot.slane %v996_v35, 7  ;;  %v658_v48 = vadd.f32 %v6519_v11, %v657_v36  ;;  %v660_v49 = vpop.f32.mrb[18].mxu0  ;;  %v1039_v50 = vshrl.u32 %v4769_v38, 16  ;;  %v6612_v21 = vld [vmem:[#allocation2 + $0x10] sm:$0xf] }
 0x1ba   : > { %v1042_v51 = vshll.u32 %v4769_v38, 16  ;;  %v1022_v52 = vshrl.u32 %v4767_v39, 16  ;;  %v1025_v53 = vshll.u32 %v4767_v39, 16  ;;  %v5119_v54 = vpop.f32.mrb[19].mxu0  ;;  %v4770_v63 = vpack.c.bf16 %v608_v41, %v608_v41  ;;  %v1133_v25 = vld [vmem:[#allocation2 + $0x68] sm:$0x1] }
 0x1bb   : > { %v1018_v56 = vor.u32 %v1016_v34, %v1015_v44  ;;  %v1020_v57 = vrot.slane %v1015_v44, 4  ;;  %v1001_v58 = vor.u32 %v999_v46, %v998_v45  ;;  %v1003_v59 = vrot.slane %v998_v45, 4  ;;  %v1126_v31 = vld [vmem:[#allocation2 + $0x5c] sm:$0x1] }
 0x1bc   : > { %v1041_v61 = vrot.slane %v1039_v50, 7  ;;  %v1024_v62 = vrot.slane %v1022_v52, 7  ;;  %v4768_v0 = vpack.c.bf16 %v606_v42, %v606_v42  ;;  %vm6607_vm12 = vcmp.eq.s32.totalorder %v668_v17, 1  ;;  %v6631_v45 = vld [vmem:[#allocation2 + $0x1c] sm:$0xf] }
 0x1bd   : > { %v1019_v1 = vsel %vm6534_vm9, %v1011_v15, %v1018_v56  ;;  %v1120_v2 = vsel %vm6465_vm3, %v1020_v57, %v1119_v37  ;;  %v1002_v3 = vsel %vm6534_vm9, %v994_v32, %v1001_v58  ;;  %v1113_v4 = vsel %vm6465_vm3, %v1003_v59, %v1112_v47  ;;  %v1760_v50 = vld [vmem:[#allocation2 + $0x18] sm:$0xe]  ;;  %v1170_v56 = vld [vmem:[#allocation2 + $0x20] sm:$0x1] }
 0x1be   : > { %1118 = vst [vmem:[#allocation2 + $0x4c] sm:$0xf] %v1019_v1  ;;  %1121 = vst [vmem:[#allocation2 + $0x50] sm:$0x1] %v1120_v2  ;;  %v1044_v7 = vor.u32 %v1042_v51, %v1041_v61  ;;  %v1027_v8 = vor.u32 %v1025_v53, %v1024_v62  ;;  %v1223_v13 = vshll.u32 %v6595_v60, 16  ;;  %v1045_v15 = vrot.slane %v1041_v61, 4 }
 0x1bf   : > { %1111 = vst [vmem:[#allocation2 + $0x40] sm:$0xf] %v1002_v3  ;;  %1114 = vst [vmem:[#allocation2 + $0x44] sm:$0x1] %v1113_v4  ;;  %v1028_v16 = vrot.slane %v1024_v62, 4  ;;  %v1047_v18 = vshrl.u32 %v4770_v63, 16  ;;  %v661_v26 = vadd.f32 %v6519_v11, %v660_v49 }
 0x1c0   : > { %v1030_v20 = vshrl.u32 %v4768_v0, 16  ;;  %v1130_v23 = vsel %vm6527_vm8, %v1044_v7, %v1129_v5  ;;  %v1123_v24 = vsel %vm6527_vm8, %v1027_v8, %v1122_v6  ;;  %v664_v17 = vmax.f32 %v658_v48, 0.0  ;;  %v6641_v51 = vld [vmem:[#allocation2 + $0xc] sm:$0xf]  ;;  %v830_v62 = vld [vmem:[#allocation2] sm:$0xf] }
 0x1c1   : > { %1131 = vst [vmem:[#allocation2 + $0x60] sm:$0xf] %v1130_v23  ;;  %1124 = vst [vmem:[#allocation2 + $0x54] sm:$0xf] %v1123_v24  ;;  %v1049_v27 = vrot.slane %v1047_v18, 7  ;;  %v1050_v28 = vshll.u32 %v4770_v63, 16 }
 0x1c2   : > { %v1032_v29 = vrot.slane %v1030_v20, 7  ;;  %v1033_v30 = vshll.u32 %v4768_v0, 16  ;;  %v670_v32 = vsel %vm6607_vm12, %v664_v17, 0.0  ;;  %v665_v33 = vmax.f32 %v661_v26, 0.0  ;;  %v834_v2 = vld [vmem:[#allocation2 + $0x8] sm:$0x1] }
 0x1c3   : > { %v4578_v34 = vrot.slane %v1759_v14, 9  ;;  %v1794_v35 = vrot.slane %v6612_v21, 5  ;;  %v1052_v36 = vor.u32 %v1050_v28, %v1049_v27  ;;  %v1054_v37 = vrot.slane %v1049_v27, 4  ;;  %v6659_v7 = vld [vmem:[#allocation2 + $0x18] sm:$0xf] }
 0x1c4   : > { %v1035_v38 = vor.u32 %v1033_v30, %v1032_v29  ;;  %v1037_v39 = vrot.slane %v1032_v29, 4  ;;  %v4751_v41 = vpack.c.bf16 %v670_v32, %v670_v32  ;;  %v671_v11 = vsel %vm6607_vm12, %v665_v33, 0.0  ;;  %v1761_v30 = vld [vmem:[#allocation2 + $0x24] sm:$0xe] }
 0x1c5   : > { %v1796_v43 = vrot.slane %v1794_v35, 4  ;;  %v1797_v44 = vrot.slane %v6595_v60, 5  ;;  %v1053_v46 = vsel %vm6534_vm9, %v1045_v15, %v1052_v36  ;;  %v1134_v47 = vsel %vm6465_vm3, %v1054_v37, %v1133_v25 }
 0x1c6   : > { %v1036_v48 = vsel %vm6534_vm9, %v1028_v16, %v1035_v38  ;;  %v1127_v49 = vsel %vm6465_vm3, %v1037_v39, %v1126_v31  ;;  %1132 = vst [vmem:[#allocation2 + $0x64] sm:$0xf] %v1053_v46  ;;  %1135 = vst [vmem:[#allocation2 + $0x68] sm:$0x1] %v1134_v47  ;;  %v809_v52 = vshrl.u32 %v4751_v41, 16  ;;  %v4752_v53 = vpack.c.bf16 %v671_v11, %v671_v11 }
 0x1c7   : > { %1125 = vst [vmem:[#allocation2 + $0x58] sm:$0xf] %v1036_v48  ;;  %1128 = vst [vmem:[#allocation2 + $0x5c] sm:$0x1] %v1127_v49  ;;  %v6645_v54 = vsel %vm6626_vm13, %v1796_v43, %v1797_v44  ;;  %v812_v57 = vshll.u32 %v4751_v41, 16  ;;  %v6647_v58 = vrot.slane %v1223_v13, 5  ;;  %v6651_v59 = vsel %vm6626_vm13, %v4578_v34, %v1794_v35 }
 0x1c8   : > { %v1801_v60 = vrot.slane %v6631_v45, 5  ;;  %v811_v61 = vrot.slane %v809_v52, 7  ;;  %v817_v63 = vshrl.u32 %v4752_v53, 16  ;;  %v4586_v0 = vcombine.low %v6651_v59, %v6645_v54  ;;  %v6672_v35 = vld [vmem:[#allocation2 + $0x28] sm:$0xf] }
 0x1c9   : > { %v1204_v1 = vshrl.u32 %v6641_v51, 16  ;;  %v4579_v3 = vrot.slane %v1760_v50, 9  ;;  %v1804_v4 = vrot.slane %v1170_v56, 5  ;;  %v1207_v5 = vshll.u32 %v6641_v51, 16  ;;  %v6678_v41 = vld [vmem:[#allocation2 + $0x2c] sm:$0x1] }
 0x1ca   : > { %v1213_v6 = vshll.u32 %v6612_v21, 16  ;;  %v814_v8 = vor.u32 %v812_v57, %v811_v61  ;;  %v819_v12 = vrot.slane %v817_v63, 7  ;;  %v820_v13 = vshll.u32 %v4752_v53, 16  ;;  %v1762_v47 = vld [vmem:[#allocation2 + $0x30] sm:$0xe] }
 0x1cb   : > { %v1206_v14 = vrot.slane %v1204_v1, 4  ;;  %v1803_v15 = vrot.slane %v1801_v60, 4  ;;  %v1209_v16 = vrot.slane %v1207_v5, 5  ;;  %v1217_v20 = vshrl.u32 %v6612_v21, 16  ;;  %v6691_v57 = vld [vmem:[#allocation2 + $0x34] sm:$0xf] }
 0x1cc   : > { %v1215_v18 = vrot.slane %v1213_v6, 5  ;;  %v815_v23 = vrot.slane %v811_v61, 4  ;;  %v831_v24 = vsel %vm6527_vm8, %v814_v8, %v830_v62  ;;  %v822_v25 = vor.u32 %v820_v13, %v819_v12  ;;  %v6771_v59 = vld [vmem:[#allocation2 + $0x40] sm:$0xf]  ;;  %v3687_v49 = vld [vmem:[#allocation2 + $0x24] sm:$0xe] }
 0x1cd   : > { %v824_v17 = vrot.slane %v819_v12, 4  ;;  %832 = vst [vmem:[#allocation2] sm:$0xf] %v831_v24  ;;  %v1210_v26 = vor.u32 %v1209_v16, %v1206_v14  ;;  %v1219_v27 = vrot.slane %v1217_v20, 4  ;;  %v1228_v28 = vshrl.u32 %v6659_v7, 16 }
 0x1ce   : > { %v1231_v29 = vshll.u32 %v6659_v7, 16  ;;  %v823_v31 = vsel %vm6534_vm9, %v815_v23, %v822_v25  ;;  %v1237_v33 = vshll.u32 %v6631_v45, 16  ;;  %v1241_v34 = vshrl.u32 %v6631_v45, 16 }
 0x1cf   : > { %v835_v32 = vsel %vm6465_vm3, %v824_v17, %v834_v2  ;;  %833 = vst [vmem:[#allocation2 + $0x4] sm:$0xf] %v823_v31  ;;  %v6676_v36 = vsel %vm6626_vm13, %v4579_v3, %v1801_v60  ;;  %v1220_v37 = vor.u32 %v1219_v27, %v1215_v18  ;;  %v1230_v38 = vrot.slane %v1228_v28, 4 }
 0x1d0   : > { %836 = vst [vmem:[#allocation2 + $0x8] sm:$0x1] %v835_v32  ;;  %v1233_v39 = vrot.slane %v1231_v29, 5  ;;  %v1211_v11 = vrot.slane %v1210_v26, 4  ;;  %v1239_v43 = vrot.slane %v1237_v33, 5  ;;  %v1243_v44 = vrot.slane %v1241_v34, 4 }
 0x1d1   : > { %v1247_v46 = vshll.u32 %v1170_v56, 16  ;;  %v6682_v48 = vsel %vm6626_vm13, %v1803_v15, %v1804_v4  ;;  %v1221_v50 = vrot.slane %v1220_v37, 4  ;;  %v1808_v53 = vrot.slane %v6672_v35, 5  ;;  %v6722_v26 = vld [vmem:[#allocation2 + $0x24] sm:$0xf] }
 0x1d2   : > { %v1234_v52 = vor.u32 %v1233_v39, %v1230_v38  ;;  %v1244_v60 = vor.u32 %v1243_v44, %v1239_v43  ;;  %v4580_v56 = vrot.slane %v1761_v30, 9  ;;  %v1811_v62 = vrot.slane %v6678_v41, 5  ;;  %v6725_v29 = vld [vmem:[#allocation2 + $0x38] sm:$0x1] }
 0x1d3   : > { %v1249_v61 = vrot.slane %v1247_v46, 5  ;;  %v1226_v63 = vsel %vm6686_vm0, %v1221_v50, %v6647_v58  ;;  %v1810_v2 = vrot.slane %v1808_v53, 4  ;;  %v4581_v3 = vrot.slane %v1762_v47, 9 }
 0x1d4   : > { %v1235_v1 = vrot.slane %v1234_v52, 4  ;;  %v1758_v4 = vld [vmem:[#allocation2] sm:$0xe]  ;;  %v4587_v5 = vcombine.low %v6676_v36, %v6682_v48  ;;  %v1216_v8 = vsel %vm6686_vm0, %v1211_v11, %v1215_v18  ;;  %v1245_v12 = vrot.slane %v1244_v60, 4 }
 0x1d5   : > { %v6699_v6 = vld [vmem:[#allocation2] sm:$0xf]  ;;  %v1815_v13 = vrot.slane %v6691_v57, 5  ;;  %v6706_v58 = vcombine.low %v1216_v8, %v1226_v63  ;;  %v6710_v16 = vsel %vm6626_vm13, %v4580_v56, %v1808_v53  ;;  %v4577_v24 = vrot.slane %v1758_v4, 9 }
 0x1d6   : > { %v1180_v14 = vshrl.u32 %v6699_v6, 16  ;;  %v1183_v15 = vshll.u32 %v6699_v6, 16  ;;  %v6712_v20 = vld [vmem:[#allocation2 + $0x4] sm:$0xf]  ;;  %v1240_v18 = vsel %vm6686_vm0, %v1235_v1, %v1239_v43  ;;  %v1250_v25 = vsel %vm6686_vm0, %v1245_v12, %v1249_v61 }
 0x1d7   : > { %v1168_v23 = vld [vmem:[#allocation2 + $0x8] sm:$0x1]  ;;  %v6720_v17 = vsel %vm6626_vm13, %v1810_v2, %v1811_v62  ;;  %v1787_v27 = vrot.slane %v6712_v20, 5  ;;  %v6729_v30 = vsel %vm6626_vm13, %v4581_v3, %v1815_v13  ;;  %v1817_v31 = vrot.slane %v1815_v13, 4  ;;  %v6733_v37 = vpop.f32.mrb[20].mxu0  ;;  %v5763_v4 = vld [vmem:[#allocation8 + $0xc8] sm:$0xff]  }
 0x1d8   : > { %v1182_v28 = vrot.slane %v1180_v14, 4  ;;  %v1199_v32 = vshll.u32 %v1168_v23, 16  ;;  %v1185_v33 = vrot.slane %v1183_v15, 5  ;;  %v1189_v34 = vshll.u32 %v6712_v20, 16  ;;  %v5138_v50 = vpop.f32.mrb[21].mxu0 }
 0x1d9   : > { %v1193_v36 = vshrl.u32 %v6712_v20, 16  ;;  %v1788_v38 = vsel %vm6626_vm13, %v4577_v24, %v1787_v27  ;;  %v1789_v39 = vrot.slane %v1787_v27, 4  ;;  %v1790_v11 = vrot.slane %v1168_v23, 5  ;;  %v6745_v56 = vpop.f32.mrb[22].mxu0  ;;  %v6747_v3 = vld [vmem:[#allocation2 + $0x30] sm:$0xf] }
 0x1da   : > { %v6737_v43 = vcombine.low %v1240_v18, %v1250_v25  ;;  %v1186_v44 = vor.u32 %v1185_v33, %v1182_v28  ;;  %v1191_v46 = vrot.slane %v1189_v34, 5  ;;  %v1818_v48 = vrot.slane %v6725_v29, 5  ;;  %v5139_v25 = vpop.f32.mrb[23].mxu0  ;;  %v6775_v50 = vld [vmem:[#allocation2 + $0x44] sm:$0x1] }
 0x1db   : > { %v1195_v47 = vrot.slane %v1193_v36, 4  ;;  %v1791_v52 = vsel %vm6626_vm13, %v1789_v39, %v1790_v11  ;;  %v1252_v53 = vshrl.u32 %v6722_v26, 16  ;;  %v1255_v60 = vshll.u32 %v6722_v26, 16  ;;  %v5764_v36 = vld [vmem:[#allocation8 + $0x8] sm:$0xff]   ;;  %v5766_v25 = vld [vmem:[#allocation8 + $0x10] sm:$0xff]  }
 0x1dc   : > { %v1261_v61 = vshll.u32 %v6672_v35, 16  ;;  %v1201_v62 = vrot.slane %v1199_v32, 5  ;;  %v4585_v63 = vcombine.low %v1788_v38, %v1791_v52  ;;  %v1187_v1 = vrot.slane %v1186_v44, 4  ;;  %v5765_v44 = vld [vmem:[#allocation8 + $0xd0] sm:$0xff]  }
 0x1dd   : > { %v1196_v2 = vor.u32 %v1195_v47, %v1191_v46  ;;  %v4588_v8 = vcombine.low %v6710_v16, %v6720_v17  ;;  %v6753_v12 = vsel %vm6626_vm13, %v1817_v31, %v1818_v48  ;;  %v1254_v13 = vrot.slane %v1252_v53, 4 }
 0x1de   : > { %v1257_v14 = vrot.slane %v1255_v60, 5  ;;  %5220 = vmatprep.mubr.bf16.mxu1 %v4585_v63  ;;  %v6755_v23 = vrot.slane %v1261_v61, 5  ;;  %v1265_v24 = vshrl.u32 %v6672_v35, 16  ;;  %v1271_v18 = vshll.u32 %v6678_v41, 16  ;;  %v5767_v60 = vld [vmem:[#allocation8 + $0xd8] sm:$0xff]  }
 0x1df   : > { %v1197_v15 = vrot.slane %v1196_v2, 4  ;;  %5221 = vmatmul.mubr.bf16.vlgmr.msra.gmra.mrb[0].mxu1 %v4586_v0  ;;  %v1276_v28 = vshrl.u32 %v6747_v3, 16  ;;  %v1279_v31 = vshll.u32 %v6747_v3, 16  ;;  %v1285_v32 = vshll.u32 %v6691_v57, 16  ;;  %v6780_v63 = vld [vmem:[#allocation2 + $0x4c] sm:$0xf] }
 0x1e0   : > { %v1258_v27 = vor.u32 %v1257_v14, %v1254_v13  ;;  %5224 = vmatprep.mubr.bf16.mxu1 %v4587_v5  ;;  %5237 = vmatpush3.bf16.msra.mxu1 %v6510_v9  ;;  %v1192_v33 = vsel %vm6686_vm0, %v1187_v1, %v1191_v46  ;;  %v1267_v34 = vrot.slane %v1265_v24, 4  ;;  %v1289_v54 = vshrl.u32 %v6691_v57, 16  ;;  %v1763_v5 = vld [vmem:[#allocation2 + $0x3c] sm:$0xe]  ;;  %v1764_v1 = vld [vmem:[#allocation2 + $0x48] sm:$0xe] }
 0x1e1   : > { %v1202_v41 = vsel %vm6686_vm0, %v1197_v15, %v1201_v62  ;;  %5238 = vmatprep.subr.bf16.mxu1 %v5763_v4  ;;  %v1278_v39 = vrot.slane %v1276_v28, 4  ;;  %v1281_v11 = vrot.slane %v1279_v31, 5  ;;  %v1287_v47 = vrot.slane %v1285_v32, 5  ;;  %v6786_v15 = vld [vmem:[#allocation2 + $0x50] sm:$0x1] }
 0x1e2   : > { %v4545_v0 = vcombine.low %v1192_v33, %v1202_v41  ;;  %v1259_v38 = vrot.slane %v1258_v27, 4  ;;  %v1268_v9 = vor.u32 %v1267_v34, %v6755_v23  ;;  %v1291_v46 = vrot.slane %v1289_v54, 4 }
 0x1e3   : > { %v1295_v48 = vshll.u32 %v6725_v29, 16  ;;  %v4589_v52 = vcombine.low %v6729_v30, %v6753_v12  ;;  %v1273_v53 = vrot.slane %v1271_v18, 5  ;;  %v1282_v61 = vor.u32 %v1281_v11, %v1278_v39  ;;  %v6788_v30 = vld [vmem:[#allocation2 + $0x3c] sm:$0xf]  ;;  %v6813_v11 = vld [vmem:[#allocation2 + $0x58] sm:$0xf] }
 0x1e4   : > { %5156 = vmatprep.mubr.bf16.mxu0 %v4545_v0  ;;  %v1822_v62 = vrot.slane %v6771_v59, 5  ;;  %5239 = vmatpush3.bf16.msra.mxu1 %v5763_v4  ;;  %v1264_v29 = vsel %vm6686_vm0, %v1259_v38, %v6755_v23  ;;  %v1269_v2 = vrot.slane %v1268_v9, 4  ;;  %v1292_v13 = vor.u32 %v1291_v46, %v1287_v47  ;;  %v6793_v4 = vld [vmem:[#allocation2 + $0x48] sm:$0xf] }
 0x1e5   : > { %5157 = vmatmul.mubr.bf16.vlgmr.msra.gmra.mrb[24].mxu0 %v6706_v58  ;;  %v4582_v14 = vrot.slane %v1763_v5, 9  ;;  %v1283_v12 = vrot.slane %v1282_v61, 4  ;;  %v1297_v24 = vrot.slane %v1295_v48, 5  ;;  %v1825_v58 = vrot.slane %v6775_v50, 5  ;;  %5240 = vmatprep.subr.bf16.mxu1 %v5765_v44  ;;  %v5769_v5 = vld [vmem:[#allocation8 + $0xe0] sm:$0xff]  }
 0x1e6   : > { %5160 = vmatprep.mubr.bf16.mxu0 %v6737_v43  ;;  %5173 = vmatpush3.bf16.msra.mxu0 %v6513_v10  ;;  %v1824_v18 = vrot.slane %v1822_v62, 4  ;;  %v1274_v23 = vsel %vm6686_vm0, %v1269_v2, %v1273_v53  ;;  %v1293_v27 = vrot.slane %v1292_v13, 4  ;;  %v4583_v28 = vrot.slane %v1764_v1, 9  ;;  %v1765_v61 = vld [vmem:[#allocation2 + $0x54] sm:$0xe] }
 0x1e7   : > { %5174 = vmatprep.subr.bf16.mxu0 %v5764_v36  ;;  %v1829_v31 = vrot.slane %v6780_v63, 5  ;;  %5225 = vmatmul.mubr.bf16.gmra.mrb[4].mxu1 %v4588_v8  ;;  %v1823_v10 = vsel %vm6626_vm13, %v4582_v14, %v1822_v62  ;;  %v1832_v32 = vrot.slane %v6786_v15, 5  ;;  %v1300_v33 = vshrl.u32 %v6788_v30, 16  ;;  %v5768_v8 = vld [vmem:[#allocation8 + $0x18] sm:$0xff]  }
 0x1e8   : > { %v1826_v43 = vsel %vm6626_vm13, %v1824_v18, %v1825_v58  ;;  %5228 = vmatprep.mubr.bf16.mxu1 %v4589_v52  ;;  %5241 = vmatpush3.bf16.msra.mxu1 %v5765_v44  ;;  %v4548_v41 = vcombine.low %v1264_v29, %v1274_v23  ;;  %v1288_v34 = vsel %vm6686_vm0, %v1283_v12, %v1287_v47  ;;  %v1303_v38 = vshll.u32 %v6788_v30, 16  ;;  %v5771_v29 = vld [vmem:[#allocation8 + $0xe8] sm:$0xff]   ;;  %v6824_v14 = vld [vmem:[#allocation2 + $0x54] sm:$0xf]  ;;  %v6827_v58 = vld [vmem:[#allocation2 + $0x5c] sm:$0x1] }
 0x1e9   : > { %v1298_v16 = vsel %vm6686_vm0, %v1293_v27, %v1297_v24  ;;  %v1831_v17 = vrot.slane %v1829_v31, 4  ;;  %5242 = vmatprep.subr.bf16.mxu1 %v5767_v60  ;;  %v4590_v54 = vcombine.low %v1823_v10, %v1826_v43  ;;  %v1302_v0 = vrot.slane %v1300_v33, 4  ;;  %v5770_v27 = vld [vmem:[#allocation8 + $0x20] sm:$0xff]  }
 0x1ea   : > { %5175 = vmatpush3.bf16.msra.mxu0 %v5764_v36  ;;  %v1309_v39 = vshll.u32 %v6771_v59, 16  ;;  %v1313_v9 = vshrl.u32 %v6771_v59, 16  ;;  %v1319_v47 = vshll.u32 %v6775_v50, 16  ;;  %v1324_v36 = vshrl.u32 %v6793_v4, 16 }
 0x1eb   : > { %5176 = vmatprep.subr.bf16.mxu0 %v5766_v25  ;;  %v1833_v44 = vsel %vm6626_vm13, %v1831_v17, %v1832_v32  ;;  %v4549_v46 = vcombine.low %v1288_v34, %v1298_v16  ;;  %v1305_v48 = vrot.slane %v1303_v38, 5  ;;  %v1327_v53 = vshll.u32 %v6793_v4, 16 }
 0x1ec   : > { %v1311_v52 = vrot.slane %v1309_v39, 5  ;;  %5243 = vmatpush3.bf16.msra.mxu1 %v5767_v60  ;;  %v1830_v62 = vsel %vm6626_vm13, %v4583_v28, %v1829_v31  ;;  %v1315_v1 = vrot.slane %v1313_v9, 4  ;;  %v1326_v2 = vrot.slane %v1324_v36, 4 }
 0x1ed   : > { %5161 = vmatmul.mubr.bf16.gmra.mrb[28].mxu0 %v4548_v41  ;;  %v1333_v13 = vshll.u32 %v6780_v63, 16  ;;  %v4591_v50 = vcombine.low %v1830_v62, %v1833_v44  ;;  %v1306_v12 = vor.u32 %v1305_v48, %v1302_v0  ;;  %v1329_v24 = vrot.slane %v1327_v53, 5  ;;  %5244 = vmatprep.subr.bf16.mxu1 %v5769_v5 }
 0x1ee   : > { %5164 = vmatprep.mubr.bf16.mxu0 %v4549_v46  ;;  %5177 = vmatpush3.bf16.msra.mxu0 %v5766_v25  ;;  %v1337_v18 = vshrl.u32 %v6780_v63, 16  ;;  %v1316_v60 = vor.u32 %v1315_v1, %v1311_v52  ;;  %v1321_v23 = vrot.slane %v1319_v47, 5  ;;  %v1836_v31 = vrot.slane %v6813_v11, 5  ;;  %v5772_v46 = vld [vmem:[#allocation8 + $0x28] sm:$0xff]  }
 0x1ef   : > { %5178 = vmatprep.subr.bf16.mxu0 %v5768_v8  ;;  %v1335_v28 = vrot.slane %v1333_v13, 5  ;;  %5229 = vmatmul.mubr.bf16.gmra.mrb[8].mxu1 %v4590_v54  ;;  %v1307_v10 = vrot.slane %v1306_v12, 4  ;;  %v1330_v43 = vor.u32 %v1329_v24, %v1326_v2  ;;  %v1343_v25 = vshll.u32 %v6786_v15, 16  ;;  %v5773_v54 = vld [vmem:[#allocation8 + $0xf0] sm:$0xff]  }
 0x1f0   : > { %v1339_v32 = vrot.slane %v1337_v18, 4  ;;  %5232 = vmatprep.mubr.bf16.mxu1 %v4591_v50  ;;  %5245 = vmatpush3.bf16.msra.mxu1 %v5769_v5  ;;  %v1317_v33 = vrot.slane %v1316_v60, 4  ;;  %v4584_v41 = vrot.slane %v1765_v61, 9  ;;  %v1838_v34 = vrot.slane %v1836_v31, 4  ;;  %v5776_v50 = vld [vmem:[#allocation8 + $0xf8] sm:$0xff]  }
 0x1f1   : > { %v1839_v16 = vrot.slane %v6827_v58, 5  ;;  %v1312_v17 = vsel %vm6686_vm0, %v1307_v10, %v1311_v52  ;;  %5246 = vmatprep.subr.bf16.mxu1 %v5771_v29  ;;  %v1331_v0 = vrot.slane %v1330_v43, 4  ;;  %v1348_v39 = vshrl.u32 %v6824_v14, 16  ;;  %v5774_v60 = vld [vmem:[#allocation2 + $0xc] sm:$0xff]   ;;  %v5780_v10 = vld [vmem:[#allocation8 + $0x100] sm:$0xff]  }
 0x1f2   : > { %5179 = vmatpush3.bf16.msra.mxu0 %v5768_v8  ;;  %v1340_v38 = vor.u32 %v1339_v32, %v1335_v28  ;;  %v1322_v15 = vsel %vm6686_vm0, %v1317_v33, %v1321_v23  ;;  %v1351_v44 = vshll.u32 %v6824_v14, 16  ;;  %v1357_v8 = vshll.u32 %v6813_v11, 16  ;;  %v5775_v23 = vld [vmem:[#allocation8 + $0x30] sm:$0xff]  }
 0x1f3   : > { %5180 = vmatprep.subr.bf16.mxu0 %v5770_v27  ;;  %v1840_v5 = vsel %vm6626_vm13, %v1838_v34, %v1839_v16  ;;  %v4550_v9 = vcombine.low %v1312_v17, %v1322_v15  ;;  %v1345_v36 = vrot.slane %v1343_v25, 5  ;;  %v1837_v48 = vsel %vm6626_vm13, %v4584_v41, %v1836_v31  ;;  %v5779_v34 = vld [vmem:[#allocation2 + $0x18] sm:$0xff]   ;;  %v5783_v16 = vld [vmem:[#allocation8 + $0x108] sm:$0xff]   ;;  %v2293_v17 = vld [vmem:[#allocation2 + $0xc] sm:$0xf] }
 0x1f4   : > { %v1341_v47 = vrot.slane %v1340_v38, 4  ;;  %5247 = vmatpush3.bf16.msra.mxu1 %v5771_v29  ;;  %v1350_v52 = vrot.slane %v1348_v39, 4  ;;  %v1353_v53 = vrot.slane %v1351_v44, 5  ;;  %v1359_v61 = vrot.slane %v1357_v8, 5  ;;  %v6855_v38 = vld [vmem:[#allocation2 + $0x10] sm:$0xf] }
 0x1f5   : > { %v1361_v62 = vshrl.u32 %v6813_v11, 16  ;;  %5165 = vmatmul.mubr.bf16.gmra.mrb[32].mxu0 %v4550_v9  ;;  %v1336_v1 = vsel %vm6686_vm0, %v1331_v0, %v1335_v28  ;;  %v4592_v13 = vcombine.low %v1837_v48, %v1840_v5  ;;  %5248 = vmatprep.subr.bf16.mxu1 %v5773_v54  ;;  %v1367_v29 = vshll.u32 %v6827_v58, 16  ;;  %v5781_v0 = vld [vmem:[#allocation2 + $0x24] sm:$0xff]   ;;  %v5789_v48 = vld [vmem:[#allocation8 + $0x118] sm:$0xff]  }
 0x1f6   : > { %v1346_v2 = vsel %vm6686_vm0, %v1341_v47, %v1345_v36  ;;  %5181 = vmatpush3.bf16.msra.mxu0 %v5770_v27  ;;  %v1354_v24 = vor.u32 %v1353_v53, %v1350_v52  ;;  %v5778_v27 = vld [vmem:[#allocation8 + $0x38] sm:$0xff]   ;;  %v4561_v41 = vcombine.low %v6699_v6, %v6712_v20  ;;  %v2321_v39 = vshll.u32 %v2293_v17, 16  ;;  %v5786_v15 = vld [vmem:[#allocation8 + $0x110] sm:$0xff]   ;;  %v6859_v20 = vld [vmem:[#allocation2 + $0x1c] sm:$0xf] }
 0x1f7   : > { %v4551_v12 = vcombine.low %v1336_v1, %v1346_v2  ;;  %v1363_v18 = vrot.slane %v1361_v62, 4  ;;  %5182 = vmatprep.subr.bf16.mxu0 %v5772_v46  ;;  %5233 = vmatmul.mubr.bf16.gmra.mrb[12].mxu1 %v4592_v13  ;;  %v1369_v32 = vrot.slane %v1367_v29, 5  ;;  %v2327_v5 = vshll.u32 %v6855_v38, 16  ;;  %v2296_v36 = vld [vmem:[#allocation2 + $0x18] sm:$0xf]  ;;  %v5787_v1 = vld [vmem:[#allocation2 + $0x3c] sm:$0xff]  }
 0x1f8   : > { %5249 = vmatpush3.bf16.msra.mxu1 %v5773_v54  ;;  %v1355_v31 = vrot.slane %v1354_v24, 4  ;;  %5252 = vmatprep.mubr.bf16.mxu1 %v5774_v60  ;;  %v2318_v54 = vshrl.u32 %v2293_v17, 16  ;;  %v2331_v6 = vshrl.u32 %v6855_v38, 16  ;;  %v4562_v44 = vcombine.low %v6641_v51, %v6612_v21  ;;  %v6869_v21 = vld [vmem:[#allocation2 + $0x14] sm:$0x1]  ;;  %v5792_v13 = vld [vmem:[#allocation8 + $0x120] sm:$0xff]  }
 0x1f9   : > { %5168 = vmatprep.mubr.bf16.mxu0 %v4551_v12  ;;  %v1364_v28 = vor.u32 %v1363_v18, %v1359_v61  ;;  %5250 = vmatprep.subr.bf16.mxu1 %v5776_v50  ;;  %v4563_v8 = vcombine.low %v6659_v7, %v6631_v45  ;;  %v2323_v47 = vrot.slane %v2321_v39, 5  ;;  %v6865_v52 = vrot.slane %v2327_v5, 5  ;;  %v6871_v7 = vld [vmem:[#allocation2 + $0x28] sm:$0xf]  ;;  %v2299_v2 = vld [vmem:[#allocation2 + $0x24] sm:$0xf] }
 0x1fa   : > { %5183 = vmatpush3.bf16.msra.mxu0 %v5772_v46  ;;  %v1360_v25 = vsel %vm6686_vm0, %v1355_v31, %v1359_v61  ;;  %v2320_v9 = vrot.slane %v2318_v54, 4  ;;  %v5785_v46 = vld [vmem:[#allocation2 + $0x30] sm:$0xff]   ;;  %v2333_v53 = vrot.slane %v2331_v6, 4  ;;  %v2351_v61 = vshll.u32 %v6859_v20, 16 }
 0x1fb   : > { %v1365_v43 = vrot.slane %v1364_v28, 4  ;;  %5184 = vmatprep.subr.bf16.mxu0 %v5775_v23  ;;  %v2355_v62 = vshrl.u32 %v6859_v20, 16  ;;  %v2342_v45 = vshrl.u32 %v2296_v36, 16  ;;  %v2345_v51 = vshll.u32 %v2296_v36, 16  ;;  %v6886_v17 = vld [vmem:[#allocation2 + $0x34] sm:$0xf] }
 0x1fc   : > { %5251 = vmatpush3.bf16.msra.mxu1 %v5776_v50  ;;  %v2324_v50 = vor.u32 %v2323_v47, %v2320_v9  ;;  %v2334_v12 = vor.u32 %v2333_v53, %v6865_v52  ;;  %v6874_v24 = vrot.slane %v2351_v61, 5  ;;  %v2337_v29 = vshll.u32 %v6869_v21, 16  ;;  %v5793_v54 = vld [vmem:[#allocation2 + $0x54] sm:$0xff]   ;;  %v2302_v5 = vld [vmem:[#allocation2 + $0x30] sm:$0xf] }
 0x1fd   : > { %v1370_v58 = vsel %vm6686_vm0, %v1365_v43, %v1369_v32  ;;  %5268 = vmatprep.subr.bf16.mxu1 %v5780_v10  ;;  %v2357_v18 = vrot.slane %v2355_v62, 4  ;;  %v2375_v60 = vshll.u32 %v6871_v7, 16  ;;  %v2344_v31 = vrot.slane %v2342_v45, 4  ;;  %v6895_v9 = vld [vmem:[#allocation2 + $0x2c] sm:$0x1] }
 0x1fe   : > { %v4552_v33 = vcombine.low %v1360_v25, %v1370_v58  ;;  %5185 = vmatpush3.bf16.msra.mxu0 %v5775_v23  ;;  %v2379_v23 = vshrl.u32 %v6871_v7, 16  ;;  %v2347_v28 = vrot.slane %v2345_v51, 5  ;;  %v2369_v43 = vshll.u32 %v2299_v2, 16  ;;  %v5795_v25 = vld [vmem:[#allocation8 + $0x128] sm:$0xff]  }
 0x1ff   : > { %5186 = vmatprep.subr.bf16.mxu0 %v5778_v27  ;;  %5253 = vmatmul.mubr.bf16.vlgmr.msra.gmra.mrb[0].mxu1 %v5779_v34  ;;  %v4564_v32 = vcombine.low %v6722_v26, %v6672_v35  ;;  %v6881_v58 = vld [vmem:[#allocation2 + $0x20] sm:$0x1]  ;;  %v2335_v34 = vrot.slane %v2334_v12, 4  ;;  %v4566_v35 = vcombine.low %v6788_v30, %v6771_v59  ;;  %v2339_v26 = vrot.slane %v2337_v29, 5 }
 0x200   : > { %5169 = vmatmul.mubr.bf16.gmra.mrb[36].mxu0 %v4552_v33  ;;  %5256 = vmatprep.mubr.bf16.mxu1 %v5781_v0  ;;  %v4565_v33 = vcombine.low %v6747_v3, %v6691_v57  ;;  %v6888_v0 = vld [vmem:[#allocation2 + $0x40] sm:$0xf]  ;;  %v6892_v39 = vrot.slane %v2375_v60, 5  ;;  %v2348_v57 = vor.u32 %v2347_v28, %v2344_v31  ;;  %v2361_v3 = vshll.u32 %v6881_v58, 16 }
 0x201   : > { %5188 = vmatprep.mubr.bf16.mxu0 %v4561_v41  ;;  %5269 = vmatpush3.bf16.msra.mxu1 %v5780_v10  ;;  %v2366_v10 = vshrl.u32 %v2299_v2, 16  ;;  %v2325_v41 = vrot.slane %v2324_v50, 4  ;;  %v2399_v47 = vshll.u32 %v6886_v17, 16  ;;  %v2403_v59 = vshrl.u32 %v6886_v17, 16  ;;  %v5797_v28 = vld [vmem:[#allocation2 + $0x60] sm:$0xff]  }
 0x202   : > { %5187 = vmatpush3.bf16.msra.mxu0 %v5778_v27  ;;  %5270 = vmatprep.subr.bf16.mxu1 %v5783_v16  ;;  %v5791_v27 = vld [vmem:[#allocation2 + $0x48] sm:$0xff]   ;;  %v2423_v30 = vshll.u32 %v6888_v0, 16  ;;  %v2427_v36 = vshrl.u32 %v6888_v0, 16  ;;  %v2340_v53 = vsel %vm6686_vm0, %v2335_v34, %v2339_v26  ;;  %v2390_v62 = vshrl.u32 %v2302_v5, 16  ;;  %v6923_v26 = vld [vmem:[#allocation2 + $0x44] sm:$0x1] }
 0x203   : > { %v2368_v6 = vrot.slane %v2366_v10, 4  ;;  %v2393_v45 = vshll.u32 %v2302_v5, 16  ;;  %v2363_v50 = vrot.slane %v2361_v3, 5  ;;  %v6908_v29 = vrot.slane %v2399_v47, 5  ;;  %v2308_v3 = vld [vmem:[#allocation2 + $0x48] sm:$0xf] }
 0x204   : > { %v2405_v60 = vrot.slane %v2403_v59, 4  ;;  %v4567_v31 = vcombine.low %v6793_v4, %v6780_v63  ;;  %v2763_v55 = vrot.slane %v6881_v58, 5 }
 0x205   : > { %5271 = vmatpush3.bf16.msra.mxu1 %v5783_v16  ;;  %v2358_v16 = vor.u32 %v2357_v18, %v6874_v24  ;;  %v2385_v18 = vshll.u32 %v6895_v9, 16 }
 0x206   : > { %5272 = vmatprep.subr.bf16.mxu1 %v5786_v15 }
 0x207   : > { %5257 = vmatmul.mubr.bf16.gmra.mrb[4].mxu1 %v5785_v46  ;;  %v5798_v46 = vld [vmem:[#allocation8 + $0x130] sm:$0xff]   ;;  %v2359_v61 = vrot.slane %v2358_v16, 4 }
 0x208   : > { %5189 = vmatmul.mubr.bf16.vlgmr.msra.gmra.mrb[24].mxu0 %v4562_v44  ;;  %5260 = vmatprep.mubr.bf16.mxu1 %v5787_v1  ;;  %v2371_v44 = vrot.slane %v2369_v43, 5  ;;  %v5800_v43 = vld [vmem:[#allocation8 + $0x138] sm:$0xff]  }
 0x209   : > { %5192 = vmatprep.mubr.bf16.mxu0 %v4563_v8  ;;  %5273 = vmatpush3.bf16.msra.mxu1 %v5786_v15  ;;  %v2381_v15 = vrot.slane %v2379_v23, 4  ;;  %v2305_v8 = vld [vmem:[#allocation2 + $0x3c] sm:$0xf]  ;;  %v2429_v23 = vrot.slane %v2427_v36, 4 }
 0x20a   : > { %5274 = vmatprep.subr.bf16.mxu1 %v5789_v48  ;;  %v2414_v51 = vshrl.u32 %v2305_v8, 16  ;;  %v2417_v2 = vshll.u32 %v2305_v8, 16  ;;  %v2372_v12 = vor.u32 %v2371_v44, %v2368_v6  ;;  %v6928_v6 = vld [vmem:[#allocation2 + $0x58] sm:$0xf]  ;;  %v4568_v44 = vcombine.low %v6824_v14, %v6813_v11 }
 0x20b   : > { %v2382_v1 = vor.u32 %v2381_v15, %v6892_v39  ;;  %v2387_v15 = vrot.slane %v2385_v18, 5  ;;  %v5801_v8 = vld [vmem:[#allocation8 + $0x140] sm:$0xff]   ;;  %v2475_v11 = vshrl.u32 %v6928_v6, 16 }
 0x20c   : > { %v2416_v34 = vrot.slane %v2414_v51, 4  ;;  %v2419_v16 = vrot.slane %v2417_v2, 5  ;;  %v2373_v4 = vrot.slane %v2372_v12, 4 }
 0x20d   : > { %5275 = vmatpush3.bf16.msra.mxu1 %v5789_v48  ;;  %v2330_v48 = vsel %vm6686_vm0, %v2325_v41, %v6865_v52  ;;  %v6910_v52 = vrot.slane %v2423_v30, 5  ;;  %v2395_v41 = vrot.slane %v2393_v45, 5  ;;  %v5802_v45 = vld [vmem:[#allocation8 + $0x148] sm:$0xff]  }
 0x20e   : > { %5276 = vmatprep.subr.bf16.mxu1 %v5792_v13  ;;  %v4617_v10 = vcombine.low %v2330_v48, %v2340_v53  ;;  %v2433_v48 = vshll.u32 %v6923_v26, 16  ;;  %v2311_v53 = vld [vmem:[#allocation2 + $0x54] sm:$0xf]  ;;  %v2378_v14 = vsel %vm6686_vm0, %v2373_v4, %v6892_v39  ;;  %v5803_v4 = vld [vmem:[#allocation8 + $0x150] sm:$0xff]  }
 0x20f   : > { %5261 = vmatmul.mubr.bf16.gmra.mrb[8].mxu1 %v5791_v27  ;;  %v6916_v27 = vld [vmem:[#allocation2 + $0x38] sm:$0x1] }
 0x210   : > { %5193 = vmatmul.mubr.bf16.gmra.mrb[28].mxu0 %v4564_v32  ;;  %5264 = vmatprep.mubr.bf16.mxu1 %v5793_v54  ;;  %v2364_v32 = vsel %vm6686_vm0, %v2359_v61, %v2363_v50  ;;  %v6918_v54 = vld [vmem:[#allocation2 + $0x4c] sm:$0xf]  ;;  %v2409_v5 = vshll.u32 %v6916_v27, 16  ;;  %v2438_v61 = vshrl.u32 %v2308_v3, 16  ;;  %v6942_v50 = vld [vmem:[#allocation2 + $0x50] sm:$0x1] }
 0x211   : > { %5196 = vmatprep.mubr.bf16.mxu0 %v4565_v33  ;;  %5277 = vmatpush3.bf16.msra.mxu1 %v5792_v13  ;;  %v2349_v13 = vrot.slane %v2348_v57, 4  ;;  %v2392_v33 = vrot.slane %v2390_v62, 4  ;;  %v2430_v57 = vor.u32 %v2429_v23, %v6910_v52  ;;  %v2447_v47 = vshll.u32 %v6918_v54, 16 }
 0x212   : > { %5278 = vmatprep.subr.bf16.mxu1 %v5795_v25  ;;  %v2451_v59 = vshrl.u32 %v6918_v54, 16  ;;  %v2441_v62 = vshll.u32 %v2308_v3, 16  ;;  %v2411_v2 = vrot.slane %v2409_v5, 5  ;;  %v2465_v23 = vshll.u32 %v2311_v53, 16 }
 0x213   : > { %v2354_v63 = vsel %vm6686_vm0, %v2349_v13, %v6874_v24  ;;  %v2396_v36 = vor.u32 %v2395_v41, %v2392_v33  ;;  %v2431_v13 = vrot.slane %v2430_v57, 4  ;;  %v6944_v12 = vrot.slane %v2447_v47, 5  ;;  %v2314_v57 = vld [vmem:[#allocation2 + $0x60] sm:$0xf] }
 0x214   : > { %v4618_v24 = vcombine.low %v2354_v63, %v2364_v32  ;;  %v2453_v18 = vrot.slane %v2451_v59, 4  ;;  %v6946_v32 = vld [vmem:[#allocation2 + $0x64] sm:$0xf]  ;;  %v2440_v39 = vrot.slane %v2438_v61, 4  ;;  %v2443_v33 = vrot.slane %v2441_v62, 5  ;;  %v5804_v62 = vld [vmem:[#allocation8 + $0x158] sm:$0xff]  }
 0x215   : > { %5279 = vmatpush3.bf16.msra.mxu1 %v5795_v25  ;;  %v2383_v25 = vrot.slane %v2382_v1, 4  ;;  %v2471_v1 = vshll.u32 %v6928_v6, 16  ;;  %v2477_v41 = vrot.slane %v2475_v11, 4  ;;  %v2457_v63 = vshll.u32 %v6942_v50, 16 }
 0x216   : > { %5280 = vmatprep.subr.bf16.mxu1 %v5798_v46  ;;  %v2467_v5 = vrot.slane %v2465_v23, 5  ;;  %v2495_v3 = vshll.u32 %v6946_v32, 16  ;;  %v2486_v61 = vshrl.u32 %v2314_v57, 16 }
 0x217   : > { %5265 = vmatmul.mubr.bf16.gmra.mrb[12].mxu1 %v5797_v28  ;;  %v2388_v30 = vsel %vm6686_vm0, %v2383_v25, %v2387_v15  ;;  %v2397_v28 = vrot.slane %v2396_v36, 4  ;;  %v6949_v25 = vrot.slane %v2471_v1, 5  ;;  %v2454_v15 = vor.u32 %v2453_v18, %v6944_v12 }
 0x218   : > { %5197 = vmatmul.mubr.bf16.gmra.mrb[32].mxu0 %v4566_v35  ;;  %5284 = vmatprep.mubr.bf16.mxu1 %v4617_v10  ;;  %v2406_v35 = vor.u32 %v2405_v60, %v6908_v29  ;;  %v2462_v60 = vshrl.u32 %v2311_v53, 16  ;;  %v2459_v53 = vrot.slane %v2457_v63, 5  ;;  %v731_v18 = vstv %s730_s1  ;;  %v6986_v63 = vld [vmem:[#allocation2 + $0x68] sm:$0x1] }
 0x219   : > { %5200 = vmatprep.mubr.bf16.mxu0 %v4567_v31  ;;  %5281 = vmatpush3.bf16.msra.mxu1 %v5798_v46  ;;  %v2420_v46 = vor.u32 %v2419_v16, %v2416_v34  ;;  %v4619_v31 = vcombine.low %v2378_v14, %v2388_v30  ;;  %v2444_v30 = vor.u32 %v2443_v33, %v2440_v39  ;;  %v2455_v1 = vrot.slane %v2454_v15, 4 }
 0x21a   : > { %5282 = vmatprep.subr.bf16.mxu1 %v5800_v43  ;;  %v2407_v51 = vrot.slane %v2406_v35, 4  ;;  %v2464_v35 = vrot.slane %v2462_v60, 4  ;;  %v2478_v36 = vor.u32 %v2477_v41, %v6949_v25  ;;  %vm6979_vm1 = vcmp.eq.s32.totalorder %v731_v18, 1  ;;  %v5805_v41 = vld [vmem:[#allocation8 + $0x160] sm:$0xff]  }
 0x21b   : > { %v2421_v10 = vrot.slane %v2420_v46, 4  ;;  %v765_v46 = vld [vmem:[#allocation2 + $0x6c] sm:$0x1]  ;;  %v2445_v23 = vrot.slane %v2444_v30, 4 }
 0x21c   : > { %v2412_v34 = vsel %vm6686_vm0, %v2407_v51, %v2411_v2  ;;  %v2468_v11 = vor.u32 %v2467_v5, %v2464_v35  ;;  %v6971_v51 = vrot.slane %v2495_v3, 5  ;;  %v797_v2 = vld [vmem:[#allocation2 + $0x74] sm:$0x1]  ;;  %v766_v60 = vsel %vm6465_vm3, 0, %v765_v46 }
 0x21d   : > { %5283 = vmatpush3.bf16.msra.mxu1 %v5800_v43  ;;  %v2435_v43 = vrot.slane %v2433_v48, 5  ;;  %v2426_v59 = vsel %vm6686_vm0, %v2421_v10, %v6910_v52  ;;  %v5849_v52 = vld [vmem:[%s7377_s2] ss:$0 sm:$0xff]  ;;  %767 = vst [vmem:[#allocation2 + $0x6c] sm:$0x1] %v766_v60  ;;  %v2460_v35 = vsel %vm6686_vm0, %v2455_v1, %v2459_v53  ;;  %v2753_v5 = vrot.slane %v6855_v38, 5 }
 0x21e   : > { %5300 = vmatprep.subr.bf16.mxu1 %v5801_v8  ;;  %v724_v10 = vadd.f32 %v5849_v52, %v6745_v56  ;;  %v5806_v38 = vld [vmem:[#allocation8 + $0x168] sm:$0xff]   ;;  %v2719_v1 = vld [vmem:[#allocation2 + $0xc] sm:$0xe] }
 0x21f   : > { %v2436_v16 = vsel %vm6686_vm0, %v2431_v13, %v2435_v43  ;;  %v2488_v43 = vrot.slane %v2486_v61, 4 }
 0x220   : > { %5201 = vmatmul.mubr.bf16.gmra.mrb[36].mxu0 %v4568_v44  ;;  %5285 = vmatmul.mubr.bf16.vlgmr.msra.gmra.mrb[0].mxu1 %v4618_v24  ;;  %v2402_v44 = vsel %vm6686_vm0, %v2397_v28, %v6908_v29  ;;  %v6961_v24 = vld [vmem:[#allocation2 + $0x5c] sm:$0x1]  ;;  %v4621_v48 = vcombine.low %v2426_v59, %v2436_v16  ;;  %v2489_v29 = vshll.u32 %v2314_v57, 16  ;;  %v728_v15 = vmax.f32 %v724_v10, 0.0 }
 0x221   : > { %5288 = vmatprep.mubr.bf16.mxu1 %v4619_v31  ;;  %5301 = vmatpush3.bf16.msra.mxu1 %v5801_v8  ;;  %v2499_v8 = vshrl.u32 %v6946_v32, 16  ;;  %v4620_v47 = vcombine.low %v2402_v44, %v2412_v34  ;;  %v2481_v14 = vshll.u32 %v6961_v24, 16  ;;  %v2479_v31 = vrot.slane %v2478_v36, 4 }
 0x222   : > { %5302 = vmatprep.subr.bf16.mxu1 %v5802_v45  ;;  %v2491_v39 = vrot.slane %v2489_v29, 5  ;;  %v2469_v34 = vrot.slane %v2468_v11, 4  ;;  %v734_v3 = vsel %vm6979_vm1, %v728_v15, 0.0  ;;  %v2450_v44 = vsel %vm6686_vm0, %v2445_v23, %v6944_v12  ;;  %v5808_v15 = vld [vmem:[#allocation8 + $0x178] sm:$0xff]  }
 0x223   : > { %v2501_v13 = vrot.slane %v2499_v8, 4  ;;  %v2483_v16 = vrot.slane %v2481_v14, 5  ;;  %v4754_v59 = vpack.c.bf16 %v734_v3, %v734_v3  ;;  %v4622_v30 = vcombine.low %v2450_v44, %v2460_v35 }
 0x224   : > { %v2492_v8 = vor.u32 %v2491_v39, %v2488_v43  ;;  %v2474_v36 = vsel %vm6686_vm0, %v2469_v34, %v6949_v25  ;;  %v2755_v12 = vrot.slane %v2753_v5, 4  ;;  %v2756_v25 = vrot.slane %v6869_v21, 5 }
 0x225   : > { %5303 = vmatpush3.bf16.msra.mxu1 %v5802_v45  ;;  %v721_v45 = vadd.f32 %v5849_v52, %v6733_v37  ;;  %v798_v37 = vsel %vm6472_vm5, 0, %v797_v2  ;;  %v2502_v56 = vor.u32 %v2501_v13, %v6971_v51  ;;  %v2484_v22 = vsel %vm6686_vm0, %v2479_v31, %v2483_v16  ;;  %v864_v13 = vld [vmem:[#allocation2 + $0x6c] sm:$0xf] }
 0x226   : > { %5304 = vmatprep.subr.bf16.mxu1 %v5803_v4  ;;  %799 = vst [vmem:[#allocation2 + $0x74] sm:$0x1] %v798_v37  ;;  %v4623_v53 = vcombine.low %v2474_v36, %v2484_v22  ;;  %v852_v29 = vshrl.u32 %v4754_v59, 16  ;;  %v2493_v14 = vrot.slane %v2492_v8, 4  ;;  %v2760_v28 = vrot.slane %v6859_v20, 5 }
 0x227   : > { %v727_v33 = vmax.f32 %v721_v45, 0.0  ;;  %v2503_v61 = vrot.slane %v2502_v56, 4  ;;  %v5807_v45 = vld [vmem:[#allocation8 + $0x170] sm:$0xff]   ;;  %v4633_v39 = vrot.slane %v2719_v1, 9  ;;  %v2767_v37 = vrot.slane %v6871_v7, 5 }
 0x228   : > { %5289 = vmatmul.mubr.bf16.gmra.mrb[4].mxu1 %v4620_v47  ;;  %v2505_v47 = vshll.u32 %v6986_v63, 16  ;;  %v854_v52 = vrot.slane %v852_v29, 7  ;;  %v2498_v21 = vsel %vm6686_vm0, %v2493_v14, %v6971_v51  ;;  %v2762_v35 = vrot.slane %v2760_v28, 4  ;;  %v2720_v56 = vld [vmem:[#allocation2 + $0x18] sm:$0xe] }
 0x229   : > { %5292 = vmatprep.mubr.bf16.mxu1 %v4621_v48  ;;  %5305 = vmatpush3.bf16.msra.mxu1 %v5803_v4  ;;  %v733_v4 = vsel %vm6979_vm1, %v727_v33, 0.0  ;;  %v2757_v33 = vsel %vm6626_vm13, %v2755_v12, %v2756_v25  ;;  %v2754_v7 = vsel %vm6626_vm13, %v4633_v39, %v2753_v5  ;;  %v2769_v51 = vrot.slane %v2767_v37, 4 }
 0x22a   : > { %5306 = vmatprep.subr.bf16.mxu1 %v5804_v62  ;;  %v4753_v57 = vpack.c.bf16 %v733_v4, %v733_v4  ;;  %v2507_v2 = vrot.slane %v2505_v47, 5  ;;  %v859_v43 = vrot.slane %v854_v52, 4  ;;  %v4641_v40 = vcombine.low %v2754_v7, %v2757_v33  ;;  %v2721_v4 = vld [vmem:[#allocation2 + $0x24] sm:$0xe] }
 0x22b   : > { %v2770_v22 = vrot.slane %v6895_v9, 5  ;;  %v2764_v5 = vsel %vm6626_vm13, %v2762_v35, %v2763_v55  ;;  %v2774_v3 = vrot.slane %v6886_v17, 5  ;;  %v4635_v44 = vrot.slane %v2721_v4, 9  ;;  %v2722_v17 = vld [vmem:[#allocation2 + $0x30] sm:$0xe]  ;;  %v5821_v55 = vld [vmem:[#allocation8 + $0x1c8] sm:$0xff]  }
 0x22c   : > { %v844_v46 = vshrl.u32 %v4753_v57, 16  ;;  %v847_v48 = vshll.u32 %v4753_v57, 16  ;;  %v2508_v31 = vsel %vm6686_vm0, %v2503_v61, %v2507_v2  ;;  %v4634_v57 = vrot.slane %v2720_v56, 9  ;;  %v5817_v35 = vld [vmem:[#allocation8 + $0x1b8] sm:$0xff]   ;;  %v5816_v56 = vld [vmem:[#allocation2 + $0x18] sm:$0xff]  }
 0x22d   : > { %5307 = vmatpush3.bf16.msra.mxu1 %v5804_v62  ;;  %v855_v62 = vshll.u32 %v4754_v59, 16  ;;  %v868_v23 = vld [vmem:[#allocation2 + $0x74] sm:$0x1]  ;;  %v4624_v16 = vcombine.low %v2498_v21, %v2508_v31  ;;  %v2771_v8 = vsel %vm6626_vm13, %v2769_v51, %v2770_v22  ;;  %v2781_v47 = vrot.slane %v6888_v0, 5  ;;  %v2723_v0 = vld [vmem:[#allocation2 + $0x3c] sm:$0xe] }
 0x22e   : > { %5308 = vmatprep.subr.bf16.mxu1 %v5805_v41  ;;  %v846_v11 = vrot.slane %v844_v46, 7  ;;  %v869_v34 = vsel %vm6465_vm3, %v859_v43, %v868_v23  ;;  %v2761_v58 = vsel %vm6626_vm13, %v4634_v57, %v2760_v28  ;;  %v2768_v9 = vsel %vm6626_vm13, %v4635_v44, %v2767_v37  ;;  %v5819_v51 = vld [vmem:[#allocation8 + $0x1c0] sm:$0xff]   ;;  %v5820_v4 = vld [vmem:[#allocation2 + $0x30] sm:$0xff]   ;;  %v5823_v57 = vld [vmem:[#allocation8 + $0x1d0] sm:$0xff]  }
 0x22f   : > { %v857_v10 = vor.u32 %v855_v62, %v854_v52  ;;  %870 = vst [vmem:[#allocation2 + $0x74] sm:$0x1] %v869_v34  ;;  %v4642_v59 = vcombine.low %v2761_v58, %v2764_v5  ;;  %v4643_v36 = vcombine.low %v2768_v9, %v2771_v8  ;;  %v2783_v46 = vrot.slane %v2781_v47, 4  ;;  %v5815_v34 = vld [vmem:[#allocation8 + $0x1b0] sm:$0xff]   ;;  %v7063_v22 = vld [vmem:[#allocation2 + $0x1c] sm:$0xf] }
 0x230   : > { %5293 = vmatmul.mubr.bf16.gmra.mrb[8].mxu1 %v4622_v30  ;;  %v849_v18 = vor.u32 %v847_v48, %v846_v11  ;;  %v850_v60 = vrot.slane %v846_v11, 4  ;;  %v5810_v30 = vld [vmem:[#allocation8 + $0x188] sm:$0xff]   ;;  %v2777_v48 = vrot.slane %v6916_v27, 5  ;;  %v2784_v61 = vrot.slane %v6923_v26, 5 }
 0x231   : > { %5296 = vmatprep.mubr.bf16.mxu1 %v4623_v53  ;;  %5309 = vmatpush3.bf16.msra.mxu1 %v5805_v41  ;;  %v5811_v53 = vld [vmem:[#allocation8 + $0x190] sm:$0xff]   ;;  %v4636_v29 = vrot.slane %v2722_v17, 9  ;;  %v2788_v1 = vrot.slane %v6918_v54, 5  ;;  %v4637_v12 = vrot.slane %v2723_v0, 9  ;;  %v2795_v14 = vrot.slane %v6928_v6, 5  ;;  %v5822_v58 = vld [vmem:[#allocation2 + $0x3c] sm:$0xff]  }
 0x232   : > { %5310 = vmatprep.subr.bf16.mxu1 %v5806_v38  ;;  %v865_v41 = vsel %vm6527_vm8, %v849_v18, %v864_v13  ;;  %v858_v20 = vsel %vm6534_vm9, %v850_v60, %v857_v10  ;;  %v2785_v11 = vsel %vm6626_vm13, %v2783_v46, %v2784_v61  ;;  %v5812_v13 = vld [vmem:[#allocation8 + $0x198] sm:$0xff]   ;;  %v2724_v54 = vld [vmem:[#allocation2 + $0x48] sm:$0xe]  ;;  %v2791_v18 = vrot.slane %v6942_v50, 5  ;;  %v5813_v60 = vld [vmem:[#allocation8 + $0x1a0] sm:$0xff]  }
 0x233   : > { %866 = vst [vmem:[#allocation2 + $0x6c] sm:$0xf] %v865_v41  ;;  %867 = vst [vmem:[#allocation2 + $0x70] sm:$0xf] %v858_v20  ;;  %v2775_v27 = vsel %vm6626_vm13, %v4636_v29, %v2774_v3  ;;  %v2782_v26 = vsel %vm6626_vm13, %v4637_v12, %v2781_v47  ;;  %v2797_v25 = vrot.slane %v2795_v14, 4  ;;  %v2798_v23 = vrot.slane %v6961_v24, 5 }
 0x234   : > { %v4645_v52 = vcombine.low %v2782_v26, %v2785_v11  ;;  %v2725_v6 = vld [vmem:[#allocation2 + $0x54] sm:$0xe]  ;;  %v4638_v31 = vrot.slane %v2724_v54, 9  ;;  %v2802_v10 = vrot.slane %v6946_v32, 5  ;;  %v5814_v24 = vld [vmem:[#allocation8 + $0x1a8] sm:$0xff]   ;;  %v2805_v32 = vrot.slane %v6986_v63, 5 }
 0x235   : > { %5311 = vmatpush3.bf16.msra.mxu1 %v5806_v38  ;;  %v2776_v38 = vrot.slane %v2774_v3, 4  ;;  %v4639_v43 = vrot.slane %v2725_v6, 9  ;;  %v2799_v39 = vsel %vm6626_vm13, %v2797_v25, %v2798_v23  ;;  %v2726_v20 = vld [vmem:[#allocation2 + $0x60] sm:$0xe]  ;;  %v5818_v63 = vld [vmem:[#allocation2 + $0x24] sm:$0xff]   ;;  %v3294_v44 = vshll.u32 %v7063_v22, 16 }
 0x236   : > { %5312 = vmatprep.subr.bf16.mxu1 %v5807_v45  ;;  %v2789_v33 = vsel %vm6626_vm13, %v4638_v31, %v2788_v1  ;;  %v2804_v21 = vrot.slane %v2802_v10, 4  ;;  %v3298_v8 = vshrl.u32 %v7063_v22, 16  ;;  %v7067_v47 = vld [vmem:[#allocation2 + $0x28] sm:$0xf]  ;;  %v3263_v46 = vld [vmem:[#allocation2 + $0x24] sm:$0xf] }
 0x237   : > { %v2778_v62 = vsel %vm6626_vm13, %v2776_v38, %v2777_v48  ;;  %v2796_v37 = vsel %vm6626_vm13, %v4639_v43, %v2795_v14  ;;  %v5824_v17 = vld [vmem:[#allocation2 + $0x48] sm:$0xff]   ;;  %v3318_v48 = vshll.u32 %v7067_v47, 16  ;;  %v3322_v0 = vshrl.u32 %v7067_v47, 16  ;;  %v7073_v61 = vld [vmem:[#allocation2 + $0x34] sm:$0xf]  ;;  %v5829_v6 = vld [vmem:[#allocation8 + $0x1e8] sm:$0xff]  }
 0x238   : > { %5297 = vmatmul.mubr.bf16.gmra.mrb[12].mxu1 %v4624_v16  ;;  %v4644_v2 = vcombine.low %v2775_v27, %v2778_v62  ;;  %v4647_v41 = vcombine.low %v2796_v37, %v2799_v39  ;;  %v4640_v16 = vrot.slane %v2726_v20, 9  ;;  %v2806_v7 = vsel %vm6626_vm13, %v2804_v21, %v2805_v32  ;;  %v7075_v29 = vld [vmem:[#allocation2 + $0x20] sm:$0x1]  ;;  %v5827_v62 = vld [vmem:[#allocation8 + $0x1e0] sm:$0xff]   ;;  %v7085_v43 = vld [vmem:[#allocation2 + $0x4c] sm:$0xf] }
 0x239   : > { %5313 = vmatpush3.bf16.msra.mxu1 %v5807_v45  ;;  %5316 = vmatprep.mubr.bf16.mxu1 %v4641_v40  ;;  %v2790_v45 = vrot.slane %v2788_v1, 4  ;;  %v3300_v38 = vrot.slane %v3298_v8, 4  ;;  %v3309_v11 = vshrl.u32 %v3263_v46, 16  ;;  %v3312_v14 = vshll.u32 %v3263_v46, 16  ;;  %v7087_v39 = vld [vmem:[#allocation2 + $0x2c] sm:$0x1] }
 0x23a   : > { %5314 = vmatprep.subr.bf16.mxu1 %v5808_v15  ;;  %v3342_v26 = vshll.u32 %v7073_v61, 16  ;;  %v7081_v54 = vrot.slane %v3318_v48, 5  ;;  %v3324_v25 = vrot.slane %v3322_v0, 4  ;;  %v3269_v20 = vld [vmem:[#allocation2 + $0x3c] sm:$0xf]  ;;  %v5830_v46 = vld [vmem:[#allocation2 + $0x6c] sm:$0xff]  }
 0x23b   : > { %v2792_v28 = vsel %vm6626_vm13, %v2790_v45, %v2791_v18  ;;  %v3304_v45 = vshll.u32 %v7075_v29, 16  ;;  %v5828_v18 = vld [vmem:[#allocation2 + $0x60] sm:$0xff]   ;;  %v5832_v0 = vld [vmem:[#allocation8 + $0x1f8] sm:$0xff]  }
 0x23c   : > { %v4646_v50 = vcombine.low %v2789_v33, %v2792_v28  ;;  %v3311_v28 = vrot.slane %v3309_v11, 4  ;;  %v7089_v37 = vrot.slane %v3342_v26, 5  ;;  %v3325_v21 = vor.u32 %v3324_v25, %v7081_v54 }
 0x23d   : > { %5315 = vmatpush3.bf16.msra.mxu1 %v5808_v15  ;;  %v2803_v15 = vsel %vm6626_vm13, %v4640_v16, %v2802_v10  ;;  %v3314_v10 = vrot.slane %v3312_v14, 5  ;;  %v7094_v16 = vld [vmem:[#allocation2 + $0x38] sm:$0x1] }
 0x23e   : > { %5332 = vmatprep.subr.bf16.mxu1 %v5809_v19  ;;  %v4648_v40 = vcombine.low %v2803_v15, %v2806_v7  ;;  %v3390_v7 = vshll.u32 %v7085_v43, 16  ;;  %v3394_v15 = vshrl.u32 %v7085_v43, 16 }
 0x240   : > { %5317 = vmatmul.mubr.bf16.vlgmr.msra.gmra.mrb[0].mxu1 %v4642_v59  ;;  %v5825_v59 = vld [vmem:[#allocation8 + $0x1d8] sm:$0xff]  }
 0x241   : > { %5320 = vmatprep.mubr.bf16.mxu1 %v4643_v36  ;;  %5333 = vmatpush3.bf16.msra.mxu1 %v5809_v19  ;;  %v3260_v19 = vld [vmem:[#allocation2 + $0x18] sm:$0xf]  ;;  %v7069_v36 = vrot.slane %v3294_v44, 5  ;;  %v3352_v44 = vshll.u32 %v7094_v16, 16 }
 0x242   : > { %5334 = vmatprep.subr.bf16.mxu1 %v5810_v30  ;;  %v3285_v5 = vshrl.u32 %v3260_v19, 16  ;;  %v3288_v3 = vshll.u32 %v3260_v19, 16 }
 0x243   : > { %v3301_v12 = vor.u32 %v3300_v38, %v7069_v36  ;;  %v3396_v38 = vrot.slane %v3394_v15, 4 }
 0x244   : > { %v3287_v9 = vrot.slane %v3285_v5, 4  ;;  %v3360_v5 = vshll.u32 %v3269_v20, 16 }
 0x245   : > { %5335 = vmatpush3.bf16.msra.mxu1 %v5810_v30  ;;  %v3290_v30 = vrot.slane %v3288_v3, 5  ;;  %v3302_v31 = vrot.slane %v3301_v12, 4  ;;  %v3326_v3 = vrot.slane %v3325_v21, 4 }
 0x246   : > { %5336 = vmatprep.subr.bf16.mxu1 %v5811_v53 }
 0x247   : > { %v3291_v1 = vor.u32 %v3290_v30, %v3287_v9 }
 0x248   : > { %5321 = vmatmul.mubr.bf16.gmra.mrb[4].mxu1 %v4644_v2 }
 0x249   : > { %5324 = vmatprep.mubr.bf16.mxu1 %v4645_v52  ;;  %5337 = vmatpush3.bf16.msra.mxu1 %v5811_v53  ;;  %v3266_v53 = vld [vmem:[#allocation2 + $0x30] sm:$0xf]  ;;  %v5826_v52 = vld [vmem:[#allocation2 + $0x54] sm:$0xff]   ;;  %v3292_v23 = vrot.slane %v3291_v1, 4  ;;  %v5842_v1 = vld [vmem:[#allocation9 + $0x8] sm:$0xff]  }
 0x24a   : > { %5338 = vmatprep.subr.bf16.mxu1 %v5812_v13  ;;  %v3333_v27 = vshrl.u32 %v3266_v53, 16  ;;  %v3336_v2 = vshll.u32 %v3266_v53, 16 }
 0x24c   : > { %v3335_v33 = vrot.slane %v3333_v27, 4  ;;  %v3362_v27 = vrot.slane %v3360_v5, 5 }
 0x24d   : > { %5339 = vmatpush3.bf16.msra.mxu1 %v5812_v13  ;;  %v3346_v13 = vshrl.u32 %v7073_v61, 16 }
 0x24e   : > { %5340 = vmatprep.subr.bf16.mxu1 %v5813_v60 }
 0x250   : > { %5325 = vmatmul.mubr.bf16.gmra.mrb[8].mxu1 %v4646_v50  ;;  %v3338_v50 = vrot.slane %v3336_v2, 5  ;;  %v7112_v2 = vld [vmem:[#allocation2 + $0x58] sm:$0xf] }
 0x251   : > { %5328 = vmatprep.mubr.bf16.mxu1 %v4647_v41  ;;  %5341 = vmatpush3.bf16.msra.mxu1 %v5813_v60  ;;  %v7083_v60 = vld [vmem:[#allocation2 + $0x40] sm:$0xf]  ;;  %v3306_v41 = vrot.slane %v3304_v45, 5  ;;  %v3354_v45 = vrot.slane %v3352_v44, 5 }
 0x252   : > { %5342 = vmatprep.subr.bf16.mxu1 %v5814_v24  ;;  %v3366_v32 = vshll.u32 %v7083_v60, 16 }
 0x254   : > { %v7106_v8 = vrot.slane %v3366_v32, 5 }
 0x255   : > { %5343 = vmatpush3.bf16.msra.mxu1 %v5814_v24  ;;  %v3348_v24 = vrot.slane %v3346_v13, 4 }
 0x256   : > { %5344 = vmatprep.subr.bf16.mxu1 %v5815_v34 }
 0x257   : > { %v3349_v19 = vor.u32 %v3348_v24, %v7089_v37  ;;  %v3414_v24 = vshll.u32 %v7112_v2, 16 }
 0x258   : > { %5329 = vmatmul.mubr.bf16.gmra.mrb[12].mxu1 %v4648_v40  ;;  %v5831_v40 = vld [vmem:[#allocation8 + $0x1f0] sm:$0xff]  }
 0x259   : > { %5345 = vmatpush3.bf16.msra.mxu1 %v5815_v34  ;;  %5348 = vmatprep.mubr.bf16.mxu1 %v5816_v56  ;;  %v3370_v34 = vshrl.u32 %v7083_v60, 16  ;;  %v3307_v56 = vsel %vm6686_vm0, %v3302_v31, %v3306_v41  ;;  %v3350_v11 = vrot.slane %v3349_v19, 4  ;;  %v5843_v31 = vld [vmem:[#allocation9 + $0x10] sm:$0xff]   ;;  %v3418_v41 = vshrl.u32 %v7112_v2, 16 }
 0x25a   : > { %5346 = vmatprep.subr.bf16.mxu1 %v5817_v35 }
 0x25b   : > { %v3355_v32 = vsel %vm6686_vm0, %v3350_v11, %v3354_v45  ;;  %v3420_v19 = vrot.slane %v3418_v41, 4  ;;  %v5835_v11 = vld [vmem:[#allocation8 + $0x210] sm:$0xff]  }
 0x25d   : > { %5347 = vmatpush3.bf16.msra.mxu1 %v5817_v35  ;;  %v3297_v35 = vsel %vm6686_vm0, %v3292_v23, %v7069_v36  ;;  %v7110_v36 = vrot.slane %v3390_v7, 5  ;;  %v7120_v23 = vld [vmem:[#allocation2 + $0x64] sm:$0xf]  ;;  %v3278_v7 = vld [vmem:[#allocation2 + $0x60] sm:$0xf] }
 0x25e   : > { %5364 = vmatprep.subr.bf16.mxu1 %v5819_v51  ;;  %v4673_v48 = vcombine.low %v3297_v35, %v3307_v56  ;;  %v3442_v35 = vshrl.u32 %v7120_v23, 16  ;;  %v3432_v5 = vshll.u32 %v3278_v7, 16 }
 0x260   : > { %5349 = vmatmul.mubr.bf16.vlgmr.msra.gmra.mrb[0].mxu1 %v5818_v63  ;;  %v3328_v63 = vshll.u32 %v7087_v39, 16  ;;  %v3434_v45 = vrot.slane %v3432_v5, 5 }
 0x261   : > { %5352 = vmatprep.mubr.bf16.mxu1 %v5820_v4  ;;  %5365 = vmatpush3.bf16.msra.mxu1 %v5819_v51  ;;  %v3315_v51 = vor.u32 %v3314_v10, %v3311_v28  ;;  %v3339_v4 = vor.u32 %v3338_v50, %v3335_v33  ;;  %v5833_v10 = vld [vmem:[#allocation8 + $0x200] sm:$0xff]   ;;  %v3275_v50 = vld [vmem:[#allocation2 + $0x54] sm:$0xf] }
 0x262   : > { %5366 = vmatprep.subr.bf16.mxu1 %v5821_v55 }
 0x263   : > { %v3316_v53 = vrot.slane %v3315_v51, 4  ;;  %v3340_v12 = vrot.slane %v3339_v4, 4  ;;  %v7136_v4 = vrot.slane %v3414_v24, 5 }
 0x265   : > { %5367 = vmatpush3.bf16.msra.mxu1 %v5821_v55  ;;  %v3272_v55 = vld [vmem:[#allocation2 + $0x48] sm:$0xf]  ;;  %v3321_v28 = vsel %vm6686_vm0, %v3316_v53, %v7081_v54 }
 0x266   : > { %5368 = vmatprep.subr.bf16.mxu1 %v5823_v57  ;;  %v3381_v9 = vshrl.u32 %v3272_v55, 16  ;;  %v3384_v30 = vshll.u32 %v3272_v55, 16  ;;  %v3408_v55 = vshll.u32 %v3275_v50, 16 }
 0x268   : > { %5353 = vmatmul.mubr.bf16.gmra.mrb[4].mxu1 %v5822_v58  ;;  %v3372_v58 = vrot.slane %v3370_v34, 4  ;;  %v3383_v25 = vrot.slane %v3381_v9, 4  ;;  %v3281_v9 = vld [vmem:[#allocation2 + $0x6c] sm:$0xf] }
 0x269   : > { %5356 = vmatprep.mubr.bf16.mxu1 %v5824_v17  ;;  %5369 = vmatpush3.bf16.msra.mxu1 %v5823_v57  ;;  %v3357_v57 = vshrl.u32 %v3269_v20, 16  ;;  %v5841_v17 = vld [vmem:[#allocation9] sm:$0xff]   ;;  %v3345_v20 = vsel %vm6686_vm0, %v3340_v12, %v7089_v37  ;;  %v5834_v37 = vld [vmem:[#allocation8 + $0x208] sm:$0xff]  }
 0x26a   : > { %5370 = vmatprep.subr.bf16.mxu1 %v5825_v59  ;;  %5428 = vmatprep.subr.bf16.mxu0 %v5841_v17  ;;  %v3373_v13 = vor.u32 %v3372_v58, %v7106_v8  ;;  %v4675_v44 = vcombine.low %v3345_v20, %v3355_v32  ;;  %v5845_v12 = vld [vmem:[#allocation9 + $0x20] sm:$0xff]   ;;  %v5836_v32 = vld [vmem:[#allocation8 + $0x218] sm:$0xff]  }
 0x26b   : > { %v3359_v14 = vrot.slane %v3357_v57, 4  ;;  %5429 = vmatpush3.bf16.msra.mxu0 %v5841_v17  ;;  %v3429_v57 = vshrl.u32 %v3278_v7, 16 }
 0x26c   : > { %5430 = vmatprep.subr.bf16.mxu0 %v5842_v1  ;;  %v3374_v54 = vrot.slane %v3373_v13, 4 }
 0x26d   : > { %5371 = vmatpush3.bf16.msra.mxu1 %v5825_v59  ;;  %v7108_v59 = vld [vmem:[#allocation2 + $0x44] sm:$0x1]  ;;  %v3363_v34 = vor.u32 %v3362_v27, %v3359_v14  ;;  %v7146_v27 = vld [vmem:[#allocation2 + $0x5c] sm:$0x1]  ;;  %v3431_v13 = vrot.slane %v3429_v57, 4 }
 0x26e   : > { %5372 = vmatprep.subr.bf16.mxu1 %v5827_v62  ;;  %v3376_v33 = vshll.u32 %v7108_v59, 16 }
 0x26f   : > { %5431 = vmatpush3.bf16.msra.mxu0 %v5842_v1  ;;  %v3410_v1 = vrot.slane %v3408_v55, 5  ;;  %v3435_v7 = vor.u32 %v3434_v45, %v3431_v13  ;;  %v5837_v55 = vld [vmem:[#allocation8 + $0x220] sm:$0xff]   ;;  %v3727_v13 = vrot.slane %v7067_v47, 5  ;;  %v3730_v47 = vrot.slane %v7087_v39, 5 }
 0x270   : > { %5357 = vmatmul.mubr.bf16.gmra.mrb[8].mxu1 %v5826_v52  ;;  %v7117_v52 = vld [vmem:[#allocation2 + $0x50] sm:$0x1]  ;;  %5432 = vmatprep.subr.bf16.mxu0 %v5843_v31  ;;  %v3378_v58 = vrot.slane %v3376_v33, 5 }
 0x271   : > { %5360 = vmatprep.mubr.bf16.mxu1 %v5828_v18  ;;  %5373 = vmatpush3.bf16.msra.mxu1 %v5827_v62  ;;  %v3330_v62 = vrot.slane %v3328_v63, 5  ;;  %v3386_v18 = vrot.slane %v3384_v30, 5  ;;  %v3400_v15 = vshll.u32 %v7117_v52, 16  ;;  %v3405_v63 = vshrl.u32 %v3275_v50, 16 }
 0x272   : > { %5374 = vmatprep.subr.bf16.mxu1 %v5829_v6  ;;  %v3364_v30 = vrot.slane %v3363_v34, 4 }
 0x273   : > { %v3331_v26 = vsel %vm6686_vm0, %v3326_v3, %v3330_v62  ;;  %v3387_v56 = vor.u32 %v3386_v18, %v3383_v25  ;;  %v5844_v3 = vld [vmem:[#allocation9 + $0x18] sm:$0xff]   ;;  %5433 = vmatpush3.bf16.msra.mxu0 %v5843_v31  ;;  %v3407_v62 = vrot.slane %v3405_v63, 4  ;;  %v7149_v25 = vld [vmem:[#allocation2 + $0x68] sm:$0x1]  ;;  %v3453_v18 = vshrl.u32 %v3281_v9, 16 }
 0x274   : > { %v4674_v21 = vcombine.low %v3321_v28, %v3331_v26  ;;  %v3421_v26 = vor.u32 %v3420_v19, %v7136_v4  ;;  %5434 = vmatprep.subr.bf16.mxu0 %v5844_v3 }
 0x275   : > { %5375 = vmatpush3.bf16.msra.mxu1 %v5829_v6  ;;  %v3397_v6 = vor.u32 %v3396_v38, %v7110_v36  ;;  %v3402_v38 = vrot.slane %v3400_v15, 5  ;;  %v3388_v53 = vrot.slane %v3387_v56, 4  ;;  %v3411_v41 = vor.u32 %v3410_v1, %v3407_v62 }
 0x276   : > { %5376 = vmatprep.subr.bf16.mxu1 %v5831_v40  ;;  %v3422_v34 = vrot.slane %v3421_v26, 4 }
 0x277   : > { %v3398_v51 = vrot.slane %v3397_v6, 4  ;;  %v3456_v6 = vshll.u32 %v3281_v9, 16  ;;  %5435 = vmatpush3.bf16.msra.mxu0 %v5844_v3  ;;  %v3393_v24 = vsel %vm6686_vm0, %v3388_v53, %v7110_v36  ;;  %v3412_v36 = vrot.slane %v3411_v41, 4 }
 0x278   : > { %5361 = vmatmul.mubr.bf16.gmra.mrb[12].mxu1 %v5830_v46  ;;  %v3444_v46 = vrot.slane %v3442_v35, 4  ;;  %5436 = vmatprep.subr.bf16.mxu0 %v5845_v12  ;;  %v3720_v9 = vrot.slane %v7063_v22, 5  ;;  %v3686_v22 = vld [vmem:[#allocation2 + $0x18] sm:$0xe]  ;;  %v4690_v41 = vrot.slane %v3687_v49, 9 }
 0x279   : > { %5377 = vmatpush3.bf16.msra.mxu1 %v5831_v40  ;;  %5380 = vmatprep.mubr.bf16.mxu1 %v4673_v48  ;;  %v3438_v40 = vshll.u32 %v7120_v23, 16  ;;  %v7140_v48 = vld [vmem:[#allocation2 + $0x70] sm:$0xf]  ;;  %v3403_v14 = vsel %vm6686_vm0, %v3398_v51, %v3402_v38  ;;  %v3458_v15 = vrot.slane %v3456_v6, 5  ;;  %v7162_v51 = vld [vmem:[#allocation2 + $0x74] sm:$0x1] }
 0x27a   : > { %5378 = vmatprep.subr.bf16.mxu1 %v5832_v0  ;;  %v3462_v31 = vshll.u32 %v7140_v48, 16  ;;  %v3466_v28 = vshrl.u32 %v7140_v48, 16  ;;  %v4677_v20 = vcombine.low %v3393_v24, %v3403_v14  ;;  %v5839_v14 = vld [vmem:[#allocation8 + $0x230] sm:$0xff]   ;;  %v4689_v45 = vrot.slane %v3686_v22, 9  ;;  %v3688_v24 = vld [vmem:[#allocation2 + $0x30] sm:$0xe] }
 0x27b   : > { %v7138_v17 = vrot.slane %v3438_v40, 5  ;;  %5437 = vmatpush3.bf16.msra.mxu0 %v5845_v12  ;;  %v3734_v6 = vrot.slane %v7073_v61, 5  ;;  %v3737_v61 = vrot.slane %v7094_v16, 5  ;;  %v3728_v39 = vsel %vm6626_vm13, %v4690_v41, %v3727_v13  ;;  %v5846_v41 = vld [vmem:[#allocation9 + $0x28] sm:$0xff]  }
 0x27c   : > { %v3464_v40 = vrot.slane %v3462_v31, 5  ;;  %v3468_v35 = vrot.slane %v3466_v28, 4  ;;  %v5840_v28 = vld [vmem:[#allocation8 + $0x238] sm:$0xff]   ;;  %5438 = vmatprep.subr.bf16.mxu0 %v5846_v41 }
 0x27d   : > { %5379 = vmatpush3.bf16.msra.mxu1 %v5832_v0  ;;  %v3379_v0 = vsel %vm6686_vm0, %v3374_v54, %v3378_v58  ;;  %v3445_v33 = vor.u32 %v3444_v46, %v7138_v17  ;;  %v3455_v54 = vrot.slane %v3453_v18, 4 }
 0x27e   : > { %5396 = vmatprep.subr.bf16.mxu1 %v5833_v10  ;;  %v3469_v3 = vor.u32 %v3468_v35, %v3464_v40 }
 0x27f   : > { %v3446_v56 = vrot.slane %v3445_v33, 4  ;;  %v3459_v5 = vor.u32 %v3458_v15, %v3455_v54  ;;  %v3729_v33 = vrot.slane %v3727_v13, 4  ;;  %5439 = vmatpush3.bf16.msra.mxu0 %v5846_v41 }
 0x280   : > { %5381 = vmatmul.mubr.bf16.vlgmr.msra.gmra.mrb[0].mxu1 %v4674_v21  ;;  %v3424_v21 = vshll.u32 %v7146_v27, 16  ;;  %v3470_v1 = vrot.slane %v3469_v3, 4 }
 0x281   : > { %5384 = vmatprep.mubr.bf16.mxu1 %v4675_v44  ;;  %5397 = vmatpush3.bf16.msra.mxu1 %v5833_v10  ;;  %v3369_v10 = vsel %vm6686_vm0, %v3364_v30, %v7106_v8  ;;  %v3448_v8 = vshll.u32 %v7149_v25, 16  ;;  %v3472_v44 = vshll.u32 %v7162_v51, 16  ;;  %v3417_v30 = vsel %vm6686_vm0, %v3412_v36, %v7136_v4 }
 0x282   : > { %5398 = vmatprep.subr.bf16.mxu1 %v5834_v37  ;;  %v4676_v50 = vcombine.low %v3369_v10, %v3379_v0  ;;  %v3426_v63 = vrot.slane %v3424_v21, 5  ;;  %v5838_v0 = vld [vmem:[#allocation8 + $0x228] sm:$0xff]   ;;  %v3460_v62 = vrot.slane %v3459_v5, 4  ;;  %v3723_v4 = vrot.slane %v7075_v29, 5 }
 0x283   : > { %v3450_v19 = vrot.slane %v3448_v8, 5  ;;  %v3474_v12 = vrot.slane %v3472_v44, 5  ;;  %v3721_v29 = vsel %vm6626_vm13, %v4689_v45, %v3720_v9  ;;  %v3731_v21 = vsel %vm6626_vm13, %v3729_v33, %v3730_v47 }
 0x284   : > { %v3427_v57 = vsel %vm6686_vm0, %v3422_v34, %v3426_v63  ;;  %v3465_v26 = vsel %vm6686_vm0, %v3460_v62, %v3464_v40  ;;  %v4698_v8 = vcombine.low %v3728_v39, %v3731_v21  ;;  %v3689_v40 = vld [vmem:[#allocation2 + $0x3c] sm:$0xe]  ;;  %v3751_v36 = vrot.slane %v7117_v52, 5  ;;  %v5847_v21 = vld [vmem:[#allocation9 + $0x30] sm:$0xff]  }
 0x285   : > { %5399 = vmatpush3.bf16.msra.mxu1 %v5834_v37  ;;  %v3436_v37 = vrot.slane %v3435_v7, 4  ;;  %v3451_v58 = vsel %vm6686_vm0, %v3446_v56, %v3450_v19  ;;  %v4678_v38 = vcombine.low %v3417_v30, %v3427_v57  ;;  %v3748_v7 = vrot.slane %v7085_v43, 5  ;;  %v3690_v56 = vld [vmem:[#allocation2 + $0x48] sm:$0xe]  ;;  %v3692_v30 = vld [vmem:[#allocation2 + $0x60] sm:$0xe]  ;;  %5440 = vmatprep.subr.bf16.mxu0 %v5847_v21 }
 0x286   : > { %5400 = vmatprep.subr.bf16.mxu1 %v5835_v11  ;;  %v4692_v43 = vrot.slane %v3689_v40, 9  ;;  %v3762_v57 = vrot.slane %v7120_v23, 5  ;;  %5441 = vmatpush3.bf16.msra.mxu0 %v5847_v21 }
 0x287   : > { %v3441_v46 = vsel %vm6686_vm0, %v3436_v37, %v7138_v17  ;;  %v3475_v17 = vsel %vm6686_vm0, %v3470_v1, %v3474_v12  ;;  %v3750_v35 = vrot.slane %v3748_v7, 4  ;;  %v4693_v37 = vrot.slane %v3690_v56, 9  ;;  %v3693_v1 = vld [vmem:[#allocation2 + $0x6c] sm:$0xe] }
 0x288   : > { %5385 = vmatmul.mubr.bf16.gmra.mrb[4].mxu1 %v4676_v50  ;;  %v4679_v53 = vcombine.low %v3441_v46, %v3451_v58  ;;  %v4680_v31 = vcombine.low %v3465_v26, %v3475_v17  ;;  %v3736_v50 = vrot.slane %v3734_v6, 4  ;;  %v3691_v58 = vld [vmem:[#allocation2 + $0x54] sm:$0xe] }
 0x289   : > { %5388 = vmatprep.mubr.bf16.mxu1 %v4677_v20  ;;  %5401 = vmatpush3.bf16.msra.mxu1 %v5835_v11  ;;  %v3722_v11 = vrot.slane %v3720_v9, 4  ;;  %v3741_v20 = vrot.slane %v7083_v60, 5  ;;  %v3744_v60 = vrot.slane %v7108_v59, 5  ;;  %v3752_v19 = vsel %vm6626_vm13, %v3750_v35, %v3751_v36 }
 0x28a   : > { %5402 = vmatprep.subr.bf16.mxu1 %v5836_v32  ;;  %v3738_v34 = vsel %vm6626_vm13, %v3736_v50, %v3737_v61  ;;  %v3749_v59 = vsel %vm6626_vm13, %v4693_v37, %v3748_v7  ;;  %v3764_v9 = vrot.slane %v3762_v57, 4  ;;  %v4694_v46 = vrot.slane %v3691_v58, 9 }
 0x28b   : > { %v3724_v18 = vsel %vm6626_vm13, %v3722_v11, %v3723_v4  ;;  %v3743_v15 = vrot.slane %v3741_v20, 4  ;;  %v3742_v5 = vsel %vm6626_vm13, %v4692_v43, %v3741_v20  ;;  %v4701_v52 = vcombine.low %v3749_v59, %v3752_v19  ;;  %v5848_v20 = vld [vmem:[#allocation9 + $0x38] sm:$0xff]  }
 0x28c   : > { %v4697_v10 = vcombine.low %v3721_v29, %v3724_v18  ;;  %v3772_v4 = vrot.slane %v7162_v51, 5  ;;  %5442 = vmatprep.subr.bf16.mxu0 %v5848_v20 }
 0x28d   : > { %5403 = vmatpush3.bf16.msra.mxu1 %v5836_v32  ;;  %v4691_v32 = vrot.slane %v3688_v24, 9  ;;  %v3745_v63 = vsel %vm6626_vm13, %v3743_v15, %v3744_v60  ;;  %5443 = vmatpush3.bf16.msra.mxu0 %v5848_v20 }
 0x28e   : > { %5404 = vmatprep.subr.bf16.mxu1 %v5837_v55  ;;  %v4700_v3 = vcombine.low %v3742_v5, %v3745_v63 }
 0x28f   : > { %v3735_v16 = vsel %vm6626_vm13, %v4691_v32, %v3734_v6 }
 0x290   : > { %5389 = vmatmul.mubr.bf16.gmra.mrb[8].mxu1 %v4678_v38  ;;  %v4699_v54 = vcombine.low %v3735_v16, %v3738_v34  ;;  %v3765_v38 = vrot.slane %v7149_v25, 5  ;;  %v4696_v25 = vrot.slane %v3693_v1, 9  ;;  %v7238_v34 = vld [vmem:[%s7440_s3] ss:$0 sm:$0xff] }
 0x291   : > { %5392 = vmatprep.mubr.bf16.mxu1 %v4679_v53  ;;  %5405 = vmatpush3.bf16.msra.mxu1 %v5837_v55  ;;  %v3755_v55 = vrot.slane %v7112_v2, 5  ;;  %v3758_v2 = vrot.slane %v7146_v27, 5  ;;  %v4695_v53 = vrot.slane %v3692_v30, 9 }
 0x292   : > { %5406 = vmatprep.subr.bf16.mxu1 %v5838_v0  ;;  %v3766_v62 = vsel %vm6626_vm13, %v3764_v9, %v3765_v38 }
 0x293   : > { %v3757_v44 = vrot.slane %v3755_v55, 4  ;;  %v3756_v12 = vsel %vm6626_vm13, %v4694_v46, %v3755_v55  ;;  %v3763_v27 = vsel %vm6626_vm13, %v4695_v53, %v3762_v57 }
 0x294   : > { %v4703_v22 = vcombine.low %v3763_v27, %v3766_v62 }
 0x295   : > { %5407 = vmatpush3.bf16.msra.mxu1 %v5838_v0  ;;  %v3759_v23 = vsel %vm6626_vm13, %v3757_v44, %v3758_v2  ;;  %v3769_v0 = vrot.slane %v7140_v48, 5 }
 0x296   : > { %5408 = vmatprep.subr.bf16.mxu1 %v5839_v14  ;;  %v4702_v11 = vcombine.low %v3756_v12, %v3759_v23 }
 0x297   : > { %v3770_v48 = vsel %vm6626_vm13, %v4696_v25, %v3769_v0 }
 0x298   : > { %5393 = vmatmul.mubr.bf16.gmra.mrb[12].mxu1 %v4680_v31 }
 0x299   : > { %5409 = vmatpush3.bf16.msra.mxu1 %v5839_v14  ;;  %5412 = vmatprep.mubr.bf16.mxu1 %v4697_v10  ;;  %v3771_v14 = vrot.slane %v3769_v0, 4 }
 0x29a   : > { %5410 = vmatprep.subr.bf16.mxu1 %v5840_v28 }
 0x29b   : > { %v3773_v26 = vsel %vm6626_vm13, %v3771_v14, %v3772_v4 }
 0x29c   : > { %v4704_v17 = vcombine.low %v3770_v48, %v3773_v26 }
 0x29d   : > { %5411 = vmatpush3.bf16.msra.mxu1 %v5840_v28 }
 0x2a0   : > { %5413 = vmatmul.mubr.bf16.vlgmr.msra.gmra.mrb[0].mxu1 %v4698_v8 }
 0x2a1   : > { %5416 = vmatprep.mubr.bf16.mxu1 %v4699_v54 }
 0x2a8   : > { %5417 = vmatmul.mubr.bf16.gmra.mrb[4].mxu1 %v4700_v3 }
 0x2a9   : > { %5420 = vmatprep.mubr.bf16.mxu1 %v4701_v52 }
 0x2b0   : > { %5421 = vmatmul.mubr.bf16.gmra.mrb[8].mxu1 %v4702_v11 }
 0x2b1   : > { %5424 = vmatprep.mubr.bf16.mxu1 %v4703_v22 }
 0x2b8   : > { %5425 = vmatmul.mubr.bf16.gmra.mrb[12].mxu1 %v4704_v17 }
 0x2db   : > { %v5190_v13 = vpop.f32.mrb[24].mxu0 }
 0x2dc   : > { %v1695_v45 = vpop.f32.mrb[25].mxu0 }
 0x2dd   : > { %v5191_v18 = vpop.f32.mrb[26].mxu0 }
 0x2de   : > { %v1698_v6 = vpop.f32.mrb[27].mxu0 }
 0x2e3   : > { %v5194_v31 = vpop.f32.mrb[28].mxu0 }
 0x2e4   : > { %v1711_v29 = vpop.f32.mrb[29].mxu0 }
 0x2e5   : > { %v5195_v28 = vpop.f32.mrb[30].mxu0 }
 0x2e6   : > { %v1714_v10 = vpop.f32.mrb[31].mxu0 }
 0x2eb   : > { %v5198_v33 = vpop.f32.mrb[32].mxu0 }
 0x2ec   : > { %v1727_v51 = vpop.f32.mrb[33].mxu0 }
 0x2ed   : > { %v5199_v49 = vpop.f32.mrb[34].mxu0 }
 0x2ee   : > { %v1730_v50 = vpop.f32.mrb[35].mxu0 }
 0x2f3   : > { %v7227_v47 = vpop.f32.mrb[36].mxu0 }
 0x2f4   : > { %v7229_v24 = vpop.f32.mrb[37].mxu0 }
 0x2f5   : > { %v7231_v42 = vpop.f32.mrb[38].mxu0 }
 0x2f6   : > { %v7233_v61 = vpop.f32.mrb[39].mxu0 }
 0x373   : > { %v5414_v32 = vpop.f32.mrb[0].mxu1 }
 0x374   : > { %v5460_v7 = vadd.f32 %v5414_v32, %v5190_v13  ;;  %v3905_v39 = vpop.f32.mrb[1].mxu1 }
 0x375   : > { %v5461_v8 = vadd.f32 %v3905_v39, %v1695_v45  ;;  %v5415_v16 = vpop.f32.mrb[2].mxu1 }
 0x376   : > { %v3993_v54 = vadd.f32 %v5460_v7, %v7238_v34  ;;  %v5462_v15 = vadd.f32 %v5415_v16, %v5191_v18  ;;  %v3908_v40 = vpop.f32.mrb[3].mxu1 }
 0x377   : > { %v3991_v35 = vadd.f32 %v5461_v8, %v7238_v34  ;;  %v5463_v60 = vadd.f32 %v3908_v40, %v1698_v6 }
 0x378   : > { %v3994_v56 = vadd.f32 %v5462_v15, %v7238_v34  ;;  %v4009_v43 = vmax.f32 %v3993_v54, 0.0 }
 0x379   : > { %v3992_v36 = vadd.f32 %v5463_v60, %v7238_v34  ;;  %v4007_v55 = vmax.f32 %v3991_v35, 0.0 }
 0x37a   : > { %v4010_v63 = vmax.f32 %v3994_v56, 0.0  ;;  %v4860_v56 = vld [vmem:[%s6431_s14 + $0x8] sm:$0xff]  }
 0x37b   : > { %v4008_v37 = vmax.f32 %v3992_v36, 0.0  ;;  %v5418_v19 = vpop.f32.mrb[4].mxu1  ;;  %v4789_v36 = vld [vmem:[%s6431_s14] sm:$0xff]  }
 0x37c   : > { %v4024_v57 = vpack.c.bf16 %v4010_v63, %v4009_v43  ;;  %v5464_v5 = vadd.f32 %v5418_v19, %v5194_v31  ;;  %v3921_v3 = vpop.f32.mrb[5].mxu1  ;;  %v4794_v43 = vunpack.c.l.bf16 %v4860_v56  ;;  %v4790_v63 = vunpack.c.l.bf16 %v4789_v36 }
 0x37d   : > { %v5465_v59 = vadd.f32 %v3921_v3, %v1711_v29  ;;  %v5419_v52 = vpop.f32.mrb[6].mxu1  ;;  %v4023_v44 = vpack.c.bf16 %v4008_v37, %v4007_v55  ;;  %v4795_v19 = vunpack.c.h.bf16 %v4860_v56  ;;  %v4791_v3 = vunpack.c.h.bf16 %v4789_v36  ;;  %v4866_v36 = vld [vmem:[%s6431_s14 + $0x38] sm:$0xff]  }
 0x37e   : > { %v3997_v58 = vadd.f32 %v5464_v5, %v7238_v34  ;;  %v5466_v9 = vadd.f32 %v5419_v52, %v5195_v28  ;;  %v3924_v2 = vpop.f32.mrb[7].mxu1 }
 0x37f   : > { %v3995_v30 = vadd.f32 %v5465_v59, %v7238_v34  ;;  %v5467_v38 = vadd.f32 %v3924_v2, %v1714_v10  ;;  %5444 = vmatprep.mubr.bf16.mxu0 %v4023_v44  ;;  %v4862_v2 = vld [vmem:[%s6431_s14 + $0x18] sm:$0xff]  }
 0x380   : > { %v3998_v46 = vadd.f32 %v5466_v9, %v7238_v34  ;;  %5445 = vmatmul.mubr.bf16.vlgmr.msra.gmra.mrb[40].mxu0 %v4024_v57  ;;  %v4013_v0 = vmax.f32 %v3997_v58, 0.0 }
 0x381   : > { %v3996_v23 = vadd.f32 %v5467_v38, %v7238_v34  ;;  %v4011_v62 = vmax.f32 %v3995_v30, 0.0  ;;  %v4861_v38 = vld [vmem:[%s6431_s14 + $0x10] sm:$0xff]  }
 0x382   : > { %v4014_v53 = vmax.f32 %v3998_v46, 0.0 }
 0x383   : > { %v4012_v1 = vmax.f32 %v3996_v23, 0.0  ;;  %v5422_v12 = vpop.f32.mrb[8].mxu1 }
 0x384   : > { %v5468_v11 = vadd.f32 %v5422_v12, %v5198_v33  ;;  %v3937_v27 = vpop.f32.mrb[9].mxu1  ;;  %v4026_v22 = vpack.c.bf16 %v4014_v53, %v4013_v0  ;;  %v4802_v53 = vunpack.c.l.bf16 %v4862_v2 }
 0x385   : > { %v5469_v25 = vadd.f32 %v3937_v27, %v1727_v51  ;;  %v5423_v14 = vpop.f32.mrb[10].mxu1  ;;  %v4025_v4 = vpack.c.bf16 %v4012_v1, %v4011_v62 }
 0x386   : > { %v4001_v48 = vadd.f32 %v5468_v11, %v7238_v34  ;;  %v5470_v26 = vadd.f32 %v5423_v14, %v5199_v49  ;;  %v3940_v17 = vpop.f32.mrb[11].mxu1  ;;  %v4798_v11 = vunpack.c.l.bf16 %v4861_v38  ;;  %v4803_v14 = vunpack.c.h.bf16 %v4862_v2 }
 0x387   : > { %v3999_v13 = vadd.f32 %v5469_v25, %v7238_v34  ;;  %v5471_v45 = vadd.f32 %v3940_v17, %v1730_v50  ;;  %5448 = vmatprep.mubr.bf16.mxu0 %v4025_v4  ;;  %v4799_v17 = vunpack.c.h.bf16 %v4861_v38 }
 0x388   : > { %v4002_v18 = vadd.f32 %v5470_v26, %v7238_v34  ;;  %5449 = vmatmul.mubr.bf16.gmra.mrb[44].mxu0 %v4026_v22  ;;  %v4017_v31 = vmax.f32 %v4001_v48, 0.0 }
 0x389   : > { %v4000_v6 = vadd.f32 %v5471_v45, %v7238_v34  ;;  %v4015_v28 = vmax.f32 %v3999_v13, 0.0 }
 0x38a   : > { %v4018_v29 = vmax.f32 %v4002_v18, 0.0 }
 0x38b   : > { %v4016_v10 = vmax.f32 %v4000_v6, 0.0  ;;  %v5426_v33 = vpop.f32.mrb[12].mxu1 }
 0x38c   : > { %v5472_v51 = vadd.f32 %v5426_v33, %v7227_v47  ;;  %v3953_v41 = vpop.f32.mrb[13].mxu1  ;;  %v4028_v21 = vpack.c.bf16 %v4018_v29, %v4017_v31  ;;  %v4864_v29 = vld [vmem:[%s6431_s14 + $0x28] sm:$0xff]  }
 0x38d   : > { %v5473_v49 = vadd.f32 %v3953_v41, %v7229_v24  ;;  %v5427_v20 = vpop.f32.mrb[14].mxu1  ;;  %v4027_v32 = vpack.c.bf16 %v4016_v10, %v4015_v28  ;;  %v4863_v10 = vld [vmem:[%s6431_s14 + $0x20] sm:$0xff]  }
 0x38e   : > { %v4005_v50 = vadd.f32 %v5472_v51, %v7238_v34  ;;  %v5474_v7 = vadd.f32 %v5427_v20, %v7231_v42  ;;  %v3956_v39 = vpop.f32.mrb[15].mxu1 }
 0x38f   : > { %v4003_v8 = vadd.f32 %v5473_v49, %v7238_v34  ;;  %v5475_v16 = vadd.f32 %v3956_v39, %v7233_v61  ;;  %5452 = vmatprep.mubr.bf16.mxu0 %v4027_v32  ;;  %v7265_v61 = vld [vmem:[%s7442_s6] ss:$0 sm:$0xff]  ;;  %s6104_s6 = smov [#allocation11]  }
 0x390   : > { %v4006_v47 = vadd.f32 %v5474_v7, %v7238_v34  ;;  %5453 = vmatmul.mubr.bf16.gmra.mrb[48].mxu0 %v4028_v21  ;;  %v4021_v24 = vmax.f32 %v4005_v50, 0.0  ;;  %v4810_v21 = vunpack.c.l.bf16 %v4864_v29  ;;  %v4806_v50 = vunpack.c.l.bf16 %v4863_v10  ;;  %s5968_s8 = sshll.u32 %s6104_s6, 4  ;;  %s5969_s8 = int_to_ptr.vmem [resolvable:$false] %s5968_s8 }
 0x391   : > { %v4004_v54 = vadd.f32 %v5475_v16, %v7238_v34  ;;  %v4019_v40 = vmax.f32 %v4003_v8, 0.0  ;;  %v4811_v16 = vunpack.c.h.bf16 %v4864_v29  ;;  %s5970_s21 = scalar_lea.vmem %s5969_s8, 2048  ;;  %p5971_p4 = scmp.lt.s32.totalorder %s7308_s18, %s5969_s8 }
 0x392   : > { %v4022_v15 = vmax.f32 %v4006_v47, 0.0  ;;  %p5972_p7 = scmp.lt.s32.totalorder %s5970_s21, %s5964_s15 }
 0x393   : > { %v4020_v35 = vmax.f32 %v4004_v54, 0.0 }
 0x394   : > { %v4030_v60 = vpack.c.bf16 %v4022_v15, %v4021_v24  ;;  %v4807_v15 = vunpack.c.h.bf16 %v4863_v10  ;;  %p5973_p3 = por %p5972_p7, %p5971_p4 }
 0x395   : > { %v4029_v42 = vpack.c.bf16 %v4020_v35, %v4019_v40 }
 0x396   : > { %p5974_p0 = pnand %p5973_p3, %p5967_p12 }
 0x397   : > { %5456 = vmatprep.mubr.bf16.mxu0 %v4029_v42 }
 0x398   : > { %5457 = vmatmul.mubr.bf16.gmra.mrb[52].mxu0 %v4030_v60 }
 0x453   : > { %v5446_v34 = vpop.f32.mrb[40].mxu0 }
 0x454   : > { %v4145_v55 = vadd.f32 %v5446_v34, %v7265_v61  ;;  %v4136_v37 = vpop.f32.mrb[41].mxu0  ;;  %v4865_v34 = vld [vmem:[%s6431_s14 + $0x30] sm:$0xff]   ;;  %s4357_s14 = sadd.s32 %s4787_s4, %s4742_s24 }
 0x455   : > { %v4137_v57 = vadd.f32 %v7265_v61, %v4136_v37  ;;  %v5447_v5 = vpop.f32.mrb[42].mxu0  ;;  %s4743_s1 = sshll.u32 %s4357_s14, 6 }
 0x456   : > { %v4233_v59 = vadd.f32 %v4794_v43, %v4145_v55  ;;  %v4148_v52 = vadd.f32 %v5447_v5, %v7265_v61  ;;  %v4139_v44 = vpop.f32.mrb[43].mxu0  ;;  %s7306_s3 = scalar_lea.hbm %s7445_s23, %s4743_s1 }
 0x457   : > { %v4231_v58 = vadd.f32 %v4790_v63, %v4137_v57  ;;  %v4140_v9 = vadd.f32 %v7265_v61, %v4139_v44 }
 0x458   : > { %v4234_v30 = vadd.f32 %v4795_v19, %v4148_v52  ;;  %v4249_v23 = vmax.f32 %v4233_v59, 0.0  ;;  %v4818_v19 = vunpack.c.l.bf16 %v4866_v36  ;;  %v4814_v59 = vunpack.c.l.bf16 %v4865_v34 }
 0x459   : > { %v4232_v46 = vadd.f32 %v4791_v3, %v4140_v9  ;;  %v4247_v62 = vmax.f32 %v4231_v58, 0.0  ;;  %v4819_v9 = vunpack.c.h.bf16 %v4866_v36 }
 0x45a   : > { %v4250_v0 = vmax.f32 %v4234_v30, 0.0 }
 0x45b   : > { %v4248_v1 = vmax.f32 %v4232_v46, 0.0  ;;  %v5450_v12 = vpop.f32.mrb[44].mxu0  ;;  %v4815_v46 = vunpack.c.h.bf16 %v4865_v34 }
 0x45c   : > { %v4828_v27 = vpack.c.bf16 %v4250_v0, %v4249_v23  ;;  %v4161_v22 = vadd.f32 %v5450_v12, %v7265_v61  ;;  %v4152_v25 = vpop.f32.mrb[45].mxu0 }
 0x45d   : > { %v4823_v4 = vpack.c.bf16 %v4248_v1, %v4247_v62  ;;  %v4153_v48 = vadd.f32 %v7265_v61, %v4152_v25  ;;  %v5451_v26 = vpop.f32.mrb[46].mxu0 }
 0x45e   : > { %4867 = vst [vmem:[%s7278_s12 + $0x8] sm:$0xff] %v4828_v27   ;;  %v4237_v13 = vadd.f32 %v4802_v53, %v4161_v22  ;;  %v4164_v45 = vadd.f32 %v5451_v26, %v7265_v61  ;;  %v4155_v18 = vpop.f32.mrb[47].mxu0 }
 0x45f   : > { %4824 = vst [vmem:[%s7278_s12] sm:$0xff] %v4823_v4   ;;  %v4235_v6 = vadd.f32 %v4798_v11, %v4153_v48  ;;  %v4156_v31 = vadd.f32 %v7265_v61, %v4155_v18 }
 0x460   : > { %v4238_v28 = vadd.f32 %v4803_v14, %v4164_v45  ;;  %v4253_v51 = vmax.f32 %v4237_v13, 0.0 }
 0x461   : > { %v4236_v33 = vadd.f32 %v4799_v17, %v4156_v31  ;;  %v4251_v49 = vmax.f32 %v4235_v6, 0.0 }
 0x462   : > { %v4254_v41 = vmax.f32 %v4238_v28, 0.0 }
 0x463   : > { %v4252_v20 = vmax.f32 %v4236_v33, 0.0  ;;  %v5454_v32 = vpop.f32.mrb[48].mxu0 }
 0x464   : > { %v4838_v7 = vpack.c.bf16 %v4254_v41, %v4253_v51  ;;  %v4177_v39 = vadd.f32 %v5454_v32, %v7265_v61  ;;  %v4168_v8 = vpop.f32.mrb[49].mxu0 }
 0x465   : > { %v4833_v47 = vpack.c.bf16 %v4252_v20, %v4251_v49  ;;  %v4169_v54 = vadd.f32 %v7265_v61, %v4168_v8  ;;  %v5455_v24 = vpop.f32.mrb[50].mxu0 }
 0x466   : > { %4869 = vst [vmem:[%s7278_s12 + $0x18] sm:$0xff] %v4838_v7   ;;  %v4241_v40 = vadd.f32 %v4810_v21, %v4177_v39  ;;  %v4180_v35 = vadd.f32 %v5455_v24, %v7265_v61  ;;  %v4171_v60 = vpop.f32.mrb[51].mxu0 }
 0x467   : > { %4868 = vst [vmem:[%s7278_s12 + $0x10] sm:$0xff] %v4833_v47   ;;  %v4239_v42 = vadd.f32 %v4806_v50, %v4169_v54  ;;  %v4172_v56 = vadd.f32 %v7265_v61, %v4171_v60 }
 0x468   : > { %v4242_v43 = vadd.f32 %v4811_v16, %v4180_v35  ;;  %v4257_v55 = vmax.f32 %v4241_v40, 0.0 }
 0x469   : > { %v4240_v63 = vadd.f32 %v4807_v15, %v4172_v56  ;;  %v4255_v57 = vmax.f32 %v4239_v42, 0.0 }
 0x46a   : > { %v4258_v37 = vmax.f32 %v4242_v43, 0.0 }
 0x46b   : > { %v4256_v5 = vmax.f32 %v4240_v63, 0.0  ;;  %v5458_v3 = vpop.f32.mrb[52].mxu0 }
 0x46c   : > { %v4848_v52 = vpack.c.bf16 %v4258_v37, %v4257_v55  ;;  %v4193_v44 = vadd.f32 %v5458_v3, %v7265_v61  ;;  %v4184_v58 = vpop.f32.mrb[53].mxu0 }
 0x46d   : > { %v4843_v2 = vpack.c.bf16 %v4256_v5, %v4255_v57  ;;  %v4185_v30 = vadd.f32 %v7265_v61, %v4184_v58  ;;  %v5459_v38 = vpop.f32.mrb[54].mxu0 }
 0x46e   : > { %4871 = vst [vmem:[%s7278_s12 + $0x28] sm:$0xff] %v4848_v52   ;;  %v4245_v23 = vadd.f32 %v4818_v19, %v4193_v44  ;;  %v4196_v0 = vadd.f32 %v5459_v38, %v7265_v61  ;;  %v4187_v53 = vpop.f32.mrb[55].mxu0 }
 0x46f   : > { %4870 = vst [vmem:[%s7278_s12 + $0x20] sm:$0xff] %v4843_v2   ;;  %v4243_v62 = vadd.f32 %v4814_v59, %v4185_v30  ;;  %v4188_v1 = vadd.f32 %v7265_v61, %v4187_v53 }
 0x470   : > { %v4246_v12 = vadd.f32 %v4819_v9, %v4196_v0  ;;  %v4261_v27 = vmax.f32 %v4245_v23, 0.0 }
 0x471   : > { %v4244_v11 = vadd.f32 %v4815_v46, %v4188_v1  ;;  %v4259_v25 = vmax.f32 %v4243_v62, 0.0 }
 0x472   : > { %v4262_v22 = vmax.f32 %v4246_v12, 0.0 }
 0x473   : > { %v4260_v14 = vmax.f32 %v4244_v11, 0.0 }
 0x474   : > { %v4858_v4 = vpack.c.bf16 %v4262_v22, %v4261_v27 }
 0x475   : > { %v4853_v61 = vpack.c.bf16 %v4260_v14, %v4259_v25 }
 0x476   : > { %4873 = vst [vmem:[%s7278_s12 + $0x38] sm:$0xff] %v4858_v4  }
 0x477   : > { %4872 = vst [vmem:[%s7278_s12 + $0x30] sm:$0xff] %v4853_v61  }
 0x478   : > { %5977 = shalt.err (!%p5974_p0)
}
 0x479   : > { %s5978_s16 = scalar_lea.hbm %s7306_s3, 1024  ;;  %s5982_s4 = scalar_lea.hbm %s7445_s23, 4096 }
 0x47a   : > { %p5979_p1 = scmp.ne.s32.totalorder %s7306_s3, %s5978_s16  ;;  %p5983_p2 = scmp.lt.u32.totalorder %s7306_s3, %s7445_s23 }
 0x47b   : > { %p5984_p9 = scmp.lt.u32.totalorder %s5982_s4, %s5978_s16  ;;  %p5986_p13 = scmp.lt.u32.totalorder %s5978_s16, %s7306_s3 }
 0x47c   : > { %p5980_p11 = pnand %p5979_p1, %p7446_p6 }
 0x47d   : > { %p5985_p5 = por %p5984_p9, %p5983_p2 }
 0x47e   : > { %p5981_p10 = pneg %p5980_p11 }
 0x47f   : > { %p5987_p8 = por %p5986_p13, %p5985_p5 }
 0x481   : > { %p5988_p12 = pnand %p5987_p8, %p5981_p10 }
 0x483   : > { %5991 = shalt.err (!%p5988_p12)
}
 0x484   : > { %s6105_s1 = smov 64   ;;  %s6106_s13 = smov 4  }
 0x485   : > { %5602 = dma.vmem_to_hbm [thread:$0]  (%p7446_p6), %s7308_s18, 1024, %s7306_s3, %s7314_s19, %s6105_s1, %s6105_s1, %s6106_s13  }
 0x486 PF: > { %s7447_s20 = sld [smem:[#allocation16_spill]]  ;;  %s7448_s15 = sld [smem:[#allocation20_spill]] }
 0x487   : > { %p5629_p4 = scmp.ge.s32.totalorder %s6094_s11, 2 }
 0x48c   : > { %s4375_s6 = sand.u32 1, %s7447_s20   ;;  %p7449_p7 = scmp.ne.s32.totalorder %s7448_s15, 0 }
 0x48d   : > { %s4376_s8 = scalar_lea.sflag [#allocation5], %s4375_s6 }
 0x48e   : > { %p5619_p3 = pnand %p5629_p4, %p7449_p7 }
 0x490   : > { %6049 = dma.done.wait (!%p5619_p3), %s4376_s8, 1024  }
 0x491   : > { %6051 = vsyncadd (!%p5619_p3), %s4376_s8, 4294966272  ;;  %s25_s11 = sadd.s32 1, %s6094_s11   ;;  %s7450_s24 = sld [smem:[#allocation17_spill]] }
 0x492   : > { %p22_p0 = scmp.ge.s32.totalorder %s25_s11, 6   ;;  %s7451_s25 = smov %s6062_s26 }
 0x493   : > { %s7452_s26 = smov %s6354_s27  ;;  %s7453_s27 = smov %s6070_s28 }
 0x494   : > { %s7454_s28 = smov %s6074_s29  ;;  %s7455_s29 = smov %s6349_s7 }
 0x495   : > { %s7456_s30 = smov %s6086_s9  ;;  %s7457_s8 = smov %s6090_s10 }
 0x496   : > { %s7458_s9 = smov %s7461_s17  ;;  %s7459_s10 = smov %s7465_s22 }
 0x497   :  { %24 = sbr.rel (!%p22_p0) target bundleno = 17 (0x11), region = 119 }
 0x49e   :  { %4381 = vsyncpa [#allocation4], 1 }
 0x49f   :  { %4383 = vsyncpa [#allocation4 + $0x1], 1 }
 0x4a0   :  { %4384 = vsyncpa [#allocation7], 1 }
 0x4a1   :  { %4385 = vsyncpa [#allocation10], 1 }
 0x4a2   :  { %4386 = vsyncpa [#allocation5], 1 }
 0x4a3   :  { %4388 = vsyncpa [#allocation5 + $0x1], 1 }

// kernel: tpu_custom_call.1
= control target key start
LH: loop header
LB: loop body
LE: loop exit
PB: predicated region body
PF: predicated region fallthrough
CT: control target
= control target key end

     0   :  { %s7375_s0 = inlined_call_operand.hbm [shape: bf16[2,16,16,128], index: 0, kind: input, shape index: {}]   ;;  %s7376_s1 = inlined_call_operand.hbm [shape: bf16[128,128], index: 1, kind: input, shape index: {}]   ;;  %s7377_s2 = inlined_call_operand.vmem [shape: f32[1,128], index: 2, kind: input, shape index: {}]   ;;  %s7378_s3 = inlined_call_operand.hbm [shape: bf16[9,128,128], index: 3, kind: input, shape index: {}]   ;;  %s7379_s4 = inlined_call_operand.vmem [shape: f32[1,128], index: 4, kind: input, shape index: {}]   ;;  %s7380_s5 = inlined_call_operand.hbm [shape: bf16[128,128], index: 5, kind: input, shape index: {}]   ;;  %s7381_s6 = inlined_call_operand.vmem [shape: f32[1,128], index: 6, kind: input, shape index: {}]   ;;  %s7382_s7 = inlined_call_operand.hbm [shape: bf16[2,16,16,128], index: 7, kind: output, shape index: {}]  }
   0x1   :  { %7397 = sst [smem:[#allocation21_spill]] %s7376_s1 }
   0x2   :  { %7398 = sst [smem:[#allocation22_spill]] %s7378_s3 }
   0x3   :  { %7399 = sst [smem:[#allocation23_spill]] %s7379_s4 }
   0x4   :  { %7400 = sst [smem:[#allocation24_spill]] %s7381_s6 }
   0x5   :  { %7401 = sst [smem:[#allocation25_spill]] %s7382_s7 }
   0x6   :  { %12 = vsyncpa [#allocation4], 0 }
   0x7   :  { %14 = vsyncpa [#allocation4 + $0x1], 0 }
   0x8   :  { %15 = vsyncpa [#allocation7], 0 }
   0x9   :  { %16 = vsyncpa [#allocation10], 0 }
   0xa   :  { %17 = vsyncpa [#allocation5], 0 }
   0xb   :  { %19 = vsyncpa [#allocation5 + $0x1], 0  ;;  %s6147_s24 = smov 0   ;;  %s6149_s25 = smov 0  }
   0xc   :  { %s6151_s26 = smov 0   ;;  %s6153_s27 = smov 0  }
   0xd   :  { %s6155_s28 = smov 0   ;;  %s6157_s29 = smov 0  }
   0xe   :  { %s6159_s30 = smov 0   ;;  %s6161_s8 = smov 0  }
   0xf   :  { %s6163_s9 = smov 0   ;;  %s6165_s10 = smov 0  }
  0x10   :  { %s6167_s11 = smov 0  }
  0x11 LB: > { %7402 = sst [smem:[#allocation16_spill]] %s6054_s24  ;;  %s4482_s12 = sadd.s32 4294967295, %s6094_s11   ;;  %s6094_s11 = sphi %s6167_s11, %s25_s11   ;;  %s6090_s10 = sphi %s6165_s10, %s7459_s10   ;;  %s6086_s9 = sphi %s6163_s9, %s7458_s9   ;;  %s6082_s8 = sphi %s6161_s8, %s7457_s8   ;;  %s6078_s30 = sphi %s6159_s30, %s7456_s30   ;;  %s6074_s29 = sphi %s6157_s29, %s7455_s29   ;;  %s6070_s28 = sphi %s6155_s28, %s7454_s28   ;;  %s6066_s27 = sphi %s6153_s27, %s7453_s27   ;;  %s6062_s26 = sphi %s6151_s26, %s7452_s26   ;;  %s6058_s25 = sphi %s6149_s25, %s7451_s25   ;;  %s6054_s24 = sphi %s6147_s24, %s7450_s24  }
  0x12   : > { %7403 = sst [smem:[#allocation17_spill]] %s6058_s25  ;;  %s4483_s13 = sadd.s32 4294967294, %s6094_s11  }
  0x13   : > { %7404 = sst [smem:[#allocation18_spill]] %s6082_s8  ;;  %p57_p0 = scmp.ne.s32.totalorder %s6070_s28, %s6066_s27 }
  0x14   : > { %p6203_p1 = scmp.eq.s32.totalorder %s4482_s12, 0  ;;  %p208_p2 = scmp.ne.s32.totalorder %s6062_s26, %s6058_s25 }
  0x15   : > { %p209_p4 = scmp.eq.s32.totalorder %s4482_s12, 3  ;;  %p214_p5 = scmp.ne.s32.totalorder %s6058_s25, %s6054_s24 }
  0x16   : > { %s7405_s14 = scalar_select %p6203_p1, 1, 0 }
  0x17   : > { %p6212_p3 = por %p6203_p1, %p57_p0  ;;  %p215_p6 = scmp.eq.s32.totalorder %s4483_s13, 3 }
  0x18   : > { %p6218_p7 = por %p209_p4, %p208_p2  ;;  %p4484_p8 = scmp.ge.s32.totalorder %s6094_s11, 1 }
  0x19   : > { %s7406_s16 = scalar_select %p6212_p3, 1, 0 }
  0x1a   : > { %s7407_s17 = scalar_select %p6218_p7, 1, 0 }
  0x1b   : > { %p6223_p9 = por %p215_p6, %p214_p5  ;;  %p222_p10 = scmp.lt.s32.totalorder %s6094_s11, 5 }
  0x1c   : > { %7408 = sst [smem:[#allocation19_spill]] %s7407_s17  ;;  %s6096_s20 = smov [#allocation6]  }
  0x1d   : > { %s7409_s18 = scalar_select %p6223_p9, 1, 0 }
  0x1e   : > { %p6228_p11 = pnand %p4484_p8, %p222_p10  ;;  %s234_s21 = sshll.u32 %s6096_s20, 4  ;;  %s6232_s21 = int_to_ptr.vmem [resolvable:$true] %s234_s21 }
  0x1f   : > { %7410 = sst [smem:[#allocation20_spill]] %s7409_s18  ;;  %s6097_s23 = smov [#allocation8]  }
  0x20   : > { %s7411_s19 = scalar_select %p6228_p11, 1, 0 }
  0x21   : > { %p5604_p12 = pneg %p6228_p11  ;;  %s250_s27 = sshll.u32 %s6097_s23, 4  ;;  %s6242_s27 = int_to_ptr.vmem [resolvable:$true] %s250_s27 }
  0x22   : > { %s6098_s12 = smov [#allocation9]   ;;  %s7413_s1 = sld [smem:[#allocation21_spill]] }
  0x23   : > { %p6238_p13 = pnand %p5604_p12, %p6203_p1  ;;  %s6244_s13 = sshll.u32 %s6098_s12, 4  ;;  %s267_s13 = int_to_ptr.vmem [resolvable:$true] %s6244_s13 }
  0x25   : > { %p6254_p2 = pneg %p6238_p13 }
  0x28   : > { %s5850_s20 = scalar_lea.hbm %s7413_s1, 1024 }
  0x29   : > { %p5851_p0 = scmp.ne.s32.totalorder %s7413_s1, %s5850_s20  ;;  %p5857_p6 = scmp.lt.u32.totalorder %s5850_s20, %s7413_s1 }
  0x2b   : > { %p5853_p4 = pnand %p6254_p2, %p5851_p0 }
  0x2d   : > { %p5854_p5 = pneg %p5853_p4 }
  0x2f   : > { %p5859_p8 = pnand %p5857_p6, %p5854_p5 }
  0x31   : > { %5862 = shalt.err (!%p5859_p8)
}
  0x32   : > { %s5863_s7 = scalar_lea.vmem %s6232_s21, 1024  ;;  %p5871_p7 = scmp.lt.s32.totalorder %s6232_s21, %s6232_s21 }
  0x33   : > { %p5864_p10 = scmp.ne.s32.totalorder %s6232_s21, %s5863_s7  ;;  %p5872_p1 = scmp.lt.s32.totalorder %s5863_s7, %s5863_s7 }
  0x35   : > { %p5866_p12 = pnand %p5864_p10, %p6254_p2  ;;  %p5873_p0 = por %p5872_p1, %p5871_p7 }
  0x37   : > { %p5867_p9 = pneg %p5866_p12 }
  0x39   : > { %p5874_p4 = pnand %p5873_p0, %p5867_p9 }
  0x3b   : > { %5877 = shalt.err (!%p5874_p4)
}
  0x3c   : > { %s7395_s24 = smov 64   ;;  %s7396_s15 = smov 4  }
  0x3d   : > { %5607 = dma.hbm_to_vmem [thread:$0]  (!%p6238_p13), %s7413_s1, 1024, %s6232_s21, [#allocation7], %s7395_s24, %s7395_s24, %s7396_s15  }
  0x3e   : > { %s7415_s3 = sld [smem:[#allocation22_spill]] }
  0x44   : > { %s5878_s7 = scalar_lea.hbm %s7415_s3, 9216 }
  0x45   : > { %p5879_p1 = scmp.ne.s32.totalorder %s7415_s3, %s5878_s7  ;;  %p5885_p5 = scmp.lt.u32.totalorder %s5878_s7, %s7415_s3 }
  0x47   : > { %p5881_p7 = pnand %p5879_p1, %p6254_p2 }
  0x49   : > { %p5882_p9 = pneg %p5881_p7 }
  0x4b   : > { %p5887_p6 = pnand %p5885_p5, %p5882_p9 }
  0x4d   : > { %5890 = shalt.err (!%p5887_p6)
}
  0x4e   : > { %s5891_s21 = scalar_lea.vmem %s6242_s27, 9216  ;;  %p5899_p0 = scmp.lt.s32.totalorder %s6242_s27, %s6242_s27 }
  0x4f   : > { %p5892_p8 = scmp.ne.s32.totalorder %s6242_s27, %s5891_s21  ;;  %p5900_p4 = scmp.lt.s32.totalorder %s5891_s21, %s5891_s21 }
  0x51   : > { %p5894_p10 = pnand %p5892_p8, %p6254_p2  ;;  %p5901_p1 = por %p5900_p4, %p5899_p0 }
  0x53   : > { %p5895_p12 = pneg %p5894_p10 }
  0x55   : > { %p5902_p7 = pnand %p5901_p1, %p5895_p12 }
  0x57   : > { %5905 = shalt.err (!%p5902_p7)
}
  0x58   : > { %5610 = dma.hbm_to_vmem [thread:$0]  (!%p6238_p13), %s7415_s3, 9216, %s6242_s27, [#allocation7], %s7395_s24, %s7395_s24, %s7396_s15  }
  0x59   : > { %s5906_s18 = scalar_lea.hbm %s7380_s5, 1024 }
  0x5a   : > { %p5907_p9 = scmp.ne.s32.totalorder %s7380_s5, %s5906_s18  ;;  %p5913_p8 = scmp.lt.u32.totalorder %s5906_s18, %s7380_s5 }
  0x5c   : > { %p5909_p5 = pnand %p5907_p9, %p6254_p2 }
  0x5e   : > { %p5910_p6 = pneg %p5909_p5 }
  0x60   : > { %p5915_p10 = pnand %p5913_p8, %p5910_p6 }
  0x62   : > { %5918 = shalt.err (!%p5915_p10)
}
  0x63   : > { %s5919_s21 = scalar_lea.vmem %s267_s13, 1024  ;;  %p5927_p1 = scmp.lt.s32.totalorder %s267_s13, %s267_s13 }
  0x64   : > { %p5920_p12 = scmp.ne.s32.totalorder %s267_s13, %s5919_s21  ;;  %p5928_p7 = scmp.lt.s32.totalorder %s5919_s21, %s5919_s21 }
  0x66   : > { %p5922_p0 = pnand %p5920_p12, %p6254_p2  ;;  %p5929_p3 = por %p5928_p7, %p5927_p1 }
  0x68   : > { %p5923_p4 = pneg %p5922_p0 }
  0x6a   : > { %p5930_p11 = pnand %p5929_p3, %p5923_p4 }
  0x6c   : > { %5933 = shalt.err (!%p5930_p11)
}
  0x6d   : > { %5613 = dma.hbm_to_vmem [thread:$0]  (!%p6238_p13), %s7380_s5, 1024, %s267_s13, [#allocation10], %s7395_s24, %s7395_s24, %s7396_s15  }
  0x6e   : > { %s34_s17 = sadd.s32 1, %s6086_s9  ;;  %s37_s22 = sadd.s32 1, %s6090_s10 }
  0x6f   : > { %p35_p3 = scmp.ge.s32.totalorder %s34_s17, 2  ;;  %s44_s6 = sadd.s32 1, %s6074_s29 }
  0x70   : > { %p51_p11 = scmp.ne.s32.totalorder %s6074_s29, %s6070_s28  ;;  %p52_p2 = scmp.eq.s32.totalorder %s6094_s11, 0 }
  0x71   : > { %s7461_s17 = smov (%p35_p3, %s34_s17), 0  ;;  %s7463_s22 = smov (!%p35_p3, %s37_s22), %s6090_s10 }
  0x72   : > { %s194_s25 = ssub.s32 %s6086_s9, %s7461_s17  ;;  %p39_p9 = scmp.ge.s32.totalorder %s7463_s22, 2 }
  0x73   : > { %p5625_p5 = scmp.lt.s32.totalorder %s6094_s11, 4  ;;  %p6338_p13 = por %p52_p2, %p51_p11 }
  0x74   : > { %s283_s8 = sand.u32 1, %s6074_s29   ;;  %s7465_s22 = smov (%p39_p9, %s7463_s22), 0 }
  0x75   : > { %s4489_s18 = sshll.u32 %s283_s8, 7  ;;  %s41_s20 = ssub.s32 %s6090_s10, %s7465_s22 }
  0x76   : > { %p42_p6 = scmp.eq.s32.totalorder %s41_s20, 0  ;;  %s195_s23 = sor.u32 %s194_s25, %s41_s20 }
  0x77   : > { %p196_p8 = scmp.eq.s32.totalorder %s195_s23, 0  ;;  %s4746_s12 = sshll.u32 %s6090_s10, 11 }
  0x78   : > { %s6349_s7 = scalar_select %p42_p6, %s6074_s29, %s44_s6  }
  0x79   : > { %s7417_s21 = sadd.s32 1, %s6062_s26  ;;  %s6359_s15 = scalar_lea.hbm %s7375_s0, %s4746_s12 }
  0x7a   : > { %s6354_s27 = scalar_select %p196_p8, %s6062_s26, %s7417_s21  }
  0x7b   : > { %s287_s1 = scalar_lea.vmem [#allocation3], %s4489_s18  ;;  %p6367_p10 = pnand %p5625_p5, %p6338_p13 }
  0x7c   : > { %s294_s3 = sshll.u32 %s287_s1, 4  ;;  %s6371_s25 = scalar_lea.sflag [#allocation4], %s283_s8  ;;  %s6361_s3 = int_to_ptr.vmem [resolvable:$true] %s294_s3 }
  0x7d   : > { %s5934_s24 = scalar_lea.hbm %s6359_s15, 2048  ;;  %p5936_p0 = pneg %p6367_p10 }
  0x7e   : > { %p5935_p12 = scmp.ne.s32.totalorder %s6359_s15, %s5934_s24  ;;  %s5939_s13 = scalar_lea.hbm %s7375_s0, 4096 }
  0x7f   : > { %p5940_p7 = scmp.lt.u32.totalorder %s6359_s15, %s7375_s0  ;;  %p5941_p3 = scmp.lt.u32.totalorder %s5939_s13, %s5934_s24 }
  0x80   : > { %p5937_p4 = pnand %p5936_p0, %p5935_p12  ;;  %p5943_p2 = scmp.lt.u32.totalorder %s5934_s24, %s6359_s15 }
  0x81   : > { %p5942_p11 = por %p5941_p3, %p5940_p7 }
  0x82   : > { %p5938_p1 = pneg %p5937_p4 }
  0x83   : > { %p5944_p9 = por %p5943_p2, %p5942_p11 }
  0x85   : > { %p5945_p5 = pnand %p5944_p9, %p5938_p1 }
  0x87   : > { %5948 = shalt.err (!%p5945_p5)
}
  0x88   : > { %s5949_s8 = scalar_lea.vmem %s6361_s3, 2048  ;;  %s6101_s12 = smov [#allocation3]  }
  0x89   : > { %p5950_p13 = scmp.ne.s32.totalorder %s6361_s3, %s5949_s8  ;;  %s5954_s21 = sshll.u32 %s6101_s12, 4  ;;  %s5955_s21 = int_to_ptr.vmem [resolvable:$false] %s5954_s21 }
  0x8a   : > { %s5956_s4 = scalar_lea.vmem %s5955_s21, 4096  ;;  %p5957_p12 = scmp.lt.s32.totalorder %s6361_s3, %s5955_s21 }
  0x8b   : > { %p5952_p6 = pnand %p5950_p13, %p5936_p0  ;;  %p5958_p4 = scmp.lt.s32.totalorder %s5956_s4, %s5949_s8 }
  0x8d   : > { %p5953_p8 = pneg %p5952_p6  ;;  %p5959_p7 = por %p5958_p4, %p5957_p12 }
  0x8f   : > { %p5960_p3 = pnand %p5959_p7, %p5953_p8 }
  0x91   : > { %5963 = shalt.err (!%p5960_p3)
}
  0x92   : > { %s7419_s24 = smov 4   ;;  %s7420_s1 = smov 64  }
  0x93   : > { %5617 = dma.hbm_to_vmem [thread:$0]  (!%p6367_p10), %s6359_s15, 2048, %s6361_s3, %s6371_s25, %s7420_s1, %s7420_s1, %s7419_s24  }
  0x94   : > { %p7421_p0 = scmp.ne.s32.totalorder %s7411_s19, 0 }
  0x95   : > { %s308_s18 = sand.u32 (!%p7421_p0), 1, %s6070_s28   ;;  %p7422_p1 = scmp.ne.s32.totalorder (!%p7421_p0), %s7406_s16, 0 }
  0x96   : > { %306 = sbr.rel (%p7421_p0) target bundleno = 1158 (0x486), region = 48  ;;  %s4493_s13 = sshll.u32 (!%p7421_p0), %s308_s18, 7 }
  0x97   : > { %s309_s20 = scalar_lea.sflag (!%p7421_p0), [#allocation4], %s308_s18  ;;  %s6405_s23 = scalar_lea.vmem (!%p7421_p0), [#allocation3], %s4493_s13 }
  0x9d   : > { %6037 = dma.done.wait (%p7422_p1), %s309_s20, 2048  }
  0x9e   : > { %6039 = vsyncadd (%p7422_p1), %s309_s20, 4294965248  ;;  %p7423_p11 = scmp.ne.s32.totalorder %s7405_s14, 0 }
  0xa0   : > { %6041 = dma.done.wait (%p7423_p11), [#allocation7], 10240  }
  0xa1   : > { %6043 = vsyncadd (%p7423_p11), [#allocation7], 4294957056 }
  0xa2   : > { %6045 = dma.done.wait (%p7423_p11), [#allocation10], 1024  }
  0xa3   : > { %6047 = vsyncadd (%p7423_p11), [#allocation10], 4294966272  ;;  %s4498_s3 = sshll.u32 %s6078_s30, 3  ;;  %v6420_v0 = vld [vmem:[#allocation6] sm:$0xff]   ;;  %v6422_v1 = vld [vmem:[#allocation6 + $0x8] sm:$0xff]   ;;  %s4748_s19 = sshll.u32 %s6078_s30, 6 }
  0xa4   : > { %s4518_s16 = sadd.s32 4294967295, %s4498_s3  ;;  %5068 = vmatprep.subr.bf16.mxu0 %v6420_v0  ;;  %s672_s15 = sadd.s32 8, %s4498_s3  ;;  %v6428_v2 = vld [vmem:[#allocation6 + $0x10] sm:$0xff]   ;;  %v6434_v3 = vld [vmem:[#allocation6 + $0x18] sm:$0xff]   ;;  %v5731_v5 = vld [vmem:[#allocation6 + $0x20] sm:$0xff]   ;;  %v6102_v11 = vmov 0.0  }
  0xa5   : > { %5069 = vmatpush3.bf16.msra.mxu0 %v6420_v0  ;;  %p610_p10 = scmp.gt.s32.totalorder %s4518_s16, 0  ;;  %s6431_s14 = scalar_lea.vmem %s6405_s23, %s4748_s19 [#allocation3]  ;;  %v5732_v6 = vld [vmem:[#allocation6 + $0x28] sm:$0xff]   ;;  %v5733_v7 = vld [vmem:[#allocation6 + $0x30] sm:$0xff]   ;;  %v5734_v8 = vld [vmem:[#allocation6 + $0x38] sm:$0xff]   ;;  %vm6103_vm0 = vmmov 0   ;;  %vm735_vm1 = vcmask 1040384  }
  0xa6   : > { %5070 = vmatprep.subr.bf16.mxu0 %v6422_v1  ;;  %p673_p2 = scmp.lt.s32.totalorder %s672_s15, 15  ;;  %v5735_v4 = vld [vmem:[%s6431_s14] sm:$0xff]   ;;  %v5736_v9 = vld [vmem:[%s6431_s14 + $0x8] sm:$0xff]   ;;  %v5737_v10 = vld [vmem:[%s6431_s14 + $0x10] sm:$0xff]   ;;  %vm736_vm2 = vsmask.f32 256 }
  0xa7   : > { %s7467_s16 = smov (!%p610_p10, %s4518_s16), 0  ;;  %5084 = vmatprep.mubr.bf16.mxu0 %v5735_v4  ;;  %v5738_v12 = vld [vmem:[%s6431_s14 + $0x18] sm:$0xff]   ;;  %v5739_v13 = vld [vmem:[%s6431_s14 + $0x20] sm:$0xff]   ;;  %v5740_v14 = vld [vmem:[%s6431_s14 + $0x28] sm:$0xff]   ;;  %vm768_vm4 = vsmask.f32 7938 }
  0xa8   : > { %s7469_s15 = smov (!%p673_p2, %s672_s15), 15  ;;  %s4749_s6 = sshll.u32 %s7467_s16, 3  ;;  %v5741_v15 = vld [vmem:[%s6431_s14 + $0x30] sm:$0xff]   ;;  %v5742_v16 = vld [vmem:[%s6431_s14 + $0x38] sm:$0xff]   ;;  %vm6465_vm3 = vmand %vm735_vm1, %vm736_vm2  ;;  %vm828_vm6 = vcmask 1043456   ;;  %vm1782_vm10 = vcmask 1042432  }
  0xa9   : > { %5071 = vmatpush3.bf16.msra.mxu0 %v6422_v1  ;;  %s4750_s25 = sshll.u32 %s7469_s15, 3  ;;  %s6442_s8 = scalar_lea.vmem %s6405_s23, %s4749_s6 [#allocation3]  ;;  %v744_v20 = vld [vmem:[#allocation2 + $0x18] sm:$0x1]  ;;  %vm6472_vm5 = vmand %vm735_vm1, %vm768_vm4  ;;  %v741_v23 = vld [vmem:[#allocation2 + $0xc] sm:$0x1]  ;;  %vm1783_vm11 = vcmask 1046532  }
  0xaa   : > { %5072 = vmatprep.subr.bf16.mxu0 %v6428_v2  ;;  %s6445_s12 = scalar_lea.vmem %s6405_s23, %s4750_s25 [#allocation3]  ;;  %v5743_v17 = vld [vmem:[%s6442_s8] sm:$0xff]   ;;  %v745_v21 = vsel %vm6465_vm3, 0, %v744_v20  ;;  %v742_v24 = vsel %vm6465_vm3, 0, %v741_v23  ;;  %v773_v27 = vld [vmem:[#allocation2 + $0x14] sm:$0x1]  ;;  %v5745_v53 = vld [vmem:[#allocation8 + $0x80] sm:$0xff]  }
  0xab   : > { %v5744_v18 = vld [vmem:[%s6445_s12] sm:$0xff]   ;;  %746 = vst [vmem:[#allocation2 + $0x18] sm:$0x1] %v745_v21  ;;  %743 = vst [vmem:[#allocation2 + $0xc] sm:$0x1] %v742_v24  ;;  %v774_v28 = vsel %vm6472_vm5, 0, %v773_v27  ;;  %5204 = vmatprep.subr.bf16.mxu1 %v5745_v53 }
  0xac   : > { %v776_v25 = vld [vmem:[#allocation2 + $0x20] sm:$0x1]  ;;  %775 = vst [vmem:[#allocation2 + $0x14] sm:$0x1] %v774_v28  ;;  %v750_v29 = vld [vmem:[#allocation2 + $0x30] sm:$0x1]  ;;  %5205 = vmatpush3.bf16.msra.mxu1 %v5745_v53  ;;  %vm6527_vm8 = vmand %vm828_vm6, %vm768_vm4 }
  0xad   : > { %5073 = vmatpush3.bf16.msra.mxu0 %v6428_v2  ;;  %v777_v26 = vsel %vm6472_vm5, 0, %v776_v25  ;;  %v751_v30 = vsel %vm6465_vm3, 0, %v750_v29  ;;  %v747_v31 = vld [vmem:[#allocation2 + $0x24] sm:$0x1]  ;;  %v782_v33 = vld [vmem:[#allocation2 + $0x38] sm:$0x1]  ;;  %vm6626_vm13 = vmor %vm1782_vm10, %vm1783_vm11 }
  0xae   : > { %5074 = vmatprep.subr.bf16.mxu0 %v6434_v3  ;;  %778 = vst [vmem:[#allocation2 + $0x20] sm:$0x1] %v777_v26  ;;  %752 = vst [vmem:[#allocation2 + $0x30] sm:$0x1] %v751_v30  ;;  %v748_v32 = vsel %vm6465_vm3, 0, %v747_v31  ;;  %v783_v34 = vsel %vm6472_vm5, 0, %v782_v33 }
  0xaf   : > { %749 = vst [vmem:[#allocation2 + $0x24] sm:$0x1] %v748_v32  ;;  %v779_v35 = vld [vmem:[#allocation2 + $0x2c] sm:$0x1]  ;;  %784 = vst [vmem:[#allocation2 + $0x38] sm:$0x1] %v783_v34 }
  0xb0   : > { %v780_v36 = vsel %vm6472_vm5, 0, %v779_v35  ;;  %v756_v37 = vld [vmem:[#allocation2 + $0x48] sm:$0x1]  ;;  %v753_v39 = vld [vmem:[#allocation2 + $0x3c] sm:$0x1]  ;;  %v5747_v55 = vld [vmem:[#allocation8 + $0x88] sm:$0xff]  }
  0xb1   : > { %5075 = vmatpush3.bf16.msra.mxu0 %v6434_v3  ;;  %781 = vst [vmem:[#allocation2 + $0x2c] sm:$0x1] %v780_v36  ;;  %v757_v38 = vsel %vm6465_vm3, 0, %v756_v37  ;;  %v754_v40 = vsel %vm6465_vm3, 0, %v753_v39  ;;  %v788_v41 = vld [vmem:[#allocation2 + $0x50] sm:$0x1]  ;;  %5206 = vmatprep.subr.bf16.mxu1 %v5747_v55 }
  0xb2   : > { %5076 = vmatprep.subr.bf16.mxu0 %v5731_v5  ;;  %758 = vst [vmem:[#allocation2 + $0x48] sm:$0x1] %v757_v38  ;;  %755 = vst [vmem:[#allocation2 + $0x3c] sm:$0x1] %v754_v40  ;;  %v789_v42 = vsel %vm6472_vm5, 0, %v788_v41  ;;  %v5746_v54 = vld [vmem:[#allocation8 + $0x40] sm:$0xff]   ;;  %5207 = vmatpush3.bf16.msra.mxu1 %v5747_v55 }
  0xb3   : > { %790 = vst [vmem:[#allocation2 + $0x50] sm:$0x1] %v789_v42  ;;  %v785_v43 = vld [vmem:[#allocation2 + $0x44] sm:$0x1]  ;;  %v762_v45 = vld [vmem:[#allocation2 + $0x60] sm:$0x1] }
  0xb4   : > { %v786_v44 = vsel %vm6472_vm5, 0, %v785_v43  ;;  %v763_v46 = vsel %vm6465_vm3, 0, %v762_v45  ;;  %v759_v47 = vld [vmem:[#allocation2 + $0x54] sm:$0x1]  ;;  %v794_v49 = vld [vmem:[#allocation2 + $0x68] sm:$0x1] }
  0xb5   : > { %5077 = vmatpush3.bf16.msra.mxu0 %v5731_v5  ;;  %787 = vst [vmem:[#allocation2 + $0x44] sm:$0x1] %v786_v44  ;;  %764 = vst [vmem:[#allocation2 + $0x60] sm:$0x1] %v763_v46  ;;  %v760_v48 = vsel %vm6465_vm3, 0, %v759_v47  ;;  %v795_v50 = vsel %vm6472_vm5, 0, %v794_v49 }
  0xb6   : > { %5078 = vmatprep.subr.bf16.mxu0 %v5732_v6  ;;  %761 = vst [vmem:[#allocation2 + $0x54] sm:$0x1] %v760_v48  ;;  %v791_v51 = vld [vmem:[#allocation2 + $0x5c] sm:$0x1]  ;;  %796 = vst [vmem:[#allocation2 + $0x68] sm:$0x1] %v795_v50 }
  0xb7   : > { %v792_v52 = vsel %vm6472_vm5, 0, %v791_v51  ;;  %v738_v56 = vld [vmem:[#allocation2] sm:$0x1]  ;;  %v770_v58 = vld [vmem:[#allocation2 + $0x8] sm:$0x1]  ;;  %v5751_v63 = vld [vmem:[#allocation8 + $0x98] sm:$0xff]  }
  0xb8   : > { %793 = vst [vmem:[#allocation2 + $0x5c] sm:$0x1] %v792_v52  ;;  %v739_v57 = vsel %vm6465_vm3, 0, %v738_v56  ;;  %v771_v59 = vsel %vm6472_vm5, 0, %v770_v58  ;;  %v5748_v60 = vld [vmem:[#allocation8 + $0x48] sm:$0xff]   ;;  %v5749_v61 = vld [vmem:[#allocation8 + $0x90] sm:$0xff]  }
  0xb9   : > { %5079 = vmatpush3.bf16.msra.mxu0 %v5732_v6  ;;  %740 = vst [vmem:[#allocation2] sm:$0x1] %v739_v57  ;;  %772 = vst [vmem:[#allocation2 + $0x8] sm:$0x1] %v771_v59  ;;  %5208 = vmatprep.subr.bf16.mxu1 %v5749_v61  ;;  %v5750_v62 = vld [vmem:[#allocation8 + $0x50] sm:$0xff]   ;;  %v5756_v4 = vld [vmem:[#allocation8 + $0x68] sm:$0xff]  }
  0xba   : > { %5080 = vmatprep.subr.bf16.mxu0 %v5733_v7  ;;  %5209 = vmatpush3.bf16.msra.mxu1 %v5749_v61  ;;  %vm806_vm7 = vsmask.f32 4368  ;;  %v1087_v41 = vld [vmem:[#allocation2 + $0x18] sm:$0xf]  ;;  %v1080_v49 = vld [vmem:[#allocation2 + $0xc] sm:$0xf] }
  0xbb   : > { %5210 = vmatprep.subr.bf16.mxu1 %v5751_v63  ;;  %vm6534_vm9 = vmor %vm736_vm2, %vm806_vm7  ;;  %v1091_v56 = vld [vmem:[#allocation2 + $0x20] sm:$0x1]  ;;  %p666_p9 = scmp.gt.s32.totalorder %s6078_s30, 0  ;;  %vm1176_vm14 = vsmask.f32 3328  ;;  %p729_p5 = scmp.lt.s32.totalorder %s6078_s30, 1 }
  0xbc   : > { %vm1177_vm15 = vsmask.f32 7440  ;;  %v5809_v19 = vld [vmem:[#allocation8 + $0x180] sm:$0xff]   ;;  %s7440_s3 = sld [smem:[#allocation23_spill]]  ;;  %s7441_s16 = sld [smem:[#allocation17_spill]] }
  0xbd   : > { %5081 = vmatpush3.bf16.msra.mxu0 %v5733_v7  ;;  %s6567_s24 = scalar_select %p666_p9, 1, 0 }
  0xbe   : > { %5082 = vmatprep.subr.bf16.mxu0 %v5734_v8  ;;  %5211 = vmatpush3.bf16.msra.mxu1 %v5751_v63  ;;  %s730_s1 = scalar_select %p729_p5, 1, 0 }
  0xbf   : > { %s7442_s6 = sld [smem:[#allocation24_spill]]  ;;  %s7443_s21 = sld [smem:[#allocation18_spill]] }
  0xc0   : > { %s4787_s4 = sshll.u32 %s6078_s30, 4  ;;  %s7444_s30 = sld [smem:[#allocation19_spill]] }
  0xc1   : > { %5083 = vmatpush3.bf16.msra.mxu0 %v5734_v8  ;;  %s7445_s23 = sld [smem:[#allocation25_spill]] }
  0xc2   : > { %5100 = vmatprep.subr.bf16.mxu0 %v6102_v11  ;;  %s352_s25 = sand.u32 1, %s7441_s16  }
  0xc3   : > { %s4497_s8 = sshll.u32 %s352_s25, 6  ;;  %s7314_s19 = scalar_lea.sflag [#allocation5], %s352_s25 }
  0xc4   : > { %5085 = vmatmul.mubr.bf16.vlgmr.msra.gmra.mrb[0].mxu0 %v5736_v9  ;;  %v6510_v9 = vld [vmem:[#allocation8 + $0xc0] sm:$0xff]   ;;  %s7278_s12 = scalar_lea.vmem [#allocation11], %s4497_s8 }
  0xc5   : > { %5101 = vmatpush3.bf16.msra.mxu0 %v6420_v0  ;;  %5088 = vmatprep.mubr.bf16.mxu0 %v5737_v10  ;;  %v6513_v10 = vld [vmem:[#allocation8] sm:$0xff]   ;;  %s4360_s18 = sshll.u32 %s7278_s12, 4  ;;  %s7308_s18 = int_to_ptr.vmem [resolvable:$true] %s4360_s18 }
  0xc6   : > { %5102 = vmatprep.subr.bf16.mxu0 %v6102_v11  ;;  %s5964_s15 = scalar_lea.vmem %s7308_s18, 1024  ;;  %p7446_p6 = scmp.ne.s32.totalorder %s7444_s30, 0 }
  0xc7   : > { %p5965_p13 = scmp.ne.s32.totalorder %s7308_s18, %s5964_s15 }
  0xc9   : > { %5103 = vmatpush3.bf16.msra.mxu0 %v6422_v1  ;;  %p5966_p8 = pnand %p5965_p13, %p7446_p6 }
  0xca   : > { %5104 = vmatprep.subr.bf16.mxu0 %v6102_v11 }
  0xcb   : > { %p5967_p12 = pneg %p5966_p8 }
  0xcc   : > { %5089 = vmatmul.mubr.bf16.gmra.mrb[4].mxu0 %v5738_v12 }
  0xcd   : > { %5105 = vmatpush3.bf16.msra.mxu0 %v6428_v2  ;;  %5092 = vmatprep.mubr.bf16.mxu0 %v5739_v13 }
  0xce   : > { %5106 = vmatprep.subr.bf16.mxu0 %v6102_v11 }
  0xd1   : > { %5107 = vmatpush3.bf16.msra.mxu0 %v6434_v3 }
  0xd2   : > { %5108 = vmatprep.subr.bf16.mxu0 %v6102_v11 }
  0xd4   : > { %5093 = vmatmul.mubr.bf16.gmra.mrb[8].mxu0 %v5740_v14 }
  0xd5   : > { %5109 = vmatpush3.bf16.msra.mxu0 %v5731_v5  ;;  %5096 = vmatprep.mubr.bf16.mxu0 %v5741_v15 }
  0xd6   : > { %5110 = vmatprep.subr.bf16.mxu0 %v6102_v11 }
  0xd9   : > { %5111 = vmatpush3.bf16.msra.mxu0 %v5732_v6 }
  0xda   : > { %5112 = vmatprep.subr.bf16.mxu0 %v6102_v11 }
  0xdc   : > { %5097 = vmatmul.mubr.bf16.gmra.mrb[12].mxu0 %v5742_v16 }
  0xdd   : > { %5113 = vmatpush3.bf16.msra.mxu0 %v5733_v7  ;;  %5116 = vmatprep.mubr.msk.bf16.mxu0 %vm6103_vm0, %v6102_v11 }
  0xde   : > { %5114 = vmatprep.subr.bf16.mxu0 %v6102_v11 }
  0xe1   : > { %5115 = vmatpush3.bf16.msra.mxu0 %v5734_v8 }
  0xe2   : > { %5120 = vmatprep.subr.bf16.mxu0 %v6102_v11 }
  0xe4   : > { %5117 = vmatmul.mubr.bf16.vlgmr.msra.gmra.mrb[16].mxu0 %v5743_v17 }
  0xe5   : > { %5121 = vmatpush3.bf16.msra.mxu0 %v6420_v0  ;;  %5136 = vmatprep.mubr.msk.bf16.mxu0 %vm6103_vm0, %v6102_v11  ;;  %v5752_v0 = vld [vmem:[#allocation8 + $0x58] sm:$0xff]   ;;  %vm6686_vm0 = vmor %vm1176_vm14, %vm1177_vm15 }
  0xe6   : > { %5122 = vmatprep.subr.bf16.mxu0 %v6102_v11 }
  0xe9   : > { %5123 = vmatpush3.bf16.msra.mxu0 %v6422_v1  ;;  %v5753_v1 = vld [vmem:[#allocation8 + $0xa0] sm:$0xff]  }
  0xea   : > { %5124 = vmatprep.subr.bf16.mxu0 %v6102_v11  ;;  %5212 = vmatprep.subr.bf16.mxu1 %v5753_v1 }
  0xeb   : > { %5213 = vmatpush3.bf16.msra.mxu1 %v5753_v1 }
  0xed   : > { %5125 = vmatpush3.bf16.msra.mxu0 %v6428_v2  ;;  %v5754_v2 = vld [vmem:[#allocation8 + $0x60] sm:$0xff]  }
  0xee   : > { %5126 = vmatprep.subr.bf16.mxu0 %v6102_v11 }
  0xf1   : > { %5127 = vmatpush3.bf16.msra.mxu0 %v6434_v3  ;;  %v5755_v3 = vld [vmem:[#allocation8 + $0xa8] sm:$0xff]  }
  0xf2   : > { %5128 = vmatprep.subr.bf16.mxu0 %v6102_v11  ;;  %5214 = vmatprep.subr.bf16.mxu1 %v5755_v3 }
  0xf3   : > { %5215 = vmatpush3.bf16.msra.mxu1 %v5755_v3 }
  0xf5   : > { %5129 = vmatpush3.bf16.msra.mxu0 %v5731_v5  ;;  %v5757_v5 = vld [vmem:[#allocation8 + $0xb0] sm:$0xff]  }
  0xf6   : > { %5130 = vmatprep.subr.bf16.mxu0 %v6102_v11  ;;  %5216 = vmatprep.subr.bf16.mxu1 %v5757_v5 }
  0xf7   : > { %5217 = vmatpush3.bf16.msra.mxu1 %v5757_v5 }
  0xf9   : > { %5131 = vmatpush3.bf16.msra.mxu0 %v5732_v6  ;;  %v5758_v6 = vld [vmem:[#allocation8 + $0x70] sm:$0xff]  }
  0xfa   : > { %5132 = vmatprep.subr.bf16.mxu0 %v6102_v11 }
  0xfd   : > { %5133 = vmatpush3.bf16.msra.mxu0 %v5733_v7  ;;  %v5759_v7 = vld [vmem:[#allocation8 + $0xb8] sm:$0xff]  }
  0xfe   : > { %5134 = vmatprep.subr.bf16.mxu0 %v6102_v11  ;;  %5218 = vmatprep.subr.bf16.mxu1 %v5759_v7  ;;  %v6519_v11 = vld [vmem:[%s7377_s2] ss:$0 sm:$0xff] }
  0xff   : > { %5219 = vmatpush3.bf16.msra.mxu1 %v5759_v7 }
 0x100   : > { %5236 = vmatprep.subr.bf16.mxu1 %v6510_v9 }
 0x101   : > { %5135 = vmatpush3.bf16.msra.mxu0 %v5734_v8  ;;  %v5760_v8 = vld [vmem:[#allocation8 + $0x78] sm:$0xff]  }
 0x102   : > { %5140 = vmatprep.subr.bf16.mxu0 %v5746_v54 }
 0x104   : > { %5137 = vmatmul.mubr.bf16.vlgmr.msra.gmra.mrb[20].mxu0 %v5744_v18 }
 0x105   : > { %5141 = vmatpush3.bf16.msra.mxu0 %v5746_v54 }
 0x106   : > { %5142 = vmatprep.subr.bf16.mxu0 %v5748_v60 }
 0x109   : > { %5143 = vmatpush3.bf16.msra.mxu0 %v5748_v60 }
 0x10a   : > { %5144 = vmatprep.subr.bf16.mxu0 %v5750_v62 }
 0x10d   : > { %5145 = vmatpush3.bf16.msra.mxu0 %v5750_v62  ;;  %v1084_v62 = vld [vmem:[#allocation2 + $0x14] sm:$0x1] }
 0x10e   : > { %5146 = vmatprep.subr.bf16.mxu0 %v5752_v0 }
 0x111   : > { %5147 = vmatpush3.bf16.msra.mxu0 %v5752_v0 }
 0x112   : > { %5148 = vmatprep.subr.bf16.mxu0 %v5754_v2 }
 0x115   : > { %5149 = vmatpush3.bf16.msra.mxu0 %v5754_v2 }
 0x116   : > { %5150 = vmatprep.subr.bf16.mxu0 %v5756_v4 }
 0x119   : > { %5151 = vmatpush3.bf16.msra.mxu0 %v5756_v4 }
 0x11a   : > { %5152 = vmatprep.subr.bf16.mxu0 %v5758_v6 }
 0x11d   : > { %5153 = vmatpush3.bf16.msra.mxu0 %v5758_v6 }
 0x11e   : > { %5154 = vmatprep.subr.bf16.mxu0 %v5760_v8 }
 0x121   : > { %5155 = vmatpush3.bf16.msra.mxu0 %v5760_v8 }
 0x122   : > { %5172 = vmatprep.subr.bf16.mxu0 %v6513_v10 }
 0x197   : > { %v5086_v12 = vpop.f32.mrb[0].mxu0 }
 0x198   : > { %v539_v13 = vadd.f32 %v5086_v12, %v6519_v11  ;;  %v530_v14 = vpop.f32.mrb[1].mxu0 }
 0x199   : > { %v531_v15 = vadd.f32 %v6519_v11, %v530_v14  ;;  %v5087_v16 = vpop.f32.mrb[2].mxu0 }
 0x19a   : > { %v595_v17 = vmax.f32 %v539_v13, 0.0  ;;  %v542_v18 = vadd.f32 %v5087_v16, %v6519_v11  ;;  %v533_v20 = vpop.f32.mrb[3].mxu0  ;;  %v1101_v16 = vld [vmem:[#allocation2 + $0x30] sm:$0xf] }
 0x19b   : > { %v593_v21 = vmax.f32 %v531_v15, 0.0  ;;  %v534_v23 = vadd.f32 %v6519_v11, %v533_v20 }
 0x19c   : > { %v4757_v24 = vpack.c.bf16 %v595_v17, %v595_v17  ;;  %v596_v25 = vmax.f32 %v542_v18, 0.0 }
 0x19d   : > { %v4755_v26 = vpack.c.bf16 %v593_v21, %v593_v21  ;;  %v594_v27 = vmax.f32 %v534_v23, 0.0 }
 0x19e   : > { %v937_v28 = vshrl.u32 %v4757_v24, 16  ;;  %v4758_v29 = vpack.c.bf16 %v596_v25, %v596_v25  ;;  %v940_v30 = vshll.u32 %v4757_v24, 16  ;;  %v1094_v25 = vld [vmem:[#allocation2 + $0x24] sm:$0xf] }
 0x19f   : > { %v920_v31 = vshrl.u32 %v4755_v26, 16  ;;  %v923_v32 = vshll.u32 %v4755_v26, 16  ;;  %v4756_v33 = vpack.c.bf16 %v594_v27, %v594_v27  ;;  %v5090_v34 = vpop.f32.mrb[4].mxu0 }
 0x1a0   : > { %v939_v35 = vrot.slane %v937_v28, 7  ;;  %v945_v36 = vshrl.u32 %v4758_v29, 16  ;;  %v948_v37 = vshll.u32 %v4758_v29, 16  ;;  %v555_v38 = vadd.f32 %v5090_v34, %v6519_v11  ;;  %v546_v39 = vpop.f32.mrb[5].mxu0 }
 0x1a1   : > { %v922_v42 = vrot.slane %v920_v31, 7  ;;  %v928_v43 = vshrl.u32 %v4756_v33, 16  ;;  %v931_v44 = vshll.u32 %v4756_v33, 16  ;;  %v547_v45 = vadd.f32 %v6519_v11, %v546_v39  ;;  %v5091_v46 = vpop.f32.mrb[6].mxu0 }
 0x1a2   : > { %v942_v47 = vor.u32 %v940_v30, %v939_v35  ;;  %v943_v48 = vrot.slane %v939_v35, 4  ;;  %v947_v50 = vrot.slane %v945_v36, 7  ;;  %v599_v51 = vmax.f32 %v555_v38, 0.0  ;;  %v549_v52 = vpop.f32.mrb[7].mxu0 }
 0x1a3   : > { %v925_v53 = vor.u32 %v923_v32, %v922_v42  ;;  %v926_v54 = vrot.slane %v922_v42, 4  ;;  %v930_v57 = vrot.slane %v928_v43, 7  ;;  %v597_v58 = vmax.f32 %v547_v45, 0.0 }
 0x1a4   : > { %v1088_v59 = vsel %vm6527_vm8, %v942_v47, %v1087_v41  ;;  %v950_v60 = vor.u32 %v948_v37, %v947_v50  ;;  %v952_v61 = vrot.slane %v947_v50, 4  ;;  %v4761_v63 = vpack.c.bf16 %v599_v51, %v599_v51  ;;  %v1105_v50 = vld [vmem:[#allocation2 + $0x38] sm:$0x1]  ;;  %v1098_v51 = vld [vmem:[#allocation2 + $0x2c] sm:$0x1] }
 0x1a5   : > { %1089 = vst [vmem:[#allocation2 + $0x18] sm:$0xf] %v1088_v59  ;;  %v1081_v0 = vsel %vm6527_vm8, %v925_v53, %v1080_v49  ;;  %v933_v1 = vor.u32 %v931_v44, %v930_v57  ;;  %v935_v2 = vrot.slane %v930_v57, 4  ;;  %v4759_v3 = vpack.c.bf16 %v597_v58, %v597_v58 }
 0x1a6   : > { %1082 = vst [vmem:[#allocation2 + $0xc] sm:$0xf] %v1081_v0  ;;  %v951_v4 = vsel %vm6534_vm9, %v943_v48, %v950_v60  ;;  %v1092_v5 = vsel %vm6465_vm3, %v952_v61, %v1091_v56  ;;  %v971_v6 = vshrl.u32 %v4761_v63, 16  ;;  %v974_v12 = vshll.u32 %v4761_v63, 16  ;;  %v1115_v0 = vld [vmem:[#allocation2 + $0x48] sm:$0xf] }
 0x1a7   : > { %1090 = vst [vmem:[#allocation2 + $0x1c] sm:$0xf] %v951_v4  ;;  %1093 = vst [vmem:[#allocation2 + $0x20] sm:$0x1] %v1092_v5  ;;  %v934_v7 = vsel %vm6534_vm9, %v926_v54, %v933_v1  ;;  %v1085_v8 = vsel %vm6465_vm3, %v935_v2, %v1084_v62  ;;  %v954_v13 = vshrl.u32 %v4759_v3, 16  ;;  %v5094_v14 = vpop.f32.mrb[8].mxu0  ;;  %v558_v17 = vadd.f32 %v5091_v46, %v6519_v11 }
 0x1a8   : > { %1083 = vst [vmem:[#allocation2 + $0x10] sm:$0xf] %v934_v7  ;;  %1086 = vst [vmem:[#allocation2 + $0x14] sm:$0x1] %v1085_v8  ;;  %v6550_v15 = vrot.slane %v971_v6, 7  ;;  %v550_v18 = vadd.f32 %v6519_v11, %v549_v52  ;;  %v571_v20 = vadd.f32 %v5094_v14, %v6519_v11  ;;  %v562_v21 = vpop.f32.mrb[9].mxu0 }
 0x1a9   : > { %v956_v23 = vrot.slane %v954_v13, 7  ;;  %v957_v24 = vshll.u32 %v4759_v3, 16  ;;  %v563_v26 = vadd.f32 %v6519_v11, %v562_v21  ;;  %v5095_v27 = vpop.f32.mrb[10].mxu0  ;;  %v600_v30 = vmax.f32 %v558_v17, 0.0 }
 0x1aa   : > { %v976_v28 = vor.u32 %v974_v12, %v6550_v15  ;;  %v977_v29 = vrot.slane %v6550_v15, 4  ;;  %v598_v31 = vmax.f32 %v550_v18, 0.0  ;;  %v565_v32 = vpop.f32.mrb[11].mxu0  ;;  %v603_v35 = vmax.f32 %v571_v20, 0.0  ;;  %v1108_v12 = vld [vmem:[#allocation2 + $0x3c] sm:$0xf] }
 0x1ab   : > { %v959_v33 = vor.u32 %v957_v24, %v956_v23  ;;  %v960_v34 = vrot.slane %v956_v23, 4  ;;  %v601_v36 = vmax.f32 %v563_v26, 0.0  ;;  %v4762_v38 = vpack.c.bf16 %v600_v30, %v600_v30 }
 0x1ac   : > { %v1102_v37 = vsel %vm6527_vm8, %v976_v28, %v1101_v16  ;;  %v4760_v39 = vpack.c.bf16 %v598_v31, %v598_v31  ;;  %v574_v41 = vadd.f32 %v5095_v27, %v6519_v11  ;;  %v4765_v43 = vpack.c.bf16 %v603_v35, %v603_v35 }
 0x1ad   : > { %1103 = vst [vmem:[#allocation2 + $0x30] sm:$0xf] %v1102_v37  ;;  %v1095_v42 = vsel %vm6527_vm8, %v959_v33, %v1094_v25  ;;  %v4763_v44 = vpack.c.bf16 %v601_v36, %v601_v36  ;;  %v566_v45 = vadd.f32 %v6519_v11, %v565_v32  ;;  %v979_v46 = vshrl.u32 %v4762_v38, 16  ;;  %v1119_v37 = vld [vmem:[#allocation2 + $0x50] sm:$0x1] }
 0x1ae   : > { %1096 = vst [vmem:[#allocation2 + $0x24] sm:$0xf] %v1095_v42  ;;  %v982_v47 = vshll.u32 %v4762_v38, 16  ;;  %v962_v48 = vshrl.u32 %v4760_v39, 16  ;;  %v965_v49 = vshll.u32 %v4760_v39, 16  ;;  %v1005_v52 = vshrl.u32 %v4765_v43, 16 }
 0x1af   : > { %v1008_v53 = vshll.u32 %v4765_v43, 16  ;;  %v988_v54 = vshrl.u32 %v4763_v44, 16  ;;  %v991_v56 = vshll.u32 %v4763_v44, 16  ;;  %v5098_v57 = vpop.f32.mrb[12].mxu0  ;;  %v981_v58 = vrot.slane %v979_v46, 7 }
 0x1b0   : > { %v964_v59 = vrot.slane %v962_v48, 7  ;;  %v604_v60 = vmax.f32 %v574_v41, 0.0  ;;  %v602_v61 = vmax.f32 %v566_v45, 0.0  ;;  %v578_v62 = vpop.f32.mrb[13].mxu0  ;;  %v6569_v63 = vrot.slane %v1005_v52, 7 }
 0x1b1   : > { %v6571_v1 = vrot.slane %v988_v54, 7  ;;  %v587_v2 = vadd.f32 %v5098_v57, %v6519_v11  ;;  %v579_v3 = vadd.f32 %v6519_v11, %v578_v62  ;;  %v5099_v4 = vpop.f32.mrb[14].mxu0  ;;  %v984_v5 = vor.u32 %v982_v47, %v981_v58  ;;  %v1112_v47 = vld [vmem:[#allocation2 + $0x44] sm:$0x1] }
 0x1b2   : > { %v986_v6 = vrot.slane %v981_v58, 4  ;;  %v967_v7 = vor.u32 %v965_v49, %v964_v59  ;;  %v969_v8 = vrot.slane %v964_v59, 4  ;;  %v581_v13 = vpop.f32.mrb[15].mxu0  ;;  %v1010_v14 = vor.u32 %v1008_v53, %v6569_v63 }
 0x1b3   : > { %v1011_v15 = vrot.slane %v6569_v63, 4  ;;  %v993_v16 = vor.u32 %v991_v56, %v6571_v1  ;;  %v668_v17 = vstv %s6567_s24  ;;  %v985_v18 = vsel %vm6534_vm9, %v977_v29, %v984_v5  ;;  %v1129_v5 = vld [vmem:[#allocation2 + $0x60] sm:$0xf]  ;;  %s4742_s24 = sshll.u32 %s7443_s21, 5 }
 0x1b4   : > { %v1106_v20 = vsel %vm6465_vm3, %v986_v6, %v1105_v50  ;;  %v968_v21 = vsel %vm6534_vm9, %v960_v34, %v967_v7  ;;  %v1099_v23 = vsel %vm6465_vm3, %v969_v8, %v1098_v51  ;;  %1104 = vst [vmem:[#allocation2 + $0x34] sm:$0xf] %v985_v18  ;;  %v1116_v24 = vsel %vm6527_vm8, %v1010_v14, %v1115_v0  ;;  %v1122_v6 = vld [vmem:[#allocation2 + $0x54] sm:$0xf]  ;;  %v1759_v14 = vld [vmem:[#allocation2 + $0xc] sm:$0xe] }
 0x1b5   : > { %1107 = vst [vmem:[#allocation2 + $0x38] sm:$0x1] %v1106_v20  ;;  %1097 = vst [vmem:[#allocation2 + $0x28] sm:$0xf] %v968_v21  ;;  %v1109_v25 = vsel %vm6527_vm8, %v993_v16, %v1108_v12  ;;  %v4766_v26 = vpack.c.bf16 %v604_v60, %v604_v60  ;;  %v4764_v27 = vpack.c.bf16 %v602_v61, %v602_v61  ;;  %v607_v28 = vmax.f32 %v587_v2, 0.0 }
 0x1b6   : > { %1100 = vst [vmem:[#allocation2 + $0x2c] sm:$0x1] %v1099_v23  ;;  %1117 = vst [vmem:[#allocation2 + $0x48] sm:$0xf] %v1116_v24  ;;  %v605_v29 = vmax.f32 %v579_v3, 0.0  ;;  %v590_v30 = vadd.f32 %v5099_v4, %v6519_v11  ;;  %v582_v31 = vadd.f32 %v6519_v11, %v581_v13  ;;  %v994_v32 = vrot.slane %v6571_v1, 4 }
 0x1b7   : > { %1110 = vst [vmem:[#allocation2 + $0x3c] sm:$0xf] %v1109_v25  ;;  %v1013_v33 = vshrl.u32 %v4766_v26, 16  ;;  %v1016_v34 = vshll.u32 %v4766_v26, 16  ;;  %v996_v35 = vshrl.u32 %v4764_v27, 16  ;;  %v657_v36 = vpop.f32.mrb[16].mxu0  ;;  %v4769_v38 = vpack.c.bf16 %v607_v28, %v607_v28 }
 0x1b8   : > { %v4767_v39 = vpack.c.bf16 %v605_v29, %v605_v29  ;;  %v608_v41 = vmax.f32 %v590_v30, 0.0  ;;  %v606_v42 = vmax.f32 %v582_v31, 0.0  ;;  %v5118_v43 = vpop.f32.mrb[17].mxu0  ;;  %v999_v46 = vshll.u32 %v4764_v27, 16  ;;  %v6595_v60 = vld [vmem:[#allocation2 + $0x14] sm:$0x1] }
 0x1b9   : > { %v1015_v44 = vrot.slane %v1013_v33, 7  ;;  %v998_v45 = vrot.slane %v996_v35, 7  ;;  %v658_v48 = vadd.f32 %v6519_v11, %v657_v36  ;;  %v660_v49 = vpop.f32.mrb[18].mxu0  ;;  %v1039_v50 = vshrl.u32 %v4769_v38, 16  ;;  %v6612_v21 = vld [vmem:[#allocation2 + $0x10] sm:$0xf] }
 0x1ba   : > { %v1042_v51 = vshll.u32 %v4769_v38, 16  ;;  %v1022_v52 = vshrl.u32 %v4767_v39, 16  ;;  %v1025_v53 = vshll.u32 %v4767_v39, 16  ;;  %v5119_v54 = vpop.f32.mrb[19].mxu0  ;;  %v4770_v63 = vpack.c.bf16 %v608_v41, %v608_v41  ;;  %v1133_v25 = vld [vmem:[#allocation2 + $0x68] sm:$0x1] }
 0x1bb   : > { %v1018_v56 = vor.u32 %v1016_v34, %v1015_v44  ;;  %v1020_v57 = vrot.slane %v1015_v44, 4  ;;  %v1001_v58 = vor.u32 %v999_v46, %v998_v45  ;;  %v1003_v59 = vrot.slane %v998_v45, 4  ;;  %v1126_v31 = vld [vmem:[#allocation2 + $0x5c] sm:$0x1] }
 0x1bc   : > { %v1041_v61 = vrot.slane %v1039_v50, 7  ;;  %v1024_v62 = vrot.slane %v1022_v52, 7  ;;  %v4768_v0 = vpack.c.bf16 %v606_v42, %v606_v42  ;;  %vm6607_vm12 = vcmp.eq.s32.totalorder %v668_v17, 1  ;;  %v6631_v45 = vld [vmem:[#allocation2 + $0x1c] sm:$0xf] }
 0x1bd   : > { %v1019_v1 = vsel %vm6534_vm9, %v1011_v15, %v1018_v56  ;;  %v1120_v2 = vsel %vm6465_vm3, %v1020_v57, %v1119_v37  ;;  %v1002_v3 = vsel %vm6534_vm9, %v994_v32, %v1001_v58  ;;  %v1113_v4 = vsel %vm6465_vm3, %v1003_v59, %v1112_v47  ;;  %v1760_v50 = vld [vmem:[#allocation2 + $0x18] sm:$0xe]  ;;  %v1170_v56 = vld [vmem:[#allocation2 + $0x20] sm:$0x1] }
 0x1be   : > { %1118 = vst [vmem:[#allocation2 + $0x4c] sm:$0xf] %v1019_v1  ;;  %1121 = vst [vmem:[#allocation2 + $0x50] sm:$0x1] %v1120_v2  ;;  %v1044_v7 = vor.u32 %v1042_v51, %v1041_v61  ;;  %v1027_v8 = vor.u32 %v1025_v53, %v1024_v62  ;;  %v1223_v13 = vshll.u32 %v6595_v60, 16  ;;  %v1045_v15 = vrot.slane %v1041_v61, 4 }
 0x1bf   : > { %1111 = vst [vmem:[#allocation2 + $0x40] sm:$0xf] %v1002_v3  ;;  %1114 = vst [vmem:[#allocation2 + $0x44] sm:$0x1] %v1113_v4  ;;  %v1028_v16 = vrot.slane %v1024_v62, 4  ;;  %v1047_v18 = vshrl.u32 %v4770_v63, 16  ;;  %v661_v26 = vadd.f32 %v6519_v11, %v660_v49 }
 0x1c0   : > { %v1030_v20 = vshrl.u32 %v4768_v0, 16  ;;  %v1130_v23 = vsel %vm6527_vm8, %v1044_v7, %v1129_v5  ;;  %v1123_v24 = vsel %vm6527_vm8, %v1027_v8, %v1122_v6  ;;  %v664_v17 = vmax.f32 %v658_v48, 0.0  ;;  %v6641_v51 = vld [vmem:[#allocation2 + $0xc] sm:$0xf]  ;;  %v830_v62 = vld [vmem:[#allocation2] sm:$0xf] }
 0x1c1   : > { %1131 = vst [vmem:[#allocation2 + $0x60] sm:$0xf] %v1130_v23  ;;  %1124 = vst [vmem:[#allocation2 + $0x54] sm:$0xf] %v1123_v24  ;;  %v1049_v27 = vrot.slane %v1047_v18, 7  ;;  %v1050_v28 = vshll.u32 %v4770_v63, 16 }
 0x1c2   : > { %v1032_v29 = vrot.slane %v1030_v20, 7  ;;  %v1033_v30 = vshll.u32 %v4768_v0, 16  ;;  %v670_v32 = vsel %vm6607_vm12, %v664_v17, 0.0  ;;  %v665_v33 = vmax.f32 %v661_v26, 0.0  ;;  %v834_v2 = vld [vmem:[#allocation2 + $0x8] sm:$0x1] }
 0x1c3   : > { %v4578_v34 = vrot.slane %v1759_v14, 9  ;;  %v1794_v35 = vrot.slane %v6612_v21, 5  ;;  %v1052_v36 = vor.u32 %v1050_v28, %v1049_v27  ;;  %v1054_v37 = vrot.slane %v1049_v27, 4  ;;  %v6659_v7 = vld [vmem:[#allocation2 + $0x18] sm:$0xf] }
 0x1c4   : > { %v1035_v38 = vor.u32 %v1033_v30, %v1032_v29  ;;  %v1037_v39 = vrot.slane %v1032_v29, 4  ;;  %v4751_v41 = vpack.c.bf16 %v670_v32, %v670_v32  ;;  %v671_v11 = vsel %vm6607_vm12, %v665_v33, 0.0  ;;  %v1761_v30 = vld [vmem:[#allocation2 + $0x24] sm:$0xe] }
 0x1c5   : > { %v1796_v43 = vrot.slane %v1794_v35, 4  ;;  %v1797_v44 = vrot.slane %v6595_v60, 5  ;;  %v1053_v46 = vsel %vm6534_vm9, %v1045_v15, %v1052_v36  ;;  %v1134_v47 = vsel %vm6465_vm3, %v1054_v37, %v1133_v25 }
 0x1c6   : > { %v1036_v48 = vsel %vm6534_vm9, %v1028_v16, %v1035_v38  ;;  %v1127_v49 = vsel %vm6465_vm3, %v1037_v39, %v1126_v31  ;;  %1132 = vst [vmem:[#allocation2 + $0x64] sm:$0xf] %v1053_v46  ;;  %1135 = vst [vmem:[#allocation2 + $0x68] sm:$0x1] %v1134_v47  ;;  %v809_v52 = vshrl.u32 %v4751_v41, 16  ;;  %v4752_v53 = vpack.c.bf16 %v671_v11, %v671_v11 }
 0x1c7   : > { %1125 = vst [vmem:[#allocation2 + $0x58] sm:$0xf] %v1036_v48  ;;  %1128 = vst [vmem:[#allocation2 + $0x5c] sm:$0x1] %v1127_v49  ;;  %v6645_v54 = vsel %vm6626_vm13, %v1796_v43, %v1797_v44  ;;  %v812_v57 = vshll.u32 %v4751_v41, 16  ;;  %v6647_v58 = vrot.slane %v1223_v13, 5  ;;  %v6651_v59 = vsel %vm6626_vm13, %v4578_v34, %v1794_v35 }
 0x1c8   : > { %v1801_v60 = vrot.slane %v6631_v45, 5  ;;  %v811_v61 = vrot.slane %v809_v52, 7  ;;  %v817_v63 = vshrl.u32 %v4752_v53, 16  ;;  %v4586_v0 = vcombine.low %v6651_v59, %v6645_v54  ;;  %v6672_v35 = vld [vmem:[#allocation2 + $0x28] sm:$0xf] }
 0x1c9   : > { %v1204_v1 = vshrl.u32 %v6641_v51, 16  ;;  %v4579_v3 = vrot.slane %v1760_v50, 9  ;;  %v1804_v4 = vrot.slane %v1170_v56, 5  ;;  %v1207_v5 = vshll.u32 %v6641_v51, 16  ;;  %v6678_v41 = vld [vmem:[#allocation2 + $0x2c] sm:$0x1] }
 0x1ca   : > { %v1213_v6 = vshll.u32 %v6612_v21, 16  ;;  %v814_v8 = vor.u32 %v812_v57, %v811_v61  ;;  %v819_v12 = vrot.slane %v817_v63, 7  ;;  %v820_v13 = vshll.u32 %v4752_v53, 16  ;;  %v1762_v47 = vld [vmem:[#allocation2 + $0x30] sm:$0xe] }
 0x1cb   : > { %v1206_v14 = vrot.slane %v1204_v1, 4  ;;  %v1803_v15 = vrot.slane %v1801_v60, 4  ;;  %v1209_v16 = vrot.slane %v1207_v5, 5  ;;  %v1217_v20 = vshrl.u32 %v6612_v21, 16  ;;  %v6691_v57 = vld [vmem:[#allocation2 + $0x34] sm:$0xf] }
 0x1cc   : > { %v1215_v18 = vrot.slane %v1213_v6, 5  ;;  %v815_v23 = vrot.slane %v811_v61, 4  ;;  %v831_v24 = vsel %vm6527_vm8, %v814_v8, %v830_v62  ;;  %v822_v25 = vor.u32 %v820_v13, %v819_v12  ;;  %v6771_v59 = vld [vmem:[#allocation2 + $0x40] sm:$0xf]  ;;  %v3687_v49 = vld [vmem:[#allocation2 + $0x24] sm:$0xe] }
 0x1cd   : > { %v824_v17 = vrot.slane %v819_v12, 4  ;;  %832 = vst [vmem:[#allocation2] sm:$0xf] %v831_v24  ;;  %v1210_v26 = vor.u32 %v1209_v16, %v1206_v14  ;;  %v1219_v27 = vrot.slane %v1217_v20, 4  ;;  %v1228_v28 = vshrl.u32 %v6659_v7, 16 }
 0x1ce   : > { %v1231_v29 = vshll.u32 %v6659_v7, 16  ;;  %v823_v31 = vsel %vm6534_vm9, %v815_v23, %v822_v25  ;;  %v1237_v33 = vshll.u32 %v6631_v45, 16  ;;  %v1241_v34 = vshrl.u32 %v6631_v45, 16 }
 0x1cf   : > { %v835_v32 = vsel %vm6465_vm3, %v824_v17, %v834_v2  ;;  %833 = vst [vmem:[#allocation2 + $0x4] sm:$0xf] %v823_v31  ;;  %v6676_v36 = vsel %vm6626_vm13, %v4579_v3, %v1801_v60  ;;  %v1220_v37 = vor.u32 %v1219_v27, %v1215_v18  ;;  %v1230_v38 = vrot.slane %v1228_v28, 4 }
 0x1d0   : > { %836 = vst [vmem:[#allocation2 + $0x8] sm:$0x1] %v835_v32  ;;  %v1233_v39 = vrot.slane %v1231_v29, 5  ;;  %v1211_v11 = vrot.slane %v1210_v26, 4  ;;  %v1239_v43 = vrot.slane %v1237_v33, 5  ;;  %v1243_v44 = vrot.slane %v1241_v34, 4 }
 0x1d1   : > { %v1247_v46 = vshll.u32 %v1170_v56, 16  ;;  %v6682_v48 = vsel %vm6626_vm13, %v1803_v15, %v1804_v4  ;;  %v1221_v50 = vrot.slane %v1220_v37, 4  ;;  %v1808_v53 = vrot.slane %v6672_v35, 5  ;;  %v6722_v26 = vld [vmem:[#allocation2 + $0x24] sm:$0xf] }
 0x1d2   : > { %v1234_v52 = vor.u32 %v1233_v39, %v1230_v38  ;;  %v1244_v60 = vor.u32 %v1243_v44, %v1239_v43  ;;  %v4580_v56 = vrot.slane %v1761_v30, 9  ;;  %v1811_v62 = vrot.slane %v6678_v41, 5  ;;  %v6725_v29 = vld [vmem:[#allocation2 + $0x38] sm:$0x1] }
 0x1d3   : > { %v1249_v61 = vrot.slane %v1247_v46, 5  ;;  %v1226_v63 = vsel %vm6686_vm0, %v1221_v50, %v6647_v58  ;;  %v1810_v2 = vrot.slane %v1808_v53, 4  ;;  %v4581_v3 = vrot.slane %v1762_v47, 9 }
 0x1d4   : > { %v1235_v1 = vrot.slane %v1234_v52, 4  ;;  %v1758_v4 = vld [vmem:[#allocation2] sm:$0xe]  ;;  %v4587_v5 = vcombine.low %v6676_v36, %v6682_v48  ;;  %v1216_v8 = vsel %vm6686_vm0, %v1211_v11, %v1215_v18  ;;  %v1245_v12 = vrot.slane %v1244_v60, 4 }
 0x1d5   : > { %v6699_v6 = vld [vmem:[#allocation2] sm:$0xf]  ;;  %v1815_v13 = vrot.slane %v6691_v57, 5  ;;  %v6706_v58 = vcombine.low %v1216_v8, %v1226_v63  ;;  %v6710_v16 = vsel %vm6626_vm13, %v4580_v56, %v1808_v53  ;;  %v4577_v24 = vrot.slane %v1758_v4, 9 }
 0x1d6   : > { %v1180_v14 = vshrl.u32 %v6699_v6, 16  ;;  %v1183_v15 = vshll.u32 %v6699_v6, 16  ;;  %v6712_v20 = vld [vmem:[#allocation2 + $0x4] sm:$0xf]  ;;  %v1240_v18 = vsel %vm6686_vm0, %v1235_v1, %v1239_v43  ;;  %v1250_v25 = vsel %vm6686_vm0, %v1245_v12, %v1249_v61 }
 0x1d7   : > { %v1168_v23 = vld [vmem:[#allocation2 + $0x8] sm:$0x1]  ;;  %v6720_v17 = vsel %vm6626_vm13, %v1810_v2, %v1811_v62  ;;  %v1787_v27 = vrot.slane %v6712_v20, 5  ;;  %v6729_v30 = vsel %vm6626_vm13, %v4581_v3, %v1815_v13  ;;  %v1817_v31 = vrot.slane %v1815_v13, 4  ;;  %v6733_v37 = vpop.f32.mrb[20].mxu0  ;;  %v5763_v4 = vld [vmem:[#allocation8 + $0xc8] sm:$0xff]  }
 0x1d8   : > { %v1182_v28 = vrot.slane %v1180_v14, 4  ;;  %v1199_v32 = vshll.u32 %v1168_v23, 16  ;;  %v1185_v33 = vrot.slane %v1183_v15, 5  ;;  %v1189_v34 = vshll.u32 %v6712_v20, 16  ;;  %v5138_v50 = vpop.f32.mrb[21].mxu0 }
 0x1d9   : > { %v1193_v36 = vshrl.u32 %v6712_v20, 16  ;;  %v1788_v38 = vsel %vm6626_vm13, %v4577_v24, %v1787_v27  ;;  %v1789_v39 = vrot.slane %v1787_v27, 4  ;;  %v1790_v11 = vrot.slane %v1168_v23, 5  ;;  %v6745_v56 = vpop.f32.mrb[22].mxu0  ;;  %v6747_v3 = vld [vmem:[#allocation2 + $0x30] sm:$0xf] }
 0x1da   : > { %v6737_v43 = vcombine.low %v1240_v18, %v1250_v25  ;;  %v1186_v44 = vor.u32 %v1185_v33, %v1182_v28  ;;  %v1191_v46 = vrot.slane %v1189_v34, 5  ;;  %v1818_v48 = vrot.slane %v6725_v29, 5  ;;  %v5139_v25 = vpop.f32.mrb[23].mxu0  ;;  %v6775_v50 = vld [vmem:[#allocation2 + $0x44] sm:$0x1] }
 0x1db   : > { %v1195_v47 = vrot.slane %v1193_v36, 4  ;;  %v1791_v52 = vsel %vm6626_vm13, %v1789_v39, %v1790_v11  ;;  %v1252_v53 = vshrl.u32 %v6722_v26, 16  ;;  %v1255_v60 = vshll.u32 %v6722_v26, 16  ;;  %v5764_v36 = vld [vmem:[#allocation8 + $0x8] sm:$0xff]   ;;  %v5766_v25 = vld [vmem:[#allocation8 + $0x10] sm:$0xff]  }
 0x1dc   : > { %v1261_v61 = vshll.u32 %v6672_v35, 16  ;;  %v1201_v62 = vrot.slane %v1199_v32, 5  ;;  %v4585_v63 = vcombine.low %v1788_v38, %v1791_v52  ;;  %v1187_v1 = vrot.slane %v1186_v44, 4  ;;  %v5765_v44 = vld [vmem:[#allocation8 + $0xd0] sm:$0xff]  }
 0x1dd   : > { %v1196_v2 = vor.u32 %v1195_v47, %v1191_v46  ;;  %v4588_v8 = vcombine.low %v6710_v16, %v6720_v17  ;;  %v6753_v12 = vsel %vm6626_vm13, %v1817_v31, %v1818_v48  ;;  %v1254_v13 = vrot.slane %v1252_v53, 4 }
 0x1de   : > { %v1257_v14 = vrot.slane %v1255_v60, 5  ;;  %5220 = vmatprep.mubr.bf16.mxu1 %v4585_v63  ;;  %v6755_v23 = vrot.slane %v1261_v61, 5  ;;  %v1265_v24 = vshrl.u32 %v6672_v35, 16  ;;  %v1271_v18 = vshll.u32 %v6678_v41, 16  ;;  %v5767_v60 = vld [vmem:[#allocation8 + $0xd8] sm:$0xff]  }
 0x1df   : > { %v1197_v15 = vrot.slane %v1196_v2, 4  ;;  %5221 = vmatmul.mubr.bf16.vlgmr.msra.gmra.mrb[0].mxu1 %v4586_v0  ;;  %v1276_v28 = vshrl.u32 %v6747_v3, 16  ;;  %v1279_v31 = vshll.u32 %v6747_v3, 16  ;;  %v1285_v32 = vshll.u32 %v6691_v57, 16  ;;  %v6780_v63 = vld [vmem:[#allocation2 + $0x4c] sm:$0xf] }
 0x1e0   : > { %v1258_v27 = vor.u32 %v1257_v14, %v1254_v13  ;;  %5224 = vmatprep.mubr.bf16.mxu1 %v4587_v5  ;;  %5237 = vmatpush3.bf16.msra.mxu1 %v6510_v9  ;;  %v1192_v33 = vsel %vm6686_vm0, %v1187_v1, %v1191_v46  ;;  %v1267_v34 = vrot.slane %v1265_v24, 4  ;;  %v1289_v54 = vshrl.u32 %v6691_v57, 16  ;;  %v1763_v5 = vld [vmem:[#allocation2 + $0x3c] sm:$0xe]  ;;  %v1764_v1 = vld [vmem:[#allocation2 + $0x48] sm:$0xe] }
 0x1e1   : > { %v1202_v41 = vsel %vm6686_vm0, %v1197_v15, %v1201_v62  ;;  %5238 = vmatprep.subr.bf16.mxu1 %v5763_v4  ;;  %v1278_v39 = vrot.slane %v1276_v28, 4  ;;  %v1281_v11 = vrot.slane %v1279_v31, 5  ;;  %v1287_v47 = vrot.slane %v1285_v32, 5  ;;  %v6786_v15 = vld [vmem:[#allocation2 + $0x50] sm:$0x1] }
 0x1e2   : > { %v4545_v0 = vcombine.low %v1192_v33, %v1202_v41  ;;  %v1259_v38 = vrot.slane %v1258_v27, 4  ;;  %v1268_v9 = vor.u32 %v1267_v34, %v6755_v23  ;;  %v1291_v46 = vrot.slane %v1289_v54, 4 }
 0x1e3   : > { %v1295_v48 = vshll.u32 %v6725_v29, 16  ;;  %v4589_v52 = vcombine.low %v6729_v30, %v6753_v12  ;;  %v1273_v53 = vrot.slane %v1271_v18, 5  ;;  %v1282_v61 = vor.u32 %v1281_v11, %v1278_v39  ;;  %v6788_v30 = vld [vmem:[#allocation2 + $0x3c] sm:$0xf]  ;;  %v6813_v11 = vld [vmem:[#allocation2 + $0x58] sm:$0xf] }
 0x1e4   : > { %5156 = vmatprep.mubr.bf16.mxu0 %v4545_v0  ;;  %v1822_v62 = vrot.slane %v6771_v59, 5  ;;  %5239 = vmatpush3.bf16.msra.mxu1 %v5763_v4  ;;  %v1264_v29 = vsel %vm6686_vm0, %v1259_v38, %v6755_v23  ;;  %v1269_v2 = vrot.slane %v1268_v9, 4  ;;  %v1292_v13 = vor.u32 %v1291_v46, %v1287_v47  ;;  %v6793_v4 = vld [vmem:[#allocation2 + $0x48] sm:$0xf] }
 0x1e5   : > { %5157 = vmatmul.mubr.bf16.vlgmr.msra.gmra.mrb[24].mxu0 %v6706_v58  ;;  %v4582_v14 = vrot.slane %v1763_v5, 9  ;;  %v1283_v12 = vrot.slane %v1282_v61, 4  ;;  %v1297_v24 = vrot.slane %v1295_v48, 5  ;;  %v1825_v58 = vrot.slane %v6775_v50, 5  ;;  %5240 = vmatprep.subr.bf16.mxu1 %v5765_v44  ;;  %v5769_v5 = vld [vmem:[#allocation8 + $0xe0] sm:$0xff]  }
 0x1e6   : > { %5160 = vmatprep.mubr.bf16.mxu0 %v6737_v43  ;;  %5173 = vmatpush3.bf16.msra.mxu0 %v6513_v10  ;;  %v1824_v18 = vrot.slane %v1822_v62, 4  ;;  %v1274_v23 = vsel %vm6686_vm0, %v1269_v2, %v1273_v53  ;;  %v1293_v27 = vrot.slane %v1292_v13, 4  ;;  %v4583_v28 = vrot.slane %v1764_v1, 9  ;;  %v1765_v61 = vld [vmem:[#allocation2 + $0x54] sm:$0xe] }
 0x1e7   : > { %5174 = vmatprep.subr.bf16.mxu0 %v5764_v36  ;;  %v1829_v31 = vrot.slane %v6780_v63, 5  ;;  %5225 = vmatmul.mubr.bf16.gmra.mrb[4].mxu1 %v4588_v8  ;;  %v1823_v10 = vsel %vm6626_vm13, %v4582_v14, %v1822_v62  ;;  %v1832_v32 = vrot.slane %v6786_v15, 5  ;;  %v1300_v33 = vshrl.u32 %v6788_v30, 16  ;;  %v5768_v8 = vld [vmem:[#allocation8 + $0x18] sm:$0xff]  }
 0x1e8   : > { %v1826_v43 = vsel %vm6626_vm13, %v1824_v18, %v1825_v58  ;;  %5228 = vmatprep.mubr.bf16.mxu1 %v4589_v52  ;;  %5241 = vmatpush3.bf16.msra.mxu1 %v5765_v44  ;;  %v4548_v41 = vcombine.low %v1264_v29, %v1274_v23  ;;  %v1288_v34 = vsel %vm6686_vm0, %v1283_v12, %v1287_v47  ;;  %v1303_v38 = vshll.u32 %v6788_v30, 16  ;;  %v5771_v29 = vld [vmem:[#allocation8 + $0xe8] sm:$0xff]   ;;  %v6824_v14 = vld [vmem:[#allocation2 + $0x54] sm:$0xf]  ;;  %v6827_v58 = vld [vmem:[#allocation2 + $0x5c] sm:$0x1] }
 0x1e9   : > { %v1298_v16 = vsel %vm6686_vm0, %v1293_v27, %v1297_v24  ;;  %v1831_v17 = vrot.slane %v1829_v31, 4  ;;  %5242 = vmatprep.subr.bf16.mxu1 %v5767_v60  ;;  %v4590_v54 = vcombine.low %v1823_v10, %v1826_v43  ;;  %v1302_v0 = vrot.slane %v1300_v33, 4  ;;  %v5770_v27 = vld [vmem:[#allocation8 + $0x20] sm:$0xff]  }
 0x1ea   : > { %5175 = vmatpush3.bf16.msra.mxu0 %v5764_v36  ;;  %v1309_v39 = vshll.u32 %v6771_v59, 16  ;;  %v1313_v9 = vshrl.u32 %v6771_v59, 16  ;;  %v1319_v47 = vshll.u32 %v6775_v50, 16  ;;  %v1324_v36 = vshrl.u32 %v6793_v4, 16 }
 0x1eb   : > { %5176 = vmatprep.subr.bf16.mxu0 %v5766_v25  ;;  %v1833_v44 = vsel %vm6626_vm13, %v1831_v17, %v1832_v32  ;;  %v4549_v46 = vcombine.low %v1288_v34, %v1298_v16  ;;  %v1305_v48 = vrot.slane %v1303_v38, 5  ;;  %v1327_v53 = vshll.u32 %v6793_v4, 16 }
 0x1ec   : > { %v1311_v52 = vrot.slane %v1309_v39, 5  ;;  %5243 = vmatpush3.bf16.msra.mxu1 %v5767_v60  ;;  %v1830_v62 = vsel %vm6626_vm13, %v4583_v28, %v1829_v31  ;;  %v1315_v1 = vrot.slane %v1313_v9, 4  ;;  %v1326_v2 = vrot.slane %v1324_v36, 4 }
 0x1ed   : > { %5161 = vmatmul.mubr.bf16.gmra.mrb[28].mxu0 %v4548_v41  ;;  %v1333_v13 = vshll.u32 %v6780_v63, 16  ;;  %v4591_v50 = vcombine.low %v1830_v62, %v1833_v44  ;;  %v1306_v12 = vor.u32 %v1305_v48, %v1302_v0  ;;  %v1329_v24 = vrot.slane %v1327_v53, 5  ;;  %5244 = vmatprep.subr.bf16.mxu1 %v5769_v5 }
 0x1ee   : > { %5164 = vmatprep.mubr.bf16.mxu0 %v4549_v46  ;;  %5177 = vmatpush3.bf16.msra.mxu0 %v5766_v25  ;;  %v1337_v18 = vshrl.u32 %v6780_v63, 16  ;;  %v1316_v60 = vor.u32 %v1315_v1, %v1311_v52  ;;  %v1321_v23 = vrot.slane %v1319_v47, 5  ;;  %v1836_v31 = vrot.slane %v6813_v11, 5  ;;  %v5772_v46 = vld [vmem:[#allocation8 + $0x28] sm:$0xff]  }
 0x1ef   : > { %5178 = vmatprep.subr.bf16.mxu0 %v5768_v8  ;;  %v1335_v28 = vrot.slane %v1333_v13, 5  ;;  %5229 = vmatmul.mubr.bf16.gmra.mrb[8].mxu1 %v4590_v54  ;;  %v1307_v10 = vrot.slane %v1306_v12, 4  ;;  %v1330_v43 = vor.u32 %v1329_v24, %v1326_v2  ;;  %v1343_v25 = vshll.u32 %v6786_v15, 16  ;;  %v5773_v54 = vld [vmem:[#allocation8 + $0xf0] sm:$0xff]  }
 0x1f0   : > { %v1339_v32 = vrot.slane %v1337_v18, 4  ;;  %5232 = vmatprep.mubr.bf16.mxu1 %v4591_v50  ;;  %5245 = vmatpush3.bf16.msra.mxu1 %v5769_v5  ;;  %v1317_v33 = vrot.slane %v1316_v60, 4  ;;  %v4584_v41 = vrot.slane %v1765_v61, 9  ;;  %v1838_v34 = vrot.slane %v1836_v31, 4  ;;  %v5776_v50 = vld [vmem:[#allocation8 + $0xf8] sm:$0xff]  }
 0x1f1   : > { %v1839_v16 = vrot.slane %v6827_v58, 5  ;;  %v1312_v17 = vsel %vm6686_vm0, %v1307_v10, %v1311_v52  ;;  %5246 = vmatprep.subr.bf16.mxu1 %v5771_v29  ;;  %v1331_v0 = vrot.slane %v1330_v43, 4  ;;  %v1348_v39 = vshrl.u32 %v6824_v14, 16  ;;  %v5774_v60 = vld [vmem:[#allocation2 + $0xc] sm:$0xff]   ;;  %v5780_v10 = vld [vmem:[#allocation8 + $0x100] sm:$0xff]  }
 0x1f2   : > { %5179 = vmatpush3.bf16.msra.mxu0 %v5768_v8  ;;  %v1340_v38 = vor.u32 %v1339_v32, %v1335_v28  ;;  %v1322_v15 = vsel %vm6686_vm0, %v1317_v33, %v1321_v23  ;;  %v1351_v44 = vshll.u32 %v6824_v14, 16  ;;  %v1357_v8 = vshll.u32 %v6813_v11, 16  ;;  %v5775_v23 = vld [vmem:[#allocation8 + $0x30] sm:$0xff]  }
 0x1f3   : > { %5180 = vmatprep.subr.bf16.mxu0 %v5770_v27  ;;  %v1840_v5 = vsel %vm6626_vm13, %v1838_v34, %v1839_v16  ;;  %v4550_v9 = vcombine.low %v1312_v17, %v1322_v15  ;;  %v1345_v36 = vrot.slane %v1343_v25, 5  ;;  %v1837_v48 = vsel %vm6626_vm13, %v4584_v41, %v1836_v31  ;;  %v5779_v34 = vld [vmem:[#allocation2 + $0x18] sm:$0xff]   ;;  %v5783_v16 = vld [vmem:[#allocation8 + $0x108] sm:$0xff]   ;;  %v2293_v17 = vld [vmem:[#allocation2 + $0xc] sm:$0xf] }
 0x1f4   : > { %v1341_v47 = vrot.slane %v1340_v38, 4  ;;  %5247 = vmatpush3.bf16.msra.mxu1 %v5771_v29  ;;  %v1350_v52 = vrot.slane %v1348_v39, 4  ;;  %v1353_v53 = vrot.slane %v1351_v44, 5  ;;  %v1359_v61 = vrot.slane %v1357_v8, 5  ;;  %v6855_v38 = vld [vmem:[#allocation2 + $0x10] sm:$0xf] }
 0x1f5   : > { %v1361_v62 = vshrl.u32 %v6813_v11, 16  ;;  %5165 = vmatmul.mubr.bf16.gmra.mrb[32].mxu0 %v4550_v9  ;;  %v1336_v1 = vsel %vm6686_vm0, %v1331_v0, %v1335_v28  ;;  %v4592_v13 = vcombine.low %v1837_v48, %v1840_v5  ;;  %5248 = vmatprep.subr.bf16.mxu1 %v5773_v54  ;;  %v1367_v29 = vshll.u32 %v6827_v58, 16  ;;  %v5781_v0 = vld [vmem:[#allocation2 + $0x24] sm:$0xff]   ;;  %v5789_v48 = vld [vmem:[#allocation8 + $0x118] sm:$0xff]  }
 0x1f6   : > { %v1346_v2 = vsel %vm6686_vm0, %v1341_v47, %v1345_v36  ;;  %5181 = vmatpush3.bf16.msra.mxu0 %v5770_v27  ;;  %v1354_v24 = vor.u32 %v1353_v53, %v1350_v52  ;;  %v5778_v27 = vld [vmem:[#allocation8 + $0x38] sm:$0xff]   ;;  %v4561_v41 = vcombine.low %v6699_v6, %v6712_v20  ;;  %v2321_v39 = vshll.u32 %v2293_v17, 16  ;;  %v5786_v15 = vld [vmem:[#allocation8 + $0x110] sm:$0xff]   ;;  %v6859_v20 = vld [vmem:[#allocation2 + $0x1c] sm:$0xf] }
 0x1f7   : > { %v4551_v12 = vcombine.low %v1336_v1, %v1346_v2  ;;  %v1363_v18 = vrot.slane %v1361_v62, 4  ;;  %5182 = vmatprep.subr.bf16.mxu0 %v5772_v46  ;;  %5233 = vmatmul.mubr.bf16.gmra.mrb[12].mxu1 %v4592_v13  ;;  %v1369_v32 = vrot.slane %v1367_v29, 5  ;;  %v2327_v5 = vshll.u32 %v6855_v38, 16  ;;  %v2296_v36 = vld [vmem:[#allocation2 + $0x18] sm:$0xf]  ;;  %v5787_v1 = vld [vmem:[#allocation2 + $0x3c] sm:$0xff]  }
 0x1f8   : > { %5249 = vmatpush3.bf16.msra.mxu1 %v5773_v54  ;;  %v1355_v31 = vrot.slane %v1354_v24, 4  ;;  %5252 = vmatprep.mubr.bf16.mxu1 %v5774_v60  ;;  %v2318_v54 = vshrl.u32 %v2293_v17, 16  ;;  %v2331_v6 = vshrl.u32 %v6855_v38, 16  ;;  %v4562_v44 = vcombine.low %v6641_v51, %v6612_v21  ;;  %v6869_v21 = vld [vmem:[#allocation2 + $0x14] sm:$0x1]  ;;  %v5792_v13 = vld [vmem:[#allocation8 + $0x120] sm:$0xff]  }
 0x1f9   : > { %5168 = vmatprep.mubr.bf16.mxu0 %v4551_v12  ;;  %v1364_v28 = vor.u32 %v1363_v18, %v1359_v61  ;;  %5250 = vmatprep.subr.bf16.mxu1 %v5776_v50  ;;  %v4563_v8 = vcombine.low %v6659_v7, %v6631_v45  ;;  %v2323_v47 = vrot.slane %v2321_v39, 5  ;;  %v6865_v52 = vrot.slane %v2327_v5, 5  ;;  %v6871_v7 = vld [vmem:[#allocation2 + $0x28] sm:$0xf]  ;;  %v2299_v2 = vld [vmem:[#allocation2 + $0x24] sm:$0xf] }
 0x1fa   : > { %5183 = vmatpush3.bf16.msra.mxu0 %v5772_v46  ;;  %v1360_v25 = vsel %vm6686_vm0, %v1355_v31, %v1359_v61  ;;  %v2320_v9 = vrot.slane %v2318_v54, 4  ;;  %v5785_v46 = vld [vmem:[#allocation2 + $0x30] sm:$0xff]   ;;  %v2333_v53 = vrot.slane %v2331_v6, 4  ;;  %v2351_v61 = vshll.u32 %v6859_v20, 16 }
 0x1fb   : > { %v1365_v43 = vrot.slane %v1364_v28, 4  ;;  %5184 = vmatprep.subr.bf16.mxu0 %v5775_v23  ;;  %v2355_v62 = vshrl.u32 %v6859_v20, 16  ;;  %v2342_v45 = vshrl.u32 %v2296_v36, 16  ;;  %v2345_v51 = vshll.u32 %v2296_v36, 16  ;;  %v6886_v17 = vld [vmem:[#allocation2 + $0x34] sm:$0xf] }
 0x1fc   : > { %5251 = vmatpush3.bf16.msra.mxu1 %v5776_v50  ;;  %v2324_v50 = vor.u32 %v2323_v47, %v2320_v9  ;;  %v2334_v12 = vor.u32 %v2333_v53, %v6865_v52  ;;  %v6874_v24 = vrot.slane %v2351_v61, 5  ;;  %v2337_v29 = vshll.u32 %v6869_v21, 16  ;;  %v5793_v54 = vld [vmem:[#allocation2 + $0x54] sm:$0xff]   ;;  %v2302_v5 = vld [vmem:[#allocation2 + $0x30] sm:$0xf] }
 0x1fd   : > { %v1370_v58 = vsel %vm6686_vm0, %v1365_v43, %v1369_v32  ;;  %5268 = vmatprep.subr.bf16.mxu1 %v5780_v10  ;;  %v2357_v18 = vrot.slane %v2355_v62, 4  ;;  %v2375_v60 = vshll.u32 %v6871_v7, 16  ;;  %v2344_v31 = vrot.slane %v2342_v45, 4  ;;  %v6895_v9 = vld [vmem:[#allocation2 + $0x2c] sm:$0x1] }
 0x1fe   : > { %v4552_v33 = vcombine.low %v1360_v25, %v1370_v58  ;;  %5185 = vmatpush3.bf16.msra.mxu0 %v5775_v23  ;;  %v2379_v23 = vshrl.u32 %v6871_v7, 16  ;;  %v2347_v28 = vrot.slane %v2345_v51, 5  ;;  %v2369_v43 = vshll.u32 %v2299_v2, 16  ;;  %v5795_v25 = vld [vmem:[#allocation8 + $0x128] sm:$0xff]  }
 0x1ff   : > { %5186 = vmatprep.subr.bf16.mxu0 %v5778_v27  ;;  %5253 = vmatmul.mubr.bf16.vlgmr.msra.gmra.mrb[0].mxu1 %v5779_v34  ;;  %v4564_v32 = vcombine.low %v6722_v26, %v6672_v35  ;;  %v6881_v58 = vld [vmem:[#allocation2 + $0x20] sm:$0x1]  ;;  %v2335_v34 = vrot.slane %v2334_v12, 4  ;;  %v4566_v35 = vcombine.low %v6788_v30, %v6771_v59  ;;  %v2339_v26 = vrot.slane %v2337_v29, 5 }
 0x200   : > { %5169 = vmatmul.mubr.bf16.gmra.mrb[36].mxu0 %v4552_v33  ;;  %5256 = vmatprep.mubr.bf16.mxu1 %v5781_v0  ;;  %v4565_v33 = vcombine.low %v6747_v3, %v6691_v57  ;;  %v6888_v0 = vld [vmem:[#allocation2 + $0x40] sm:$0xf]  ;;  %v6892_v39 = vrot.slane %v2375_v60, 5  ;;  %v2348_v57 = vor.u32 %v2347_v28, %v2344_v31  ;;  %v2361_v3 = vshll.u32 %v6881_v58, 16 }
 0x201   : > { %5188 = vmatprep.mubr.bf16.mxu0 %v4561_v41  ;;  %5269 = vmatpush3.bf16.msra.mxu1 %v5780_v10  ;;  %v2366_v10 = vshrl.u32 %v2299_v2, 16  ;;  %v2325_v41 = vrot.slane %v2324_v50, 4  ;;  %v2399_v47 = vshll.u32 %v6886_v17, 16  ;;  %v2403_v59 = vshrl.u32 %v6886_v17, 16  ;;  %v5797_v28 = vld [vmem:[#allocation2 + $0x60] sm:$0xff]  }
 0x202   : > { %5187 = vmatpush3.bf16.msra.mxu0 %v5778_v27  ;;  %5270 = vmatprep.subr.bf16.mxu1 %v5783_v16  ;;  %v5791_v27 = vld [vmem:[#allocation2 + $0x48] sm:$0xff]   ;;  %v2423_v30 = vshll.u32 %v6888_v0, 16  ;;  %v2427_v36 = vshrl.u32 %v6888_v0, 16  ;;  %v2340_v53 = vsel %vm6686_vm0, %v2335_v34, %v2339_v26  ;;  %v2390_v62 = vshrl.u32 %v2302_v5, 16  ;;  %v6923_v26 = vld [vmem:[#allocation2 + $0x44] sm:$0x1] }
 0x203   : > { %v2368_v6 = vrot.slane %v2366_v10, 4  ;;  %v2393_v45 = vshll.u32 %v2302_v5, 16  ;;  %v2363_v50 = vrot.slane %v2361_v3, 5  ;;  %v6908_v29 = vrot.slane %v2399_v47, 5  ;;  %v2308_v3 = vld [vmem:[#allocation2 + $0x48] sm:$0xf] }
 0x204   : > { %v2405_v60 = vrot.slane %v2403_v59, 4  ;;  %v4567_v31 = vcombine.low %v6793_v4, %v6780_v63  ;;  %v2763_v55 = vrot.slane %v6881_v58, 5 }
 0x205   : > { %5271 = vmatpush3.bf16.msra.mxu1 %v5783_v16  ;;  %v2358_v16 = vor.u32 %v2357_v18, %v6874_v24  ;;  %v2385_v18 = vshll.u32 %v6895_v9, 16 }
 0x206   : > { %5272 = vmatprep.subr.bf16.mxu1 %v5786_v15 }
 0x207   : > { %5257 = vmatmul.mubr.bf16.gmra.mrb[4].mxu1 %v5785_v46  ;;  %v5798_v46 = vld [vmem:[#allocation8 + $0x130] sm:$0xff]   ;;  %v2359_v61 = vrot.slane %v2358_v16, 4 }
 0x208   : > { %5189 = vmatmul.mubr.bf16.vlgmr.msra.gmra.mrb[24].mxu0 %v4562_v44  ;;  %5260 = vmatprep.mubr.bf16.mxu1 %v5787_v1  ;;  %v2371_v44 = vrot.slane %v2369_v43, 5  ;;  %v5800_v43 = vld [vmem:[#allocation8 + $0x138] sm:$0xff]  }
 0x209   : > { %5192 = vmatprep.mubr.bf16.mxu0 %v4563_v8  ;;  %5273 = vmatpush3.bf16.msra.mxu1 %v5786_v15  ;;  %v2381_v15 = vrot.slane %v2379_v23, 4  ;;  %v2305_v8 = vld [vmem:[#allocation2 + $0x3c] sm:$0xf]  ;;  %v2429_v23 = vrot.slane %v2427_v36, 4 }
 0x20a   : > { %5274 = vmatprep.subr.bf16.mxu1 %v5789_v48  ;;  %v2414_v51 = vshrl.u32 %v2305_v8, 16  ;;  %v2417_v2 = vshll.u32 %v2305_v8, 16  ;;  %v2372_v12 = vor.u32 %v2371_v44, %v2368_v6  ;;  %v6928_v6 = vld [vmem:[#allocation2 + $0x58] sm:$0xf]  ;;  %v4568_v44 = vcombine.low %v6824_v14, %v6813_v11 }
 0x20b   : > { %v2382_v1 = vor.u32 %v2381_v15, %v6892_v39  ;;  %v2387_v15 = vrot.slane %v2385_v18, 5  ;;  %v5801_v8 = vld [vmem:[#allocation8 + $0x140] sm:$0xff]   ;;  %v2475_v11 = vshrl.u32 %v6928_v6, 16 }
 0x20c   : > { %v2416_v34 = vrot.slane %v2414_v51, 4  ;;  %v2419_v16 = vrot.slane %v2417_v2, 5  ;;  %v2373_v4 = vrot.slane %v2372_v12, 4 }
 0x20d   : > { %5275 = vmatpush3.bf16.msra.mxu1 %v5789_v48  ;;  %v2330_v48 = vsel %vm6686_vm0, %v2325_v41, %v6865_v52  ;;  %v6910_v52 = vrot.slane %v2423_v30, 5  ;;  %v2395_v41 = vrot.slane %v2393_v45, 5  ;;  %v5802_v45 = vld [vmem:[#allocation8 + $0x148] sm:$0xff]  }
 0x20e   : > { %5276 = vmatprep.subr.bf16.mxu1 %v5792_v13  ;;  %v4617_v10 = vcombine.low %v2330_v48, %v2340_v53  ;;  %v2433_v48 = vshll.u32 %v6923_v26, 16  ;;  %v2311_v53 = vld [vmem:[#allocation2 + $0x54] sm:$0xf]  ;;  %v2378_v14 = vsel %vm6686_vm0, %v2373_v4, %v6892_v39  ;;  %v5803_v4 = vld [vmem:[#allocation8 + $0x150] sm:$0xff]  }
 0x20f   : > { %5261 = vmatmul.mubr.bf16.gmra.mrb[8].mxu1 %v5791_v27  ;;  %v6916_v27 = vld [vmem:[#allocation2 + $0x38] sm:$0x1] }
 0x210   : > { %5193 = vmatmul.mubr.bf16.gmra.mrb[28].mxu0 %v4564_v32  ;;  %5264 = vmatprep.mubr.bf16.mxu1 %v5793_v54  ;;  %v2364_v32 = vsel %vm6686_vm0, %v2359_v61, %v2363_v50  ;;  %v6918_v54 = vld [vmem:[#allocation2 + $0x4c] sm:$0xf]  ;;  %v2409_v5 = vshll.u32 %v6916_v27, 16  ;;  %v2438_v61 = vshrl.u32 %v2308_v3, 16  ;;  %v6942_v50 = vld [vmem:[#allocation2 + $0x50] sm:$0x1] }
 0x211   : > { %5196 = vmatprep.mubr.bf16.mxu0 %v4565_v33  ;;  %5277 = vmatpush3.bf16.msra.mxu1 %v5792_v13  ;;  %v2349_v13 = vrot.slane %v2348_v57, 4  ;;  %v2392_v33 = vrot.slane %v2390_v62, 4  ;;  %v2430_v57 = vor.u32 %v2429_v23, %v6910_v52  ;;  %v2447_v47 = vshll.u32 %v6918_v54, 16 }
 0x212   : > { %5278 = vmatprep.subr.bf16.mxu1 %v5795_v25  ;;  %v2451_v59 = vshrl.u32 %v6918_v54, 16  ;;  %v2441_v62 = vshll.u32 %v2308_v3, 16  ;;  %v2411_v2 = vrot.slane %v2409_v5, 5  ;;  %v2465_v23 = vshll.u32 %v2311_v53, 16 }
 0x213   : > { %v2354_v63 = vsel %vm6686_vm0, %v2349_v13, %v6874_v24  ;;  %v2396_v36 = vor.u32 %v2395_v41, %v2392_v33  ;;  %v2431_v13 = vrot.slane %v2430_v57, 4  ;;  %v6944_v12 = vrot.slane %v2447_v47, 5  ;;  %v2314_v57 = vld [vmem:[#allocation2 + $0x60] sm:$0xf] }
 0x214   : > { %v4618_v24 = vcombine.low %v2354_v63, %v2364_v32  ;;  %v2453_v18 = vrot.slane %v2451_v59, 4  ;;  %v6946_v32 = vld [vmem:[#allocation2 + $0x64] sm:$0xf]  ;;  %v2440_v39 = vrot.slane %v2438_v61, 4  ;;  %v2443_v33 = vrot.slane %v2441_v62, 5  ;;  %v5804_v62 = vld [vmem:[#allocation8 + $0x158] sm:$0xff]  }
 0x215   : > { %5279 = vmatpush3.bf16.msra.mxu1 %v5795_v25  ;;  %v2383_v25 = vrot.slane %v2382_v1, 4  ;;  %v2471_v1 = vshll.u32 %v6928_v6, 16  ;;  %v2477_v41 = vrot.slane %v2475_v11, 4  ;;  %v2457_v63 = vshll.u32 %v6942_v50, 16 }
 0x216   : > { %5280 = vmatprep.subr.bf16.mxu1 %v5798_v46  ;;  %v2467_v5 = vrot.slane %v2465_v23, 5  ;;  %v2495_v3 = vshll.u32 %v6946_v32, 16  ;;  %v2486_v61 = vshrl.u32 %v2314_v57, 16 }
 0x217   : > { %5265 = vmatmul.mubr.bf16.gmra.mrb[12].mxu1 %v5797_v28  ;;  %v2388_v30 = vsel %vm6686_vm0, %v2383_v25, %v2387_v15  ;;  %v2397_v28 = vrot.slane %v2396_v36, 4  ;;  %v6949_v25 = vrot.slane %v2471_v1, 5  ;;  %v2454_v15 = vor.u32 %v2453_v18, %v6944_v12 }
 0x218   : > { %5197 = vmatmul.mubr.bf16.gmra.mrb[32].mxu0 %v4566_v35  ;;  %5284 = vmatprep.mubr.bf16.mxu1 %v4617_v10  ;;  %v2406_v35 = vor.u32 %v2405_v60, %v6908_v29  ;;  %v2462_v60 = vshrl.u32 %v2311_v53, 16  ;;  %v2459_v53 = vrot.slane %v2457_v63, 5  ;;  %v731_v18 = vstv %s730_s1  ;;  %v6986_v63 = vld [vmem:[#allocation2 + $0x68] sm:$0x1] }
 0x219   : > { %5200 = vmatprep.mubr.bf16.mxu0 %v4567_v31  ;;  %5281 = vmatpush3.bf16.msra.mxu1 %v5798_v46  ;;  %v2420_v46 = vor.u32 %v2419_v16, %v2416_v34  ;;  %v4619_v31 = vcombine.low %v2378_v14, %v2388_v30  ;;  %v2444_v30 = vor.u32 %v2443_v33, %v2440_v39  ;;  %v2455_v1 = vrot.slane %v2454_v15, 4 }
 0x21a   : > { %5282 = vmatprep.subr.bf16.mxu1 %v5800_v43  ;;  %v2407_v51 = vrot.slane %v2406_v35, 4  ;;  %v2464_v35 = vrot.slane %v2462_v60, 4  ;;  %v2478_v36 = vor.u32 %v2477_v41, %v6949_v25  ;;  %vm6979_vm1 = vcmp.eq.s32.totalorder %v731_v18, 1  ;;  %v5805_v41 = vld [vmem:[#allocation8 + $0x160] sm:$0xff]  }
 0x21b   : > { %v2421_v10 = vrot.slane %v2420_v46, 4  ;;  %v765_v46 = vld [vmem:[#allocation2 + $0x6c] sm:$0x1]  ;;  %v2445_v23 = vrot.slane %v2444_v30, 4 }
 0x21c   : > { %v2412_v34 = vsel %vm6686_vm0, %v2407_v51, %v2411_v2  ;;  %v2468_v11 = vor.u32 %v2467_v5, %v2464_v35  ;;  %v6971_v51 = vrot.slane %v2495_v3, 5  ;;  %v797_v2 = vld [vmem:[#allocation2 + $0x74] sm:$0x1]  ;;  %v766_v60 = vsel %vm6465_vm3, 0, %v765_v46 }
 0x21d   : > { %5283 = vmatpush3.bf16.msra.mxu1 %v5800_v43  ;;  %v2435_v43 = vrot.slane %v2433_v48, 5  ;;  %v2426_v59 = vsel %vm6686_vm0, %v2421_v10, %v6910_v52  ;;  %v5849_v52 = vld [vmem:[%s7377_s2] ss:$0 sm:$0xff]  ;;  %767 = vst [vmem:[#allocation2 + $0x6c] sm:$0x1] %v766_v60  ;;  %v2460_v35 = vsel %vm6686_vm0, %v2455_v1, %v2459_v53  ;;  %v2753_v5 = vrot.slane %v6855_v38, 5 }
 0x21e   : > { %5300 = vmatprep.subr.bf16.mxu1 %v5801_v8  ;;  %v724_v10 = vadd.f32 %v5849_v52, %v6745_v56  ;;  %v5806_v38 = vld [vmem:[#allocation8 + $0x168] sm:$0xff]   ;;  %v2719_v1 = vld [vmem:[#allocation2 + $0xc] sm:$0xe] }
 0x21f   : > { %v2436_v16 = vsel %vm6686_vm0, %v2431_v13, %v2435_v43  ;;  %v2488_v43 = vrot.slane %v2486_v61, 4 }
 0x220   : > { %5201 = vmatmul.mubr.bf16.gmra.mrb[36].mxu0 %v4568_v44  ;;  %5285 = vmatmul.mubr.bf16.vlgmr.msra.gmra.mrb[0].mxu1 %v4618_v24  ;;  %v2402_v44 = vsel %vm6686_vm0, %v2397_v28, %v6908_v29  ;;  %v6961_v24 = vld [vmem:[#allocation2 + $0x5c] sm:$0x1]  ;;  %v4621_v48 = vcombine.low %v2426_v59, %v2436_v16  ;;  %v2489_v29 = vshll.u32 %v2314_v57, 16  ;;  %v728_v15 = vmax.f32 %v724_v10, 0.0 }
 0x221   : > { %5288 = vmatprep.mubr.bf16.mxu1 %v4619_v31  ;;  %5301 = vmatpush3.bf16.msra.mxu1 %v5801_v8  ;;  %v2499_v8 = vshrl.u32 %v6946_v32, 16  ;;  %v4620_v47 = vcombine.low %v2402_v44, %v2412_v34  ;;  %v2481_v14 = vshll.u32 %v6961_v24, 16  ;;  %v2479_v31 = vrot.slane %v2478_v36, 4 }
 0x222   : > { %5302 = vmatprep.subr.bf16.mxu1 %v5802_v45  ;;  %v2491_v39 = vrot.slane %v2489_v29, 5  ;;  %v2469_v34 = vrot.slane %v2468_v11, 4  ;;  %v734_v3 = vsel %vm6979_vm1, %v728_v15, 0.0  ;;  %v2450_v44 = vsel %vm6686_vm0, %v2445_v23, %v6944_v12  ;;  %v5808_v15 = vld [vmem:[#allocation8 + $0x178] sm:$0xff]  }
 0x223   : > { %v2501_v13 = vrot.slane %v2499_v8, 4  ;;  %v2483_v16 = vrot.slane %v2481_v14, 5  ;;  %v4754_v59 = vpack.c.bf16 %v734_v3, %v734_v3  ;;  %v4622_v30 = vcombine.low %v2450_v44, %v2460_v35 }
 0x224   : > { %v2492_v8 = vor.u32 %v2491_v39, %v2488_v43  ;;  %v2474_v36 = vsel %vm6686_vm0, %v2469_v34, %v6949_v25  ;;  %v2755_v12 = vrot.slane %v2753_v5, 4  ;;  %v2756_v25 = vrot.slane %v6869_v21, 5 }
 0x225   : > { %5303 = vmatpush3.bf16.msra.mxu1 %v5802_v45  ;;  %v721_v45 = vadd.f32 %v5849_v52, %v6733_v37  ;;  %v798_v37 = vsel %vm6472_vm5, 0, %v797_v2  ;;  %v2502_v56 = vor.u32 %v2501_v13, %v6971_v51  ;;  %v2484_v22 = vsel %vm6686_vm0, %v2479_v31, %v2483_v16  ;;  %v864_v13 = vld [vmem:[#allocation2 + $0x6c] sm:$0xf] }
 0x226   : > { %5304 = vmatprep.subr.bf16.mxu1 %v5803_v4  ;;  %799 = vst [vmem:[#allocation2 + $0x74] sm:$0x1] %v798_v37  ;;  %v4623_v53 = vcombine.low %v2474_v36, %v2484_v22  ;;  %v852_v29 = vshrl.u32 %v4754_v59, 16  ;;  %v2493_v14 = vrot.slane %v2492_v8, 4  ;;  %v2760_v28 = vrot.slane %v6859_v20, 5 }
 0x227   : > { %v727_v33 = vmax.f32 %v721_v45, 0.0  ;;  %v2503_v61 = vrot.slane %v2502_v56, 4  ;;  %v5807_v45 = vld [vmem:[#allocation8 + $0x170] sm:$0xff]   ;;  %v4633_v39 = vrot.slane %v2719_v1, 9  ;;  %v2767_v37 = vrot.slane %v6871_v7, 5 }
 0x228   : > { %5289 = vmatmul.mubr.bf16.gmra.mrb[4].mxu1 %v4620_v47  ;;  %v2505_v47 = vshll.u32 %v6986_v63, 16  ;;  %v854_v52 = vrot.slane %v852_v29, 7  ;;  %v2498_v21 = vsel %vm6686_vm0, %v2493_v14, %v6971_v51  ;;  %v2762_v35 = vrot.slane %v2760_v28, 4  ;;  %v2720_v56 = vld [vmem:[#allocation2 + $0x18] sm:$0xe] }
 0x229   : > { %5292 = vmatprep.mubr.bf16.mxu1 %v4621_v48  ;;  %5305 = vmatpush3.bf16.msra.mxu1 %v5803_v4  ;;  %v733_v4 = vsel %vm6979_vm1, %v727_v33, 0.0  ;;  %v2757_v33 = vsel %vm6626_vm13, %v2755_v12, %v2756_v25  ;;  %v2754_v7 = vsel %vm6626_vm13, %v4633_v39, %v2753_v5  ;;  %v2769_v51 = vrot.slane %v2767_v37, 4 }
 0x22a   : > { %5306 = vmatprep.subr.bf16.mxu1 %v5804_v62  ;;  %v4753_v57 = vpack.c.bf16 %v733_v4, %v733_v4  ;;  %v2507_v2 = vrot.slane %v2505_v47, 5  ;;  %v859_v43 = vrot.slane %v854_v52, 4  ;;  %v4641_v40 = vcombine.low %v2754_v7, %v2757_v33  ;;  %v2721_v4 = vld [vmem:[#allocation2 + $0x24] sm:$0xe] }
 0x22b   : > { %v2770_v22 = vrot.slane %v6895_v9, 5  ;;  %v2764_v5 = vsel %vm6626_vm13, %v2762_v35, %v2763_v55  ;;  %v2774_v3 = vrot.slane %v6886_v17, 5  ;;  %v4635_v44 = vrot.slane %v2721_v4, 9  ;;  %v2722_v17 = vld [vmem:[#allocation2 + $0x30] sm:$0xe]  ;;  %v5821_v55 = vld [vmem:[#allocation8 + $0x1c8] sm:$0xff]  }
 0x22c   : > { %v844_v46 = vshrl.u32 %v4753_v57, 16  ;;  %v847_v48 = vshll.u32 %v4753_v57, 16  ;;  %v2508_v31 = vsel %vm6686_vm0, %v2503_v61, %v2507_v2  ;;  %v4634_v57 = vrot.slane %v2720_v56, 9  ;;  %v5817_v35 = vld [vmem:[#allocation8 + $0x1b8] sm:$0xff]   ;;  %v5816_v56 = vld [vmem:[#allocation2 + $0x18] sm:$0xff]  }
 0x22d   : > { %5307 = vmatpush3.bf16.msra.mxu1 %v5804_v62  ;;  %v855_v62 = vshll.u32 %v4754_v59, 16  ;;  %v868_v23 = vld [vmem:[#allocation2 + $0x74] sm:$0x1]  ;;  %v4624_v16 = vcombine.low %v2498_v21, %v2508_v31  ;;  %v2771_v8 = vsel %vm6626_vm13, %v2769_v51, %v2770_v22  ;;  %v2781_v47 = vrot.slane %v6888_v0, 5  ;;  %v2723_v0 = vld [vmem:[#allocation2 + $0x3c] sm:$0xe] }
 0x22e   : > { %5308 = vmatprep.subr.bf16.mxu1 %v5805_v41  ;;  %v846_v11 = vrot.slane %v844_v46, 7  ;;  %v869_v34 = vsel %vm6465_vm3, %v859_v43, %v868_v23  ;;  %v2761_v58 = vsel %vm6626_vm13, %v4634_v57, %v2760_v28  ;;  %v2768_v9 = vsel %vm6626_vm13, %v4635_v44, %v2767_v37  ;;  %v5819_v51 = vld [vmem:[#allocation8 + $0x1c0] sm:$0xff]   ;;  %v5820_v4 = vld [vmem:[#allocation2 + $0x30] sm:$0xff]   ;;  %v5823_v57 = vld [vmem:[#allocation8 + $0x1d0] sm:$0xff]  }
 0x22f   : > { %v857_v10 = vor.u32 %v855_v62, %v854_v52  ;;  %870 = vst [vmem:[#allocation2 + $0x74] sm:$0x1] %v869_v34  ;;  %v4642_v59 = vcombine.low %v2761_v58, %v2764_v5  ;;  %v4643_v36 = vcombine.low %v2768_v9, %v2771_v8  ;;  %v2783_v46 = vrot.slane %v2781_v47, 4  ;;  %v5815_v34 = vld [vmem:[#allocation8 + $0x1b0] sm:$0xff]   ;;  %v7063_v22 = vld [vmem:[#allocation2 + $0x1c] sm:$0xf] }
 0x230   : > { %5293 = vmatmul.mubr.bf16.gmra.mrb[8].mxu1 %v4622_v30  ;;  %v849_v18 = vor.u32 %v847_v48, %v846_v11  ;;  %v850_v60 = vrot.slane %v846_v11, 4  ;;  %v5810_v30 = vld [vmem:[#allocation8 + $0x188] sm:$0xff]   ;;  %v2777_v48 = vrot.slane %v6916_v27, 5  ;;  %v2784_v61 = vrot.slane %v6923_v26, 5 }
 0x231   : > { %5296 = vmatprep.mubr.bf16.mxu1 %v4623_v53  ;;  %5309 = vmatpush3.bf16.msra.mxu1 %v5805_v41  ;;  %v5811_v53 = vld [vmem:[#allocation8 + $0x190] sm:$0xff]   ;;  %v4636_v29 = vrot.slane %v2722_v17, 9  ;;  %v2788_v1 = vrot.slane %v6918_v54, 5  ;;  %v4637_v12 = vrot.slane %v2723_v0, 9  ;;  %v2795_v14 = vrot.slane %v6928_v6, 5  ;;  %v5822_v58 = vld [vmem:[#allocation2 + $0x3c] sm:$0xff]  }
 0x232   : > { %5310 = vmatprep.subr.bf16.mxu1 %v5806_v38  ;;  %v865_v41 = vsel %vm6527_vm8, %v849_v18, %v864_v13  ;;  %v858_v20 = vsel %vm6534_vm9, %v850_v60, %v857_v10  ;;  %v2785_v11 = vsel %vm6626_vm13, %v2783_v46, %v2784_v61  ;;  %v5812_v13 = vld [vmem:[#allocation8 + $0x198] sm:$0xff]   ;;  %v2724_v54 = vld [vmem:[#allocation2 + $0x48] sm:$0xe]  ;;  %v2791_v18 = vrot.slane %v6942_v50, 5  ;;  %v5813_v60 = vld [vmem:[#allocation8 + $0x1a0] sm:$0xff]  }
 0x233   : > { %866 = vst [vmem:[#allocation2 + $0x6c] sm:$0xf] %v865_v41  ;;  %867 = vst [vmem:[#allocation2 + $0x70] sm:$0xf] %v858_v20  ;;  %v2775_v27 = vsel %vm6626_vm13, %v4636_v29, %v2774_v3  ;;  %v2782_v26 = vsel %vm6626_vm13, %v4637_v12, %v2781_v47  ;;  %v2797_v25 = vrot.slane %v2795_v14, 4  ;;  %v2798_v23 = vrot.slane %v6961_v24, 5 }
 0x234   : > { %v4645_v52 = vcombine.low %v2782_v26, %v2785_v11  ;;  %v2725_v6 = vld [vmem:[#allocation2 + $0x54] sm:$0xe]  ;;  %v4638_v31 = vrot.slane %v2724_v54, 9  ;;  %v2802_v10 = vrot.slane %v6946_v32, 5  ;;  %v5814_v24 = vld [vmem:[#allocation8 + $0x1a8] sm:$0xff]   ;;  %v2805_v32 = vrot.slane %v6986_v63, 5 }
 0x235   : > { %5311 = vmatpush3.bf16.msra.mxu1 %v5806_v38  ;;  %v2776_v38 = vrot.slane %v2774_v3, 4  ;;  %v4639_v43 = vrot.slane %v2725_v6, 9  ;;  %v2799_v39 = vsel %vm6626_vm13, %v2797_v25, %v2798_v23  ;;  %v2726_v20 = vld [vmem:[#allocation2 + $0x60] sm:$0xe]  ;;  %v5818_v63 = vld [vmem:[#allocation2 + $0x24] sm:$0xff]   ;;  %v3294_v44 = vshll.u32 %v7063_v22, 16 }
 0x236   : > { %5312 = vmatprep.subr.bf16.mxu1 %v5807_v45  ;;  %v2789_v33 = vsel %vm6626_vm13, %v4638_v31, %v2788_v1  ;;  %v2804_v21 = vrot.slane %v2802_v10, 4  ;;  %v3298_v8 = vshrl.u32 %v7063_v22, 16  ;;  %v7067_v47 = vld [vmem:[#allocation2 + $0x28] sm:$0xf]  ;;  %v3263_v46 = vld [vmem:[#allocation2 + $0x24] sm:$0xf] }
 0x237   : > { %v2778_v62 = vsel %vm6626_vm13, %v2776_v38, %v2777_v48  ;;  %v2796_v37 = vsel %vm6626_vm13, %v4639_v43, %v2795_v14  ;;  %v5824_v17 = vld [vmem:[#allocation2 + $0x48] sm:$0xff]   ;;  %v3318_v48 = vshll.u32 %v7067_v47, 16  ;;  %v3322_v0 = vshrl.u32 %v7067_v47, 16  ;;  %v7073_v61 = vld [vmem:[#allocation2 + $0x34] sm:$0xf]  ;;  %v5829_v6 = vld [vmem:[#allocation8 + $0x1e8] sm:$0xff]  }
 0x238   : > { %5297 = vmatmul.mubr.bf16.gmra.mrb[12].mxu1 %v4624_v16  ;;  %v4644_v2 = vcombine.low %v2775_v27, %v2778_v62  ;;  %v4647_v41 = vcombine.low %v2796_v37, %v2799_v39  ;;  %v4640_v16 = vrot.slane %v2726_v20, 9  ;;  %v2806_v7 = vsel %vm6626_vm13, %v2804_v21, %v2805_v32  ;;  %v7075_v29 = vld [vmem:[#allocation2 + $0x20] sm:$0x1]  ;;  %v5827_v62 = vld [vmem:[#allocation8 + $0x1e0] sm:$0xff]   ;;  %v7085_v43 = vld [vmem:[#allocation2 + $0x4c] sm:$0xf] }
 0x239   : > { %5313 = vmatpush3.bf16.msra.mxu1 %v5807_v45  ;;  %5316 = vmatprep.mubr.bf16.mxu1 %v4641_v40  ;;  %v2790_v45 = vrot.slane %v2788_v1, 4  ;;  %v3300_v38 = vrot.slane %v3298_v8, 4  ;;  %v3309_v11 = vshrl.u32 %v3263_v46, 16  ;;  %v3312_v14 = vshll.u32 %v3263_v46, 16  ;;  %v7087_v39 = vld [vmem:[#allocation2 + $0x2c] sm:$0x1] }
 0x23a   : > { %5314 = vmatprep.subr.bf16.mxu1 %v5808_v15  ;;  %v3342_v26 = vshll.u32 %v7073_v61, 16  ;;  %v7081_v54 = vrot.slane %v3318_v48, 5  ;;  %v3324_v25 = vrot.slane %v3322_v0, 4  ;;  %v3269_v20 = vld [vmem:[#allocation2 + $0x3c] sm:$0xf]  ;;  %v5830_v46 = vld [vmem:[#allocation2 + $0x6c] sm:$0xff]  }
 0x23b   : > { %v2792_v28 = vsel %vm6626_vm13, %v2790_v45, %v2791_v18  ;;  %v3304_v45 = vshll.u32 %v7075_v29, 16  ;;  %v5828_v18 = vld [vmem:[#allocation2 + $0x60] sm:$0xff]   ;;  %v5832_v0 = vld [vmem:[#allocation8 + $0x1f8] sm:$0xff]  }
 0x23c   : > { %v4646_v50 = vcombine.low %v2789_v33, %v2792_v28  ;;  %v3311_v28 = vrot.slane %v3309_v11, 4  ;;  %v7089_v37 = vrot.slane %v3342_v26, 5  ;;  %v3325_v21 = vor.u32 %v3324_v25, %v7081_v54 }
 0x23d   : > { %5315 = vmatpush3.bf16.msra.mxu1 %v5808_v15  ;;  %v2803_v15 = vsel %vm6626_vm13, %v4640_v16, %v2802_v10  ;;  %v3314_v10 = vrot.slane %v3312_v14, 5  ;;  %v7094_v16 = vld [vmem:[#allocation2 + $0x38] sm:$0x1] }
 0x23e   : > { %5332 = vmatprep.subr.bf16.mxu1 %v5809_v19  ;;  %v4648_v40 = vcombine.low %v2803_v15, %v2806_v7  ;;  %v3390_v7 = vshll.u32 %v7085_v43, 16  ;;  %v3394_v15 = vshrl.u32 %v7085_v43, 16 }
 0x240   : > { %5317 = vmatmul.mubr.bf16.vlgmr.msra.gmra.mrb[0].mxu1 %v4642_v59  ;;  %v5825_v59 = vld [vmem:[#allocation8 + $0x1d8] sm:$0xff]  }
 0x241   : > { %5320 = vmatprep.mubr.bf16.mxu1 %v4643_v36  ;;  %5333 = vmatpush3.bf16.msra.mxu1 %v5809_v19  ;;  %v3260_v19 = vld [vmem:[#allocation2 + $0x18] sm:$0xf]  ;;  %v7069_v36 = vrot.slane %v3294_v44, 5  ;;  %v3352_v44 = vshll.u32 %v7094_v16, 16 }
 0x242   : > { %5334 = vmatprep.subr.bf16.mxu1 %v5810_v30  ;;  %v3285_v5 = vshrl.u32 %v3260_v19, 16  ;;  %v3288_v3 = vshll.u32 %v3260_v19, 16 }
 0x243   : > { %v3301_v12 = vor.u32 %v3300_v38, %v7069_v36  ;;  %v3396_v38 = vrot.slane %v3394_v15, 4 }
 0x244   : > { %v3287_v9 = vrot.slane %v3285_v5, 4  ;;  %v3360_v5 = vshll.u32 %v3269_v20, 16 }
 0x245   : > { %5335 = vmatpush3.bf16.msra.mxu1 %v5810_v30  ;;  %v3290_v30 = vrot.slane %v3288_v3, 5  ;;  %v3302_v31 = vrot.slane %v3301_v12, 4  ;;  %v3326_v3 = vrot.slane %v3325_v21, 4 }
 0x246   : > { %5336 = vmatprep.subr.bf16.mxu1 %v5811_v53 }
 0x247   : > { %v3291_v1 = vor.u32 %v3290_v30, %v3287_v9 }
 0x248   : > { %5321 = vmatmul.mubr.bf16.gmra.mrb[4].mxu1 %v4644_v2 }
 0x249   : > { %5324 = vmatprep.mubr.bf16.mxu1 %v4645_v52  ;;  %5337 = vmatpush3.bf16.msra.mxu1 %v5811_v53  ;;  %v3266_v53 = vld [vmem:[#allocation2 + $0x30] sm:$0xf]  ;;  %v5826_v52 = vld [vmem:[#allocation2 + $0x54] sm:$0xff]   ;;  %v3292_v23 = vrot.slane %v3291_v1, 4  ;;  %v5842_v1 = vld [vmem:[#allocation9 + $0x8] sm:$0xff]  }
 0x24a   : > { %5338 = vmatprep.subr.bf16.mxu1 %v5812_v13  ;;  %v3333_v27 = vshrl.u32 %v3266_v53, 16  ;;  %v3336_v2 = vshll.u32 %v3266_v53, 16 }
 0x24c   : > { %v3335_v33 = vrot.slane %v3333_v27, 4  ;;  %v3362_v27 = vrot.slane %v3360_v5, 5 }
 0x24d   : > { %5339 = vmatpush3.bf16.msra.mxu1 %v5812_v13  ;;  %v3346_v13 = vshrl.u32 %v7073_v61, 16 }
 0x24e   : > { %5340 = vmatprep.subr.bf16.mxu1 %v5813_v60 }
 0x250   : > { %5325 = vmatmul.mubr.bf16.gmra.mrb[8].mxu1 %v4646_v50  ;;  %v3338_v50 = vrot.slane %v3336_v2, 5  ;;  %v7112_v2 = vld [vmem:[#allocation2 + $0x58] sm:$0xf] }
 0x251   : > { %5328 = vmatprep.mubr.bf16.mxu1 %v4647_v41  ;;  %5341 = vmatpush3.bf16.msra.mxu1 %v5813_v60  ;;  %v7083_v60 = vld [vmem:[#allocation2 + $0x40] sm:$0xf]  ;;  %v3306_v41 = vrot.slane %v3304_v45, 5  ;;  %v3354_v45 = vrot.slane %v3352_v44, 5 }
 0x252   : > { %5342 = vmatprep.subr.bf16.mxu1 %v5814_v24  ;;  %v3366_v32 = vshll.u32 %v7083_v60, 16 }
 0x254   : > { %v7106_v8 = vrot.slane %v3366_v32, 5 }
 0x255   : > { %5343 = vmatpush3.bf16.msra.mxu1 %v5814_v24  ;;  %v3348_v24 = vrot.slane %v3346_v13, 4 }
 0x256   : > { %5344 = vmatprep.subr.bf16.mxu1 %v5815_v34 }
 0x257   : > { %v3349_v19 = vor.u32 %v3348_v24, %v7089_v37  ;;  %v3414_v24 = vshll.u32 %v7112_v2, 16 }
 0x258   : > { %5329 = vmatmul.mubr.bf16.gmra.mrb[12].mxu1 %v4648_v40  ;;  %v5831_v40 = vld [vmem:[#allocation8 + $0x1f0] sm:$0xff]  }
 0x259   : > { %5345 = vmatpush3.bf16.msra.mxu1 %v5815_v34  ;;  %5348 = vmatprep.mubr.bf16.mxu1 %v5816_v56  ;;  %v3370_v34 = vshrl.u32 %v7083_v60, 16  ;;  %v3307_v56 = vsel %vm6686_vm0, %v3302_v31, %v3306_v41  ;;  %v3350_v11 = vrot.slane %v3349_v19, 4  ;;  %v5843_v31 = vld [vmem:[#allocation9 + $0x10] sm:$0xff]   ;;  %v3418_v41 = vshrl.u32 %v7112_v2, 16 }
 0x25a   : > { %5346 = vmatprep.subr.bf16.mxu1 %v5817_v35 }
 0x25b   : > { %v3355_v32 = vsel %vm6686_vm0, %v3350_v11, %v3354_v45  ;;  %v3420_v19 = vrot.slane %v3418_v41, 4  ;;  %v5835_v11 = vld [vmem:[#allocation8 + $0x210] sm:$0xff]  }
 0x25d   : > { %5347 = vmatpush3.bf16.msra.mxu1 %v5817_v35  ;;  %v3297_v35 = vsel %vm6686_vm0, %v3292_v23, %v7069_v36  ;;  %v7110_v36 = vrot.slane %v3390_v7, 5  ;;  %v7120_v23 = vld [vmem:[#allocation2 + $0x64] sm:$0xf]  ;;  %v3278_v7 = vld [vmem:[#allocation2 + $0x60] sm:$0xf] }
 0x25e   : > { %5364 = vmatprep.subr.bf16.mxu1 %v5819_v51  ;;  %v4673_v48 = vcombine.low %v3297_v35, %v3307_v56  ;;  %v3442_v35 = vshrl.u32 %v7120_v23, 16  ;;  %v3432_v5 = vshll.u32 %v3278_v7, 16 }
 0x260   : > { %5349 = vmatmul.mubr.bf16.vlgmr.msra.gmra.mrb[0].mxu1 %v5818_v63  ;;  %v3328_v63 = vshll.u32 %v7087_v39, 16  ;;  %v3434_v45 = vrot.slane %v3432_v5, 5 }
 0x261   : > { %5352 = vmatprep.mubr.bf16.mxu1 %v5820_v4  ;;  %5365 = vmatpush3.bf16.msra.mxu1 %v5819_v51  ;;  %v3315_v51 = vor.u32 %v3314_v10, %v3311_v28  ;;  %v3339_v4 = vor.u32 %v3338_v50, %v3335_v33  ;;  %v5833_v10 = vld [vmem:[#allocation8 + $0x200] sm:$0xff]   ;;  %v3275_v50 = vld [vmem:[#allocation2 + $0x54] sm:$0xf] }
 0x262   : > { %5366 = vmatprep.subr.bf16.mxu1 %v5821_v55 }
 0x263   : > { %v3316_v53 = vrot.slane %v3315_v51, 4  ;;  %v3340_v12 = vrot.slane %v3339_v4, 4  ;;  %v7136_v4 = vrot.slane %v3414_v24, 5 }
 0x265   : > { %5367 = vmatpush3.bf16.msra.mxu1 %v5821_v55  ;;  %v3272_v55 = vld [vmem:[#allocation2 + $0x48] sm:$0xf]  ;;  %v3321_v28 = vsel %vm6686_vm0, %v3316_v53, %v7081_v54 }
 0x266   : > { %5368 = vmatprep.subr.bf16.mxu1 %v5823_v57  ;;  %v3381_v9 = vshrl.u32 %v3272_v55, 16  ;;  %v3384_v30 = vshll.u32 %v3272_v55, 16  ;;  %v3408_v55 = vshll.u32 %v3275_v50, 16 }
 0x268   : > { %5353 = vmatmul.mubr.bf16.gmra.mrb[4].mxu1 %v5822_v58  ;;  %v3372_v58 = vrot.slane %v3370_v34, 4  ;;  %v3383_v25 = vrot.slane %v3381_v9, 4  ;;  %v3281_v9 = vld [vmem:[#allocation2 + $0x6c] sm:$0xf] }
 0x269   : > { %5356 = vmatprep.mubr.bf16.mxu1 %v5824_v17  ;;  %5369 = vmatpush3.bf16.msra.mxu1 %v5823_v57  ;;  %v3357_v57 = vshrl.u32 %v3269_v20, 16  ;;  %v5841_v17 = vld [vmem:[#allocation9] sm:$0xff]   ;;  %v3345_v20 = vsel %vm6686_vm0, %v3340_v12, %v7089_v37  ;;  %v5834_v37 = vld [vmem:[#allocation8 + $0x208] sm:$0xff]  }
 0x26a   : > { %5370 = vmatprep.subr.bf16.mxu1 %v5825_v59  ;;  %5428 = vmatprep.subr.bf16.mxu0 %v5841_v17  ;;  %v3373_v13 = vor.u32 %v3372_v58, %v7106_v8  ;;  %v4675_v44 = vcombine.low %v3345_v20, %v3355_v32  ;;  %v5845_v12 = vld [vmem:[#allocation9 + $0x20] sm:$0xff]   ;;  %v5836_v32 = vld [vmem:[#allocation8 + $0x218] sm:$0xff]  }
 0x26b   : > { %v3359_v14 = vrot.slane %v3357_v57, 4  ;;  %5429 = vmatpush3.bf16.msra.mxu0 %v5841_v17  ;;  %v3429_v57 = vshrl.u32 %v3278_v7, 16 }
 0x26c   : > { %5430 = vmatprep.subr.bf16.mxu0 %v5842_v1  ;;  %v3374_v54 = vrot.slane %v3373_v13, 4 }
 0x26d   : > { %5371 = vmatpush3.bf16.msra.mxu1 %v5825_v59  ;;  %v7108_v59 = vld [vmem:[#allocation2 + $0x44] sm:$0x1]  ;;  %v3363_v34 = vor.u32 %v3362_v27, %v3359_v14  ;;  %v7146_v27 = vld [vmem:[#allocation2 + $0x5c] sm:$0x1]  ;;  %v3431_v13 = vrot.slane %v3429_v57, 4 }
 0x26e   : > { %5372 = vmatprep.subr.bf16.mxu1 %v5827_v62  ;;  %v3376_v33 = vshll.u32 %v7108_v59, 16 }
 0x26f   : > { %5431 = vmatpush3.bf16.msra.mxu0 %v5842_v1  ;;  %v3410_v1 = vrot.slane %v3408_v55, 5  ;;  %v3435_v7 = vor.u32 %v3434_v45, %v3431_v13  ;;  %v5837_v55 = vld [vmem:[#allocation8 + $0x220] sm:$0xff]   ;;  %v3727_v13 = vrot.slane %v7067_v47, 5  ;;  %v3730_v47 = vrot.slane %v7087_v39, 5 }
 0x270   : > { %5357 = vmatmul.mubr.bf16.gmra.mrb[8].mxu1 %v5826_v52  ;;  %v7117_v52 = vld [vmem:[#allocation2 + $0x50] sm:$0x1]  ;;  %5432 = vmatprep.subr.bf16.mxu0 %v5843_v31  ;;  %v3378_v58 = vrot.slane %v3376_v33, 5 }
 0x271   : > { %5360 = vmatprep.mubr.bf16.mxu1 %v5828_v18  ;;  %5373 = vmatpush3.bf16.msra.mxu1 %v5827_v62  ;;  %v3330_v62 = vrot.slane %v3328_v63, 5  ;;  %v3386_v18 = vrot.slane %v3384_v30, 5  ;;  %v3400_v15 = vshll.u32 %v7117_v52, 16  ;;  %v3405_v63 = vshrl.u32 %v3275_v50, 16 }
 0x272   : > { %5374 = vmatprep.subr.bf16.mxu1 %v5829_v6  ;;  %v3364_v30 = vrot.slane %v3363_v34, 4 }
 0x273   : > { %v3331_v26 = vsel %vm6686_vm0, %v3326_v3, %v3330_v62  ;;  %v3387_v56 = vor.u32 %v3386_v18, %v3383_v25  ;;  %v5844_v3 = vld [vmem:[#allocation9 + $0x18] sm:$0xff]   ;;  %5433 = vmatpush3.bf16.msra.mxu0 %v5843_v31  ;;  %v3407_v62 = vrot.slane %v3405_v63, 4  ;;  %v7149_v25 = vld [vmem:[#allocation2 + $0x68] sm:$0x1]  ;;  %v3453_v18 = vshrl.u32 %v3281_v9, 16 }
 0x274   : > { %v4674_v21 = vcombine.low %v3321_v28, %v3331_v26  ;;  %v3421_v26 = vor.u32 %v3420_v19, %v7136_v4  ;;  %5434 = vmatprep.subr.bf16.mxu0 %v5844_v3 }
 0x275   : > { %5375 = vmatpush3.bf16.msra.mxu1 %v5829_v6  ;;  %v3397_v6 = vor.u32 %v3396_v38, %v7110_v36  ;;  %v3402_v38 = vrot.slane %v3400_v15, 5  ;;  %v3388_v53 = vrot.slane %v3387_v56, 4  ;;  %v3411_v41 = vor.u32 %v3410_v1, %v3407_v62 }
 0x276   : > { %5376 = vmatprep.subr.bf16.mxu1 %v5831_v40  ;;  %v3422_v34 = vrot.slane %v3421_v26, 4 }
 0x277   : > { %v3398_v51 = vrot.slane %v3397_v6, 4  ;;  %v3456_v6 = vshll.u32 %v3281_v9, 16  ;;  %5435 = vmatpush3.bf16.msra.mxu0 %v5844_v3  ;;  %v3393_v24 = vsel %vm6686_vm0, %v3388_v53, %v7110_v36  ;;  %v3412_v36 = vrot.slane %v3411_v41, 4 }
 0x278   : > { %5361 = vmatmul.mubr.bf16.gmra.mrb[12].mxu1 %v5830_v46  ;;  %v3444_v46 = vrot.slane %v3442_v35, 4  ;;  %5436 = vmatprep.subr.bf16.mxu0 %v5845_v12  ;;  %v3720_v9 = vrot.slane %v7063_v22, 5  ;;  %v3686_v22 = vld [vmem:[#allocation2 + $0x18] sm:$0xe]  ;;  %v4690_v41 = vrot.slane %v3687_v49, 9 }
 0x279   : > { %5377 = vmatpush3.bf16.msra.mxu1 %v5831_v40  ;;  %5380 = vmatprep.mubr.bf16.mxu1 %v4673_v48  ;;  %v3438_v40 = vshll.u32 %v7120_v23, 16  ;;  %v7140_v48 = vld [vmem:[#allocation2 + $0x70] sm:$0xf]  ;;  %v3403_v14 = vsel %vm6686_vm0, %v3398_v51, %v3402_v38  ;;  %v3458_v15 = vrot.slane %v3456_v6, 5  ;;  %v7162_v51 = vld [vmem:[#allocation2 + $0x74] sm:$0x1] }
 0x27a   : > { %5378 = vmatprep.subr.bf16.mxu1 %v5832_v0  ;;  %v3462_v31 = vshll.u32 %v7140_v48, 16  ;;  %v3466_v28 = vshrl.u32 %v7140_v48, 16  ;;  %v4677_v20 = vcombine.low %v3393_v24, %v3403_v14  ;;  %v5839_v14 = vld [vmem:[#allocation8 + $0x230] sm:$0xff]   ;;  %v4689_v45 = vrot.slane %v3686_v22, 9  ;;  %v3688_v24 = vld [vmem:[#allocation2 + $0x30] sm:$0xe] }
 0x27b   : > { %v7138_v17 = vrot.slane %v3438_v40, 5  ;;  %5437 = vmatpush3.bf16.msra.mxu0 %v5845_v12  ;;  %v3734_v6 = vrot.slane %v7073_v61, 5  ;;  %v3737_v61 = vrot.slane %v7094_v16, 5  ;;  %v3728_v39 = vsel %vm6626_vm13, %v4690_v41, %v3727_v13  ;;  %v5846_v41 = vld [vmem:[#allocation9 + $0x28] sm:$0xff]  }
 0x27c   : > { %v3464_v40 = vrot.slane %v3462_v31, 5  ;;  %v3468_v35 = vrot.slane %v3466_v28, 4  ;;  %v5840_v28 = vld [vmem:[#allocation8 + $0x238] sm:$0xff]   ;;  %5438 = vmatprep.subr.bf16.mxu0 %v5846_v41 }
 0x27d   : > { %5379 = vmatpush3.bf16.msra.mxu1 %v5832_v0  ;;  %v3379_v0 = vsel %vm6686_vm0, %v3374_v54, %v3378_v58  ;;  %v3445_v33 = vor.u32 %v3444_v46, %v7138_v17  ;;  %v3455_v54 = vrot.slane %v3453_v18, 4 }
 0x27e   : > { %5396 = vmatprep.subr.bf16.mxu1 %v5833_v10  ;;  %v3469_v3 = vor.u32 %v3468_v35, %v3464_v40 }
 0x27f   : > { %v3446_v56 = vrot.slane %v3445_v33, 4  ;;  %v3459_v5 = vor.u32 %v3458_v15, %v3455_v54  ;;  %v3729_v33 = vrot.slane %v3727_v13, 4  ;;  %5439 = vmatpush3.bf16.msra.mxu0 %v5846_v41 }
 0x280   : > { %5381 = vmatmul.mubr.bf16.vlgmr.msra.gmra.mrb[0].mxu1 %v4674_v21  ;;  %v3424_v21 = vshll.u32 %v7146_v27, 16  ;;  %v3470_v1 = vrot.slane %v3469_v3, 4 }
 0x281   : > { %5384 = vmatprep.mubr.bf16.mxu1 %v4675_v44  ;;  %5397 = vmatpush3.bf16.msra.mxu1 %v5833_v10  ;;  %v3369_v10 = vsel %vm6686_vm0, %v3364_v30, %v7106_v8  ;;  %v3448_v8 = vshll.u32 %v7149_v25, 16  ;;  %v3472_v44 = vshll.u32 %v7162_v51, 16  ;;  %v3417_v30 = vsel %vm6686_vm0, %v3412_v36, %v7136_v4 }
 0x282   : > { %5398 = vmatprep.subr.bf16.mxu1 %v5834_v37  ;;  %v4676_v50 = vcombine.low %v3369_v10, %v3379_v0  ;;  %v3426_v63 = vrot.slane %v3424_v21, 5  ;;  %v5838_v0 = vld [vmem:[#allocation8 + $0x228] sm:$0xff]   ;;  %v3460_v62 = vrot.slane %v3459_v5, 4  ;;  %v3723_v4 = vrot.slane %v7075_v29, 5 }
 0x283   : > { %v3450_v19 = vrot.slane %v3448_v8, 5  ;;  %v3474_v12 = vrot.slane %v3472_v44, 5  ;;  %v3721_v29 = vsel %vm6626_vm13, %v4689_v45, %v3720_v9  ;;  %v3731_v21 = vsel %vm6626_vm13, %v3729_v33, %v3730_v47 }
 0x284   : > { %v3427_v57 = vsel %vm6686_vm0, %v3422_v34, %v3426_v63  ;;  %v3465_v26 = vsel %vm6686_vm0, %v3460_v62, %v3464_v40  ;;  %v4698_v8 = vcombine.low %v3728_v39, %v3731_v21  ;;  %v3689_v40 = vld [vmem:[#allocation2 + $0x3c] sm:$0xe]  ;;  %v3751_v36 = vrot.slane %v7117_v52, 5  ;;  %v5847_v21 = vld [vmem:[#allocation9 + $0x30] sm:$0xff]  }
 0x285   : > { %5399 = vmatpush3.bf16.msra.mxu1 %v5834_v37  ;;  %v3436_v37 = vrot.slane %v3435_v7, 4  ;;  %v3451_v58 = vsel %vm6686_vm0, %v3446_v56, %v3450_v19  ;;  %v4678_v38 = vcombine.low %v3417_v30, %v3427_v57  ;;  %v3748_v7 = vrot.slane %v7085_v43, 5  ;;  %v3690_v56 = vld [vmem:[#allocation2 + $0x48] sm:$0xe]  ;;  %v3692_v30 = vld [vmem:[#allocation2 + $0x60] sm:$0xe]  ;;  %5440 = vmatprep.subr.bf16.mxu0 %v5847_v21 }
 0x286   : > { %5400 = vmatprep.subr.bf16.mxu1 %v5835_v11  ;;  %v4692_v43 = vrot.slane %v3689_v40, 9  ;;  %v3762_v57 = vrot.slane %v7120_v23, 5  ;;  %5441 = vmatpush3.bf16.msra.mxu0 %v5847_v21 }
 0x287   : > { %v3441_v46 = vsel %vm6686_vm0, %v3436_v37, %v7138_v17  ;;  %v3475_v17 = vsel %vm6686_vm0, %v3470_v1, %v3474_v12  ;;  %v3750_v35 = vrot.slane %v3748_v7, 4  ;;  %v4693_v37 = vrot.slane %v3690_v56, 9  ;;  %v3693_v1 = vld [vmem:[#allocation2 + $0x6c] sm:$0xe] }
 0x288   : > { %5385 = vmatmul.mubr.bf16.gmra.mrb[4].mxu1 %v4676_v50  ;;  %v4679_v53 = vcombine.low %v3441_v46, %v3451_v58  ;;  %v4680_v31 = vcombine.low %v3465_v26, %v3475_v17  ;;  %v3736_v50 = vrot.slane %v3734_v6, 4  ;;  %v3691_v58 = vld [vmem:[#allocation2 + $0x54] sm:$0xe] }
 0x289   : > { %5388 = vmatprep.mubr.bf16.mxu1 %v4677_v20  ;;  %5401 = vmatpush3.bf16.msra.mxu1 %v5835_v11  ;;  %v3722_v11 = vrot.slane %v3720_v9, 4  ;;  %v3741_v20 = vrot.slane %v7083_v60, 5  ;;  %v3744_v60 = vrot.slane %v7108_v59, 5  ;;  %v3752_v19 = vsel %vm6626_vm13, %v3750_v35, %v3751_v36 }
 0x28a   : > { %5402 = vmatprep.subr.bf16.mxu1 %v5836_v32  ;;  %v3738_v34 = vsel %vm6626_vm13, %v3736_v50, %v3737_v61  ;;  %v3749_v59 = vsel %vm6626_vm13, %v4693_v37, %v3748_v7  ;;  %v3764_v9 = vrot.slane %v3762_v57, 4  ;;  %v4694_v46 = vrot.slane %v3691_v58, 9 }
 0x28b   : > { %v3724_v18 = vsel %vm6626_vm13, %v3722_v11, %v3723_v4  ;;  %v3743_v15 = vrot.slane %v3741_v20, 4  ;;  %v3742_v5 = vsel %vm6626_vm13, %v4692_v43, %v3741_v20  ;;  %v4701_v52 = vcombine.low %v3749_v59, %v3752_v19  ;;  %v5848_v20 = vld [vmem:[#allocation9 + $0x38] sm:$0xff]  }
 0x28c   : > { %v4697_v10 = vcombine.low %v3721_v29, %v3724_v18  ;;  %v3772_v4 = vrot.slane %v7162_v51, 5  ;;  %5442 = vmatprep.subr.bf16.mxu0 %v5848_v20 }
 0x28d   : > { %5403 = vmatpush3.bf16.msra.mxu1 %v5836_v32  ;;  %v4691_v32 = vrot.slane %v3688_v24, 9  ;;  %v3745_v63 = vsel %vm6626_vm13, %v3743_v15, %v3744_v60  ;;  %5443 = vmatpush3.bf16.msra.mxu0 %v5848_v20 }
 0x28e   : > { %5404 = vmatprep.subr.bf16.mxu1 %v5837_v55  ;;  %v4700_v3 = vcombine.low %v3742_v5, %v3745_v63 }
 0x28f   : > { %v3735_v16 = vsel %vm6626_vm13, %v4691_v32, %v3734_v6 }
 0x290   : > { %5389 = vmatmul.mubr.bf16.gmra.mrb[8].mxu1 %v4678_v38  ;;  %v4699_v54 = vcombine.low %v3735_v16, %v3738_v34  ;;  %v3765_v38 = vrot.slane %v7149_v25, 5  ;;  %v4696_v25 = vrot.slane %v3693_v1, 9  ;;  %v7238_v34 = vld [vmem:[%s7440_s3] ss:$0 sm:$0xff] }
 0x291   : > { %5392 = vmatprep.mubr.bf16.mxu1 %v4679_v53  ;;  %5405 = vmatpush3.bf16.msra.mxu1 %v5837_v55  ;;  %v3755_v55 = vrot.slane %v7112_v2, 5  ;;  %v3758_v2 = vrot.slane %v7146_v27, 5  ;;  %v4695_v53 = vrot.slane %v3692_v30, 9 }
 0x292   : > { %5406 = vmatprep.subr.bf16.mxu1 %v5838_v0  ;;  %v3766_v62 = vsel %vm6626_vm13, %v3764_v9, %v3765_v38 }
 0x293   : > { %v3757_v44 = vrot.slane %v3755_v55, 4  ;;  %v3756_v12 = vsel %vm6626_vm13, %v4694_v46, %v3755_v55  ;;  %v3763_v27 = vsel %vm6626_vm13, %v4695_v53, %v3762_v57 }
 0x294   : > { %v4703_v22 = vcombine.low %v3763_v27, %v3766_v62 }
 0x295   : > { %5407 = vmatpush3.bf16.msra.mxu1 %v5838_v0  ;;  %v3759_v23 = vsel %vm6626_vm13, %v3757_v44, %v3758_v2  ;;  %v3769_v0 = vrot.slane %v7140_v48, 5 }
 0x296   : > { %5408 = vmatprep.subr.bf16.mxu1 %v5839_v14  ;;  %v4702_v11 = vcombine.low %v3756_v12, %v3759_v23 }
 0x297   : > { %v3770_v48 = vsel %vm6626_vm13, %v4696_v25, %v3769_v0 }
 0x298   : > { %5393 = vmatmul.mubr.bf16.gmra.mrb[12].mxu1 %v4680_v31 }
 0x299   : > { %5409 = vmatpush3.bf16.msra.mxu1 %v5839_v14  ;;  %5412 = vmatprep.mubr.bf16.mxu1 %v4697_v10  ;;  %v3771_v14 = vrot.slane %v3769_v0, 4 }
 0x29a   : > { %5410 = vmatprep.subr.bf16.mxu1 %v5840_v28 }
 0x29b   : > { %v3773_v26 = vsel %vm6626_vm13, %v3771_v14, %v3772_v4 }
 0x29c   : > { %v4704_v17 = vcombine.low %v3770_v48, %v3773_v26 }
 0x29d   : > { %5411 = vmatpush3.bf16.msra.mxu1 %v5840_v28 }
 0x2a0   : > { %5413 = vmatmul.mubr.bf16.vlgmr.msra.gmra.mrb[0].mxu1 %v4698_v8 }
 0x2a1   : > { %5416 = vmatprep.mubr.bf16.mxu1 %v4699_v54 }
 0x2a8   : > { %5417 = vmatmul.mubr.bf16.gmra.mrb[4].mxu1 %v4700_v3 }
 0x2a9   : > { %5420 = vmatprep.mubr.bf16.mxu1 %v4701_v52 }
 0x2b0   : > { %5421 = vmatmul.mubr.bf16.gmra.mrb[8].mxu1 %v4702_v11 }
 0x2b1   : > { %5424 = vmatprep.mubr.bf16.mxu1 %v4703_v22 }
 0x2b8   : > { %5425 = vmatmul.mubr.bf16.gmra.mrb[12].mxu1 %v4704_v17 }
 0x2db   : > { %v5190_v13 = vpop.f32.mrb[24].mxu0 }
 0x2dc   : > { %v1695_v45 = vpop.f32.mrb[25].mxu0 }
 0x2dd   : > { %v5191_v18 = vpop.f32.mrb[26].mxu0 }
 0x2de   : > { %v1698_v6 = vpop.f32.mrb[27].mxu0 }
 0x2e3   : > { %v5194_v31 = vpop.f32.mrb[28].mxu0 }
 0x2e4   : > { %v1711_v29 = vpop.f32.mrb[29].mxu0 }
 0x2e5   : > { %v5195_v28 = vpop.f32.mrb[30].mxu0 }
 0x2e6   : > { %v1714_v10 = vpop.f32.mrb[31].mxu0 }
 0x2eb   : > { %v5198_v33 = vpop.f32.mrb[32].mxu0 }
 0x2ec   : > { %v1727_v51 = vpop.f32.mrb[33].mxu0 }
 0x2ed   : > { %v5199_v49 = vpop.f32.mrb[34].mxu0 }
 0x2ee   : > { %v1730_v50 = vpop.f32.mrb[35].mxu0 }
 0x2f3   : > { %v7227_v47 = vpop.f32.mrb[36].mxu0 }
 0x2f4   : > { %v7229_v24 = vpop.f32.mrb[37].mxu0 }
 0x2f5   : > { %v7231_v42 = vpop.f32.mrb[38].mxu0 }
 0x2f6   : > { %v7233_v61 = vpop.f32.mrb[39].mxu0 }
 0x373   : > { %v5414_v32 = vpop.f32.mrb[0].mxu1 }
 0x374   : > { %v5460_v7 = vadd.f32 %v5414_v32, %v5190_v13  ;;  %v3905_v39 = vpop.f32.mrb[1].mxu1 }
 0x375   : > { %v5461_v8 = vadd.f32 %v3905_v39, %v1695_v45  ;;  %v5415_v16 = vpop.f32.mrb[2].mxu1 }
 0x376   : > { %v3993_v54 = vadd.f32 %v5460_v7, %v7238_v34  ;;  %v5462_v15 = vadd.f32 %v5415_v16, %v5191_v18  ;;  %v3908_v40 = vpop.f32.mrb[3].mxu1 }
 0x377   : > { %v3991_v35 = vadd.f32 %v5461_v8, %v7238_v34  ;;  %v5463_v60 = vadd.f32 %v3908_v40, %v1698_v6 }
 0x378   : > { %v3994_v56 = vadd.f32 %v5462_v15, %v7238_v34  ;;  %v4009_v43 = vmax.f32 %v3993_v54, 0.0 }
 0x379   : > { %v3992_v36 = vadd.f32 %v5463_v60, %v7238_v34  ;;  %v4007_v55 = vmax.f32 %v3991_v35, 0.0 }
 0x37a   : > { %v4010_v63 = vmax.f32 %v3994_v56, 0.0  ;;  %v4860_v56 = vld [vmem:[%s6431_s14 + $0x8] sm:$0xff]  }
 0x37b   : > { %v4008_v37 = vmax.f32 %v3992_v36, 0.0  ;;  %v5418_v19 = vpop.f32.mrb[4].mxu1  ;;  %v4789_v36 = vld [vmem:[%s6431_s14] sm:$0xff]  }
 0x37c   : > { %v4024_v57 = vpack.c.bf16 %v4010_v63, %v4009_v43  ;;  %v5464_v5 = vadd.f32 %v5418_v19, %v5194_v31  ;;  %v3921_v3 = vpop.f32.mrb[5].mxu1  ;;  %v4794_v43 = vunpack.c.l.bf16 %v4860_v56  ;;  %v4790_v63 = vunpack.c.l.bf16 %v4789_v36 }
 0x37d   : > { %v5465_v59 = vadd.f32 %v3921_v3, %v1711_v29  ;;  %v5419_v52 = vpop.f32.mrb[6].mxu1  ;;  %v4023_v44 = vpack.c.bf16 %v4008_v37, %v4007_v55  ;;  %v4795_v19 = vunpack.c.h.bf16 %v4860_v56  ;;  %v4791_v3 = vunpack.c.h.bf16 %v4789_v36  ;;  %v4866_v36 = vld [vmem:[%s6431_s14 + $0x38] sm:$0xff]  }
 0x37e   : > { %v3997_v58 = vadd.f32 %v5464_v5, %v7238_v34  ;;  %v5466_v9 = vadd.f32 %v5419_v52, %v5195_v28  ;;  %v3924_v2 = vpop.f32.mrb[7].mxu1 }
 0x37f   : > { %v3995_v30 = vadd.f32 %v5465_v59, %v7238_v34  ;;  %v5467_v38 = vadd.f32 %v3924_v2, %v1714_v10  ;;  %5444 = vmatprep.mubr.bf16.mxu0 %v4023_v44  ;;  %v4862_v2 = vld [vmem:[%s6431_s14 + $0x18] sm:$0xff]  }
 0x380   : > { %v3998_v46 = vadd.f32 %v5466_v9, %v7238_v34  ;;  %5445 = vmatmul.mubr.bf16.vlgmr.msra.gmra.mrb[40].mxu0 %v4024_v57  ;;  %v4013_v0 = vmax.f32 %v3997_v58, 0.0 }
 0x381   : > { %v3996_v23 = vadd.f32 %v5467_v38, %v7238_v34  ;;  %v4011_v62 = vmax.f32 %v3995_v30, 0.0  ;;  %v4861_v38 = vld [vmem:[%s6431_s14 + $0x10] sm:$0xff]  }
 0x382   : > { %v4014_v53 = vmax.f32 %v3998_v46, 0.0 }
 0x383   : > { %v4012_v1 = vmax.f32 %v3996_v23, 0.0  ;;  %v5422_v12 = vpop.f32.mrb[8].mxu1 }
 0x384   : > { %v5468_v11 = vadd.f32 %v5422_v12, %v5198_v33  ;;  %v3937_v27 = vpop.f32.mrb[9].mxu1  ;;  %v4026_v22 = vpack.c.bf16 %v4014_v53, %v4013_v0  ;;  %v4802_v53 = vunpack.c.l.bf16 %v4862_v2 }
 0x385   : > { %v5469_v25 = vadd.f32 %v3937_v27, %v1727_v51  ;;  %v5423_v14 = vpop.f32.mrb[10].mxu1  ;;  %v4025_v4 = vpack.c.bf16 %v4012_v1, %v4011_v62 }
 0x386   : > { %v4001_v48 = vadd.f32 %v5468_v11, %v7238_v34  ;;  %v5470_v26 = vadd.f32 %v5423_v14, %v5199_v49  ;;  %v3940_v17 = vpop.f32.mrb[11].mxu1  ;;  %v4798_v11 = vunpack.c.l.bf16 %v4861_v38  ;;  %v4803_v14 = vunpack.c.h.bf16 %v4862_v2 }
 0x387   : > { %v3999_v13 = vadd.f32 %v5469_v25, %v7238_v34  ;;  %v5471_v45 = vadd.f32 %v3940_v17, %v1730_v50  ;;  %5448 = vmatprep.mubr.bf16.mxu0 %v4025_v4  ;;  %v4799_v17 = vunpack.c.h.bf16 %v4861_v38 }
 0x388   : > { %v4002_v18 = vadd.f32 %v5470_v26, %v7238_v34  ;;  %5449 = vmatmul.mubr.bf16.gmra.mrb[44].mxu0 %v4026_v22  ;;  %v4017_v31 = vmax.f32 %v4001_v48, 0.0 }
 0x389   : > { %v4000_v6 = vadd.f32 %v5471_v45, %v7238_v34  ;;  %v4015_v28 = vmax.f32 %v3999_v13, 0.0 }
 0x38a   : > { %v4018_v29 = vmax.f32 %v4002_v18, 0.0 }
 0x38b   : > { %v4016_v10 = vmax.f32 %v4000_v6, 0.0  ;;  %v5426_v33 = vpop.f32.mrb[12].mxu1 }
 0x38c   : > { %v5472_v51 = vadd.f32 %v5426_v33, %v7227_v47  ;;  %v3953_v41 = vpop.f32.mrb[13].mxu1  ;;  %v4028_v21 = vpack.c.bf16 %v4018_v29, %v4017_v31  ;;  %v4864_v29 = vld [vmem:[%s6431_s14 + $0x28] sm:$0xff]  }
 0x38d   : > { %v5473_v49 = vadd.f32 %v3953_v41, %v7229_v24  ;;  %v5427_v20 = vpop.f32.mrb[14].mxu1  ;;  %v4027_v32 = vpack.c.bf16 %v4016_v10, %v4015_v28  ;;  %v4863_v10 = vld [vmem:[%s6431_s14 + $0x20] sm:$0xff]  }
 0x38e   : > { %v4005_v50 = vadd.f32 %v5472_v51, %v7238_v34  ;;  %v5474_v7 = vadd.f32 %v5427_v20, %v7231_v42  ;;  %v3956_v39 = vpop.f32.mrb[15].mxu1 }
 0x38f   : > { %v4003_v8 = vadd.f32 %v5473_v49, %v7238_v34  ;;  %v5475_v16 = vadd.f32 %v3956_v39, %v7233_v61  ;;  %5452 = vmatprep.mubr.bf16.mxu0 %v4027_v32  ;;  %v7265_v61 = vld [vmem:[%s7442_s6] ss:$0 sm:$0xff]  ;;  %s6104_s6 = smov [#allocation11]  }
 0x390   : > { %v4006_v47 = vadd.f32 %v5474_v7, %v7238_v34  ;;  %5453 = vmatmul.mubr.bf16.gmra.mrb[48].mxu0 %v4028_v21  ;;  %v4021_v24 = vmax.f32 %v4005_v50, 0.0  ;;  %v4810_v21 = vunpack.c.l.bf16 %v4864_v29  ;;  %v4806_v50 = vunpack.c.l.bf16 %v4863_v10  ;;  %s5968_s8 = sshll.u32 %s6104_s6, 4  ;;  %s5969_s8 = int_to_ptr.vmem [resolvable:$false] %s5968_s8 }
 0x391   : > { %v4004_v54 = vadd.f32 %v5475_v16, %v7238_v34  ;;  %v4019_v40 = vmax.f32 %v4003_v8, 0.0  ;;  %v4811_v16 = vunpack.c.h.bf16 %v4864_v29  ;;  %s5970_s21 = scalar_lea.vmem %s5969_s8, 2048  ;;  %p5971_p4 = scmp.lt.s32.totalorder %s7308_s18, %s5969_s8 }
 0x392   : > { %v4022_v15 = vmax.f32 %v4006_v47, 0.0  ;;  %p5972_p7 = scmp.lt.s32.totalorder %s5970_s21, %s5964_s15 }
 0x393   : > { %v4020_v35 = vmax.f32 %v4004_v54, 0.0 }
 0x394   : > { %v4030_v60 = vpack.c.bf16 %v4022_v15, %v4021_v24  ;;  %v4807_v15 = vunpack.c.h.bf16 %v4863_v10  ;;  %p5973_p3 = por %p5972_p7, %p5971_p4 }
 0x395   : > { %v4029_v42 = vpack.c.bf16 %v4020_v35, %v4019_v40 }
 0x396   : > { %p5974_p0 = pnand %p5973_p3, %p5967_p12 }
 0x397   : > { %5456 = vmatprep.mubr.bf16.mxu0 %v4029_v42 }
 0x398   : > { %5457 = vmatmul.mubr.bf16.gmra.mrb[52].mxu0 %v4030_v60 }
 0x453   : > { %v5446_v34 = vpop.f32.mrb[40].mxu0 }
 0x454   : > { %v4145_v55 = vadd.f32 %v5446_v34, %v7265_v61  ;;  %v4136_v37 = vpop.f32.mrb[41].mxu0  ;;  %v4865_v34 = vld [vmem:[%s6431_s14 + $0x30] sm:$0xff]   ;;  %s4357_s14 = sadd.s32 %s4787_s4, %s4742_s24 }
 0x455   : > { %v4137_v57 = vadd.f32 %v7265_v61, %v4136_v37  ;;  %v5447_v5 = vpop.f32.mrb[42].mxu0  ;;  %s4743_s1 = sshll.u32 %s4357_s14, 6 }
 0x456   : > { %v4233_v59 = vadd.f32 %v4794_v43, %v4145_v55  ;;  %v4148_v52 = vadd.f32 %v5447_v5, %v7265_v61  ;;  %v4139_v44 = vpop.f32.mrb[43].mxu0  ;;  %s7306_s3 = scalar_lea.hbm %s7445_s23, %s4743_s1 }
 0x457   : > { %v4231_v58 = vadd.f32 %v4790_v63, %v4137_v57  ;;  %v4140_v9 = vadd.f32 %v7265_v61, %v4139_v44 }
 0x458   : > { %v4234_v30 = vadd.f32 %v4795_v19, %v4148_v52  ;;  %v4249_v23 = vmax.f32 %v4233_v59, 0.0  ;;  %v4818_v19 = vunpack.c.l.bf16 %v4866_v36  ;;  %v4814_v59 = vunpack.c.l.bf16 %v4865_v34 }
 0x459   : > { %v4232_v46 = vadd.f32 %v4791_v3, %v4140_v9  ;;  %v4247_v62 = vmax.f32 %v4231_v58, 0.0  ;;  %v4819_v9 = vunpack.c.h.bf16 %v4866_v36 }
 0x45a   : > { %v4250_v0 = vmax.f32 %v4234_v30, 0.0 }
 0x45b   : > { %v4248_v1 = vmax.f32 %v4232_v46, 0.0  ;;  %v5450_v12 = vpop.f32.mrb[44].mxu0  ;;  %v4815_v46 = vunpack.c.h.bf16 %v4865_v34 }
 0x45c   : > { %v4828_v27 = vpack.c.bf16 %v4250_v0, %v4249_v23  ;;  %v4161_v22 = vadd.f32 %v5450_v12, %v7265_v61  ;;  %v4152_v25 = vpop.f32.mrb[45].mxu0 }
 0x45d   : > { %v4823_v4 = vpack.c.bf16 %v4248_v1, %v4247_v62  ;;  %v4153_v48 = vadd.f32 %v7265_v61, %v4152_v25  ;;  %v5451_v26 = vpop.f32.mrb[46].mxu0 }
 0x45e   : > { %4867 = vst [vmem:[%s7278_s12 + $0x8] sm:$0xff] %v4828_v27   ;;  %v4237_v13 = vadd.f32 %v4802_v53, %v4161_v22  ;;  %v4164_v45 = vadd.f32 %v5451_v26, %v7265_v61  ;;  %v4155_v18 = vpop.f32.mrb[47].mxu0 }
 0x45f   : > { %4824 = vst [vmem:[%s7278_s12] sm:$0xff] %v4823_v4   ;;  %v4235_v6 = vadd.f32 %v4798_v11, %v4153_v48  ;;  %v4156_v31 = vadd.f32 %v7265_v61, %v4155_v18 }
 0x460   : > { %v4238_v28 = vadd.f32 %v4803_v14, %v4164_v45  ;;  %v4253_v51 = vmax.f32 %v4237_v13, 0.0 }
 0x461   : > { %v4236_v33 = vadd.f32 %v4799_v17, %v4156_v31  ;;  %v4251_v49 = vmax.f32 %v4235_v6, 0.0 }
 0x462   : > { %v4254_v41 = vmax.f32 %v4238_v28, 0.0 }
 0x463   : > { %v4252_v20 = vmax.f32 %v4236_v33, 0.0  ;;  %v5454_v32 = vpop.f32.mrb[48].mxu0 }
 0x464   : > { %v4838_v7 = vpack.c.bf16 %v4254_v41, %v4253_v51  ;;  %v4177_v39 = vadd.f32 %v5454_v32, %v7265_v61  ;;  %v4168_v8 = vpop.f32.mrb[49].mxu0 }
 0x465   : > { %v4833_v47 = vpack.c.bf16 %v4252_v20, %v4251_v49  ;;  %v4169_v54 = vadd.f32 %v7265_v61, %v4168_v8  ;;  %v5455_v24 = vpop.f32.mrb[50].mxu0 }
 0x466   : > { %4869 = vst [vmem:[%s7278_s12 + $0x18] sm:$0xff] %v4838_v7   ;;  %v4241_v40 = vadd.f32 %v4810_v21, %v4177_v39  ;;  %v4180_v35 = vadd.f32 %v5455_v24, %v7265_v61  ;;  %v4171_v60 = vpop.f32.mrb[51].mxu0 }
 0x467   : > { %4868 = vst [vmem:[%s7278_s12 + $0x10] sm:$0xff] %v4833_v47   ;;  %v4239_v42 = vadd.f32 %v4806_v50, %v4169_v54  ;;  %v4172_v56 = vadd.f32 %v7265_v61, %v4171_v60 }
 0x468   : > { %v4242_v43 = vadd.f32 %v4811_v16, %v4180_v35  ;;  %v4257_v55 = vmax.f32 %v4241_v40, 0.0 }
 0x469   : > { %v4240_v63 = vadd.f32 %v4807_v15, %v4172_v56  ;;  %v4255_v57 = vmax.f32 %v4239_v42, 0.0 }
 0x46a   : > { %v4258_v37 = vmax.f32 %v4242_v43, 0.0 }
 0x46b   : > { %v4256_v5 = vmax.f32 %v4240_v63, 0.0  ;;  %v5458_v3 = vpop.f32.mrb[52].mxu0 }
 0x46c   : > { %v4848_v52 = vpack.c.bf16 %v4258_v37, %v4257_v55  ;;  %v4193_v44 = vadd.f32 %v5458_v3, %v7265_v61  ;;  %v4184_v58 = vpop.f32.mrb[53].mxu0 }
 0x46d   : > { %v4843_v2 = vpack.c.bf16 %v4256_v5, %v4255_v57  ;;  %v4185_v30 = vadd.f32 %v7265_v61, %v4184_v58  ;;  %v5459_v38 = vpop.f32.mrb[54].mxu0 }
 0x46e   : > { %4871 = vst [vmem:[%s7278_s12 + $0x28] sm:$0xff] %v4848_v52   ;;  %v4245_v23 = vadd.f32 %v4818_v19, %v4193_v44  ;;  %v4196_v0 = vadd.f32 %v5459_v38, %v7265_v61  ;;  %v4187_v53 = vpop.f32.mrb[55].mxu0 }
 0x46f   : > { %4870 = vst [vmem:[%s7278_s12 + $0x20] sm:$0xff] %v4843_v2   ;;  %v4243_v62 = vadd.f32 %v4814_v59, %v4185_v30  ;;  %v4188_v1 = vadd.f32 %v7265_v61, %v4187_v53 }
 0x470   : > { %v4246_v12 = vadd.f32 %v4819_v9, %v4196_v0  ;;  %v4261_v27 = vmax.f32 %v4245_v23, 0.0 }
 0x471   : > { %v4244_v11 = vadd.f32 %v4815_v46, %v4188_v1  ;;  %v4259_v25 = vmax.f32 %v4243_v62, 0.0 }
 0x472   : > { %v4262_v22 = vmax.f32 %v4246_v12, 0.0 }
 0x473   : > { %v4260_v14 = vmax.f32 %v4244_v11, 0.0 }
 0x474   : > { %v4858_v4 = vpack.c.bf16 %v4262_v22, %v4261_v27 }
 0x475   : > { %v4853_v61 = vpack.c.bf16 %v4260_v14, %v4259_v25 }
 0x476   : > { %4873 = vst [vmem:[%s7278_s12 + $0x38] sm:$0xff] %v4858_v4  }
 0x477   : > { %4872 = vst [vmem:[%s7278_s12 + $0x30] sm:$0xff] %v4853_v61  }
 0x478   : > { %5977 = shalt.err (!%p5974_p0)
}
 0x479   : > { %s5978_s16 = scalar_lea.hbm %s7306_s3, 1024  ;;  %s5982_s4 = scalar_lea.hbm %s7445_s23, 4096 }
 0x47a   : > { %p5979_p1 = scmp.ne.s32.totalorder %s7306_s3, %s5978_s16  ;;  %p5983_p2 = scmp.lt.u32.totalorder %s7306_s3, %s7445_s23 }
 0x47b   : > { %p5984_p9 = scmp.lt.u32.totalorder %s5982_s4, %s5978_s16  ;;  %p5986_p13 = scmp.lt.u32.totalorder %s5978_s16, %s7306_s3 }
 0x47c   : > { %p5980_p11 = pnand %p5979_p1, %p7446_p6 }
 0x47d   : > { %p5985_p5 = por %p5984_p9, %p5983_p2 }
 0x47e   : > { %p5981_p10 = pneg %p5980_p11 }
 0x47f   : > { %p5987_p8 = por %p5986_p13, %p5985_p5 }
 0x481   : > { %p5988_p12 = pnand %p5987_p8, %p5981_p10 }
 0x483   : > { %5991 = shalt.err (!%p5988_p12)
}
 0x484   : > { %s6105_s1 = smov 64   ;;  %s6106_s13 = smov 4  }
 0x485   : > { %5602 = dma.vmem_to_hbm [thread:$0]  (%p7446_p6), %s7308_s18, 1024, %s7306_s3, %s7314_s19, %s6105_s1, %s6105_s1, %s6106_s13  }
 0x486 PF: > { %s7447_s20 = sld [smem:[#allocation16_spill]]  ;;  %s7448_s15 = sld [smem:[#allocation20_spill]] }
 0x487   : > { %p5629_p4 = scmp.ge.s32.totalorder %s6094_s11, 2 }
 0x48c   : > { %s4375_s6 = sand.u32 1, %s7447_s20   ;;  %p7449_p7 = scmp.ne.s32.totalorder %s7448_s15, 0 }
 0x48d   : > { %s4376_s8 = scalar_lea.sflag [#allocation5], %s4375_s6 }
 0x48e   : > { %p5619_p3 = pnand %p5629_p4, %p7449_p7 }
 0x490   : > { %6049 = dma.done.wait (!%p5619_p3), %s4376_s8, 1024  }
 0x491   : > { %6051 = vsyncadd (!%p5619_p3), %s4376_s8, 4294966272  ;;  %s25_s11 = sadd.s32 1, %s6094_s11   ;;  %s7450_s24 = sld [smem:[#allocation17_spill]] }
 0x492   : > { %p22_p0 = scmp.ge.s32.totalorder %s25_s11, 6   ;;  %s7451_s25 = smov %s6062_s26 }
 0x493   : > { %s7452_s26 = smov %s6354_s27  ;;  %s7453_s27 = smov %s6070_s28 }
 0x494   : > { %s7454_s28 = smov %s6074_s29  ;;  %s7455_s29 = smov %s6349_s7 }
 0x495   : > { %s7456_s30 = smov %s6086_s9  ;;  %s7457_s8 = smov %s6090_s10 }
 0x496   : > { %s7458_s9 = smov %s7461_s17  ;;  %s7459_s10 = smov %s7465_s22 }
 0x497   :  { %24 = sbr.rel (!%p22_p0) target bundleno = 17 (0x11), region = 119 }
 0x49e   :  { %4381 = vsyncpa [#allocation4], 1 }
 0x49f   :  { %4383 = vsyncpa [#allocation4 + $0x1], 1 }
 0x4a0   :  { %4384 = vsyncpa [#allocation7], 1 }
 0x4a1   :  { %4385 = vsyncpa [#allocation10], 1 }
 0x4a2   :  { %4386 = vsyncpa [#allocation5], 1 }
 0x4a3   :  { %4388 = vsyncpa [#allocation5 + $0x1], 1 }

</bundles_post_ra>
